<compile_context>
chip_gen: v7x
topology: tpu7x:2x2x1
jax: 0.10.0
libtpu: 0.0.40
codegen_flags: <defaults>
</compile_context>

<pallas_src>
import jax
import jax.numpy as jnp
from jax.experimental import pallas as pl
from jax.experimental.pallas import tpu as pltpu


def _round_up(x, m):
    return -(-x // m) * m


# ---------------------------------------------------------------------------
# Kernel B: fused (feature_fc + GRU input projection) + GRU recurrence.
# Grid: (batch blocks [parallel], time blocks [arbitrary / sequential]).
# ---------------------------------------------------------------------------
def _gru_fused_kernel(x_ref,       # (Bb, Tb, E)  bf16  inputs, batch-first block
                      wc_ref,      # (E, 3H)      bf16  folded input weights (r|z|n)
                      bc_ref,      # (1, 3H)      f32   folded input bias (+bhh_r,+bhh_z)
                      whh_ref,     # (H, 3H)      bf16  recurrent weights (r|z|n)
                      bhhn_ref,    # (1, H)       f32   recurrent bias of the n gate
                      hs_ref,      # (Bb, Tb, H)  bf16  hidden states out (batch-first)
                      gi_scratch,  # (Bb, Tb, 3H) f32   block input pre-activations
                      h_scratch):  # (Bb, H)      f32   carried hidden state
    @pl.when(pl.program_id(1) == 0)         # new batch block -> reset hidden state
    def _():
        h_scratch[...] = jnp.zeros_like(h_scratch)

    Bb, Tb, E = x_ref.shape
    H = hs_ref.shape[-1]

    # One wide bf16 GEMM for the whole time block's input projection (all 3 gates,
    # feature_fc already folded in).  Result stays in VMEM (never written to HBM).
    x2d = x_ref[...].reshape(Bb * Tb, E)
    gi = jnp.dot(x2d, wc_ref[...], preferred_element_type=jnp.float32) + bc_ref[...]
    gi_scratch[...] = gi.reshape(Bb, Tb, 3 * H)

    whh = whh_ref[...]
    bhh_n = bhhn_ref[...]

    # Sequential recurrence.  Static unroll => every Ref index below is static.
    h = h_scratch[...]                                              # f32 carry
    for j in range(Tb):
        gh = jnp.dot(h.astype(jnp.bfloat16), whh,
                     preferred_element_type=jnp.float32)            # (Bb, 3H)
        gi_t = gi_scratch[:, j, :]                                  # (Bb, 3H)
        r = jax.nn.sigmoid(gi_t[:, :H] + gh[:, :H])
        z = jax.nn.sigmoid(gi_t[:, H:2 * H] + gh[:, H:2 * H])
        n = jnp.tanh(gi_t[:, 2 * H:] + r * (gh[:, 2 * H:] + bhh_n))
        h = (1.0 - z) * n + z * h
        hs_ref[:, j, :] = h.astype(hs_ref.dtype)                    # batch-first store
    h_scratch[...] = h


# ---------------------------------------------------------------------------
# Kernel C: output vocab projection, tiled over (vocab, time), batch-first out.
# ---------------------------------------------------------------------------
def _vocab_proj_kernel(hs_ref,    # (Bp, Tb, H)  bf16
                       wo_ref,    # (H, Vt)      bf16
                       bo_ref,    # (1, Vt)      f32
                       out_ref):  # (Bp, Tb, Vt) f32
    Bp, Tb, H = hs_ref.shape
    Vt = wo_ref.shape[-1]
    x2d = hs_ref[...].reshape(Bp * Tb, H)
    y = jnp.dot(x2d, wo_ref[...], preferred_element_type=jnp.float32) + bo_ref[...]
    out_ref[...] = y.reshape(Bp, Tb, Vt)


def decoder_rnn_forward(features, captions, params, *,
                        time_block=16, vocab_block=2048):
    """features: (B, E) f32, captions: (B, L) int32 -> logits (B, L, V) f32."""
    assert time_block % 8 == 0 and vocab_block % 128 == 0
    emb_table = params["embed"]                      # (V, E)
    B, E = features.shape
    H = params["wf"].shape[1]
    V = params["wo"].shape[1]

    # ---- plain-JAX glue: embedding gather + concat (batch-first (B, T, E)) ----
    embeddings = jnp.take(emb_table, captions[:, :-1], axis=0)            # (B, L-1, E)
    inputs = jnp.concatenate([features[:, None, :], embeddings], axis=1)  # (B, T, E)
    T = inputs.shape[1]

    # ---- fold feature_fc into the GRU input projection (one-time, tiny) ----
    # gi = (x @ wf + bf) @ wih + bih = x @ (wf @ wih) + (bf @ wih + bih)
    # Also fold bhh_r / bhh_z into the input bias; bhh_n stays (scaled by r).
    w_comb = (params["wf"] @ params["wih"]).astype(jnp.bfloat16)          # (E, 3H) bf16
    b_comb = params["bf"] @ params["wih"] + params["bih"]                 # (1, 3H) f32
    b_comb = b_comb.at[:, :2 * H].add(params["bhh"][:, :2 * H])
    whh = params["whh"].astype(jnp.bfloat16)                              # (H, 3H) bf16
    bhh_n = params["bhh"][:, 2 * H:]                                      # (1, H)  f32

    # ---- padding (batch to sublane-friendly multiple, time to the block) ----
    Tb = time_block
    Bp = _round_up(max(B, 8), 8)
    Tp = _round_up(T, Tb)
    n_tb = Tp // Tb
    inputs = jnp.pad(inputs, ((0, Bp - B), (0, Tp - T), (0, 0))).astype(jnp.bfloat16)

    # Batch-block split of the recurrence grid (lets the serial loop use both
    # TensorCores on v7x for B >= 32; size-1 parallel axis otherwise).
    n_bb = 2 if (Bp >= 32 and Bp % 16 == 0) else 1
    Bb = Bp // n_bb

    def _full(shape):
        return pl.BlockSpec(shape, lambda b, t, _s=len(shape): (0,) * _s)

    # ---- Kernel B: fused input projection + GRU recurrence ----
    vmem_b = 2 * (Bb * Tb * E * 2 + Bb * Tb * H * 2            # x / hs double buffers
                  + E * 3 * H * 2 + H * 3 * H * 2              # bf16 weights
                  + 3 * H * 4 + H * 4)                          # f32 biases
    vmem_b += Bb * Tb * 3 * H * 4 + Bb * H * 4                  # scratches
    vmem_b = min(max(int(vmem_b * 1.5), 32 * 1024 * 1024), 100 * 1024 * 1024)

    hs = pl.pallas_call(
        _gru_fused_kernel,
        out_shape=jax.ShapeDtypeStruct((Bp, Tp, H), jnp.bfloat16),
        grid_spec=pltpu.PrefetchScalarGridSpec(
            num_scalar_prefetch=0,
            grid=(n_bb, n_tb),
            in_specs=[
                pl.BlockSpec((Bb, Tb, E), lambda b, t: (b, t, 0)),
                _full((E, 3 * H)), _full((1, 3 * H)),
                _full((H, 3 * H)), _full((1, H)),
            ],
            out_specs=pl.BlockSpec((Bb, Tb, H), lambda b, t: (b, t, 0)),
            scratch_shapes=[pltpu.VMEM((Bb, Tb, 3 * H), jnp.float32),
                            pltpu.VMEM((Bb, H), jnp.float32)],
        ),
        compiler_params=pltpu.CompilerParams(
            dimension_semantics=("parallel", "arbitrary"),
            vmem_limit_bytes=vmem_b),
    )(inputs, w_comb, b_comb, whh, bhh_n)

    # ---- Kernel C: vocab projection, tiled over V, batch-first lane-dense out ----
    if V > vocab_block:
        Vt = vocab_block
        Vp = _round_up(V, Vt)
    else:
        Vt = Vp = V
    n_vt = Vp // Vt
    wo = jnp.pad(params["wo"], ((0, 0), (0, Vp - V))).astype(jnp.bfloat16)  # (H, Vp)
    bo = jnp.pad(params["bo"], ((0, 0), (0, Vp - V)))                       # (1, Vp)

    vmem_c = 2 * (Bp * Tb * H * 2 + H * Vt * 2 + Vt * 4 + Bp * Tb * Vt * 4)
    vmem_c = min(max(int(vmem_c * 1.5), 32 * 1024 * 1024), 100 * 1024 * 1024)

    logits_p = pl.pallas_call(
        _vocab_proj_kernel,
        out_shape=jax.ShapeDtypeStruct((Bp, Tp, Vp), jnp.float32),
        grid_spec=pltpu.PrefetchScalarGridSpec(
            num_scalar_prefetch=0,
            grid=(n_vt, n_tb),            # vocab outermost: wo tile resident over t
            in_specs=[
                pl.BlockSpec((Bp, Tb, H), lambda v, t: (0, t, 0)),
                pl.BlockSpec((H, Vt), lambda v, t: (0, v)),
                pl.BlockSpec((1, Vt), lambda v, t: (0, v)),
            ],
            out_specs=pl.BlockSpec((Bp, Tb, Vt), lambda v, t: (0, t, v)),
        ),
        compiler_params=pltpu.CompilerParams(
            dimension_semantics=("parallel", "parallel"),
            vmem_limit_bytes=vmem_c),
    )(hs, wo, bo)

    return logits_p[:B, :T, :V]                                            # (B, T, V)


def decoder_rnn_reference(features, captions, params):
    """Pure-JAX f32 reference (matches PyTorch DecoderRNN.forward semantics)."""
    embeddings = jnp.take(params["embed"], captions[:, :-1], axis=0)
    inputs = jnp.concatenate([features[:, None, :], embeddings], axis=1)
    x = inputs @ params["wf"] + params["bf"]                              # (B, T, H)
    B, T, H = x.shape

    def step(h, x_t):
        gi = x_t @ params["wih"] + params["bih"]
        gh = h @ params["whh"] + params["bhh"]
        r = jax.nn.sigmoid(gi[:, :H] + gh[:, :H])
        z = jax.nn.sigmoid(gi[:, H:2 * H] + gh[:, H:2 * H])
        n = jnp.tanh(gi[:, 2 * H:] + r * gh[:, 2 * H:])
        h_new = (1.0 - z) * n + z * h
        return h_new, h_new

    _, hs = jax.lax.scan(step, jnp.zeros((B, H), jnp.float32),
                         jnp.transpose(x, (1, 0, 2)))
    hs = jnp.transpose(hs, (1, 0, 2))                                     # (B, T, H)
    return hs @ params["wo"] + params["bo"]


def init_params(key, embed_size, hidden_size, vocab_size):
    ks = jax.random.split(key, 9)
    s = 0.1
    # Weights stored pre-transposed as (in, out); GRU gate order r|z|n like PyTorch.
    return {
        "embed": s * jax.random.normal(ks[0], (vocab_size, embed_size), jnp.float32),
        "wf":    s * jax.random.normal(ks[1], (embed_size, hidden_size), jnp.float32),
        "bf":    s * jax.random.normal(ks[2], (1, hidden_size), jnp.float32),
        "wih":   s * jax.random.normal(ks[3], (hidden_size, 3 * hidden_size), jnp.float32),
        "bih":   s * jax.random.normal(ks[4], (1, 3 * hidden_size), jnp.float32),
        "whh":   s * jax.random.normal(ks[5], (hidden_size, 3 * hidden_size), jnp.float32),
        "bhh":   s * jax.random.normal(ks[6], (1, 3 * hidden_size), jnp.float32),
        "wo":    s * jax.random.normal(ks[7], (hidden_size, vocab_size), jnp.float32),
        "bo":    s * jax.random.normal(ks[8], (1, vocab_size), jnp.float32),
    }


if __name__ == "__main__":
    B, L = 2, 8            # batch, caption length (sequence fed to RNN has length L)
    E, H, V = 16, 32, 64   # embed_size, hidden_size, vocab_size

    key = jax.random.PRNGKey(0)
    kp, kf, kc = jax.random.split(key, 3)
    params = init_params(kp, E, H, V)

    features = jax.random.normal(kf, (B, E), jnp.float32)
    captions = jax.random.randint(kc, (B, L), 0, V, jnp.int32)

    out = decoder_rnn_forward(features, captions, params)
    out = jax.block_until_ready(out)

    ref = decoder_rnn_reference(features, captions, params)
    assert out.shape == (B, L, V), out.shape
    # Tolerance loosened vs the all-f32 version: MXU operands are bf16 (weights,
    # activations, stored hidden states); accumulation and gate math stay f32.
    assert jnp.allclose(out, ref, atol=2e-2, rtol=2e-2), "mismatch vs reference"

    print("KERNEL_OK")
</pallas_src>

<mosaic_0001>
module attributes {stable_mosaic.version = 11 : i64} {
  func.func @_gru_fused_kernel(%arg0: i32, %arg1: i32, %arg2: memref<8x16x16xbf16, #tpu.memory_space<vmem>>, %arg3: memref<16x96xbf16, #tpu.memory_space<vmem>>, %arg4: memref<1x96xf32, #tpu.memory_space<vmem>>, %arg5: memref<32x96xbf16, #tpu.memory_space<vmem>>, %arg6: memref<1x32xf32, #tpu.memory_space<vmem>>, %arg7: memref<8x16x32xbf16, #tpu.memory_space<vmem>>, %arg8: memref<8x16x96xf32, #tpu.memory_space<vmem>>, %arg9: memref<8x32xf32, #tpu.memory_space<vmem>>) attributes {dimension_semantics = [#tpu.dimension_semantics<parallel>, #tpu.dimension_semantics<arbitrary>], iteration_bounds = array<i64: 1, 1>, scalar_prefetch = 0 : i64, scratch_operands = 2 : i64, tpu.core_type = #tpu.core_type<tc>, window_params = [{transform_indices = @transform_0, window_bounds = array<i64: 8, 16, 16>}, {pipeline_mode = #tpu.pipeline_mode<synchronous>, transform_indices = @transform_1, window_bounds = array<i64: 16, 96>}, {pipeline_mode = #tpu.pipeline_mode<synchronous>, transform_indices = @transform_2, window_bounds = array<i64: 1, 96>}, {pipeline_mode = #tpu.pipeline_mode<synchronous>, transform_indices = @transform_3, window_bounds = array<i64: 32, 96>}, {pipeline_mode = #tpu.pipeline_mode<synchronous>, transform_indices = @transform_4, window_bounds = array<i64: 1, 32>}, {transform_indices = @transform_5, window_bounds = array<i64: 8, 16, 32>}]} {
    %c0_i32 = arith.constant 0 : i32
    %0 = arith.cmpi eq, %arg1, %c0_i32 : i32
    %1 = arith.extui %0 : i1 to i32
    %c0_i32_0 = arith.constant 0 : i32
    %2 = arith.cmpi ne, %1, %c0_i32_0 : i32
    scf.if %2 {
      %cst_163 = arith.constant 0.000000e+00 : f32
      %592 = vector.broadcast %cst_163 : f32 to vector<8x32xf32>
      %c0_164 = arith.constant 0 : index
      %c0_165 = arith.constant 0 : index
      %593 = vector.load %arg9[%c0_164, %c0_165] : memref<8x32xf32, #tpu.memory_space<vmem>>, vector<8x32xf32>
      tpu.vector_store %arg9[%c0_164, %c0_165], %592 {strides = array<i32>} : memref<8x32xf32, #tpu.memory_space<vmem>>, vector<8x32xf32>,
    } else {
    }
    %c0 = arith.constant 0 : index
    %c0_1 = arith.constant 0 : index
    %c0_2 = arith.constant 0 : index
    %3 = vector.load %arg2[%c0, %c0_1, %c0_2] : memref<8x16x16xbf16, #tpu.memory_space<vmem>>, vector<8x16x16xbf16>
    %4 = vector.shape_cast %3 : vector<8x16x16xbf16> to vector<128x16xbf16>
    %c0_3 = arith.constant 0 : index
    %c0_4 = arith.constant 0 : index
    %5 = vector.load %arg3[%c0_3, %c0_4] : memref<16x96xbf16, #tpu.memory_space<vmem>>, vector<16x96xbf16>
    %cst = arith.constant dense<0.000000e+00> : vector<128x96xf32>
    %6 = tpu.matmul %4, %5, %cst {dimension_numbers = #tpu.dot_dimension_numbers<[1], [0], [0], [1], [0, 0, 1, 1], [], []>} : vector<128x16xbf16>, vector<16x96xbf16>, vector<128x96xf32> -> vector<128x96xf32>
    %c0_5 = arith.constant 0 : index
    %c0_6 = arith.constant 0 : index
    %7 = vector.load %arg4[%c0_5, %c0_6] : memref<1x96xf32, #tpu.memory_space<vmem>>, vector<1x96xf32>
    %8 = vector.broadcast %7 : vector<1x96xf32> to vector<128x96xf32>
    %9 = arith.addf %6, %8 : vector<128x96xf32>
    %10 = vector.shape_cast %9 : vector<128x96xf32> to vector<8x16x96xf32>
    %c0_7 = arith.constant 0 : index
    %c0_8 = arith.constant 0 : index
    %c0_9 = arith.constant 0 : index
    %11 = vector.load %arg8[%c0_7, %c0_8, %c0_9] : memref<8x16x96xf32, #tpu.memory_space<vmem>>, vector<8x16x96xf32>
    tpu.vector_store %arg8[%c0_7, %c0_8, %c0_9], %10 {strides = array<i32>} : memref<8x16x96xf32, #tpu.memory_space<vmem>>, vector<8x16x96xf32>,
    %c0_10 = arith.constant 0 : index
    %c0_11 = arith.constant 0 : index
    %12 = vector.load %arg5[%c0_10, %c0_11] : memref<32x96xbf16, #tpu.memory_space<vmem>>, vector<32x96xbf16>
    %c0_12 = arith.constant 0 : index
    %c0_13 = arith.constant 0 : index
    %13 = vector.load %arg6[%c0_12, %c0_13] : memref<1x32xf32, #tpu.memory_space<vmem>>, vector<1x32xf32>
    %c0_14 = arith.constant 0 : index
    %c0_15 = arith.constant 0 : index
    %14 = vector.load %arg9[%c0_14, %c0_15] : memref<8x32xf32, #tpu.memory_space<vmem>>, vector<8x32xf32>
    %15 = arith.truncf %14 : vector<8x32xf32> to vector<8x32xbf16>
    %cst_16 = arith.constant dense<0.000000e+00> : vector<8x96xf32>
    %16 = tpu.matmul %15, %12, %cst_16 {dimension_numbers = #tpu.dot_dimension_numbers<[1], [0], [0], [1], [0, 0, 1, 1], [], []>} : vector<8x32xbf16>, vector<32x96xbf16>, vector<8x96xf32> -> vector<8x96xf32>
    %c0_17 = arith.constant 0 : index
    %c0_18 = arith.constant 0 : index
    %c0_19 = arith.constant 0 : index
    %17 = vector.load %arg8[%c0_17, %c0_18, %c0_19] : memref<8x16x96xf32, #tpu.memory_space<vmem>>, vector<8x1x96xf32>
    %18 = vector.shape_cast %17 : vector<8x1x96xf32> to vector<8x96xf32>
    %19 = vector.extract_strided_slice %18 {offsets = [0, 0], sizes = [8, 32], strides = [1, 1]} : vector<8x96xf32> to vector<8x32xf32>
    %20 = vector.extract_strided_slice %16 {offsets = [0, 0], sizes = [8, 32], strides = [1, 1]} : vector<8x96xf32> to vector<8x32xf32>
    %21 = arith.addf %19, %20 : vector<8x32xf32>
    %22 = arith.negf %21 : vector<8x32xf32>
    %23 = math.exp %22 : vector<8x32xf32>
    %cst_20 = arith.constant 1.000000e+00 : f32
    %24 = vector.broadcast %cst_20 : f32 to vector<8x32xf32>
    %25 = arith.addf %24, %23 : vector<8x32xf32>
    %26 = arith.divf %24, %25 : vector<8x32xf32>
    %27 = vector.extract_strided_slice %18 {offsets = [0, 32], sizes = [8, 32], strides = [1, 1]} : vector<8x96xf32> to vector<8x32xf32>
    %28 = vector.extract_strided_slice %16 {offsets = [0, 32], sizes = [8, 32], strides = [1, 1]} : vector<8x96xf32> to vector<8x32xf32>
    %29 = arith.addf %27, %28 : vector<8x32xf32>
    %30 = arith.negf %29 : vector<8x32xf32>
    %31 = math.exp %30 : vector<8x32xf32>
    %cst_21 = arith.constant 1.000000e+00 : f32
    %32 = vector.broadcast %cst_21 : f32 to vector<8x32xf32>
    %33 = arith.addf %32, %31 : vector<8x32xf32>
    %34 = arith.divf %32, %33 : vector<8x32xf32>
    %35 = vector.extract_strided_slice %18 {offsets = [0, 64], sizes = [8, 32], strides = [1, 1]} : vector<8x96xf32> to vector<8x32xf32>
    %36 = vector.extract_strided_slice %16 {offsets = [0, 64], sizes = [8, 32], strides = [1, 1]} : vector<8x96xf32> to vector<8x32xf32>
    %37 = vector.broadcast %13 : vector<1x32xf32> to vector<8x32xf32>
    %38 = arith.addf %36, %37 : vector<8x32xf32>
    %39 = arith.mulf %26, %38 : vector<8x32xf32>
    %40 = arith.addf %35, %39 : vector<8x32xf32>
    %41 = math.tanh %40 : vector<8x32xf32>
    %cst_22 = arith.constant 1.000000e+00 : f32
    %42 = vector.broadcast %cst_22 : f32 to vector<8x32xf32>
    %43 = arith.subf %42, %34 : vector<8x32xf32>
    %44 = arith.mulf %43, %41 : vector<8x32xf32>
    %45 = arith.mulf %34, %14 : vector<8x32xf32>
    %46 = arith.addf %44, %45 : vector<8x32xf32>
    %47 = arith.truncf %46 : vector<8x32xf32> to vector<8x32xbf16>
    %c0_23 = arith.constant 0 : index
    %c0_24 = arith.constant 0 : index
    %c0_25 = arith.constant 0 : index
    %48 = vector.load %arg7[%c0_23, %c0_24, %c0_25] : memref<8x16x32xbf16, #tpu.memory_space<vmem>>, vector<8x1x32xbf16>
    %49 = vector.shape_cast %48 : vector<8x1x32xbf16> to vector<8x32xbf16>
    %50 = vector.shape_cast %47 : vector<8x32xbf16> to vector<8x1x32xbf16>
    tpu.vector_store %arg7[%c0_23, %c0_24, %c0_25], %50 {strides = array<i32>} : memref<8x16x32xbf16, #tpu.memory_space<vmem>>, vector<8x1x32xbf16>,
    %51 = arith.truncf %46 : vector<8x32xf32> to vector<8x32xbf16>
    %cst_26 = arith.constant dense<0.000000e+00> : vector<8x96xf32>
    %52 = tpu.matmul %51, %12, %cst_26 {dimension_numbers = #tpu.dot_dimension_numbers<[1], [0], [0], [1], [0, 0, 1, 1], [], []>} : vector<8x32xbf16>, vector<32x96xbf16>, vector<8x96xf32> -> vector<8x96xf32>
    %c0_27 = arith.constant 0 : index
    %c1 = arith.constant 1 : index
    %c0_28 = arith.constant 0 : index
    %53 = vector.load %arg8[%c0_27, %c1, %c0_28] : memref<8x16x96xf32, #tpu.memory_space<vmem>>, vector<8x1x96xf32>
    %54 = vector.shape_cast %53 : vector<8x1x96xf32> to vector<8x96xf32>
    %55 = vector.extract_strided_slice %54 {offsets = [0, 0], sizes = [8, 32], strides = [1, 1]} : vector<8x96xf32> to vector<8x32xf32>
    %56 = vector.extract_strided_slice %52 {offsets = [0, 0], sizes = [8, 32], strides = [1, 1]} : vector<8x96xf32> to vector<8x32xf32>
    %57 = arith.addf %55, %56 : vector<8x32xf32>
    %58 = arith.negf %57 : vector<8x32xf32>
    %59 = math.exp %58 : vector<8x32xf32>
    %cst_29 = arith.constant 1.000000e+00 : f32
    %60 = vector.broadcast %cst_29 : f32 to vector<8x32xf32>
    %61 = arith.addf %60, %59 : vector<8x32xf32>
    %62 = arith.divf %60, %61 : vector<8x32xf32>
    %63 = vector.extract_strided_slice %54 {offsets = [0, 32], sizes = [8, 32], strides = [1, 1]} : vector<8x96xf32> to vector<8x32xf32>
    %64 = vector.extract_strided_slice %52 {offsets = [0, 32], sizes = [8, 32], strides = [1, 1]} : vector<8x96xf32> to vector<8x32xf32>
    %65 = arith.addf %63, %64 : vector<8x32xf32>
    %66 = arith.negf %65 : vector<8x32xf32>
    %67 = math.exp %66 : vector<8x32xf32>
    %cst_30 = arith.constant 1.000000e+00 : f32
    %68 = vector.broadcast %cst_30 : f32 to vector<8x32xf32>
    %69 = arith.addf %68, %67 : vector<8x32xf32>
    %70 = arith.divf %68, %69 : vector<8x32xf32>
    %71 = vector.extract_strided_slice %54 {offsets = [0, 64], sizes = [8, 32], strides = [1, 1]} : vector<8x96xf32> to vector<8x32xf32>
    %72 = vector.extract_strided_slice %52 {offsets = [0, 64], sizes = [8, 32], strides = [1, 1]} : vector<8x96xf32> to vector<8x32xf32>
    %73 = vector.broadcast %13 : vector<1x32xf32> to vector<8x32xf32>
    %74 = arith.addf %72, %73 : vector<8x32xf32>
    %75 = arith.mulf %62, %74 : vector<8x32xf32>
    %76 = arith.addf %71, %75 : vector<8x32xf32>
    %77 = math.tanh %76 : vector<8x32xf32>
    %cst_31 = arith.constant 1.000000e+00 : f32
    %78 = vector.broadcast %cst_31 : f32 to vector<8x32xf32>
    %79 = arith.subf %78, %70 : vector<8x32xf32>
    %80 = arith.mulf %79, %77 : vector<8x32xf32>
    %81 = arith.mulf %70, %46 : vector<8x32xf32>
    %82 = arith.addf %80, %81 : vector<8x32xf32>
    %83 = arith.truncf %82 : vector<8x32xf32> to vector<8x32xbf16>
    %c0_32 = arith.constant 0 : index
    %c1_33 = arith.constant 1 : index
    %c0_34 = arith.constant 0 : index
    %84 = vector.load %arg7[%c0_32, %c1_33, %c0_34] : memref<8x16x32xbf16, #tpu.memory_space<vmem>>, vector<8x1x32xbf16>
    %85 = vector.shape_cast %84 : vector<8x1x32xbf16> to vector<8x32xbf16>
    %86 = vector.shape_cast %83 : vector<8x32xbf16> to vector<8x1x32xbf16>
    tpu.vector_store %arg7[%c0_32, %c1_33, %c0_34], %86 {strides = array<i32>} : memref<8x16x32xbf16, #tpu.memory_space<vmem>>, vector<8x1x32xbf16>,
    %87 = arith.truncf %82 : vector<8x32xf32> to vector<8x32xbf16>
    %cst_35 = arith.constant dense<0.000000e+00> : vector<8x96xf32>
    %88 = tpu.matmul %87, %12, %cst_35 {dimension_numbers = #tpu.dot_dimension_numbers<[1], [0], [0], [1], [0, 0, 1, 1], [], []>} : vector<8x32xbf16>, vector<32x96xbf16>, vector<8x96xf32> -> vector<8x96xf32>
    %c0_36 = arith.constant 0 : index
    %c2 = arith.constant 2 : index
    %c0_37 = arith.constant 0 : index
    %89 = vector.load %arg8[%c0_36, %c2, %c0_37] : memref<8x16x96xf32, #tpu.memory_space<vmem>>, vector<8x1x96xf32>
    %90 = vector.shape_cast %89 : vector<8x1x96xf32> to vector<8x96xf32>
    %91 = vector.extract_strided_slice %90 {offsets = [0, 0], sizes = [8, 32], strides = [1, 1]} : vector<8x96xf32> to vector<8x32xf32>
    %92 = vector.extract_strided_slice %88 {offsets = [0, 0], sizes = [8, 32], strides = [1, 1]} : vector<8x96xf32> to vector<8x32xf32>
    %93 = arith.addf %91, %92 : vector<8x32xf32>
    %94 = arith.negf %93 : vector<8x32xf32>
    %95 = math.exp %94 : vector<8x32xf32>
    %cst_38 = arith.constant 1.000000e+00 : f32
    %96 = vector.broadcast %cst_38 : f32 to vector<8x32xf32>
    %97 = arith.addf %96, %95 : vector<8x32xf32>
    %98 = arith.divf %96, %97 : vector<8x32xf32>
    %99 = vector.extract_strided_slice %90 {offsets = [0, 32], sizes = [8, 32], strides = [1, 1]} : vector<8x96xf32> to vector<8x32xf32>
    %100 = vector.extract_strided_slice %88 {offsets = [0, 32], sizes = [8, 32], strides = [1, 1]} : vector<8x96xf32> to vector<8x32xf32>
    %101 = arith.addf %99, %100 : vector<8x32xf32>
    %102 = arith.negf %101 : vector<8x32xf32>
    %103 = math.exp %102 : vector<8x32xf32>
    %cst_39 = arith.constant 1.000000e+00 : f32
    %104 = vector.broadcast %cst_39 : f32 to vector<8x32xf32>
    %105 = arith.addf %104, %103 : vector<8x32xf32>
    %106 = arith.divf %104, %105 : vector<8x32xf32>
    %107 = vector.extract_strided_slice %90 {offsets = [0, 64], sizes = [8, 32], strides = [1, 1]} : vector<8x96xf32> to vector<8x32xf32>
    %108 = vector.extract_strided_slice %88 {offsets = [0, 64], sizes = [8, 32], strides = [1, 1]} : vector<8x96xf32> to vector<8x32xf32>
    %109 = vector.broadcast %13 : vector<1x32xf32> to vector<8x32xf32>
    %110 = arith.addf %108, %109 : vector<8x32xf32>
    %111 = arith.mulf %98, %110 : vector<8x32xf32>
    %112 = arith.addf %107, %111 : vector<8x32xf32>
    %113 = math.tanh %112 : vector<8x32xf32>
    %cst_40 = arith.constant 1.000000e+00 : f32
    %114 = vector.broadcast %cst_40 : f32 to vector<8x32xf32>
    %115 = arith.subf %114, %106 : vector<8x32xf32>
    %116 = arith.mulf %115, %113 : vector<8x32xf32>
    %117 = arith.mulf %106, %82 : vector<8x32xf32>
    %118 = arith.addf %116, %117 : vector<8x32xf32>
    %119 = arith.truncf %118 : vector<8x32xf32> to vector<8x32xbf16>
    %c0_41 = arith.constant 0 : index
    %c2_42 = arith.constant 2 : index
    %c0_43 = arith.constant 0 : index
    %120 = vector.load %arg7[%c0_41, %c2_42, %c0_43] : memref<8x16x32xbf16, #tpu.memory_space<vmem>>, vector<8x1x32xbf16>
    %121 = vector.shape_cast %120 : vector<8x1x32xbf16> to vector<8x32xbf16>
    %122 = vector.shape_cast %119 : vector<8x32xbf16> to vector<8x1x32xbf16>
    tpu.vector_store %arg7[%c0_41, %c2_42, %c0_43], %122 {strides = array<i32>} : memref<8x16x32xbf16, #tpu.memory_space<vmem>>, vector<8x1x32xbf16>,
    %123 = arith.truncf %118 : vector<8x32xf32> to vector<8x32xbf16>
    %cst_44 = arith.constant dense<0.000000e+00> : vector<8x96xf32>
    %124 = tpu.matmul %123, %12, %cst_44 {dimension_numbers = #tpu.dot_dimension_numbers<[1], [0], [0], [1], [0, 0, 1, 1], [], []>} : vector<8x32xbf16>, vector<32x96xbf16>, vector<8x96xf32> -> vector<8x96xf32>
    %c0_45 = arith.constant 0 : index
    %c3 = arith.constant 3 : index
    %c0_46 = arith.constant 0 : index
    %125 = vector.load %arg8[%c0_45, %c3, %c0_46] : memref<8x16x96xf32, #tpu.memory_space<vmem>>, vector<8x1x96xf32>
    %126 = vector.shape_cast %125 : vector<8x1x96xf32> to vector<8x96xf32>
    %127 = vector.extract_strided_slice %126 {offsets = [0, 0], sizes = [8, 32], strides = [1, 1]} : vector<8x96xf32> to vector<8x32xf32>
    %128 = vector.extract_strided_slice %124 {offsets = [0, 0], sizes = [8, 32], strides = [1, 1]} : vector<8x96xf32> to vector<8x32xf32>
    %129 = arith.addf %127, %128 : vector<8x32xf32>
    %130 = arith.negf %129 : vector<8x32xf32>
    %131 = math.exp %130 : vector<8x32xf32>
    %cst_47 = arith.constant 1.000000e+00 : f32
    %132 = vector.broadcast %cst_47 : f32 to vector<8x32xf32>
    %133 = arith.addf %132, %131 : vector<8x32xf32>
    %134 = arith.divf %132, %133 : vector<8x32xf32>
    %135 = vector.extract_strided_slice %126 {offsets = [0, 32], sizes = [8, 32], strides = [1, 1]} : vector<8x96xf32> to vector<8x32xf32>
    %136 = vector.extract_strided_slice %124 {offsets = [0, 32], sizes = [8, 32], strides = [1, 1]} : vector<8x96xf32> to vector<8x32xf32>
    %137 = arith.addf %135, %136 : vector<8x32xf32>
    %138 = arith.negf %137 : vector<8x32xf32>
    %139 = math.exp %138 : vector<8x32xf32>
    %cst_48 = arith.constant 1.000000e+00 : f32
    %140 = vector.broadcast %cst_48 : f32 to vector<8x32xf32>
    %141 = arith.addf %140, %139 : vector<8x32xf32>
    %142 = arith.divf %140, %141 : vector<8x32xf32>
    %143 = vector.extract_strided_slice %126 {offsets = [0, 64], sizes = [8, 32], strides = [1, 1]} : vector<8x96xf32> to vector<8x32xf32>
    %144 = vector.extract_strided_slice %124 {offsets = [0, 64], sizes = [8, 32], strides = [1, 1]} : vector<8x96xf32> to vector<8x32xf32>
    %145 = vector.broadcast %13 : vector<1x32xf32> to vector<8x32xf32>
    %146 = arith.addf %144, %145 : vector<8x32xf32>
    %147 = arith.mulf %134, %146 : vector<8x32xf32>
    %148 = arith.addf %143, %147 : vector<8x32xf32>
    %149 = math.tanh %148 : vector<8x32xf32>
    %cst_49 = arith.constant 1.000000e+00 : f32
    %150 = vector.broadcast %cst_49 : f32 to vector<8x32xf32>
    %151 = arith.subf %150, %142 : vector<8x32xf32>
    %152 = arith.mulf %151, %149 : vector<8x32xf32>
    %153 = arith.mulf %142, %118 : vector<8x32xf32>
    %154 = arith.addf %152, %153 : vector<8x32xf32>
    %155 = arith.truncf %154 : vector<8x32xf32> to vector<8x32xbf16>
    %c0_50 = arith.constant 0 : index
    %c3_51 = arith.constant 3 : index
    %c0_52 = arith.constant 0 : index
    %156 = vector.load %arg7[%c0_50, %c3_51, %c0_52] : memref<8x16x32xbf16, #tpu.memory_space<vmem>>, vector<8x1x32xbf16>
    %157 = vector.shape_cast %156 : vector<8x1x32xbf16> to vector<8x32xbf16>
    %158 = vector.shape_cast %155 : vector<8x32xbf16> to vector<8x1x32xbf16>
    tpu.vector_store %arg7[%c0_50, %c3_51, %c0_52], %158 {strides = array<i32>} : memref<8x16x32xbf16, #tpu.memory_space<vmem>>, vector<8x1x32xbf16>,
    %159 = arith.truncf %154 : vector<8x32xf32> to vector<8x32xbf16>
    %cst_53 = arith.constant dense<0.000000e+00> : vector<8x96xf32>
    %160 = tpu.matmul %159, %12, %cst_53 {dimension_numbers = #tpu.dot_dimension_numbers<[1], [0], [0], [1], [0, 0, 1, 1], [], []>} : vector<8x32xbf16>, vector<32x96xbf16>, vector<8x96xf32> -> vector<8x96xf32>
    %c0_54 = arith.constant 0 : index
    %c4 = arith.constant 4 : index
    %c0_55 = arith.constant 0 : index
    %161 = vector.load %arg8[%c0_54, %c4, %c0_55] : memref<8x16x96xf32, #tpu.memory_space<vmem>>, vector<8x1x96xf32>
    %162 = vector.shape_cast %161 : vector<8x1x96xf32> to vector<8x96xf32>
    %163 = vector.extract_strided_slice %162 {offsets = [0, 0], sizes = [8, 32], strides = [1, 1]} : vector<8x96xf32> to vector<8x32xf32>
    %164 = vector.extract_strided_slice %160 {offsets = [0, 0], sizes = [8, 32], strides = [1, 1]} : vector<8x96xf32> to vector<8x32xf32>
    %165 = arith.addf %163, %164 : vector<8x32xf32>
    %166 = arith.negf %165 : vector<8x32xf32>
    %167 = math.exp %166 : vector<8x32xf32>
    %cst_56 = arith.constant 1.000000e+00 : f32
    %168 = vector.broadcast %cst_56 : f32 to vector<8x32xf32>
    %169 = arith.addf %168, %167 : vector<8x32xf32>
    %170 = arith.divf %168, %169 : vector<8x32xf32>
    %171 = vector.extract_strided_slice %162 {offsets = [0, 32], sizes = [8, 32], strides = [1, 1]} : vector<8x96xf32> to vector<8x32xf32>
    %172 = vector.extract_strided_slice %160 {offsets = [0, 32], sizes = [8, 32], strides = [1, 1]} : vector<8x96xf32> to vector<8x32xf32>
    %173 = arith.addf %171, %172 : vector<8x32xf32>
    %174 = arith.negf %173 : vector<8x32xf32>
    %175 = math.exp %174 : vector<8x32xf32>
    %cst_57 = arith.constant 1.000000e+00 : f32
    %176 = vector.broadcast %cst_57 : f32 to vector<8x32xf32>
    %177 = arith.addf %176, %175 : vector<8x32xf32>
    %178 = arith.divf %176, %177 : vector<8x32xf32>
    %179 = vector.extract_strided_slice %162 {offsets = [0, 64], sizes = [8, 32], strides = [1, 1]} : vector<8x96xf32> to vector<8x32xf32>
    %180 = vector.extract_strided_slice %160 {offsets = [0, 64], sizes = [8, 32], strides = [1, 1]} : vector<8x96xf32> to vector<8x32xf32>
    %181 = vector.broadcast %13 : vector<1x32xf32> to vector<8x32xf32>
    %182 = arith.addf %180, %181 : vector<8x32xf32>
    %183 = arith.mulf %170, %182 : vector<8x32xf32>
    %184 = arith.addf %179, %183 : vector<8x32xf32>
    %185 = math.tanh %184 : vector<8x32xf32>
    %cst_58 = arith.constant 1.000000e+00 : f32
    %186 = vector.broadcast %cst_58 : f32 to vector<8x32xf32>
    %187 = arith.subf %186, %178 : vector<8x32xf32>
    %188 = arith.mulf %187, %185 : vector<8x32xf32>
    %189 = arith.mulf %178, %154 : vector<8x32xf32>
    %190 = arith.addf %188, %189 : vector<8x32xf32>
    %191 = arith.truncf %190 : vector<8x32xf32> to vector<8x32xbf16>
    %c0_59 = arith.constant 0 : index
    %c4_60 = arith.constant 4 : index
    %c0_61 = arith.constant 0 : index
    %192 = vector.load %arg7[%c0_59, %c4_60, %c0_61] : memref<8x16x32xbf16, #tpu.memory_space<vmem>>, vector<8x1x32xbf16>
    %193 = vector.shape_cast %192 : vector<8x1x32xbf16> to vector<8x32xbf16>
    %194 = vector.shape_cast %191 : vector<8x32xbf16> to vector<8x1x32xbf16>
    tpu.vector_store %arg7[%c0_59, %c4_60, %c0_61], %194 {strides = array<i32>} : memref<8x16x32xbf16, #tpu.memory_space<vmem>>, vector<8x1x32xbf16>,
    %195 = arith.truncf %190 : vector<8x32xf32> to vector<8x32xbf16>
    %cst_62 = arith.constant dense<0.000000e+00> : vector<8x96xf32>
    %196 = tpu.matmul %195, %12, %cst_62 {dimension_numbers = #tpu.dot_dimension_numbers<[1], [0], [0], [1], [0, 0, 1, 1], [], []>} : vector<8x32xbf16>, vector<32x96xbf16>, vector<8x96xf32> -> vector<8x96xf32>
    %c0_63 = arith.constant 0 : index
    %c5 = arith.constant 5 : index
    %c0_64 = arith.constant 0 : index
    %197 = vector.load %arg8[%c0_63, %c5, %c0_64] : memref<8x16x96xf32, #tpu.memory_space<vmem>>, vector<8x1x96xf32>
    %198 = vector.shape_cast %197 : vector<8x1x96xf32> to vector<8x96xf32>
    %199 = vector.extract_strided_slice %198 {offsets = [0, 0], sizes = [8, 32], strides = [1, 1]} : vector<8x96xf32> to vector<8x32xf32>
    %200 = vector.extract_strided_slice %196 {offsets = [0, 0], sizes = [8, 32], strides = [1, 1]} : vector<8x96xf32> to vector<8x32xf32>
    %201 = arith.addf %199, %200 : vector<8x32xf32>
    %202 = arith.negf %201 : vector<8x32xf32>
    %203 = math.exp %202 : vector<8x32xf32>
    %cst_65 = arith.constant 1.000000e+00 : f32
    %204 = vector.broadcast %cst_65 : f32 to vector<8x32xf32>
    %205 = arith.addf %204, %203 : vector<8x32xf32>
    %206 = arith.divf %204, %205 : vector<8x32xf32>
    %207 = vector.extract_strided_slice %198 {offsets = [0, 32], sizes = [8, 32], strides = [1, 1]} : vector<8x96xf32> to vector<8x32xf32>
    %208 = vector.extract_strided_slice %196 {offsets = [0, 32], sizes = [8, 32], strides = [1, 1]} : vector<8x96xf32> to vector<8x32xf32>
    %209 = arith.addf %207, %208 : vector<8x32xf32>
    %210 = arith.negf %209 : vector<8x32xf32>
    %211 = math.exp %210 : vector<8x32xf32>
    %cst_66 = arith.constant 1.000000e+00 : f32
    %212 = vector.broadcast %cst_66 : f32 to vector<8x32xf32>
    %213 = arith.addf %212, %211 : vector<8x32xf32>
    %214 = arith.divf %212, %213 : vector<8x32xf32>
    %215 = vector.extract_strided_slice %198 {offsets = [0, 64], sizes = [8, 32], strides = [1, 1]} : vector<8x96xf32> to vector<8x32xf32>
    %216 = vector.extract_strided_slice %196 {offsets = [0, 64], sizes = [8, 32], strides = [1, 1]} : vector<8x96xf32> to vector<8x32xf32>
    %217 = vector.broadcast %13 : vector<1x32xf32> to vector<8x32xf32>
    %218 = arith.addf %216, %217 : vector<8x32xf32>
    %219 = arith.mulf %206, %218 : vector<8x32xf32>
    %220 = arith.addf %215, %219 : vector<8x32xf32>
    %221 = math.tanh %220 : vector<8x32xf32>
    %cst_67 = arith.constant 1.000000e+00 : f32
    %222 = vector.broadcast %cst_67 : f32 to vector<8x32xf32>
    %223 = arith.subf %222, %214 : vector<8x32xf32>
    %224 = arith.mulf %223, %221 : vector<8x32xf32>
    %225 = arith.mulf %214, %190 : vector<8x32xf32>
    %226 = arith.addf %224, %225 : vector<8x32xf32>
    %227 = arith.truncf %226 : vector<8x32xf32> to vector<8x32xbf16>
    %c0_68 = arith.constant 0 : index
    %c5_69 = arith.constant 5 : index
    %c0_70 = arith.constant 0 : index
    %228 = vector.load %arg7[%c0_68, %c5_69, %c0_70] : memref<8x16x32xbf16, #tpu.memory_space<vmem>>, vector<8x1x32xbf16>
    %229 = vector.shape_cast %228 : vector<8x1x32xbf16> to vector<8x32xbf16>
    %230 = vector.shape_cast %227 : vector<8x32xbf16> to vector<8x1x32xbf16>
    tpu.vector_store %arg7[%c0_68, %c5_69, %c0_70], %230 {strides = array<i32>} : memref<8x16x32xbf16, #tpu.memory_space<vmem>>, vector<8x1x32xbf16>,
    %231 = arith.truncf %226 : vector<8x32xf32> to vector<8x32xbf16>
    %cst_71 = arith.constant dense<0.000000e+00> : vector<8x96xf32>
    %232 = tpu.matmul %231, %12, %cst_71 {dimension_numbers = #tpu.dot_dimension_numbers<[1], [0], [0], [1], [0, 0, 1, 1], [], []>} : vector<8x32xbf16>, vector<32x96xbf16>, vector<8x96xf32> -> vector<8x96xf32>
    %c0_72 = arith.constant 0 : index
    %c6 = arith.constant 6 : index
    %c0_73 = arith.constant 0 : index
    %233 = vector.load %arg8[%c0_72, %c6, %c0_73] : memref<8x16x96xf32, #tpu.memory_space<vmem>>, vector<8x1x96xf32>
    %234 = vector.shape_cast %233 : vector<8x1x96xf32> to vector<8x96xf32>
    %235 = vector.extract_strided_slice %234 {offsets = [0, 0], sizes = [8, 32], strides = [1, 1]} : vector<8x96xf32> to vector<8x32xf32>
    %236 = vector.extract_strided_slice %232 {offsets = [0, 0], sizes = [8, 32], strides = [1, 1]} : vector<8x96xf32> to vector<8x32xf32>
    %237 = arith.addf %235, %236 : vector<8x32xf32>
    %238 = arith.negf %237 : vector<8x32xf32>
    %239 = math.exp %238 : vector<8x32xf32>
    %cst_74 = arith.constant 1.000000e+00 : f32
    %240 = vector.broadcast %cst_74 : f32 to vector<8x32xf32>
    %241 = arith.addf %240, %239 : vector<8x32xf32>
    %242 = arith.divf %240, %241 : vector<8x32xf32>
    %243 = vector.extract_strided_slice %234 {offsets = [0, 32], sizes = [8, 32], strides = [1, 1]} : vector<8x96xf32> to vector<8x32xf32>
    %244 = vector.extract_strided_slice %232 {offsets = [0, 32], sizes = [8, 32], strides = [1, 1]} : vector<8x96xf32> to vector<8x32xf32>
    %245 = arith.addf %243, %244 : vector<8x32xf32>
    %246 = arith.negf %245 : vector<8x32xf32>
    %247 = math.exp %246 : vector<8x32xf32>
    %cst_75 = arith.constant 1.000000e+00 : f32
    %248 = vector.broadcast %cst_75 : f32 to vector<8x32xf32>
    %249 = arith.addf %248, %247 : vector<8x32xf32>
    %250 = arith.divf %248, %249 : vector<8x32xf32>
    %251 = vector.extract_strided_slice %234 {offsets = [0, 64], sizes = [8, 32], strides = [1, 1]} : vector<8x96xf32> to vector<8x32xf32>
    %252 = vector.extract_strided_slice %232 {offsets = [0, 64], sizes = [8, 32], strides = [1, 1]} : vector<8x96xf32> to vector<8x32xf32>
    %253 = vector.broadcast %13 : vector<1x32xf32> to vector<8x32xf32>
    %254 = arith.addf %252, %253 : vector<8x32xf32>
    %255 = arith.mulf %242, %254 : vector<8x32xf32>
    %256 = arith.addf %251, %255 : vector<8x32xf32>
    %257 = math.tanh %256 : vector<8x32xf32>
    %cst_76 = arith.constant 1.000000e+00 : f32
    %258 = vector.broadcast %cst_76 : f32 to vector<8x32xf32>
    %259 = arith.subf %258, %250 : vector<8x32xf32>
    %260 = arith.mulf %259, %257 : vector<8x32xf32>
    %261 = arith.mulf %250, %226 : vector<8x32xf32>
    %262 = arith.addf %260, %261 : vector<8x32xf32>
    %263 = arith.truncf %262 : vector<8x32xf32> to vector<8x32xbf16>
    %c0_77 = arith.constant 0 : index
    %c6_78 = arith.constant 6 : index
    %c0_79 = arith.constant 0 : index
    %264 = vector.load %arg7[%c0_77, %c6_78, %c0_79] : memref<8x16x32xbf16, #tpu.memory_space<vmem>>, vector<8x1x32xbf16>
    %265 = vector.shape_cast %264 : vector<8x1x32xbf16> to vector<8x32xbf16>
    %266 = vector.shape_cast %263 : vector<8x32xbf16> to vector<8x1x32xbf16>
    tpu.vector_store %arg7[%c0_77, %c6_78, %c0_79], %266 {strides = array<i32>} : memref<8x16x32xbf16, #tpu.memory_space<vmem>>, vector<8x1x32xbf16>,
    %267 = arith.truncf %262 : vector<8x32xf32> to vector<8x32xbf16>
    %cst_80 = arith.constant dense<0.000000e+00> : vector<8x96xf32>
    %268 = tpu.matmul %267, %12, %cst_80 {dimension_numbers = #tpu.dot_dimension_numbers<[1], [0], [0], [1], [0, 0, 1, 1], [], []>} : vector<8x32xbf16>, vector<32x96xbf16>, vector<8x96xf32> -> vector<8x96xf32>
    %c0_81 = arith.constant 0 : index
    %c7 = arith.constant 7 : index
    %c0_82 = arith.constant 0 : index
    %269 = vector.load %arg8[%c0_81, %c7, %c0_82] : memref<8x16x96xf32, #tpu.memory_space<vmem>>, vector<8x1x96xf32>
    %270 = vector.shape_cast %269 : vector<8x1x96xf32> to vector<8x96xf32>
    %271 = vector.extract_strided_slice %270 {offsets = [0, 0], sizes = [8, 32], strides = [1, 1]} : vector<8x96xf32> to vector<8x32xf32>
    %272 = vector.extract_strided_slice %268 {offsets = [0, 0], sizes = [8, 32], strides = [1, 1]} : vector<8x96xf32> to vector<8x32xf32>
    %273 = arith.addf %271, %272 : vector<8x32xf32>
    %274 = arith.negf %273 : vector<8x32xf32>
    %275 = math.exp %274 : vector<8x32xf32>
    %cst_83 = arith.constant 1.000000e+00 : f32
    %276 = vector.broadcast %cst_83 : f32 to vector<8x32xf32>
    %277 = arith.addf %276, %275 : vector<8x32xf32>
    %278 = arith.divf %276, %277 : vector<8x32xf32>
    %279 = vector.extract_strided_slice %270 {offsets = [0, 32], sizes = [8, 32], strides = [1, 1]} : vector<8x96xf32> to vector<8x32xf32>
    %280 = vector.extract_strided_slice %268 {offsets = [0, 32], sizes = [8, 32], strides = [1, 1]} : vector<8x96xf32> to vector<8x32xf32>
    %281 = arith.addf %279, %280 : vector<8x32xf32>
    %282 = arith.negf %281 : vector<8x32xf32>
    %283 = math.exp %282 : vector<8x32xf32>
    %cst_84 = arith.constant 1.000000e+00 : f32
    %284 = vector.broadcast %cst_84 : f32 to vector<8x32xf32>
    %285 = arith.addf %284, %283 : vector<8x32xf32>
    %286 = arith.divf %284, %285 : vector<8x32xf32>
    %287 = vector.extract_strided_slice %270 {offsets = [0, 64], sizes = [8, 32], strides = [1, 1]} : vector<8x96xf32> to vector<8x32xf32>
    %288 = vector.extract_strided_slice %268 {offsets = [0, 64], sizes = [8, 32], strides = [1, 1]} : vector<8x96xf32> to vector<8x32xf32>
    %289 = vector.broadcast %13 : vector<1x32xf32> to vector<8x32xf32>
    %290 = arith.addf %288, %289 : vector<8x32xf32>
    %291 = arith.mulf %278, %290 : vector<8x32xf32>
    %292 = arith.addf %287, %291 : vector<8x32xf32>
    %293 = math.tanh %292 : vector<8x32xf32>
    %cst_85 = arith.constant 1.000000e+00 : f32
    %294 = vector.broadcast %cst_85 : f32 to vector<8x32xf32>
    %295 = arith.subf %294, %286 : vector<8x32xf32>
    %296 = arith.mulf %295, %293 : vector<8x32xf32>
    %297 = arith.mulf %286, %262 : vector<8x32xf32>
    %298 = arith.addf %296, %297 : vector<8x32xf32>
    %299 = arith.truncf %298 : vector<8x32xf32> to vector<8x32xbf16>
    %c0_86 = arith.constant 0 : index
    %c7_87 = arith.constant 7 : index
    %c0_88 = arith.constant 0 : index
    %300 = vector.load %arg7[%c0_86, %c7_87, %c0_88] : memref<8x16x32xbf16, #tpu.memory_space<vmem>>, vector<8x1x32xbf16>
    %301 = vector.shape_cast %300 : vector<8x1x32xbf16> to vector<8x32xbf16>
    %302 = vector.shape_cast %299 : vector<8x32xbf16> to vector<8x1x32xbf16>
    tpu.vector_store %arg7[%c0_86, %c7_87, %c0_88], %302 {strides = array<i32>} : memref<8x16x32xbf16, #tpu.memory_space<vmem>>, vector<8x1x32xbf16>,
    %303 = arith.truncf %298 : vector<8x32xf32> to vector<8x32xbf16>
    %cst_89 = arith.constant dense<0.000000e+00> : vector<8x96xf32>
    %304 = tpu.matmul %303, %12, %cst_89 {dimension_numbers = #tpu.dot_dimension_numbers<[1], [0], [0], [1], [0, 0, 1, 1], [], []>} : vector<8x32xbf16>, vector<32x96xbf16>, vector<8x96xf32> -> vector<8x96xf32>
    %c0_90 = arith.constant 0 : index
    %c8 = arith.constant 8 : index
    %c0_91 = arith.constant 0 : index
    %305 = vector.load %arg8[%c0_90, %c8, %c0_91] : memref<8x16x96xf32, #tpu.memory_space<vmem>>, vector<8x1x96xf32>
    %306 = vector.shape_cast %305 : vector<8x1x96xf32> to vector<8x96xf32>
    %307 = vector.extract_strided_slice %306 {offsets = [0, 0], sizes = [8, 32], strides = [1, 1]} : vector<8x96xf32> to vector<8x32xf32>
    %308 = vector.extract_strided_slice %304 {offsets = [0, 0], sizes = [8, 32], strides = [1, 1]} : vector<8x96xf32> to vector<8x32xf32>
    %309 = arith.addf %307, %308 : vector<8x32xf32>
    %310 = arith.negf %309 : vector<8x32xf32>
    %311 = math.exp %310 : vector<8x32xf32>
    %cst_92 = arith.constant 1.000000e+00 : f32
    %312 = vector.broadcast %cst_92 : f32 to vector<8x32xf32>
    %313 = arith.addf %312, %311 : vector<8x32xf32>
    %314 = arith.divf %312, %313 : vector<8x32xf32>
    %315 = vector.extract_strided_slice %306 {offsets = [0, 32], sizes = [8, 32], strides = [1, 1]} : vector<8x96xf32> to vector<8x32xf32>
    %316 = vector.extract_strided_slice %304 {offsets = [0, 32], sizes = [8, 32], strides = [1, 1]} : vector<8x96xf32> to vector<8x32xf32>
    %317 = arith.addf %315, %316 : vector<8x32xf32>
    %318 = arith.negf %317 : vector<8x32xf32>
    %319 = math.exp %318 : vector<8x32xf32>
    %cst_93 = arith.constant 1.000000e+00 : f32
    %320 = vector.broadcast %cst_93 : f32 to vector<8x32xf32>
    %321 = arith.addf %320, %319 : vector<8x32xf32>
    %322 = arith.divf %320, %321 : vector<8x32xf32>
    %323 = vector.extract_strided_slice %306 {offsets = [0, 64], sizes = [8, 32], strides = [1, 1]} : vector<8x96xf32> to vector<8x32xf32>
    %324 = vector.extract_strided_slice %304 {offsets = [0, 64], sizes = [8, 32], strides = [1, 1]} : vector<8x96xf32> to vector<8x32xf32>
    %325 = vector.broadcast %13 : vector<1x32xf32> to vector<8x32xf32>
    %326 = arith.addf %324, %325 : vector<8x32xf32>
    %327 = arith.mulf %314, %326 : vector<8x32xf32>
    %328 = arith.addf %323, %327 : vector<8x32xf32>
    %329 = math.tanh %328 : vector<8x32xf32>
    %cst_94 = arith.constant 1.000000e+00 : f32
    %330 = vector.broadcast %cst_94 : f32 to vector<8x32xf32>
    %331 = arith.subf %330, %322 : vector<8x32xf32>
    %332 = arith.mulf %331, %329 : vector<8x32xf32>
    %333 = arith.mulf %322, %298 : vector<8x32xf32>
    %334 = arith.addf %332, %333 : vector<8x32xf32>
    %335 = arith.truncf %334 : vector<8x32xf32> to vector<8x32xbf16>
    %c0_95 = arith.constant 0 : index
    %c8_96 = arith.constant 8 : index
    %c0_97 = arith.constant 0 : index
    %336 = vector.load %arg7[%c0_95, %c8_96, %c0_97] : memref<8x16x32xbf16, #tpu.memory_space<vmem>>, vector<8x1x32xbf16>
    %337 = vector.shape_cast %336 : vector<8x1x32xbf16> to vector<8x32xbf16>
    %338 = vector.shape_cast %335 : vector<8x32xbf16> to vector<8x1x32xbf16>
    tpu.vector_store %arg7[%c0_95, %c8_96, %c0_97], %338 {strides = array<i32>} : memref<8x16x32xbf16, #tpu.memory_space<vmem>>, vector<8x1x32xbf16>,
    %339 = arith.truncf %334 : vector<8x32xf32> to vector<8x32xbf16>
    %cst_98 = arith.constant dense<0.000000e+00> : vector<8x96xf32>
    %340 = tpu.matmul %339, %12, %cst_98 {dimension_numbers = #tpu.dot_dimension_numbers<[1], [0], [0], [1], [0, 0, 1, 1], [], []>} : vector<8x32xbf16>, vector<32x96xbf16>, vector<8x96xf32> -> vector<8x96xf32>
    %c0_99 = arith.constant 0 : index
    %c9 = arith.constant 9 : index
    %c0_100 = arith.constant 0 : index
    %341 = vector.load %arg8[%c0_99, %c9, %c0_100] : memref<8x16x96xf32, #tpu.memory_space<vmem>>, vector<8x1x96xf32>
    %342 = vector.shape_cast %341 : vector<8x1x96xf32> to vector<8x96xf32>
    %343 = vector.extract_strided_slice %342 {offsets = [0, 0], sizes = [8, 32], strides = [1, 1]} : vector<8x96xf32> to vector<8x32xf32>
    %344 = vector.extract_strided_slice %340 {offsets = [0, 0], sizes = [8, 32], strides = [1, 1]} : vector<8x96xf32> to vector<8x32xf32>
    %345 = arith.addf %343, %344 : vector<8x32xf32>
    %346 = arith.negf %345 : vector<8x32xf32>
    %347 = math.exp %346 : vector<8x32xf32>
    %cst_101 = arith.constant 1.000000e+00 : f32
    %348 = vector.broadcast %cst_101 : f32 to vector<8x32xf32>
    %349 = arith.addf %348, %347 : vector<8x32xf32>
    %350 = arith.divf %348, %349 : vector<8x32xf32>
    %351 = vector.extract_strided_slice %342 {offsets = [0, 32], sizes = [8, 32], strides = [1, 1]} : vector<8x96xf32> to vector<8x32xf32>
    %352 = vector.extract_strided_slice %340 {offsets = [0, 32], sizes = [8, 32], strides = [1, 1]} : vector<8x96xf32> to vector<8x32xf32>
    %353 = arith.addf %351, %352 : vector<8x32xf32>
    %354 = arith.negf %353 : vector<8x32xf32>
    %355 = math.exp %354 : vector<8x32xf32>
    %cst_102 = arith.constant 1.000000e+00 : f32
    %356 = vector.broadcast %cst_102 : f32 to vector<8x32xf32>
    %357 = arith.addf %356, %355 : vector<8x32xf32>
    %358 = arith.divf %356, %357 : vector<8x32xf32>
    %359 = vector.extract_strided_slice %342 {offsets = [0, 64], sizes = [8, 32], strides = [1, 1]} : vector<8x96xf32> to vector<8x32xf32>
    %360 = vector.extract_strided_slice %340 {offsets = [0, 64], sizes = [8, 32], strides = [1, 1]} : vector<8x96xf32> to vector<8x32xf32>
    %361 = vector.broadcast %13 : vector<1x32xf32> to vector<8x32xf32>
    %362 = arith.addf %360, %361 : vector<8x32xf32>
    %363 = arith.mulf %350, %362 : vector<8x32xf32>
    %364 = arith.addf %359, %363 : vector<8x32xf32>
    %365 = math.tanh %364 : vector<8x32xf32>
    %cst_103 = arith.constant 1.000000e+00 : f32
    %366 = vector.broadcast %cst_103 : f32 to vector<8x32xf32>
    %367 = arith.subf %366, %358 : vector<8x32xf32>
    %368 = arith.mulf %367, %365 : vector<8x32xf32>
    %369 = arith.mulf %358, %334 : vector<8x32xf32>
    %370 = arith.addf %368, %369 : vector<8x32xf32>
    %371 = arith.truncf %370 : vector<8x32xf32> to vector<8x32xbf16>
    %c0_104 = arith.constant 0 : index
    %c9_105 = arith.constant 9 : index
    %c0_106 = arith.constant 0 : index
    %372 = vector.load %arg7[%c0_104, %c9_105, %c0_106] : memref<8x16x32xbf16, #tpu.memory_space<vmem>>, vector<8x1x32xbf16>
    %373 = vector.shape_cast %372 : vector<8x1x32xbf16> to vector<8x32xbf16>
    %374 = vector.shape_cast %371 : vector<8x32xbf16> to vector<8x1x32xbf16>
    tpu.vector_store %arg7[%c0_104, %c9_105, %c0_106], %374 {strides = array<i32>} : memref<8x16x32xbf16, #tpu.memory_space<vmem>>, vector<8x1x32xbf16>,
    %375 = arith.truncf %370 : vector<8x32xf32> to vector<8x32xbf16>
    %cst_107 = arith.constant dense<0.000000e+00> : vector<8x96xf32>
    %376 = tpu.matmul %375, %12, %cst_107 {dimension_numbers = #tpu.dot_dimension_numbers<[1], [0], [0], [1], [0, 0, 1, 1], [], []>} : vector<8x32xbf16>, vector<32x96xbf16>, vector<8x96xf32> -> vector<8x96xf32>
    %c0_108 = arith.constant 0 : index
    %c10 = arith.constant 10 : index
    %c0_109 = arith.constant 0 : index
    %377 = vector.load %arg8[%c0_108, %c10, %c0_109] : memref<8x16x96xf32, #tpu.memory_space<vmem>>, vector<8x1x96xf32>
    %378 = vector.shape_cast %377 : vector<8x1x96xf32> to vector<8x96xf32>
    %379 = vector.extract_strided_slice %378 {offsets = [0, 0], sizes = [8, 32], strides = [1, 1]} : vector<8x96xf32> to vector<8x32xf32>
    %380 = vector.extract_strided_slice %376 {offsets = [0, 0], sizes = [8, 32], strides = [1, 1]} : vector<8x96xf32> to vector<8x32xf32>
    %381 = arith.addf %379, %380 : vector<8x32xf32>
    %382 = arith.negf %381 : vector<8x32xf32>
    %383 = math.exp %382 : vector<8x32xf32>
    %cst_110 = arith.constant 1.000000e+00 : f32
    %384 = vector.broadcast %cst_110 : f32 to vector<8x32xf32>
    %385 = arith.addf %384, %383 : vector<8x32xf32>
    %386 = arith.divf %384, %385 : vector<8x32xf32>
    %387 = vector.extract_strided_slice %378 {offsets = [0, 32], sizes = [8, 32], strides = [1, 1]} : vector<8x96xf32> to vector<8x32xf32>
    %388 = vector.extract_strided_slice %376 {offsets = [0, 32], sizes = [8, 32], strides = [1, 1]} : vector<8x96xf32> to vector<8x32xf32>
    %389 = arith.addf %387, %388 : vector<8x32xf32>
    %390 = arith.negf %389 : vector<8x32xf32>
    %391 = math.exp %390 : vector<8x32xf32>
    %cst_111 = arith.constant 1.000000e+00 : f32
    %392 = vector.broadcast %cst_111 : f32 to vector<8x32xf32>
    %393 = arith.addf %392, %391 : vector<8x32xf32>
    %394 = arith.divf %392, %393 : vector<8x32xf32>
    %395 = vector.extract_strided_slice %378 {offsets = [0, 64], sizes = [8, 32], strides = [1, 1]} : vector<8x96xf32> to vector<8x32xf32>
    %396 = vector.extract_strided_slice %376 {offsets = [0, 64], sizes = [8, 32], strides = [1, 1]} : vector<8x96xf32> to vector<8x32xf32>
    %397 = vector.broadcast %13 : vector<1x32xf32> to vector<8x32xf32>
    %398 = arith.addf %396, %397 : vector<8x32xf32>
    %399 = arith.mulf %386, %398 : vector<8x32xf32>
    %400 = arith.addf %395, %399 : vector<8x32xf32>
    %401 = math.tanh %400 : vector<8x32xf32>
    %cst_112 = arith.constant 1.000000e+00 : f32
    %402 = vector.broadcast %cst_112 : f32 to vector<8x32xf32>
    %403 = arith.subf %402, %394 : vector<8x32xf32>
    %404 = arith.mulf %403, %401 : vector<8x32xf32>
    %405 = arith.mulf %394, %370 : vector<8x32xf32>
    %406 = arith.addf %404, %405 : vector<8x32xf32>
    %407 = arith.truncf %406 : vector<8x32xf32> to vector<8x32xbf16>
    %c0_113 = arith.constant 0 : index
    %c10_114 = arith.constant 10 : index
    %c0_115 = arith.constant 0 : index
    %408 = vector.load %arg7[%c0_113, %c10_114, %c0_115] : memref<8x16x32xbf16, #tpu.memory_space<vmem>>, vector<8x1x32xbf16>
    %409 = vector.shape_cast %408 : vector<8x1x32xbf16> to vector<8x32xbf16>
    %410 = vector.shape_cast %407 : vector<8x32xbf16> to vector<8x1x32xbf16>
    tpu.vector_store %arg7[%c0_113, %c10_114, %c0_115], %410 {strides = array<i32>} : memref<8x16x32xbf16, #tpu.memory_space<vmem>>, vector<8x1x32xbf16>,
    %411 = arith.truncf %406 : vector<8x32xf32> to vector<8x32xbf16>
    %cst_116 = arith.constant dense<0.000000e+00> : vector<8x96xf32>
    %412 = tpu.matmul %411, %12, %cst_116 {dimension_numbers = #tpu.dot_dimension_numbers<[1], [0], [0], [1], [0, 0, 1, 1], [], []>} : vector<8x32xbf16>, vector<32x96xbf16>, vector<8x96xf32> -> vector<8x96xf32>
    %c0_117 = arith.constant 0 : index
    %c11 = arith.constant 11 : index
    %c0_118 = arith.constant 0 : index
    %413 = vector.load %arg8[%c0_117, %c11, %c0_118] : memref<8x16x96xf32, #tpu.memory_space<vmem>>, vector<8x1x96xf32>
    %414 = vector.shape_cast %413 : vector<8x1x96xf32> to vector<8x96xf32>
    %415 = vector.extract_strided_slice %414 {offsets = [0, 0], sizes = [8, 32], strides = [1, 1]} : vector<8x96xf32> to vector<8x32xf32>
    %416 = vector.extract_strided_slice %412 {offsets = [0, 0], sizes = [8, 32], strides = [1, 1]} : vector<8x96xf32> to vector<8x32xf32>
    %417 = arith.addf %415, %416 : vector<8x32xf32>
    %418 = arith.negf %417 : vector<8x32xf32>
    %419 = math.exp %418 : vector<8x32xf32>
    %cst_119 = arith.constant 1.000000e+00 : f32
    %420 = vector.broadcast %cst_119 : f32 to vector<8x32xf32>
    %421 = arith.addf %420, %419 : vector<8x32xf32>
    %422 = arith.divf %420, %421 : vector<8x32xf32>
    %423 = vector.extract_strided_slice %414 {offsets = [0, 32], sizes = [8, 32], strides = [1, 1]} : vector<8x96xf32> to vector<8x32xf32>
    %424 = vector.extract_strided_slice %412 {offsets = [0, 32], sizes = [8, 32], strides = [1, 1]} : vector<8x96xf32> to vector<8x32xf32>
    %425 = arith.addf %423, %424 : vector<8x32xf32>
    %426 = arith.negf %425 : vector<8x32xf32>
    %427 = math.exp %426 : vector<8x32xf32>
    %cst_120 = arith.constant 1.000000e+00 : f32
    %428 = vector.broadcast %cst_120 : f32 to vector<8x32xf32>
    %429 = arith.addf %428, %427 : vector<8x32xf32>
    %430 = arith.divf %428, %429 : vector<8x32xf32>
    %431 = vector.extract_strided_slice %414 {offsets = [0, 64], sizes = [8, 32], strides = [1, 1]} : vector<8x96xf32> to vector<8x32xf32>
    %432 = vector.extract_strided_slice %412 {offsets = [0, 64], sizes = [8, 32], strides = [1, 1]} : vector<8x96xf32> to vector<8x32xf32>
    %433 = vector.broadcast %13 : vector<1x32xf32> to vector<8x32xf32>
    %434 = arith.addf %432, %433 : vector<8x32xf32>
    %435 = arith.mulf %422, %434 : vector<8x32xf32>
    %436 = arith.addf %431, %435 : vector<8x32xf32>
    %437 = math.tanh %436 : vector<8x32xf32>
    %cst_121 = arith.constant 1.000000e+00 : f32
    %438 = vector.broadcast %cst_121 : f32 to vector<8x32xf32>
    %439 = arith.subf %438, %430 : vector<8x32xf32>
    %440 = arith.mulf %439, %437 : vector<8x32xf32>
    %441 = arith.mulf %430, %406 : vector<8x32xf32>
    %442 = arith.addf %440, %441 : vector<8x32xf32>
    %443 = arith.truncf %442 : vector<8x32xf32> to vector<8x32xbf16>
    %c0_122 = arith.constant 0 : index
    %c11_123 = arith.constant 11 : index
    %c0_124 = arith.constant 0 : index
    %444 = vector.load %arg7[%c0_122, %c11_123, %c0_124] : memref<8x16x32xbf16, #tpu.memory_space<vmem>>, vector<8x1x32xbf16>
    %445 = vector.shape_cast %444 : vector<8x1x32xbf16> to vector<8x32xbf16>
    %446 = vector.shape_cast %443 : vector<8x32xbf16> to vector<8x1x32xbf16>
    tpu.vector_store %arg7[%c0_122, %c11_123, %c0_124], %446 {strides = array<i32>} : memref<8x16x32xbf16, #tpu.memory_space<vmem>>, vector<8x1x32xbf16>,
    %447 = arith.truncf %442 : vector<8x32xf32> to vector<8x32xbf16>
    %cst_125 = arith.constant dense<0.000000e+00> : vector<8x96xf32>
    %448 = tpu.matmul %447, %12, %cst_125 {dimension_numbers = #tpu.dot_dimension_numbers<[1], [0], [0], [1], [0, 0, 1, 1], [], []>} : vector<8x32xbf16>, vector<32x96xbf16>, vector<8x96xf32> -> vector<8x96xf32>
    %c0_126 = arith.constant 0 : index
    %c12 = arith.constant 12 : index
    %c0_127 = arith.constant 0 : index
    %449 = vector.load %arg8[%c0_126, %c12, %c0_127] : memref<8x16x96xf32, #tpu.memory_space<vmem>>, vector<8x1x96xf32>
    %450 = vector.shape_cast %449 : vector<8x1x96xf32> to vector<8x96xf32>
    %451 = vector.extract_strided_slice %450 {offsets = [0, 0], sizes = [8, 32], strides = [1, 1]} : vector<8x96xf32> to vector<8x32xf32>
    %452 = vector.extract_strided_slice %448 {offsets = [0, 0], sizes = [8, 32], strides = [1, 1]} : vector<8x96xf32> to vector<8x32xf32>
    %453 = arith.addf %451, %452 : vector<8x32xf32>
    %454 = arith.negf %453 : vector<8x32xf32>
    %455 = math.exp %454 : vector<8x32xf32>
    %cst_128 = arith.constant 1.000000e+00 : f32
    %456 = vector.broadcast %cst_128 : f32 to vector<8x32xf32>
    %457 = arith.addf %456, %455 : vector<8x32xf32>
    %458 = arith.divf %456, %457 : vector<8x32xf32>
    %459 = vector.extract_strided_slice %450 {offsets = [0, 32], sizes = [8, 32], strides = [1, 1]} : vector<8x96xf32> to vector<8x32xf32>
    %460 = vector.extract_strided_slice %448 {offsets = [0, 32], sizes = [8, 32], strides = [1, 1]} : vector<8x96xf32> to vector<8x32xf32>
    %461 = arith.addf %459, %460 : vector<8x32xf32>
    %462 = arith.negf %461 : vector<8x32xf32>
    %463 = math.exp %462 : vector<8x32xf32>
    %cst_129 = arith.constant 1.000000e+00 : f32
    %464 = vector.broadcast %cst_129 : f32 to vector<8x32xf32>
    %465 = arith.addf %464, %463 : vector<8x32xf32>
    %466 = arith.divf %464, %465 : vector<8x32xf32>
    %467 = vector.extract_strided_slice %450 {offsets = [0, 64], sizes = [8, 32], strides = [1, 1]} : vector<8x96xf32> to vector<8x32xf32>
    %468 = vector.extract_strided_slice %448 {offsets = [0, 64], sizes = [8, 32], strides = [1, 1]} : vector<8x96xf32> to vector<8x32xf32>
    %469 = vector.broadcast %13 : vector<1x32xf32> to vector<8x32xf32>
    %470 = arith.addf %468, %469 : vector<8x32xf32>
    %471 = arith.mulf %458, %470 : vector<8x32xf32>
    %472 = arith.addf %467, %471 : vector<8x32xf32>
    %473 = math.tanh %472 : vector<8x32xf32>
    %cst_130 = arith.constant 1.000000e+00 : f32
    %474 = vector.broadcast %cst_130 : f32 to vector<8x32xf32>
    %475 = arith.subf %474, %466 : vector<8x32xf32>
    %476 = arith.mulf %475, %473 : vector<8x32xf32>
    %477 = arith.mulf %466, %442 : vector<8x32xf32>
    %478 = arith.addf %476, %477 : vector<8x32xf32>
    %479 = arith.truncf %478 : vector<8x32xf32> to vector<8x32xbf16>
    %c0_131 = arith.constant 0 : index
    %c12_132 = arith.constant 12 : index
    %c0_133 = arith.constant 0 : index
    %480 = vector.load %arg7[%c0_131, %c12_132, %c0_133] : memref<8x16x32xbf16, #tpu.memory_space<vmem>>, vector<8x1x32xbf16>
    %481 = vector.shape_cast %480 : vector<8x1x32xbf16> to vector<8x32xbf16>
    %482 = vector.shape_cast %479 : vector<8x32xbf16> to vector<8x1x32xbf16>
    tpu.vector_store %arg7[%c0_131, %c12_132, %c0_133], %482 {strides = array<i32>} : memref<8x16x32xbf16, #tpu.memory_space<vmem>>, vector<8x1x32xbf16>,
    %483 = arith.truncf %478 : vector<8x32xf32> to vector<8x32xbf16>
    %cst_134 = arith.constant dense<0.000000e+00> : vector<8x96xf32>
    %484 = tpu.matmul %483, %12, %cst_134 {dimension_numbers = #tpu.dot_dimension_numbers<[1], [0], [0], [1], [0, 0, 1, 1], [], []>} : vector<8x32xbf16>, vector<32x96xbf16>, vector<8x96xf32> -> vector<8x96xf32>
    %c0_135 = arith.constant 0 : index
    %c13 = arith.constant 13 : index
    %c0_136 = arith.constant 0 : index
    %485 = vector.load %arg8[%c0_135, %c13, %c0_136] : memref<8x16x96xf32, #tpu.memory_space<vmem>>, vector<8x1x96xf32>
    %486 = vector.shape_cast %485 : vector<8x1x96xf32> to vector<8x96xf32>
    %487 = vector.extract_strided_slice %486 {offsets = [0, 0], sizes = [8, 32], strides = [1, 1]} : vector<8x96xf32> to vector<8x32xf32>
    %488 = vector.extract_strided_slice %484 {offsets = [0, 0], sizes = [8, 32], strides = [1, 1]} : vector<8x96xf32> to vector<8x32xf32>
    %489 = arith.addf %487, %488 : vector<8x32xf32>
    %490 = arith.negf %489 : vector<8x32xf32>
    %491 = math.exp %490 : vector<8x32xf32>
    %cst_137 = arith.constant 1.000000e+00 : f32
    %492 = vector.broadcast %cst_137 : f32 to vector<8x32xf32>
    %493 = arith.addf %492, %491 : vector<8x32xf32>
    %494 = arith.divf %492, %493 : vector<8x32xf32>
    %495 = vector.extract_strided_slice %486 {offsets = [0, 32], sizes = [8, 32], strides = [1, 1]} : vector<8x96xf32> to vector<8x32xf32>
    %496 = vector.extract_strided_slice %484 {offsets = [0, 32], sizes = [8, 32], strides = [1, 1]} : vector<8x96xf32> to vector<8x32xf32>
    %497 = arith.addf %495, %496 : vector<8x32xf32>
    %498 = arith.negf %497 : vector<8x32xf32>
    %499 = math.exp %498 : vector<8x32xf32>
    %cst_138 = arith.constant 1.000000e+00 : f32
    %500 = vector.broadcast %cst_138 : f32 to vector<8x32xf32>
    %501 = arith.addf %500, %499 : vector<8x32xf32>
    %502 = arith.divf %500, %501 : vector<8x32xf32>
    %503 = vector.extract_strided_slice %486 {offsets = [0, 64], sizes = [8, 32], strides = [1, 1]} : vector<8x96xf32> to vector<8x32xf32>
    %504 = vector.extract_strided_slice %484 {offsets = [0, 64], sizes = [8, 32], strides = [1, 1]} : vector<8x96xf32> to vector<8x32xf32>
    %505 = vector.broadcast %13 : vector<1x32xf32> to vector<8x32xf32>
    %506 = arith.addf %504, %505 : vector<8x32xf32>
    %507 = arith.mulf %494, %506 : vector<8x32xf32>
    %508 = arith.addf %503, %507 : vector<8x32xf32>
    %509 = math.tanh %508 : vector<8x32xf32>
    %cst_139 = arith.constant 1.000000e+00 : f32
    %510 = vector.broadcast %cst_139 : f32 to vector<8x32xf32>
    %511 = arith.subf %510, %502 : vector<8x32xf32>
    %512 = arith.mulf %511, %509 : vector<8x32xf32>
    %513 = arith.mulf %502, %478 : vector<8x32xf32>
    %514 = arith.addf %512, %513 : vector<8x32xf32>
    %515 = arith.truncf %514 : vector<8x32xf32> to vector<8x32xbf16>
    %c0_140 = arith.constant 0 : index
    %c13_141 = arith.constant 13 : index
    %c0_142 = arith.constant 0 : index
    %516 = vector.load %arg7[%c0_140, %c13_141, %c0_142] : memref<8x16x32xbf16, #tpu.memory_space<vmem>>, vector<8x1x32xbf16>
    %517 = vector.shape_cast %516 : vector<8x1x32xbf16> to vector<8x32xbf16>
    %518 = vector.shape_cast %515 : vector<8x32xbf16> to vector<8x1x32xbf16>
    tpu.vector_store %arg7[%c0_140, %c13_141, %c0_142], %518 {strides = array<i32>} : memref<8x16x32xbf16, #tpu.memory_space<vmem>>, vector<8x1x32xbf16>,
    %519 = arith.truncf %514 : vector<8x32xf32> to vector<8x32xbf16>
    %cst_143 = arith.constant dense<0.000000e+00> : vector<8x96xf32>
    %520 = tpu.matmul %519, %12, %cst_143 {dimension_numbers = #tpu.dot_dimension_numbers<[1], [0], [0], [1], [0, 0, 1, 1], [], []>} : vector<8x32xbf16>, vector<32x96xbf16>, vector<8x96xf32> -> vector<8x96xf32>
    %c0_144 = arith.constant 0 : index
    %c14 = arith.constant 14 : index
    %c0_145 = arith.constant 0 : index
    %521 = vector.load %arg8[%c0_144, %c14, %c0_145] : memref<8x16x96xf32, #tpu.memory_space<vmem>>, vector<8x1x96xf32>
    %522 = vector.shape_cast %521 : vector<8x1x96xf32> to vector<8x96xf32>
    %523 = vector.extract_strided_slice %522 {offsets = [0, 0], sizes = [8, 32], strides = [1, 1]} : vector<8x96xf32> to vector<8x32xf32>
    %524 = vector.extract_strided_slice %520 {offsets = [0, 0], sizes = [8, 32], strides = [1, 1]} : vector<8x96xf32> to vector<8x32xf32>
    %525 = arith.addf %523, %524 : vector<8x32xf32>
    %526 = arith.negf %525 : vector<8x32xf32>
    %527 = math.exp %526 : vector<8x32xf32>
    %cst_146 = arith.constant 1.000000e+00 : f32
    %528 = vector.broadcast %cst_146 : f32 to vector<8x32xf32>
    %529 = arith.addf %528, %527 : vector<8x32xf32>
    %530 = arith.divf %528, %529 : vector<8x32xf32>
    %531 = vector.extract_strided_slice %522 {offsets = [0, 32], sizes = [8, 32], strides = [1, 1]} : vector<8x96xf32> to vector<8x32xf32>
    %532 = vector.extract_strided_slice %520 {offsets = [0, 32], sizes = [8, 32], strides = [1, 1]} : vector<8x96xf32> to vector<8x32xf32>
    %533 = arith.addf %531, %532 : vector<8x32xf32>
    %534 = arith.negf %533 : vector<8x32xf32>
    %535 = math.exp %534 : vector<8x32xf32>
    %cst_147 = arith.constant 1.000000e+00 : f32
    %536 = vector.broadcast %cst_147 : f32 to vector<8x32xf32>
    %537 = arith.addf %536, %535 : vector<8x32xf32>
    %538 = arith.divf %536, %537 : vector<8x32xf32>
    %539 = vector.extract_strided_slice %522 {offsets = [0, 64], sizes = [8, 32], strides = [1, 1]} : vector<8x96xf32> to vector<8x32xf32>
    %540 = vector.extract_strided_slice %520 {offsets = [0, 64], sizes = [8, 32], strides = [1, 1]} : vector<8x96xf32> to vector<8x32xf32>
    %541 = vector.broadcast %13 : vector<1x32xf32> to vector<8x32xf32>
    %542 = arith.addf %540, %541 : vector<8x32xf32>
    %543 = arith.mulf %530, %542 : vector<8x32xf32>
    %544 = arith.addf %539, %543 : vector<8x32xf32>
    %545 = math.tanh %544 : vector<8x32xf32>
    %cst_148 = arith.constant 1.000000e+00 : f32
    %546 = vector.broadcast %cst_148 : f32 to vector<8x32xf32>
    %547 = arith.subf %546, %538 : vector<8x32xf32>
    %548 = arith.mulf %547, %545 : vector<8x32xf32>
    %549 = arith.mulf %538, %514 : vector<8x32xf32>
    %550 = arith.addf %548, %549 : vector<8x32xf32>
    %551 = arith.truncf %550 : vector<8x32xf32> to vector<8x32xbf16>
    %c0_149 = arith.constant 0 : index
    %c14_150 = arith.constant 14 : index
    %c0_151 = arith.constant 0 : index
    %552 = vector.load %arg7[%c0_149, %c14_150, %c0_151] : memref<8x16x32xbf16, #tpu.memory_space<vmem>>, vector<8x1x32xbf16>
    %553 = vector.shape_cast %552 : vector<8x1x32xbf16> to vector<8x32xbf16>
    %554 = vector.shape_cast %551 : vector<8x32xbf16> to vector<8x1x32xbf16>
    tpu.vector_store %arg7[%c0_149, %c14_150, %c0_151], %554 {strides = array<i32>} : memref<8x16x32xbf16, #tpu.memory_space<vmem>>, vector<8x1x32xbf16>,
    %555 = arith.truncf %550 : vector<8x32xf32> to vector<8x32xbf16>
    %cst_152 = arith.constant dense<0.000000e+00> : vector<8x96xf32>
    %556 = tpu.matmul %555, %12, %cst_152 {dimension_numbers = #tpu.dot_dimension_numbers<[1], [0], [0], [1], [0, 0, 1, 1], [], []>} : vector<8x32xbf16>, vector<32x96xbf16>, vector<8x96xf32> -> vector<8x96xf32>
    %c0_153 = arith.constant 0 : index
    %c15 = arith.constant 15 : index
    %c0_154 = arith.constant 0 : index
    %557 = vector.load %arg8[%c0_153, %c15, %c0_154] : memref<8x16x96xf32, #tpu.memory_space<vmem>>, vector<8x1x96xf32>
    %558 = vector.shape_cast %557 : vector<8x1x96xf32> to vector<8x96xf32>
    %559 = vector.extract_strided_slice %558 {offsets = [0, 0], sizes = [8, 32], strides = [1, 1]} : vector<8x96xf32> to vector<8x32xf32>
    %560 = vector.extract_strided_slice %556 {offsets = [0, 0], sizes = [8, 32], strides = [1, 1]} : vector<8x96xf32> to vector<8x32xf32>
    %561 = arith.addf %559, %560 : vector<8x32xf32>
    %562 = arith.negf %561 : vector<8x32xf32>
    %563 = math.exp %562 : vector<8x32xf32>
    %cst_155 = arith.constant 1.000000e+00 : f32
    %564 = vector.broadcast %cst_155 : f32 to vector<8x32xf32>
    %565 = arith.addf %564, %563 : vector<8x32xf32>
    %566 = arith.divf %564, %565 : vector<8x32xf32>
    %567 = vector.extract_strided_slice %558 {offsets = [0, 32], sizes = [8, 32], strides = [1, 1]} : vector<8x96xf32> to vector<8x32xf32>
    %568 = vector.extract_strided_slice %556 {offsets = [0, 32], sizes = [8, 32], strides = [1, 1]} : vector<8x96xf32> to vector<8x32xf32>
    %569 = arith.addf %567, %568 : vector<8x32xf32>
    %570 = arith.negf %569 : vector<8x32xf32>
    %571 = math.exp %570 : vector<8x32xf32>
    %cst_156 = arith.constant 1.000000e+00 : f32
    %572 = vector.broadcast %cst_156 : f32 to vector<8x32xf32>
    %573 = arith.addf %572, %571 : vector<8x32xf32>
    %574 = arith.divf %572, %573 : vector<8x32xf32>
    %575 = vector.extract_strided_slice %558 {offsets = [0, 64], sizes = [8, 32], strides = [1, 1]} : vector<8x96xf32> to vector<8x32xf32>
    %576 = vector.extract_strided_slice %556 {offsets = [0, 64], sizes = [8, 32], strides = [1, 1]} : vector<8x96xf32> to vector<8x32xf32>
    %577 = vector.broadcast %13 : vector<1x32xf32> to vector<8x32xf32>
    %578 = arith.addf %576, %577 : vector<8x32xf32>
    %579 = arith.mulf %566, %578 : vector<8x32xf32>
    %580 = arith.addf %575, %579 : vector<8x32xf32>
    %581 = math.tanh %580 : vector<8x32xf32>
    %cst_157 = arith.constant 1.000000e+00 : f32
    %582 = vector.broadcast %cst_157 : f32 to vector<8x32xf32>
    %583 = arith.subf %582, %574 : vector<8x32xf32>
    %584 = arith.mulf %583, %581 : vector<8x32xf32>
    %585 = arith.mulf %574, %550 : vector<8x32xf32>
    %586 = arith.addf %584, %585 : vector<8x32xf32>
    %587 = arith.truncf %586 : vector<8x32xf32> to vector<8x32xbf16>
    %c0_158 = arith.constant 0 : index
    %c15_159 = arith.constant 15 : index
    %c0_160 = arith.constant 0 : index
    %588 = vector.load %arg7[%c0_158, %c15_159, %c0_160] : memref<8x16x32xbf16, #tpu.memory_space<vmem>>, vector<8x1x32xbf16>
    %589 = vector.shape_cast %588 : vector<8x1x32xbf16> to vector<8x32xbf16>
    %590 = vector.shape_cast %587 : vector<8x32xbf16> to vector<8x1x32xbf16>
    tpu.vector_store %arg7[%c0_158, %c15_159, %c0_160], %590 {strides = array<i32>} : memref<8x16x32xbf16, #tpu.memory_space<vmem>>, vector<8x1x32xbf16>,
    %c0_161 = arith.constant 0 : index
    %c0_162 = arith.constant 0 : index
    %591 = vector.load %arg9[%c0_161, %c0_162] : memref<8x32xf32, #tpu.memory_space<vmem>>, vector<8x32xf32>
    tpu.vector_store %arg9[%c0_161, %c0_162], %586 {strides = array<i32>} : memref<8x32xf32, #tpu.memory_space<vmem>>, vector<8x32xf32>,
    return
  }
  func.func @transform_0(%arg0: i32, %arg1: i32) -> (i32, i32, i32) {
    %c0_i32 = arith.constant 0 : i32
    %c0_i32_0 = arith.constant 0 : i32
    return %arg0, %arg1, %c0_i32 : i32, i32, i32
  }
  func.func @transform_1(%arg0: i32, %arg1: i32) -> (i32, i32) {
    %c0_i32 = arith.constant 0 : i32
    %c0_i32_0 = arith.constant 0 : i32
    %c0_i32_1 = arith.constant 0 : i32
    return %c0_i32, %c0_i32_0 : i32, i32
  }
  func.func @transform_2(%arg0: i32, %arg1: i32) -> (i32, i32) {
    %c0_i32 = arith.constant 0 : i32
    %c0_i32_0 = arith.constant 0 : i32
    %c0_i32_1 = arith.constant 0 : i32
    return %c0_i32, %c0_i32_0 : i32, i32
  }
  func.func @transform_3(%arg0: i32, %arg1: i32) -> (i32, i32) {
    %c0_i32 = arith.constant 0 : i32
    %c0_i32_0 = arith.constant 0 : i32
    %c0_i32_1 = arith.constant 0 : i32
    return %c0_i32, %c0_i32_0 : i32, i32
  }
  func.func @transform_4(%arg0: i32, %arg1: i32) -> (i32, i32) {
    %c0_i32 = arith.constant 0 : i32
    %c0_i32_0 = arith.constant 0 : i32
    %c0_i32_1 = arith.constant 0 : i32
    return %c0_i32, %c0_i32_0 : i32, i32
  }
  func.func @transform_5(%arg0: i32, %arg1: i32) -> (i32, i32, i32) {
    %c0_i32 = arith.constant 0 : i32
    %c0_i32_0 = arith.constant 0 : i32
    return %arg0, %arg1, %c0_i32 : i32, i32, i32
  }
}

</mosaic_0001>

<bundles_post_ra>
// kernel: tpu_custom_call.1
= control target key start
LH: loop header
LB: loop body
LE: loop exit
PB: predicated region body
PF: predicated region fallthrough
CT: control target
= control target key end

     0   :  { %10 = vsyncpa [#allocation5], 0  ;;  %s11792_s0 = inlined_call_operand.hbm [shape: bf16[8,16,16], index: 0, kind: input, shape index: {}]   ;;  %s11793_s1 = inlined_call_operand.hbm [shape: bf16[16,96], index: 1, kind: input, shape index: {}]   ;;  %s11794_s2 = inlined_call_operand.vmem [shape: f32[1,96], index: 2, kind: input, shape index: {}]   ;;  %s11795_s3 = inlined_call_operand.hbm [shape: bf16[32,96], index: 3, kind: input, shape index: {}]   ;;  %s11796_s4 = inlined_call_operand.vmem [shape: f32[1,32], index: 4, kind: input, shape index: {}]   ;;  %s11797_s5 = inlined_call_operand.hbm [shape: bf16[8,16,32], index: 5, kind: output, shape index: {}]  }
   0x1   :  { %11 = vsyncpa [#allocation8], 0 }
   0x2   :  { %12 = vsyncpa [#allocation6], 0  ;;  %s8324_s18 = smov [#allocation7]   ;;  %s8325_s20 = smov [#allocation4]  }
   0x3   :  { %s30_s19 = sshll.u32 %s8324_s18, 4  ;;  %s18_s21 = sshll.u32 %s8325_s20, 4  ;;  %s31_s19 = int_to_ptr.vmem [resolvable:$true] %s30_s19  ;;  %s8364_s21 = int_to_ptr.vmem [resolvable:$true] %s18_s21 }
   0x4   :  { %s8230_s24 = scalar_lea.hbm %s11793_s1, 128 }
   0x5   :  { %p8231_p0 = scmp.ne.s32.totalorder %s11793_s1, %s8230_s24  ;;  %p8234_p1 = scmp.lt.u32.totalorder %s8230_s24, %s11793_s1 }
   0x7   :  { %p8236_p2 = pnand %p8234_p1, %p8231_p0 }
   0x9   :  { %8239 = shalt.err (!%p8236_p2)
}
   0xa   :  { %s8240_s29 = scalar_lea.vmem %s31_s19, 128  ;;  %p8245_p4 = scmp.lt.s32.totalorder %s31_s19, %s31_s19 }
   0xb   :  { %p8241_p3 = scmp.ne.s32.totalorder %s31_s19, %s8240_s29  ;;  %p8246_p5 = scmp.lt.s32.totalorder %s8240_s29, %s8240_s29 }
   0xd   :  { %p8247_p6 = por %p8246_p5, %p8245_p4 }
   0xf   :  { %p8248_p7 = pnand %p8247_p6, %p8241_p3 }
  0x11   :  { %8251 = shalt.err (!%p8248_p7)
}
  0x12   :  { %s8326_s30 = smov 64   ;;  %s8327_s6 = smov 4  }
  0x13   :  { %36 = dma.hbm_to_vmem [thread:$0]  %s11793_s1, 128, %s31_s19, [#allocation8], %s8326_s30, %s8326_s30, %s8327_s6  }
  0x14   :  { %s8252_s11 = scalar_lea.hbm %s11792_s0, 1024 }
  0x15   :  { %p8253_p8 = scmp.ne.s32.totalorder %s11792_s0, %s8252_s11  ;;  %p8256_p9 = scmp.lt.u32.totalorder %s8252_s11, %s11792_s0 }
  0x17   :  { %p8258_p10 = pnand %p8256_p9, %p8253_p8 }
  0x19   :  { %8261 = shalt.err (!%p8258_p10)
}
  0x1a   :  { %s8262_s16 = scalar_lea.vmem %s8364_s21, 1024  ;;  %p8267_p12 = scmp.lt.s32.totalorder %s8364_s21, %s8364_s21 }
  0x1b   :  { %p8263_p11 = scmp.ne.s32.totalorder %s8364_s21, %s8262_s16  ;;  %p8268_p13 = scmp.lt.s32.totalorder %s8262_s16, %s8262_s16 }
  0x1d   :  { %p8269_p0 = por %p8268_p13, %p8267_p12 }
  0x1f   :  { %p8270_p1 = pnand %p8269_p0, %p8263_p11 }
  0x21   :  { %8273 = shalt.err (!%p8270_p1)
}
  0x22   :  { %24 = dma.hbm_to_vmem [thread:$0]  %s11792_s0, 1024, %s8364_s21, [#allocation5], %s8326_s30, %s8326_s30, %s8327_s6  }
  0x23   :  { %s8328_s18 = smov [#allocation9]   ;;  %s8274_s23 = scalar_lea.hbm %s11795_s3, 256 }
  0x24   :  { %s44_s19 = sshll.u32 %s8328_s18, 4  ;;  %p8275_p2 = scmp.ne.s32.totalorder %s11795_s3, %s8274_s23  ;;  %s45_s19 = int_to_ptr.vmem [resolvable:$true] %s44_s19 }
  0x25   :  { %p8278_p3 = scmp.lt.u32.totalorder %s8274_s23, %s11795_s3 }
  0x27   :  { %p8280_p4 = pnand %p8278_p3, %p8275_p2 }
  0x29   :  { %8283 = shalt.err (!%p8280_p4)
}
  0x2a   :  { %s8284_s28 = scalar_lea.vmem %s45_s19, 256  ;;  %p8289_p6 = scmp.lt.s32.totalorder %s45_s19, %s45_s19 }
  0x2b   :  { %p8285_p5 = scmp.ne.s32.totalorder %s45_s19, %s8284_s28  ;;  %p8290_p7 = scmp.lt.s32.totalorder %s8284_s28, %s8284_s28 }
  0x2d   :  { %p8291_p8 = por %p8290_p7, %p8289_p6 }
  0x2f   :  { %p8292_p9 = pnand %p8291_p8, %p8285_p5 }
  0x31   :  { %8295 = shalt.err (!%p8292_p9)
}
  0x32   :  { %50 = dma.hbm_to_vmem [thread:$0]  %s11795_s3, 256, %s45_s19, [#allocation8], %s8326_s30, %s8326_s30, %s8327_s6  }
  0x33   :  { %8318 = dma.done.wait [#allocation5], 1024  }
  0x34   :  { %8319 = vsyncadd [#allocation5], 4294966272 }
  0x35   :  { %8320 = dma.done.wait [#allocation8], 384  }
  0x36   :  { %8321 = vsyncadd [#allocation8], 4294966912  ;;  %vm11872_vm0 = vcmask 261120   ;;  %v11798_v0 = vmov 0.0   ;;  %vm8330_vm1 = vmmov 0   ;;  %v7443_v1 = vld [vmem:[#allocation7] sm:$0xff]  }
  0x37   :  { %7145 = vmatprep.subr.bf16.mxu1 %v11798_v0  ;;  %7149 = vmatprep.mubr.msk.bf16.mxu1 %vm8330_vm1, %v11798_v0  ;;  %68 = vst.msk [vmem:[#allocation3] sm:$0xff] %vm11872_vm0, %v11798_v0  ;;  %v8421_v2 = vld [vmem:[#allocation9] sm:$0xff]   ;;  %vm140_vm2 = vcmask 130048   ;;  %v7445_v3 = vld [vmem:[#allocation4] sm:$0xff]   ;;  %v8426_v5 = vld [vmem:[#allocation9 + $0x8] sm:$0xff]   ;;  %vm262_vm3 = vcmask 785408  }
  0x38   :  { %7127 = vmatprep.subr.bf16.mxu0 %v7443_v1  ;;  %7146 = vmatpush3.bf16.msra.mxu1 %v8421_v2  ;;  %v7446_v4 = vld [vmem:[#allocation4 + $0x8] sm:$0xff]   ;;  %v7448_v8 = vld [vmem:[#allocation4 + $0x10] sm:$0xff]   ;;  %v7449_v9 = vld [vmem:[#allocation4 + $0x18] sm:$0xff]   ;;  %s8332_s8 = smov 96   ;;  %vm699_vm4 = vcmask 1041409   ;;  %vm702_vm5 = vcmask 1042434  }
  0x39   :  { %7128 = vmatpush3.bf16.msra.mxu0 %v7443_v1  ;;  %7129 = vmatprep.mubr.msk.bf16.mxu0 %vm140_vm2, %v7445_v3  ;;  %v7450_v10 = vld [vmem:[#allocation4 + $0x20] sm:$0xff]   ;;  %v6678_v11 = vld [vmem:[%s11796_s4] ss:$0 sm:$0xff]  ;;  %v7451_v12 = vld [vmem:[#allocation4 + $0x28] sm:$0xff]   ;;  %vm705_vm6 = vcmask 1043459   ;;  %vm708_vm7 = vcmask 1044484  }
  0x3a   :  { %7147 = vmatprep.subr.bf16.mxu1 %v11798_v0  ;;  %7177 = vmatprep.subr.bf16.mxu0 %v11798_v0  ;;  %v7452_v13 = vld [vmem:[#allocation4 + $0x30] sm:$0xff]   ;;  %v7453_v14 = vld [vmem:[#allocation4 + $0x38] sm:$0xff]   ;;  %vm711_vm8 = vcmask 1045509   ;;  %vm714_vm9 = vcmask 1046534   ;;  %vm11873_vm10 = vcmask 1047559   ;;  %vm671_vm11 = vcmask 253952  }
  0x3b   :  { %427 = vrot.lane.b32.xlu0 %v6678_v11, %s8326_s30  ;;  %v8462_v15 = vld [vmem:[%s11794_s2] ss:$0 sm:$0xff]  ;;  %s8331_s2 = smov 32   ;;  %vm672_vm12 = vsmask.f32 256  ;;  %s8333_s9 = smov [#allocation10]  }
  0x3c   :  { %7130 = vmatmul.mubr.msk.bf16.vlgmr.msra.gmra.mrb[0].mxu0 %vm140_vm2, %v7446_v4  ;;  %7148 = vmatpush3.bf16.msra.mxu1 %v8426_v5  ;;  %vm11129_vm13 = vmand %vm671_vm11, %vm672_vm12  ;;  %vm1078_vm14 = vsmask.f32 7938  ;;  %s6636_s10 = sshll.u32 %s8333_s9, 4  ;;  %s6637_s10 = int_to_ptr.vmem [resolvable:$true] %s6636_s10 }
  0x3d   :  { %7178 = vmatpush3.bf16.msra.mxu0 %v8421_v2  ;;  %7133 = vmatprep.mubr.msk.bf16.mxu0 %vm140_vm2, %v7448_v8  ;;  %vm11163_vm15 = vmand %vm671_vm11, %vm1078_vm14  ;;  %vm1869_vm11 = vsmask.f32 7942  ;;  %vm2252_vm14 = vcmask 256002   ;;  %s8296_s11 = scalar_lea.vmem %s6637_s10, 1024  ;;  %p8301_p11 = scmp.lt.s32.totalorder %s6637_s10, %s6637_s10 }
  0x3e   :  { %v8428_v6 = vld [vmem:[#allocation3] sm:$0xff]  ;;  %7153 = vmatprep.subr.bf16.mxu1 %v11798_v0  ;;  %7179 = vmatprep.subr.bf16.mxu0 %v11798_v0  ;;  %p8297_p10 = scmp.ne.s32.totalorder %s6637_s10, %s8296_s11  ;;  %p8302_p12 = scmp.lt.s32.totalorder %s8296_s11, %s8296_s11 }
  0x3f   :  { %v285_v7 = vpack.c.bf16 %v8428_v6, %v8428_v6 }
  0x40   :  { %p8303_p13 = por %p8302_p12, %p8301_p11 }
  0x41   :  { %7150 = vmatmul.mubr.msk.bf16.vlgmr.msra.gmra.mrb[0].mxu1 %vm11872_vm0, %v285_v7  ;;  %7180 = vmatpush3.bf16.msra.mxu0 %v8426_v5 }
  0x42   :  { %7154 = vmatpush3.bf16.msra.mxu1 %v8421_v2  ;;  %7157 = vmatprep.mubr.msk.bf16.mxu1 %vm8330_vm1, %v11798_v0  ;;  %p8304_p0 = pnand %p8303_p13, %p8297_p10 }
  0x43   :  { %7155 = vmatprep.subr.bf16.mxu1 %v11798_v0  ;;  %7193 = vmatprep.subr.bf16.mxu0 %v11798_v0 }
  0x44   :  { %7134 = vmatmul.mubr.msk.bf16.gmra.mrb[4].mxu0 %vm140_vm2, %v7449_v9 }
  0x45   :  { %7137 = vmatprep.mubr.msk.bf16.mxu0 %vm140_vm2, %v7450_v10 }
  0x46   :  { %7156 = vmatpush3.bf16.msra.mxu1 %v8426_v5 }
  0x47   :  { %7161 = vmatprep.subr.bf16.mxu1 %v11798_v0 }
  0x4c   :  { %7138 = vmatmul.mubr.msk.bf16.gmra.mrb[8].mxu0 %vm140_vm2, %v7451_v12 }
  0x4d   :  { %7141 = vmatprep.mubr.msk.bf16.mxu0 %vm140_vm2, %v7452_v13 }
  0x54   :  { %7142 = vmatmul.mubr.msk.bf16.gmra.mrb[12].mxu0 %vm140_vm2, %v7453_v14  ;;  %vm1462_vm2 = vsmask.f32 1280 }
  0x55   :  { %7181 = vmatprep.mubr.msk.bf16.mxu0 %vm8330_vm1, %v11798_v0 }
  0xad   :  { %v8467_v21 = vpop.permute.xlu0 %427 }
 0x10f   :  { %v7131_v16 = vpop.f32.mrb[0].mxu0 }
 0x110   :  { %v208_v17 = vadd.f32 %v7131_v16, %v8462_v15  ;;  %v199_v18 = vpop.f32.mrb[1].mxu0 }
 0x111   :  { %v200_v19 = vadd.f32 %v8462_v15, %v199_v18  ;;  %v7132_v20 = vpop.f32.mrb[2].mxu0 }
 0x112   :  { %265 = vst.msk [vmem:[#allocation2 + $0x10] sm:$0xff] %vm262_vm3, %v208_v17  ;;  %v211_v22 = vadd.f32 %v7132_v20, %v8462_v15  ;;  %v202_v23 = vpop.f32.mrb[3].mxu0 }
 0x113   :  { %263 = vst.msk [vmem:[#allocation2] sm:$0xff] %vm262_vm3, %v200_v19  ;;  %v203_v25 = vadd.f32 %v8462_v15, %v202_v23 }
 0x114   :  { %v8471_v24 = vpop.f32.mrb[0].mxu1  ;;  %266 = vst.msk [vmem:[#allocation2 + $0x18] sm:$0xff] %vm262_vm3, %v211_v22 }
 0x115   :  { %v7151_v26 = vpop.f32.mrb[1].mxu1  ;;  %v430_v27 = vadd.f32 %v8467_v21, %v8471_v24  ;;  %264 = vst.msk [vmem:[#allocation2 + $0x8] sm:$0xff] %vm262_vm3, %v203_v25  ;;  %v351_v1 = vrot.slane %v8471_v24, 1  ;;  %v352_v4 = vrot.slane %v8471_v24, 2  ;;  %v353_v11 = vrot.slane %v8471_v24, 3 }
 0x116   :  { %v339_v28 = vpop.f32.mrb[2].mxu1  ;;  %v354_v13 = vrot.slane %v8471_v24, 4  ;;  %v355_v19 = vrot.slane %v8471_v24, 5  ;;  %v356_v22 = vrot.slane %v8471_v24, 6 }
 0x117   :  { %v7152_v29 = vpop.f32.mrb[3].mxu1  ;;  %439 = vrot.lane.b32.xlu1 %v430_v27, %s8326_s30  ;;  %v7135_v30 = vpop.f32.mrb[4].mxu0  ;;  %v432_v31 = vrot.slane %v430_v27, 1  ;;  %v433_v35 = vrot.slane %v430_v27, 2  ;;  %v434_v39 = vrot.slane %v430_v27, 3  ;;  %v435_v41 = vrot.slane %v430_v27, 4 }
 0x118   :  { %v224_v32 = vadd.f32 %v7135_v30, %v8462_v15  ;;  %v215_v33 = vpop.f32.mrb[5].mxu0  ;;  %v436_v43 = vrot.slane %v430_v27, 5  ;;  %v437_v47 = vrot.slane %v430_v27, 6  ;;  %v438_v51 = vrot.slane %v430_v27, 7 }
 0x119   :  { %441 = vrot.lane.b32.xlu0 %v432_v31, %s8326_s30  ;;  %v216_v34 = vadd.f32 %v8462_v15, %v215_v33  ;;  %v7136_v36 = vpop.f32.mrb[6].mxu0  ;;  %v8512_v62 = vld [vmem:[#allocation2 + $0x10] sm:$0x1]  ;;  %v357_v29 = vrot.slane %v8471_v24, 7 }
 0x11a   :  { %269 = vst.msk [vmem:[#allocation2 + $0x30] sm:$0xff] %vm262_vm3, %v224_v32  ;;  %v227_v37 = vadd.f32 %v7136_v36, %v8462_v15  ;;  %v218_v38 = vpop.f32.mrb[7].mxu0  ;;  %v8510_v61 = vld [vmem:[#allocation2] sm:$0x1]  ;;  %v367_v7 = vadd.f32 %v351_v1, %v8512_v62 }
 0x11b   :  { %267 = vst.msk [vmem:[#allocation2 + $0x20] sm:$0xff] %vm262_vm3, %v216_v34  ;;  %443 = vrot.lane.b32.xlu1 %v433_v35, %s8326_s30  ;;  %v219_v40 = vadd.f32 %v8462_v15, %v218_v38  ;;  %v366_v63 = vadd.f32 %v8510_v61, %v8471_v24 }
 0x11c   :  { %270 = vst.msk [vmem:[#allocation2 + $0x38] sm:$0xff] %vm262_vm3, %v227_v37  ;;  %v6671_v14 = vmul.f32 -1.442695, %v367_v7 }
 0x11d   :  { %445 = vrot.lane.b32.xlu0 %v434_v39, %s8326_s30  ;;  %268 = vst.msk [vmem:[#allocation2 + $0x28] sm:$0xff] %vm262_vm3, %v219_v40  ;;  %v6670_v8 = vmul.f32 -1.442695, %v366_v63 }
 0x11f   :  { %447 = vrot.lane.b32.xlu1 %v435_v41, %s8326_s30  ;;  %v7139_v42 = vpop.f32.mrb[8].mxu0  ;;  %7454 = vpow2.f32 %v6670_v8 }
 0x120   :  { %v240_v44 = vadd.f32 %v7139_v42, %v8462_v15  ;;  %v231_v45 = vpop.f32.mrb[9].mxu0  ;;  %7456 = vpow2.f32 %v6671_v14 }
 0x121   :  { %449 = vrot.lane.b32.xlu0 %v436_v43, %s8326_s30  ;;  %v232_v46 = vadd.f32 %v8462_v15, %v231_v45  ;;  %v7140_v48 = vpop.f32.mrb[10].mxu0  ;;  %v8522_v10 = vld [vmem:[#allocation2 + $0x30] sm:$0x1] }
 0x122   :  { %273 = vst.msk [vmem:[#allocation2 + $0x50] sm:$0xff] %vm262_vm3, %v240_v44  ;;  %v243_v49 = vadd.f32 %v7140_v48, %v8462_v15  ;;  %v234_v50 = vpop.f32.mrb[11].mxu0  ;;  %v8517_v3 = vld [vmem:[#allocation2 + $0x20] sm:$0x1] }
 0x123   :  { %271 = vst.msk [vmem:[#allocation2 + $0x40] sm:$0xff] %vm262_vm3, %v232_v46  ;;  %451 = vrot.lane.b32.xlu1 %v437_v47, %s8326_s30  ;;  %v235_v52 = vadd.f32 %v8462_v15, %v234_v50  ;;  %v368_v9 = vadd.f32 %v352_v4, %v8517_v3 }
 0x124   :  { %274 = vst.msk [vmem:[#allocation2 + $0x58] sm:$0xff] %vm262_vm3, %v243_v49 }
 0x125   :  { %453 = vrot.lane.b32.xlu0 %v438_v51, %s8326_s30  ;;  %272 = vst.msk [vmem:[#allocation2 + $0x48] sm:$0xff] %vm262_vm3, %v235_v52  ;;  %v6672_v16 = vmul.f32 -1.442695, %v368_v9 }
 0x127   :  { %v7143_v53 = vpop.f32.mrb[12].mxu0  ;;  %7458 = vpow2.f32 %v6672_v16 }
 0x128   :  { %v256_v54 = vadd.f32 %v7143_v53, %v8462_v15  ;;  %v247_v55 = vpop.f32.mrb[13].mxu0 }
 0x129   :  { %v248_v56 = vadd.f32 %v8462_v15, %v247_v55  ;;  %v7144_v57 = vpop.f32.mrb[14].mxu0  ;;  %v8530_v18 = vld [vmem:[#allocation2 + $0x50] sm:$0x1]  ;;  %v7455_v33 = vpop.eup %7454 }
 0x12a   :  { %277 = vst.msk [vmem:[#allocation2 + $0x70] sm:$0xff] %vm262_vm3, %v256_v54  ;;  %v259_v58 = vadd.f32 %v7144_v57, %v8462_v15  ;;  %v250_v59 = vpop.f32.mrb[15].mxu0  ;;  %v8525_v12 = vld [vmem:[#allocation2 + $0x40] sm:$0x1]  ;;  %v371_v25 = vadd.f32 %v355_v19, %v8530_v18  ;;  %v7457_v35 = vpop.eup %7456  ;;  %v398_v36 = vadd.f32 1.0, %v7455_v33  ;;  %v568_v19 = vrot.slane %v8428_v6, 1 }
 0x12b   :  { %275 = vst.msk [vmem:[#allocation2 + $0x60] sm:$0xff] %vm262_vm3, %v248_v56  ;;  %v251_v60 = vadd.f32 %v8462_v15, %v250_v59  ;;  %v369_v15 = vadd.f32 %v353_v11, %v8522_v10  ;;  %v370_v17 = vadd.f32 %v354_v13, %v8525_v12  ;;  %v399_v38 = vadd.f32 1.0, %v7457_v35 }
 0x12c   :  { %278 = vst.msk [vmem:[#allocation2 + $0x78] sm:$0xff] %vm262_vm3, %v259_v58  ;;  %v6675_v30 = vmul.f32 -1.442695, %v371_v25  ;;  %v571_v25 = vrot.slane %v8428_v6, 4 }
 0x12d   :  { %276 = vst.msk [vmem:[#allocation2 + $0x68] sm:$0xff] %vm262_vm3, %v251_v60  ;;  %v6673_v23 = vmul.f32 -1.442695, %v369_v15  ;;  %v6674_v26 = vmul.f32 -1.442695, %v370_v17 }
 0x12f   :  { %7460 = vpow2.f32 %v6673_v23  ;;  %v570_v23 = vrot.slane %v8428_v6, 3 }
 0x130   :  { %7462 = vpow2.f32 %v6674_v26  ;;  %v572_v26 = vrot.slane %v8428_v6, 5 }
 0x131   :  { %v8538_v28 = vld [vmem:[#allocation2 + $0x70] sm:$0x1]  ;;  %7464 = vpow2.f32 %v6675_v30  ;;  %v7459_v37 = vpop.eup %7458 }
 0x132   :  { %v8533_v20 = vld [vmem:[#allocation2 + $0x60] sm:$0x1]  ;;  %v373_v32 = vadd.f32 %v357_v29, %v8538_v28  ;;  %v400_v40 = vadd.f32 1.0, %v7459_v37 }
 0x133   :  { %v372_v27 = vadd.f32 %v356_v22, %v8533_v20  ;;  %v569_v22 = vrot.slane %v8428_v6, 2 }
 0x134   :  { %v6677_v34 = vmul.f32 -1.442695, %v373_v32 }
 0x135   :  { %v6676_v31 = vmul.f32 -1.442695, %v372_v27  ;;  %v573_v27 = vrot.slane %v8428_v6, 6 }
 0x137   :  { %7466 = vpow2.f32 %v6676_v31 }
 0x138   :  { %7468 = vpow2.f32 %v6677_v34 }
 0x139   :  { %v7461_v39 = vpop.eup %7460  ;;  %7470 = vrcp.f32 %v398_v36 }
 0x13a   :  { %v7463_v41 = vpop.eup %7462  ;;  %7472 = vrcp.f32 %v399_v38  ;;  %v401_v24 = vadd.f32 1.0, %v7461_v39 }
 0x13b   :  { %v7465_v42 = vpop.eup %7464  ;;  %7474 = vrcp.f32 %v400_v40  ;;  %v402_v43 = vadd.f32 1.0, %v7463_v41 }
 0x13c   :  { %7476 = vrcp.f32 %v401_v24  ;;  %v403_v45 = vadd.f32 1.0, %v7465_v42 }
 0x13d   :  { %7478 = vrcp.f32 %v402_v43 }
 0x13e   :  { %7480 = vrcp.f32 %v403_v45 }
 0x141   :  { %v7467_v44 = vpop.eup %7466 }
 0x142   :  { %v404_v46 = vadd.f32 1.0, %v7467_v44  ;;  %v7469_v47 = vpop.eup %7468 }
 0x143   :  { %v8542_v48 = vpop.eup %7470  ;;  %v405_v52 = vadd.f32 1.0, %v7469_v47 }
 0x144   :  { %7482 = vrcp.f32 %v404_v46  ;;  %v8545_v53 = vpop.eup %7472 }
 0x145   :  { %v8548_v54 = vpop.eup %7474  ;;  %7484 = vrcp.f32 %v405_v52 }
 0x146   :  { %v8552_v59 = vpop.eup %7476 }
 0x147   :  { %v8556_v60 = vpop.eup %7478 }
 0x148   :  { %v8560_v8 = vpop.eup %7480 }
 0x14e   :  { %v8564_v9 = vpop.eup %7482 }
 0x14f   :  { %v8570_v16 = vpop.eup %7484 }
 0x189   :  { %v440_v49 = vpop.permute.xlu1 %439 }
 0x18a   :  { %v463_v50 = vmul.f32 %v8542_v48, %v440_v49 }
 0x18b   :  { %v442_v51 = vpop.permute.xlu0 %441 }
 0x18c   :  { %479 = vrot.lane.b32.xlu1 %v463_v50, %s8326_s30  ;;  %v464_v57 = vmul.f32 %v8545_v53, %v442_v51 }
 0x18d   :  { %v444_v55 = vpop.permute.xlu1 %443 }
 0x18e   :  { %v465_v56 = vmul.f32 %v8548_v54, %v444_v55 }
 0x18f   :  { %v446_v58 = vpop.permute.xlu0 %445 }
 0x190   :  { %483 = vrot.lane.b32.xlu0 %v465_v56, %s8326_s30  ;;  %481 = vrot.lane.b32.xlu1 %v464_v57, %s8326_s30  ;;  %v466_v1 = vmul.f32 %v8552_v59, %v446_v58  ;;  %v520_v56 = vsub.f32 1.0, %v8545_v53  ;;  %v521_v58 = vsub.f32 1.0, %v8548_v54 }
 0x191   :  { %v448_v63 = vpop.permute.xlu1 %447 }
 0x192   :  { %v467_v4 = vmul.f32 %v8556_v60, %v448_v63 }
 0x193   :  { %v450_v7 = vpop.permute.xlu0 %449 }
 0x194   :  { %485 = vrot.lane.b32.xlu0 %v466_v1, %s8326_s30  ;;  %487 = vrot.lane.b32.xlu1 %v467_v4, %s8326_s30  ;;  %v468_v13 = vmul.f32 %v8560_v8, %v450_v7  ;;  %v522_v7 = vsub.f32 1.0, %v8552_v59 }
 0x195   :  { %v452_v11 = vpop.permute.xlu1 %451 }
 0x196   :  { %v469_v14 = vmul.f32 %v8564_v9, %v452_v11 }
 0x197   :  { %v454_v15 = vpop.permute.xlu0 %453 }
 0x198   :  { %489 = vrot.lane.b32.xlu0 %v468_v13, %s8326_s30  ;;  %491 = vrot.lane.b32.xlu1 %v469_v14, %s8326_s30  ;;  %v470_v17 = vmul.f32 %v8570_v16, %v454_v15  ;;  %v519_v14 = vsub.f32 1.0, %v8542_v48 }
 0x19c   :  { %493 = vrot.lane.b32.xlu0 %v470_v17, %s8326_s30  ;;  %575 = vrot.lane.b32.xlu1 %v8428_v6, %s8331_s2 }
 0x1a0   :  { %577 = vrot.lane.b32.xlu0 %v568_v19, %s8331_s2  ;;  %v523_v19 = vsub.f32 1.0, %v8556_v60 }
 0x1a4   :  { %579 = vrot.lane.b32.xlu0 %v569_v22, %s8331_s2 }
 0x1a8   :  { %581 = vrot.lane.b32.xlu0 %v570_v23, %s8331_s2 }
 0x1ac   :  { %583 = vrot.lane.b32.xlu0 %v571_v25, %s8331_s2 }
 0x1b0   :  { %585 = vrot.lane.b32.xlu0 %v572_v26, %s8331_s2 }
 0x1b4   :  { %587 = vrot.lane.b32.xlu0 %v573_v27, %s8331_s2 }
 0x1fe   :  { %v480_v29 = vpop.permute.xlu1 %479 }
 0x1ff   :  { %v503_v30 = vadd.f32 %v480_v29, %v8510_v61 }
 0x201   :  { %7486 = vtanh.f32 %v503_v30 }
 0x202   :  { %v484_v31 = vpop.permute.xlu0 %483  ;;  %v482_v32 = vpop.permute.xlu1 %481 }
 0x203   :  { %v504_v33 = vadd.f32 %v482_v32, %v8512_v62  ;;  %v505_v34 = vadd.f32 %v484_v31, %v8517_v3  ;;  %v524_v31 = vsub.f32 1.0, %v8560_v8 }
 0x205   :  { %7488 = vtanh.f32 %v504_v33 }
 0x206   :  { %v486_v35 = vpop.permute.xlu0 %485  ;;  %v488_v37 = vpop.permute.xlu1 %487 }
 0x207   :  { %v506_v36 = vadd.f32 %v486_v35, %v8522_v10  ;;  %v507_v38 = vadd.f32 %v488_v37, %v8525_v12  ;;  %v574_v12 = vrot.slane %v8428_v6, 7 }
 0x209   :  { %7490 = vtanh.f32 %v506_v36 }
 0x20a   :  { %7492 = vtanh.f32 %v505_v34  ;;  %v490_v40 = vpop.permute.xlu0 %489  ;;  %v492_v62 = vpop.permute.xlu1 %491 }
 0x20b   :  { %v7487_v39 = vpop.eup %7486  ;;  %7494 = vtanh.f32 %v507_v38  ;;  %v508_v61 = vadd.f32 %v490_v40, %v8530_v18  ;;  %v509_v3 = vadd.f32 %v492_v62, %v8533_v20  ;;  %v525_v38 = vsub.f32 1.0, %v8564_v9 }
 0x20c   :  { %535 = vrot.lane.b32.xlu1 %v7487_v39, %s8332_s8 }
 0x20d   :  { %7496 = vtanh.f32 %v508_v61 }
 0x20e   :  { %v494_v24 = vpop.permute.xlu0 %493  ;;  %7498 = vtanh.f32 %v509_v3 }
 0x20f   :  { %v7489_v41 = vpop.eup %7488  ;;  %v510_v43 = vadd.f32 %v494_v24, %v8538_v28  ;;  %v576_v28 = vpop.permute.xlu1 %575  ;;  %v526_v24 = vsub.f32 1.0, %v8570_v16 }
 0x210   :  { %537 = vrot.lane.b32.xlu1 %v7489_v41, %s8332_s8 }
 0x211   :  { %7500 = vtanh.f32 %v510_v43 }
 0x212   :  { %v578_v6 = vpop.permute.xlu0 %577 }
 0x213   :  { %v7491_v10 = vpop.eup %7490  ;;  %v600_v4 = vmul.f32 %v8545_v53, %v578_v6  ;;  %v599_v53 = vmul.f32 %v8542_v48, %v576_v28 }
 0x214   :  { %v7493_v42 = vpop.eup %7492  ;;  %541 = vrot.lane.b32.xlu0 %v7491_v10, %s8332_s8 }
 0x215   :  { %539 = vrot.lane.b32.xlu1 %v7493_v42, %s8332_s8  ;;  %v7495_v18 = vpop.eup %7494 }
 0x216   :  { %v580_v46 = vpop.permute.xlu0 %579 }
 0x217   :  { %v7497_v44 = vpop.eup %7496  ;;  %v601_v13 = vmul.f32 %v8548_v54, %v580_v46 }
 0x218   :  { %589 = vrot.lane.b32.xlu0 %v574_v12, %s8331_s2  ;;  %v7499_v20 = vpop.eup %7498 }
 0x219   :  { %543 = vrot.lane.b32.xlu1 %v7495_v18, %s8332_s8 }
 0x21a   :  { %v582_v47 = vpop.permute.xlu0 %581 }
 0x21b   :  { %v7501_v45 = vpop.eup %7500  ;;  %v602_v26 = vmul.f32 %v8552_v59, %v582_v47 }
 0x21d   :  { %545 = vrot.lane.b32.xlu1 %v7497_v44, %s8332_s8 }
 0x21e   :  { %v584_v49 = vpop.permute.xlu0 %583 }
 0x21f   :  { %v603_v29 = vmul.f32 %v8556_v60, %v584_v49 }
 0x221   :  { %547 = vrot.lane.b32.xlu1 %v7499_v20, %s8332_s8 }
 0x222   :  { %v586_v50 = vpop.permute.xlu0 %585 }
 0x223   :  { %v604_v48 = vmul.f32 %v8560_v8, %v586_v50 }
 0x225   :  { %549 = vrot.lane.b32.xlu1 %v7501_v45, %s8332_s8 }
 0x226   :  { %v588_v52 = vpop.permute.xlu0 %587 }
 0x227   :  { %v605_v62 = vmul.f32 %v8564_v9, %v588_v52 }
 0x27e   :  { %v536_v51 = vpop.permute.xlu1 %535 }
 0x27f   :  { %v559_v22 = vmul.f32 %v536_v51, %v519_v14 }
 0x281   :  { %v8627_v32 = vadd.f32 %v599_v53, %v559_v22 }
 0x282   :  { %v538_v55 = vpop.permute.xlu1 %537 }
 0x283   :  { %v560_v57 = vmul.f32 %v538_v55, %v520_v56  ;;  %v8646_v39 = vpack.c.bf16 %v8627_v32, %v8627_v32 }
 0x285   :  { %v8612_v15 = vadd.f32 %v600_v4, %v560_v57  ;;  %v631_v18 = vunpack.c.l.b16 %v8646_v39 }
 0x286   :  { %v542_v63 = vpop.permute.xlu0 %541 }
 0x287   :  { %v540_v1 = vpop.permute.xlu1 %539  ;;  %v562_v17 = vmul.f32 %v542_v63, %v522_v7  ;;  %v8622_v54 = vpack.c.bf16 %v8612_v15, %v8612_v15 }
 0x288   :  { %v561_v11 = vmul.f32 %v540_v1, %v521_v58 }
 0x289   :  { %v8624_v30 = vadd.f32 %v602_v26, %v562_v17  ;;  %v632_v35 = vunpack.c.l.b16 %v8622_v54 }
 0x28a   :  { %v8615_v23 = vadd.f32 %v601_v13, %v561_v11  ;;  %v590_v10 = vpop.permute.xlu0 %589 }
 0x28b   :  { %v544_v25 = vpop.permute.xlu1 %543  ;;  %v8639_v36 = vpack.c.bf16 %v8624_v30, %v8624_v30  ;;  %v698_v42 = vrot.slane %v632_v35, 7  ;;  %v606_v45 = vmul.f32 %v8570_v16, %v590_v10  ;;  %v8702_v35 = vld [vmem:[#allocation2 + $0x1] sm:$0x1]  ;;  %v8708_v10 = vld [vmem:[#allocation2 + $0x11] sm:$0x1] }
 0x28c   :  { %v563_v27 = vmul.f32 %v544_v25, %v523_v19  ;;  %v8631_v33 = vpack.c.bf16 %v8615_v23, %v8615_v23 }
 0x28d   :  { %v634_v12 = vunpack.c.l.b16 %v8639_v36  ;;  %v700_v49 = vsel %vm699_vm4, %v698_v42, %v631_v18  ;;  %v8711_v18 = vld [vmem:[#allocation2 + $0x31] sm:$0x1] }
 0x28e   :  { %v8633_v59 = vadd.f32 %v603_v29, %v563_v27  ;;  %v633_v40 = vunpack.c.l.b16 %v8631_v33 }
 0x28f   :  { %v546_v34 = vpop.permute.xlu1 %545  ;;  %v704_v28 = vrot.slane %v634_v12, 5 }
 0x290   :  { %v564_v60 = vmul.f32 %v546_v34, %v524_v31  ;;  %v8651_v8 = vpack.c.bf16 %v8633_v59, %v8633_v59  ;;  %v701_v44 = vrot.slane %v633_v40, 6 }
 0x292   :  { %v8641_v37 = vadd.f32 %v604_v48, %v564_v60  ;;  %v635_v9 = vunpack.c.l.b16 %v8651_v8  ;;  %v703_v52 = vsel %vm702_vm5, %v701_v44, %v700_v49 }
 0x293   :  { %v548_v61 = vpop.permute.xlu1 %547  ;;  %v706_v63 = vsel %vm705_vm6, %v704_v28, %v703_v52  ;;  %v8717_v28 = vld [vmem:[#allocation2 + $0x51] sm:$0x1] }
 0x294   :  { %v8656_v41 = vpack.c.bf16 %v8641_v37, %v8641_v37  ;;  %v565_v3 = vmul.f32 %v548_v61, %v525_v38  ;;  %v707_v55 = vrot.slane %v635_v9, 4  ;;  %v8705_v61 = vld [vmem:[#allocation2 + $0x21] sm:$0x1] }
 0x296   :  { %v8660_v43 = vadd.f32 %v605_v62, %v565_v3  ;;  %v636_v6 = vunpack.c.l.b16 %v8656_v41  ;;  %v709_v1 = vsel %vm708_vm7, %v707_v55, %v706_v63  ;;  %v8723_v63 = vld [vmem:[#allocation2 + $0x71] sm:$0x1] }
 0x297   :  { %v550_v20 = vpop.permute.xlu1 %549 }
 0x298   :  { %v8668_v46 = vpack.c.bf16 %v8660_v43, %v8660_v43  ;;  %v566_v47 = vmul.f32 %v550_v20, %v526_v24  ;;  %v710_v56 = vrot.slane %v636_v6, 3 }
 0x29a   :  { %v637_v50 = vunpack.c.l.b16 %v8668_v46  ;;  %v8672_v51 = vadd.f32 %v606_v45, %v566_v47  ;;  %v712_v7 = vsel %vm711_vm8, %v710_v56, %v709_v1  ;;  %v8714_v45 = vld [vmem:[#allocation2 + $0x41] sm:$0x1] }
 0x29b   :  { %v8720_v56 = vld [vmem:[#allocation2 + $0x61] sm:$0x1] }
 0x29c   :  { %v8677_v16 = vpack.c.bf16 %v8672_v51, %v8672_v51  ;;  %v713_v57 = vrot.slane %v637_v50, 2 }
 0x29e   :  { %v638_v58 = vunpack.c.l.b16 %v8677_v16  ;;  %v715_v11 = vsel %vm714_vm9, %v713_v57, %v712_v7 }
 0x2a0   :  { %v716_v4 = vrot.slane %v638_v58, 1 }
 0x2a2   :  { %v718_v13 = vsel %vm11873_vm10, %v716_v4, %v715_v11 }
 0x2a3   :  { %v719_v14 = vpack.c.b16 %v718_v13, %v718_v13 }
 0x2a5   :  { %720 = vrot.lane.b32.xlu1 %v719_v14, %s8332_s8 }
 0x317   :  { %v721_v17 = vpop.permute.xlu1 %720 }
 0x318   :  { %7158 = vmatmul.mubr.msk.bf16.vlgmr.msra.gmra.mrb[4].mxu1 %vm11872_vm0, %v721_v17 }
 0x319   :  { %7162 = vmatpush3.bf16.msra.mxu1 %v8421_v2  ;;  %7165 = vmatprep.mubr.msk.bf16.mxu1 %vm8330_vm1, %v11798_v0 }
 0x31a   :  { %7163 = vmatprep.subr.bf16.mxu1 %v11798_v0 }
 0x31d   :  { %7164 = vmatpush3.bf16.msra.mxu1 %v8426_v5 }
 0x31e   :  { %7169 = vmatprep.subr.bf16.mxu1 %v11798_v0 }
 0x3eb   :  { %v759_v19 = vpop.f32.mrb[4].mxu1 }
 0x3ec   :  { %v7159_v22 = vpop.f32.mrb[5].mxu1  ;;  %v845_v27 = vadd.f32 %v759_v19, %v8467_v21  ;;  %v775_v60 = vrot.slane %v759_v19, 2  ;;  %v774_v38 = vrot.slane %v759_v19, 1  ;;  %v789_v40 = vadd.f32 %v8702_v35, %v759_v19 }
 0x3ed   :  { %v762_v25 = vpop.f32.mrb[6].mxu1  ;;  %v776_v62 = vrot.slane %v759_v19, 3  ;;  %v777_v24 = vrot.slane %v759_v19, 4  ;;  %v778_v44 = vrot.slane %v759_v19, 5  ;;  %v779_v6 = vrot.slane %v759_v19, 6 }
 0x3ee   :  { %v7160_v26 = vpop.f32.mrb[7].mxu1  ;;  %854 = vrot.lane.b32.xlu0 %v845_v27, %s8326_s30  ;;  %v848_v53 = vrot.slane %v845_v27, 2  ;;  %v847_v2 = vrot.slane %v845_v27, 1  ;;  %v849_v29 = vrot.slane %v845_v27, 3  ;;  %v850_v5 = vrot.slane %v845_v27, 4 }
 0x3ef   :  { %v851_v31 = vrot.slane %v845_v27, 5  ;;  %v852_v34 = vrot.slane %v845_v27, 6  ;;  %v853_v48 = vrot.slane %v845_v27, 7  ;;  %v791_v3 = vadd.f32 %v775_v60, %v8705_v61 }
 0x3f0   :  { %858 = vrot.lane.b32.xlu1 %v848_v53, %s8326_s30  ;;  %v790_v42 = vadd.f32 %v774_v38, %v8708_v10  ;;  %v6688_v12 = vmul.f32 -1.442695, %v789_v40  ;;  %v792_v9 = vadd.f32 %v776_v62, %v8711_v18  ;;  %v793_v47 = vadd.f32 %v777_v24, %v8714_v45 }
 0x3f1   :  { %v6690_v20 = vmul.f32 -1.442695, %v791_v3  ;;  %v780_v50 = vrot.slane %v759_v19, 7  ;;  %v794_v52 = vadd.f32 %v778_v44, %v8717_v28  ;;  %v795_v57 = vadd.f32 %v779_v6, %v8720_v56 }
 0x3f2   :  { %856 = vrot.lane.b32.xlu0 %v847_v2, %s8326_s30  ;;  %7502 = vpow2.f32 %v6688_v12  ;;  %v6689_v49 = vmul.f32 -1.442695, %v790_v42  ;;  %v6691_v55 = vmul.f32 -1.442695, %v792_v9  ;;  %v6692_v58 = vmul.f32 -1.442695, %v793_v47 }
 0x3f3   :  { %7504 = vpow2.f32 %v6690_v20  ;;  %v796_v1 = vadd.f32 %v780_v50, %v8723_v63  ;;  %v6693_v4 = vmul.f32 -1.442695, %v794_v52  ;;  %v6694_v7 = vmul.f32 -1.442695, %v795_v57 }
 0x3f4   :  { %860 = vrot.lane.b32.xlu1 %v849_v29, %s8326_s30  ;;  %7506 = vpow2.f32 %v6689_v49 }
 0x3f5   :  { %7508 = vpow2.f32 %v6691_v55  ;;  %v6695_v13 = vmul.f32 -1.442695, %v796_v1 }
 0x3f6   :  { %862 = vrot.lane.b32.xlu0 %v850_v5, %s8326_s30  ;;  %7510 = vpow2.f32 %v6692_v58 }
 0x3f7   :  { %7512 = vpow2.f32 %v6693_v4 }
 0x3f8   :  { %864 = vrot.lane.b32.xlu1 %v851_v31, %s8326_s30  ;;  %7514 = vpow2.f32 %v6694_v7 }
 0x3f9   :  { %7516 = vpow2.f32 %v6695_v13 }
 0x3fa   :  { %866 = vrot.lane.b32.xlu0 %v852_v34, %s8326_s30 }
 0x3fc   :  { %868 = vrot.lane.b32.xlu1 %v853_v48, %s8326_s30  ;;  %v7503_v11 = vpop.eup %7502 }
 0x3fd   :  { %v7505_v14 = vpop.eup %7504  ;;  %v821_v17 = vadd.f32 1.0, %v7503_v11 }
 0x3fe   :  { %v7507_v19 = vpop.eup %7506  ;;  %v823_v22 = vadd.f32 1.0, %v7505_v14 }
 0x3ff   :  { %v7509_v25 = vpop.eup %7508  ;;  %7518 = vrcp.f32 %v821_v17  ;;  %v822_v26 = vadd.f32 1.0, %v7507_v19 }
 0x400   :  { %v7511_v27 = vpop.eup %7510  ;;  %7520 = vrcp.f32 %v823_v22  ;;  %v824_v53 = vadd.f32 1.0, %v7509_v25 }
 0x401   :  { %v7513_v2 = vpop.eup %7512  ;;  %7522 = vrcp.f32 %v822_v26  ;;  %v825_v29 = vadd.f32 1.0, %v7511_v27 }
 0x402   :  { %v7515_v5 = vpop.eup %7514  ;;  %7524 = vrcp.f32 %v824_v53  ;;  %v826_v31 = vadd.f32 1.0, %v7513_v2 }
 0x403   :  { %v7517_v34 = vpop.eup %7516  ;;  %7526 = vrcp.f32 %v825_v29  ;;  %v827_v48 = vadd.f32 1.0, %v7515_v5 }
 0x404   :  { %7528 = vrcp.f32 %v826_v31  ;;  %v828_v40 = vadd.f32 1.0, %v7517_v34 }
 0x405   :  { %7530 = vrcp.f32 %v827_v48 }
 0x406   :  { %7532 = vrcp.f32 %v828_v40 }
 0x409   :  { %v8726_v60 = vpop.eup %7518 }
 0x40a   :  { %v8729_v3 = vpop.eup %7520 }
 0x40b   :  { %v8733_v12 = vpop.eup %7522 }
 0x40c   :  { %v8737_v20 = vpop.eup %7524 }
 0x40d   :  { %v8741_v49 = vpop.eup %7526 }
 0x40e   :  { %v8745_v55 = vpop.eup %7528 }
 0x40f   :  { %v8749_v1 = vpop.eup %7530 }
 0x410   :  { %v8753_v11 = vpop.eup %7532 }
 0x460   :  { %v855_v38 = vpop.permute.xlu0 %854 }
 0x461   :  { %v878_v62 = vmul.f32 %v8726_v60, %v855_v38 }
 0x462   :  { %v859_v24 = vpop.permute.xlu1 %858 }
 0x463   :  { %894 = vrot.lane.b32.xlu0 %v878_v62, %s8326_s30  ;;  %v880_v42 = vmul.f32 %v8729_v3, %v859_v24 }
 0x464   :  { %v857_v44 = vpop.permute.xlu0 %856 }
 0x465   :  { %898 = vrot.lane.b32.xlu1 %v880_v42, %s8326_s30  ;;  %v879_v9 = vmul.f32 %v8733_v12, %v857_v44  ;;  %v982_v44 = vmul.f32 %v8726_v60, %v8627_v32  ;;  %v937_v32 = vsub.f32 1.0, %v8737_v20 }
 0x466   :  { %v861_v6 = vpop.permute.xlu1 %860 }
 0x467   :  { %896 = vrot.lane.b32.xlu0 %v879_v9, %s8326_s30  ;;  %v881_v47 = vmul.f32 %v8737_v20, %v861_v6  ;;  %v936_v6 = vsub.f32 1.0, %v8729_v3 }
 0x468   :  { %v863_v50 = vpop.permute.xlu0 %862 }
 0x469   :  { %900 = vrot.lane.b32.xlu1 %v881_v47, %s8326_s30  ;;  %v882_v52 = vmul.f32 %v8741_v49, %v863_v50 }
 0x46a   :  { %v865_v57 = vpop.permute.xlu1 %864 }
 0x46b   :  { %902 = vrot.lane.b32.xlu0 %v882_v52, %s8326_s30  ;;  %v883_v58 = vmul.f32 %v8745_v55, %v865_v57  ;;  %v984_v52 = vmul.f32 %v8729_v3, %v8615_v23  ;;  %v938_v3 = vsub.f32 1.0, %v8741_v49 }
 0x46c   :  { %v867_v4 = vpop.permute.xlu0 %866 }
 0x46d   :  { %904 = vrot.lane.b32.xlu1 %v883_v58, %s8326_s30  ;;  %v884_v7 = vmul.f32 %v8749_v1, %v867_v4  ;;  %v935_v58 = vsub.f32 1.0, %v8733_v12 }
 0x46e   :  { %v869_v13 = vpop.permute.xlu1 %868 }
 0x46f   :  { %906 = vrot.lane.b32.xlu0 %v884_v7, %s8326_s30  ;;  %v885_v14 = vmul.f32 %v8753_v11, %v869_v13  ;;  %v983_v13 = vmul.f32 %v8733_v12, %v8612_v15  ;;  %v986_v15 = vmul.f32 %v8741_v49, %v8633_v59  ;;  %v941_v59 = vsub.f32 1.0, %v8753_v11 }
 0x471   :  { %908 = vrot.lane.b32.xlu1 %v885_v14, %s8326_s30 }
 0x4d5   :  { %v895_v17 = vpop.permute.xlu0 %894 }
 0x4d6   :  { %v918_v19 = vadd.f32 %v895_v17, %v8702_v35 }
 0x4d7   :  { %v899_v22 = vpop.permute.xlu1 %898 }
 0x4d8   :  { %7534 = vtanh.f32 %v918_v19  ;;  %v920_v25 = vadd.f32 %v899_v22, %v8705_v61  ;;  %v985_v22 = vmul.f32 %v8737_v20, %v8624_v30  ;;  %v988_v20 = vmul.f32 %v8749_v1, %v8660_v43 }
 0x4d9   :  { %v897_v26 = vpop.permute.xlu0 %896 }
 0x4da   :  { %7536 = vtanh.f32 %v920_v25  ;;  %v919_v27 = vadd.f32 %v897_v26, %v8708_v10  ;;  %v939_v26 = vsub.f32 1.0, %v8745_v55 }
 0x4db   :  { %v901_v53 = vpop.permute.xlu1 %900 }
 0x4dc   :  { %7538 = vtanh.f32 %v919_v27  ;;  %v921_v2 = vadd.f32 %v901_v53, %v8711_v18 }
 0x4dd   :  { %v903_v29 = vpop.permute.xlu0 %902 }
 0x4de   :  { %7540 = vtanh.f32 %v921_v2  ;;  %v922_v5 = vadd.f32 %v903_v29, %v8714_v45  ;;  %v987_v2 = vmul.f32 %v8745_v55, %v8641_v37  ;;  %v940_v29 = vsub.f32 1.0, %v8749_v1 }
 0x4df   :  { %v905_v31 = vpop.permute.xlu1 %904 }
 0x4e0   :  { %7542 = vtanh.f32 %v922_v5  ;;  %v923_v35 = vadd.f32 %v905_v31, %v8717_v28 }
 0x4e1   :  { %v907_v34 = vpop.permute.xlu0 %906 }
 0x4e2   :  { %v7535_v48 = vpop.eup %7534  ;;  %7544 = vtanh.f32 %v923_v35  ;;  %v924_v61 = vadd.f32 %v907_v34, %v8720_v56 }
 0x4e3   :  { %v909_v38 = vpop.permute.xlu1 %908  ;;  %950 = vrot.lane.b32.xlu0 %v7535_v48, %s8332_s8 }
 0x4e4   :  { %v7537_v10 = vpop.eup %7536  ;;  %7546 = vtanh.f32 %v924_v61  ;;  %v925_v18 = vadd.f32 %v909_v38, %v8723_v63  ;;  %v934_v63 = vsub.f32 1.0, %v8726_v60 }
 0x4e5   :  { %954 = vrot.lane.b32.xlu1 %v7537_v10, %s8332_s8  ;;  %v989_v10 = vmul.f32 %v8753_v11, %v8672_v51 }
 0x4e6   :  { %v7539_v40 = vpop.eup %7538  ;;  %7548 = vtanh.f32 %v925_v18 }
 0x4e7   :  { %952 = vrot.lane.b32.xlu0 %v7539_v40, %s8332_s8 }
 0x4e8   :  { %v7541_v45 = vpop.eup %7540 }
 0x4e9   :  { %956 = vrot.lane.b32.xlu1 %v7541_v45, %s8332_s8 }
 0x4ea   :  { %v7543_v28 = vpop.eup %7542 }
 0x4eb   :  { %958 = vrot.lane.b32.xlu0 %v7543_v28, %s8332_s8 }
 0x4ec   :  { %v7545_v56 = vpop.eup %7544 }
 0x4ed   :  { %960 = vrot.lane.b32.xlu1 %v7545_v56, %s8332_s8 }
 0x4ee   :  { %v7547_v62 = vpop.eup %7546 }
 0x4ef   :  { %962 = vrot.lane.b32.xlu0 %v7547_v62, %s8332_s8 }
 0x4f0   :  { %v7549_v24 = vpop.eup %7548 }
 0x4f1   :  { %964 = vrot.lane.b32.xlu1 %v7549_v24, %s8332_s8 }
 0x555   :  { %v951_v42 = vpop.permute.xlu0 %950 }
 0x556   :  { %v974_v9 = vmul.f32 %v951_v42, %v934_v63 }
 0x557   :  { %v955_v47 = vpop.permute.xlu1 %954 }
 0x558   :  { %v8778_v50 = vadd.f32 %v982_v44, %v974_v9  ;;  %v976_v57 = vmul.f32 %v955_v47, %v936_v6 }
 0x559   :  { %v953_v4 = vpop.permute.xlu0 %952 }
 0x55a   :  { %v8783_v7 = vadd.f32 %v984_v52, %v976_v57  ;;  %v975_v14 = vmul.f32 %v953_v4, %v935_v58  ;;  %v998_v17 = vpack.c.bf16 %v8778_v50, %v8778_v50 }
 0x55b   :  { %v957_v60 = vpop.permute.xlu1 %956 }
 0x55c   :  { %v1000_v19 = vpack.c.bf16 %v8783_v7, %v8783_v7  ;;  %v8792_v23 = vadd.f32 %v983_v13, %v975_v14  ;;  %v977_v25 = vmul.f32 %v957_v60, %v937_v32  ;;  %v1031_v49 = vshll.u32 %v998_v17, 16 }
 0x55d   :  { %v959_v12 = vpop.permute.xlu0 %958  ;;  %v1014_v61 = vunpack.c.l.b16 %v998_v17 }
 0x55e   :  { %v999_v27 = vpack.c.bf16 %v8792_v23, %v8792_v23  ;;  %v978_v53 = vmul.f32 %v959_v12, %v938_v3  ;;  %v1016_v5 = vunpack.c.l.b16 %v1000_v19  ;;  %v8805_v31 = vadd.f32 %v985_v22, %v977_v25 }
 0x55f   :  { %v961_v30 = vpop.permute.xlu1 %960  ;;  %v1037_v63 = vshll.u32 %v1000_v19, 16 }
 0x560   :  { %v1015_v35 = vunpack.c.l.b16 %v999_v27  ;;  %v1034_v34 = vshll.u32 %v999_v27, 16  ;;  %v8810_v48 = vadd.f32 %v986_v15, %v978_v53  ;;  %v1001_v37 = vpack.c.bf16 %v8805_v31, %v8805_v31 }
 0x561   :  { %v979_v55 = vmul.f32 %v961_v30, %v939_v26  ;;  %v963_v38 = vpop.permute.xlu0 %962  ;;  %v1106_v45 = vrot.slane %v1016_v5, 6 }
 0x562   :  { %v1104_v18 = vrot.slane %v1015_v35, 7  ;;  %v1002_v43 = vpack.c.bf16 %v8810_v48, %v8810_v48  ;;  %v980_v1 = vmul.f32 %v963_v38, %v940_v29  ;;  %v8818_v40 = vpack.i.bf16 %v1034_v34, %v1031_v49  ;;  %v8847_v49 = vld [vmem:[#allocation9] sm:$0xff]   ;;  %v8853_v35 = vld [vmem:[#allocation9 + $0x8] sm:$0xff]  }
 0x563   :  { %v1017_v28 = vunpack.c.l.b16 %v1001_v37  ;;  %v1040_v56 = vshll.u32 %v1001_v37, 16  ;;  %v8820_v62 = vadd.f32 %v987_v2, %v979_v55  ;;  %v965_v24 = vpop.permute.xlu1 %964 }
 0x564   :  { %v1105_v42 = vsel %vm699_vm4, %v1104_v18, %v1014_v61  ;;  %v1018_v44 = vunpack.c.l.b16 %v1002_v43  ;;  %v8823_v9 = vadd.f32 %v988_v20, %v980_v1  ;;  %v981_v47 = vmul.f32 %v965_v24, %v941_v59 }
 0x565   :  { %v1107_v51 = vsel %vm702_vm5, %v1106_v45, %v1105_v42  ;;  %v1108_v11 = vrot.slane %v1017_v28, 5  ;;  %v1003_v6 = vpack.c.bf16 %v8820_v62, %v8820_v62  ;;  %v1043_v52 = vshll.u32 %v1002_v43, 16 }
 0x566   :  { %v1110_v57 = vrot.slane %v1018_v44, 4  ;;  %v1004_v58 = vpack.c.bf16 %v8823_v9, %v8823_v9  ;;  %v8830_v4 = vpack.i.bf16 %v1040_v56, %v1037_v63  ;;  %v8833_v60 = vadd.f32 %v989_v10, %v981_v47  ;;  %v8866_v63 = vld [vmem:[#allocation2 + $0x2] sm:$0x1]  ;;  %v8872_v47 = vld [vmem:[#allocation2 + $0x12] sm:$0x1] }
 0x567   :  { %v1109_v13 = vsel %vm705_vm6, %v1108_v11, %v1107_v51  ;;  %v1019_v14 = vunpack.c.l.b16 %v1003_v6  ;;  %v1046_v32 = vshll.u32 %v1003_v6, 16  ;;  %v8869_v51 = vld [vmem:[#allocation2 + $0x22] sm:$0x1] }
 0x568   :  { %v1020_v17 = vunpack.c.l.b16 %v1004_v58  ;;  %v1111_v19 = vsel %vm708_vm7, %v1110_v57, %v1109_v13  ;;  %v1005_v22 = vpack.c.bf16 %v8833_v60, %v8833_v60  ;;  %v1049_v12 = vshll.u32 %v1004_v58, 16  ;;  %v8875_v13 = vld [vmem:[#allocation2 + $0x32] sm:$0x1] }
 0x569   :  { %v1112_v3 = vrot.slane %v1019_v14, 3  ;;  %v8838_v25 = vpack.i.bf16 %v1046_v32, %v1043_v52 }
 0x56a   :  { %v1114_v15 = vrot.slane %v1020_v17, 2  ;;  %v1021_v26 = vunpack.c.l.b16 %v1005_v22  ;;  %v1052_v27 = vshll.u32 %v1005_v22, 16 }
 0x56b   :  { %v1113_v53 = vsel %vm711_vm8, %v1112_v3, %v1111_v19  ;;  %v8878_v19 = vld [vmem:[#allocation2 + $0x42] sm:$0x1] }
 0x56c   :  { %v1115_v2 = vsel %vm714_vm9, %v1114_v15, %v1113_v53  ;;  %v1116_v29 = vrot.slane %v1021_v26, 1  ;;  %v8842_v5 = vpack.i.bf16 %v1052_v27, %v1049_v12  ;;  %v8881_v12 = vld [vmem:[#allocation2 + $0x52] sm:$0x1] }
 0x56e   :  { %v1117_v30 = vsel %vm11873_vm10, %v1116_v29, %v1115_v2  ;;  %v8884_v2 = vld [vmem:[#allocation2 + $0x62] sm:$0x1] }
 0x56f   :  { %v1118_v20 = vpack.c.b16 %v1117_v30, %v1117_v30 }
 0x571   :  { %1119 = vrot.lane.b32.xlu0 %v1118_v20, %s8332_s8  ;;  %v8887_v20 = vld [vmem:[#allocation2 + $0x72] sm:$0x1] }
 0x5e3   :  { %v1120_v59 = vpop.permute.xlu0 %1119 }
 0x5e4   :  { %7166 = vmatmul.mubr.msk.bf16.vlgmr.msra.gmra.mrb[8].mxu1 %vm11872_vm0, %v1120_v59 }
 0x5e5   :  { %7170 = vmatpush3.bf16.msra.mxu1 %v8847_v49  ;;  %7173 = vmatprep.mubr.msk.bf16.mxu1 %vm8330_vm1, %v11798_v0 }
 0x5e6   :  { %7171 = vmatprep.subr.bf16.mxu1 %v11798_v0 }
 0x5e9   :  { %7172 = vmatpush3.bf16.msra.mxu1 %v8853_v35 }
 0x5ea   :  { %7185 = vmatprep.subr.bf16.mxu1 %v11798_v0 }
 0x6b7   :  { %v1158_v34 = vpop.f32.mrb[8].mxu1 }
 0x6b8   :  { %v7167_v61 = vpop.f32.mrb[9].mxu1  ;;  %v1244_v38 = vadd.f32 %v1158_v34, %v8467_v21  ;;  %v1174_v24 = vrot.slane %v1158_v34, 2  ;;  %v1173_v42 = vrot.slane %v1158_v34, 1  ;;  %v1188_v44 = vadd.f32 %v8866_v63, %v1158_v34 }
 0x6b9   :  { %v1161_v37 = vpop.f32.mrb[10].mxu1  ;;  %v1175_v11 = vrot.slane %v1158_v34, 3  ;;  %v1176_v52 = vrot.slane %v1158_v34, 4  ;;  %v1177_v14 = vrot.slane %v1158_v34, 5  ;;  %v1178_v3 = vrot.slane %v1158_v34, 6 }
 0x6ba   :  { %v7168_v55 = vpop.f32.mrb[11].mxu1  ;;  %1253 = vrot.lane.b32.xlu1 %v1244_v38, %s8326_s30  ;;  %v1247_v10 = vrot.slane %v1244_v38, 2  ;;  %v1246_v18 = vrot.slane %v1244_v38, 1  ;;  %v1248_v43 = vrot.slane %v1244_v38, 3  ;;  %v1249_v1 = vrot.slane %v1244_v38, 4 }
 0x6bb   :  { %v1250_v45 = vrot.slane %v1244_v38, 5  ;;  %v1251_v28 = vrot.slane %v1244_v38, 6  ;;  %v1252_v56 = vrot.slane %v1244_v38, 7  ;;  %v1190_v6 = vadd.f32 %v1174_v24, %v8869_v51 }
 0x6bc   :  { %1257 = vrot.lane.b32.xlu0 %v1247_v10, %s8326_s30  ;;  %v1189_v57 = vadd.f32 %v1173_v42, %v8872_v47  ;;  %v6705_v58 = vmul.f32 -1.442695, %v1188_v44  ;;  %v1191_v32 = vadd.f32 %v1175_v11, %v8875_v13  ;;  %v1192_v22 = vadd.f32 %v1176_v52, %v8878_v19 }
 0x6bd   :  { %v6707_v17 = vmul.f32 -1.442695, %v1190_v6  ;;  %v1179_v26 = vrot.slane %v1158_v34, 7  ;;  %v1193_v27 = vadd.f32 %v1177_v14, %v8881_v12  ;;  %v1194_v29 = vadd.f32 %v1178_v3, %v8884_v2 }
 0x6be   :  { %1255 = vrot.lane.b32.xlu1 %v1246_v18, %s8326_s30  ;;  %7550 = vpow2.f32 %v6705_v58  ;;  %v6706_v15 = vmul.f32 -1.442695, %v1189_v57  ;;  %v6708_v53 = vmul.f32 -1.442695, %v1191_v32  ;;  %v6709_v30 = vmul.f32 -1.442695, %v1192_v22 }
 0x6bf   :  { %7552 = vpow2.f32 %v6707_v17  ;;  %v1195_v59 = vadd.f32 %v1179_v26, %v8887_v20  ;;  %v6710_v61 = vmul.f32 -1.442695, %v1193_v27  ;;  %v6711_v37 = vmul.f32 -1.442695, %v1194_v29 }
 0x6c0   :  { %1259 = vrot.lane.b32.xlu0 %v1248_v43, %s8326_s30  ;;  %7554 = vpow2.f32 %v6706_v15 }
 0x6c1   :  { %7556 = vpow2.f32 %v6708_v53  ;;  %v6712_v34 = vmul.f32 -1.442695, %v1195_v59 }
 0x6c2   :  { %1261 = vrot.lane.b32.xlu1 %v1249_v1, %s8326_s30  ;;  %7558 = vpow2.f32 %v6709_v30 }
 0x6c3   :  { %7560 = vpow2.f32 %v6710_v61 }
 0x6c4   :  { %1263 = vrot.lane.b32.xlu0 %v1250_v45, %s8326_s30  ;;  %7562 = vpow2.f32 %v6711_v37 }
 0x6c5   :  { %7564 = vpow2.f32 %v6712_v34 }
 0x6c6   :  { %1265 = vrot.lane.b32.xlu1 %v1251_v28, %s8326_s30 }
 0x6c8   :  { %1267 = vrot.lane.b32.xlu0 %v1252_v56, %s8326_s30  ;;  %v7551_v55 = vpop.eup %7550 }
 0x6c9   :  { %v7553_v38 = vpop.eup %7552  ;;  %v1220_v10 = vadd.f32 1.0, %v7551_v55 }
 0x6ca   :  { %v7555_v18 = vpop.eup %7554  ;;  %v1222_v43 = vadd.f32 1.0, %v7553_v38 }
 0x6cb   :  { %v7557_v1 = vpop.eup %7556  ;;  %7566 = vrcp.f32 %v1220_v10  ;;  %v1221_v45 = vadd.f32 1.0, %v7555_v18 }
 0x6cc   :  { %v7559_v28 = vpop.eup %7558  ;;  %7568 = vrcp.f32 %v1222_v43  ;;  %v1223_v56 = vadd.f32 1.0, %v7557_v1 }
 0x6cd   :  { %v7561_v24 = vpop.eup %7560  ;;  %7570 = vrcp.f32 %v1221_v45  ;;  %v1224_v42 = vadd.f32 1.0, %v7559_v28 }
 0x6ce   :  { %v7563_v44 = vpop.eup %7562  ;;  %7572 = vrcp.f32 %v1223_v56  ;;  %v1225_v11 = vadd.f32 1.0, %v7561_v24 }
 0x6cf   :  { %v7565_v6 = vpop.eup %7564  ;;  %7574 = vrcp.f32 %v1224_v42  ;;  %v1226_v52 = vadd.f32 1.0, %v7563_v44 }
 0x6d0   :  { %7576 = vrcp.f32 %v1225_v11  ;;  %v1227_v14 = vadd.f32 1.0, %v7565_v6 }
 0x6d1   :  { %7578 = vrcp.f32 %v1226_v52 }
 0x6d2   :  { %7580 = vrcp.f32 %v1227_v14 }
 0x6d5   :  { %v8890_v57 = vpop.eup %7566 }
 0x6d6   :  { %v8893_v17 = vpop.eup %7568 }
 0x6d7   :  { %v8897_v15 = vpop.eup %7570 }
 0x6d8   :  { %v8901_v53 = vpop.eup %7572 }
 0x6d9   :  { %v8905_v59 = vpop.eup %7574 }
 0x6da   :  { %v8909_v55 = vpop.eup %7576 }
 0x6db   :  { %v8913_v10 = vpop.eup %7578 }
 0x6dc   :  { %v8917_v1 = vpop.eup %7580 }
 0x72c   :  { %v1254_v58 = vpop.permute.xlu1 %1253 }
 0x72d   :  { %v1277_v32 = vmul.f32 %v8890_v57, %v1254_v58 }
 0x72e   :  { %v1258_v3 = vpop.permute.xlu0 %1257 }
 0x72f   :  { %1293 = vrot.lane.b32.xlu1 %v1277_v32, %s8326_s30  ;;  %v1279_v22 = vmul.f32 %v8893_v17, %v1258_v3 }
 0x730   :  { %v1256_v26 = vpop.permute.xlu1 %1255 }
 0x731   :  { %1297 = vrot.lane.b32.xlu0 %v1279_v22, %s8326_s30  ;;  %v1278_v27 = vmul.f32 %v8897_v15, %v1256_v26 }
 0x732   :  { %v1260_v29 = vpop.permute.xlu0 %1259 }
 0x733   :  { %1295 = vrot.lane.b32.xlu1 %v1278_v27, %s8326_s30  ;;  %v1280_v30 = vmul.f32 %v8901_v53, %v1260_v29 }
 0x734   :  { %v1262_v61 = vpop.permute.xlu1 %1261 }
 0x735   :  { %1299 = vrot.lane.b32.xlu0 %v1280_v30, %s8326_s30  ;;  %v1281_v37 = vmul.f32 %v8905_v59, %v1262_v61 }
 0x736   :  { %v1264_v34 = vpop.permute.xlu0 %1263 }
 0x737   :  { %1301 = vrot.lane.b32.xlu1 %v1281_v37, %s8326_s30  ;;  %v1282_v38 = vmul.f32 %v8909_v55, %v1264_v34 }
 0x738   :  { %v1266_v18 = vpop.permute.xlu1 %1265 }
 0x739   :  { %1303 = vrot.lane.b32.xlu0 %v1282_v38, %s8326_s30  ;;  %v1283_v43 = vmul.f32 %v8913_v10, %v1266_v18  ;;  %v1335_v38 = vsub.f32 1.0, %v8893_v17  ;;  %v1381_v18 = vmul.f32 %v8890_v57, %v8778_v50  ;;  %v1384_v50 = vmul.f32 %v8901_v53, %v8805_v31 }
 0x73a   :  { %v1268_v45 = vpop.permute.xlu0 %1267 }
 0x73b   :  { %1305 = vrot.lane.b32.xlu1 %v1283_v43, %s8326_s30  ;;  %v1284_v28 = vmul.f32 %v8917_v1, %v1268_v45  ;;  %v1383_v45 = vmul.f32 %v8893_v17, %v8783_v7 }
 0x73d   :  { %1307 = vrot.lane.b32.xlu0 %v1284_v28, %s8326_s30 }
 0x7a1   :  { %v1294_v56 = vpop.permute.xlu1 %1293 }
 0x7a2   :  { %v1317_v24 = vadd.f32 %v1294_v56, %v8866_v63  ;;  %v1334_v56 = vsub.f32 1.0, %v8897_v15 }
 0x7a3   :  { %v1298_v42 = vpop.permute.xlu0 %1297 }
 0x7a4   :  { %7582 = vtanh.f32 %v1317_v24  ;;  %v1319_v44 = vadd.f32 %v1298_v42, %v8869_v51 }
 0x7a5   :  { %v1296_v11 = vpop.permute.xlu1 %1295 }
 0x7a6   :  { %7584 = vtanh.f32 %v1319_v44  ;;  %v1318_v6 = vadd.f32 %v1296_v11, %v8872_v47  ;;  %v1382_v11 = vmul.f32 %v8897_v15, %v8792_v23 }
 0x7a7   :  { %v1300_v52 = vpop.permute.xlu0 %1299 }
 0x7a8   :  { %7586 = vtanh.f32 %v1318_v6  ;;  %v1320_v58 = vadd.f32 %v1300_v52, %v8875_v13  ;;  %v1336_v52 = vsub.f32 1.0, %v8901_v53  ;;  %v1385_v53 = vmul.f32 %v8905_v59, %v8810_v48 }
 0x7a9   :  { %v1302_v14 = vpop.permute.xlu1 %1301  ;;  %v1386_v48 = vmul.f32 %v8909_v55, %v8820_v62 }
 0x7aa   :  { %7588 = vtanh.f32 %v1320_v58  ;;  %v1321_v32 = vadd.f32 %v1302_v14, %v8878_v19  ;;  %v1337_v14 = vsub.f32 1.0, %v8905_v59 }
 0x7ab   :  { %v1304_v3 = vpop.permute.xlu0 %1303 }
 0x7ac   :  { %7590 = vtanh.f32 %v1321_v32  ;;  %v1322_v63 = vadd.f32 %v1304_v3, %v8881_v12 }
 0x7ad   :  { %v1306_v22 = vpop.permute.xlu1 %1305 }
 0x7ae   :  { %v7583_v26 = vpop.eup %7582  ;;  %7592 = vtanh.f32 %v1322_v63  ;;  %v1323_v51 = vadd.f32 %v1306_v22, %v8884_v2  ;;  %v1338_v22 = vsub.f32 1.0, %v8909_v55 }
 0x7af   :  { %v1308_v27 = vpop.permute.xlu0 %1307  ;;  %1349 = vrot.lane.b32.xlu1 %v7583_v26, %s8332_s8 }
 0x7b0   :  { %v7585_v47 = vpop.eup %7584  ;;  %7594 = vtanh.f32 %v1323_v51  ;;  %v1324_v13 = vadd.f32 %v1308_v27, %v8887_v20  ;;  %v1333_v20 = vsub.f32 1.0, %v8890_v57 }
 0x7b1   :  { %1353 = vrot.lane.b32.xlu0 %v7585_v47, %s8332_s8 }
 0x7b2   :  { %v7587_v29 = vpop.eup %7586  ;;  %7596 = vtanh.f32 %v1324_v13  ;;  %v1339_v13 = vsub.f32 1.0, %v8913_v10 }
 0x7b3   :  { %1351 = vrot.lane.b32.xlu1 %v7587_v29, %s8332_s8 }
 0x7b4   :  { %v7589_v19 = vpop.eup %7588 }
 0x7b5   :  { %1355 = vrot.lane.b32.xlu0 %v7589_v19, %s8332_s8  ;;  %v1387_v19 = vmul.f32 %v8913_v10, %v8823_v9 }
 0x7b6   :  { %v7591_v12 = vpop.eup %7590 }
 0x7b7   :  { %1357 = vrot.lane.b32.xlu1 %v7591_v12, %s8332_s8 }
 0x7b8   :  { %v7593_v2 = vpop.eup %7592 }
 0x7b9   :  { %1359 = vrot.lane.b32.xlu0 %v7593_v2, %s8332_s8 }
 0x7ba   :  { %v7595_v30 = vpop.eup %7594 }
 0x7bb   :  { %1361 = vrot.lane.b32.xlu1 %v7595_v30, %s8332_s8 }
 0x7bc   :  { %v7597_v61 = vpop.eup %7596 }
 0x7bd   :  { %1363 = vrot.lane.b32.xlu0 %v7597_v61, %s8332_s8 }
 0x821   :  { %v1350_v37 = vpop.permute.xlu1 %1349 }
 0x822   :  { %v1373_v34 = vmul.f32 %v1350_v37, %v1333_v20 }
 0x823   :  { %v1354_v43 = vpop.permute.xlu0 %1353 }
 0x824   :  { %v1375_v28 = vmul.f32 %v1354_v43, %v1335_v38  ;;  %v8945_v24 = vadd.f32 %v1381_v18, %v1373_v34  ;;  %v1340_v38 = vsub.f32 1.0, %v8917_v1 }
 0x825   :  { %v1352_v42 = vpop.permute.xlu1 %1351 }
 0x826   :  { %v8947_v44 = vadd.f32 %v1383_v45, %v1375_v28  ;;  %v1374_v6 = vmul.f32 %v1352_v42, %v1334_v56  ;;  %v8963_v32 = vpack.c.bf16 %v8945_v24, %v8945_v24  ;;  %v1388_v28 = vmul.f32 %v8917_v1, %v8833_v60 }
 0x827   :  { %v1356_v57 = vpop.permute.xlu0 %1355 }
 0x828   :  { %v8956_v7 = vpack.c.bf16 %v8947_v44, %v8947_v44  ;;  %v8958_v17 = vadd.f32 %v1382_v11, %v1374_v6  ;;  %v1376_v58 = vmul.f32 %v1356_v57, %v1336_v52  ;;  %v1413_v29 = vunpack.c.l.b16 %v8963_v32 }
 0x829   :  { %v1358_v23 = vpop.permute.xlu1 %1357 }
 0x82a   :  { %v8967_v15 = vpack.c.bf16 %v8958_v17, %v8958_v17  ;;  %v8969_v31 = vadd.f32 %v1384_v50, %v1376_v58  ;;  %v1377_v3 = vmul.f32 %v1358_v23, %v1337_v14  ;;  %v1415_v63 = vunpack.c.l.b16 %v8956_v7 }
 0x82b   :  { %v1360_v26 = vpop.permute.xlu0 %1359 }
 0x82c   :  { %v1414_v51 = vunpack.c.l.b16 %v8967_v15  ;;  %v8978_v27 = vpack.c.bf16 %v8969_v31, %v8969_v31  ;;  %v8980_v47 = vadd.f32 %v1385_v53, %v1377_v3  ;;  %v1378_v59 = vmul.f32 %v1360_v26, %v1338_v22 }
 0x82d   :  { %v1362_v12 = vpop.permute.xlu1 %1361  ;;  %v1490_v37 = vrot.slane %v1415_v63, 6 }
 0x82e   :  { %v1488_v2 = vrot.slane %v1414_v51, 7  ;;  %v1416_v30 = vunpack.c.l.b16 %v8978_v27  ;;  %v8991_v61 = vpack.c.bf16 %v8980_v47, %v8980_v47  ;;  %v1379_v20 = vmul.f32 %v1362_v12, %v1339_v13 }
 0x82f   :  { %v8993_v34 = vadd.f32 %v1386_v48, %v1378_v59  ;;  %v1364_v18 = vpop.permute.xlu0 %1363 }
 0x830   :  { %v1489_v62 = vsel %vm699_vm4, %v1488_v2, %v1413_v29  ;;  %v1492_v55 = vrot.slane %v1416_v30, 5  ;;  %v1417_v9 = vunpack.c.l.b16 %v8991_v61  ;;  %v8998_v10 = vadd.f32 %v1387_v19, %v1379_v20 }
 0x831   :  { %v1491_v43 = vsel %vm702_vm5, %v1490_v37, %v1489_v62  ;;  %v9003_v45 = vpack.c.bf16 %v8993_v34, %v8993_v34  ;;  %v1380_v56 = vmul.f32 %v1364_v18, %v1340_v38 }
 0x832   :  { %v1493_v42 = vsel %vm705_vm6, %v1492_v55, %v1491_v43  ;;  %v1494_v11 = vrot.slane %v1417_v9, 4  ;;  %v9010_v6 = vpack.c.bf16 %v8998_v10, %v8998_v10  ;;  %v9042_v55 = vld [vmem:[#allocation2 + $0x3] sm:$0x1] }
 0x833   :  { %v1418_v52 = vunpack.c.l.b16 %v9003_v45  ;;  %v9013_v50 = vadd.f32 %v1388_v28, %v1380_v56  ;;  %v9045_v28 = vld [vmem:[#allocation2 + $0x23] sm:$0x1] }
 0x834   :  { %v1419_v57 = vunpack.c.l.b16 %v9010_v6  ;;  %v1495_v58 = vsel %vm708_vm7, %v1494_v11, %v1493_v42  ;;  %v9048_v11 = vld [vmem:[#allocation2 + $0x13] sm:$0x1] }
 0x835   :  { %v1496_v14 = vrot.slane %v1418_v52, 3  ;;  %v9019_v60 = vpack.c.bf16 %v9013_v50, %v9013_v50 }
 0x836   :  { %v1498_v1 = vrot.slane %v1419_v57, 2 }
 0x837   :  { %v1420_v23 = vunpack.c.l.b16 %v9019_v60  ;;  %v1497_v53 = vsel %vm711_vm8, %v1496_v14, %v1495_v58  ;;  %v9051_v14 = vld [vmem:[#allocation2 + $0x33] sm:$0x1] }
 0x838   :  { %v1499_v3 = vsel %vm714_vm9, %v1498_v1, %v1497_v53 }
 0x839   :  { %v1500_v63 = vrot.slane %v1420_v23, 1 }
 0x83b   :  { %v1501_v22 = vsel %vm11873_vm10, %v1500_v63, %v1499_v3  ;;  %v9054_v3 = vld [vmem:[#allocation2 + $0x43] sm:$0x1] }
 0x83c   :  { %v1502_v26 = vpack.c.b16 %v1501_v22, %v1501_v22 }
 0x83e   :  { %1503 = vrot.lane.b32.xlu1 %v1502_v26, %s8332_s8 }
 0x8b0   :  { %v1504_v51 = vpop.permute.xlu1 %1503 }
 0x8b1   :  { %7174 = vmatmul.mubr.msk.bf16.vlgmr.msra.gmra.mrb[12].mxu1 %vm11872_vm0, %v1504_v51  ;;  %v9057_v51 = vld [vmem:[#allocation2 + $0x53] sm:$0x1] }
 0x8b2   :  { %7186 = vmatpush3.bf16.msra.mxu1 %v8847_v49  ;;  %7189 = vmatprep.mubr.msk.bf16.mxu1 %vm8330_vm1, %v11798_v0 }
 0x8b3   :  { %7187 = vmatprep.subr.bf16.mxu1 %v11798_v0 }
 0x8b6   :  { %7188 = vmatpush3.bf16.msra.mxu1 %v8853_v35 }
 0x8b7   :  { %7201 = vmatprep.subr.bf16.mxu1 %v11798_v0 }
 0x984   :  { %v1542_v13 = vpop.f32.mrb[12].mxu1 }
 0x985   :  { %v7175_v29 = vpop.f32.mrb[13].mxu1  ;;  %v1628_v19 = vadd.f32 %v1542_v13, %v8467_v21  ;;  %v1558_v62 = vrot.slane %v1542_v13, 2  ;;  %v1557_v9 = vrot.slane %v1542_v13, 1  ;;  %v1572_v43 = vadd.f32 %v9042_v55, %v1542_v13 }
 0x986   :  { %v1545_v48 = vpop.f32.mrb[14].mxu1  ;;  %v1559_v56 = vrot.slane %v1542_v13, 3  ;;  %v1560_v52 = vrot.slane %v1542_v13, 4  ;;  %v1561_v1 = vrot.slane %v1542_v13, 5  ;;  %v1562_v63 = vrot.slane %v1542_v13, 6 }
 0x987   :  { %v7176_v59 = vpop.f32.mrb[15].mxu1  ;;  %1637 = vrot.lane.b32.xlu0 %v1628_v19, %s8326_s30  ;;  %v1631_v12 = vrot.slane %v1628_v19, 2  ;;  %v1630_v2 = vrot.slane %v1628_v19, 1  ;;  %v1632_v30 = vrot.slane %v1628_v19, 3  ;;  %v1633_v20 = vrot.slane %v1628_v19, 4 }
 0x988   :  { %v1634_v37 = vrot.slane %v1628_v19, 5  ;;  %v1635_v38 = vrot.slane %v1628_v19, 6  ;;  %v1636_v18 = vrot.slane %v1628_v19, 7  ;;  %v1574_v42 = vadd.f32 %v1558_v62, %v9045_v28  ;;  %v9060_v19 = vld [vmem:[#allocation2 + $0x63] sm:$0x1] }
 0x989   :  { %1641 = vrot.lane.b32.xlu1 %v1631_v12, %s8326_s30  ;;  %v1573_v57 = vadd.f32 %v1557_v9, %v9048_v11  ;;  %v6722_v58 = vmul.f32 -1.442695, %v1572_v43  ;;  %v1575_v23 = vadd.f32 %v1559_v56, %v9051_v14  ;;  %v1576_v22 = vadd.f32 %v1560_v52, %v9054_v3 }
 0x98a   :  { %v6724_v53 = vmul.f32 -1.442695, %v1574_v42  ;;  %v1563_v29 = vrot.slane %v1542_v13, 7  ;;  %v1577_v48 = vadd.f32 %v1561_v1, %v9057_v51  ;;  %v1578_v12 = vadd.f32 %v1562_v63, %v9060_v19 }
 0x98b   :  { %1639 = vrot.lane.b32.xlu0 %v1630_v2, %s8326_s30  ;;  %7598 = vpow2.f32 %v6722_v58  ;;  %v6723_v26 = vmul.f32 -1.442695, %v1573_v57  ;;  %v6725_v59 = vmul.f32 -1.442695, %v1575_v23  ;;  %v6726_v2 = vmul.f32 -1.442695, %v1576_v22 }
 0x98c   :  { %7600 = vpow2.f32 %v6724_v53 }
 0x98d   :  { %1643 = vrot.lane.b32.xlu1 %v1632_v30, %s8326_s30  ;;  %7602 = vpow2.f32 %v6723_v26  ;;  %v9063_v30 = vld [vmem:[#allocation2 + $0x73] sm:$0x1] }
 0x98e   :  { %7604 = vpow2.f32 %v6725_v59 }
 0x98f   :  { %1645 = vrot.lane.b32.xlu0 %v1633_v20, %s8326_s30  ;;  %v1579_v20 = vadd.f32 %v1563_v29, %v9063_v30  ;;  %7606 = vpow2.f32 %v6726_v2 }
 0x991   :  { %1647 = vrot.lane.b32.xlu1 %v1634_v37, %s8326_s30  ;;  %v6727_v37 = vmul.f32 -1.442695, %v1577_v48  ;;  %v6729_v13 = vmul.f32 -1.442695, %v1579_v20 }
 0x993   :  { %1649 = vrot.lane.b32.xlu0 %v1635_v38, %s8326_s30  ;;  %v6728_v38 = vmul.f32 -1.442695, %v1578_v12  ;;  %7608 = vpow2.f32 %v6727_v37 }
 0x995   :  { %1651 = vrot.lane.b32.xlu1 %v1636_v18, %s8326_s30  ;;  %v7599_v18 = vpop.eup %7598  ;;  %7610 = vpow2.f32 %v6728_v38 }
 0x996   :  { %v7601_v62 = vpop.eup %7600  ;;  %v1604_v9 = vadd.f32 1.0, %v7599_v18  ;;  %7612 = vpow2.f32 %v6729_v13 }
 0x997   :  { %v7603_v43 = vpop.eup %7602  ;;  %v1606_v56 = vadd.f32 1.0, %v7601_v62 }
 0x998   :  { %v7605_v42 = vpop.eup %7604  ;;  %7614 = vrcp.f32 %v1604_v9  ;;  %v1605_v52 = vadd.f32 1.0, %v7603_v43 }
 0x999   :  { %v7607_v57 = vpop.eup %7606  ;;  %7616 = vrcp.f32 %v1606_v56  ;;  %v1607_v58 = vadd.f32 1.0, %v7605_v42 }
 0x99a   :  { %7618 = vrcp.f32 %v1605_v52  ;;  %v1608_v23 = vadd.f32 1.0, %v7607_v57 }
 0x99b   :  { %7620 = vrcp.f32 %v1607_v58 }
 0x99c   :  { %7622 = vrcp.f32 %v1608_v23 }
 0x99d   :  { %v7609_v1 = vpop.eup %7608 }
 0x99e   :  { %v1609_v63 = vadd.f32 1.0, %v7609_v1 }
 0x99f   :  { %v7611_v53 = vpop.eup %7610 }
 0x9a0   :  { %v7613_v22 = vpop.eup %7612  ;;  %v1610_v26 = vadd.f32 1.0, %v7611_v53  ;;  %7624 = vrcp.f32 %v1609_v63 }
 0x9a1   :  { %v1611_v59 = vadd.f32 1.0, %v7613_v22 }
 0x9a2   :  { %v9066_v29 = vpop.eup %7614  ;;  %7626 = vrcp.f32 %v1610_v26 }
 0x9a3   :  { %v9069_v2 = vpop.eup %7616  ;;  %7628 = vrcp.f32 %v1611_v59 }
 0x9a4   :  { %v9073_v38 = vpop.eup %7618 }
 0x9a5   :  { %v9077_v62 = vpop.eup %7620 }
 0x9a6   :  { %v9081_v56 = vpop.eup %7622 }
 0x9aa   :  { %v9085_v57 = vpop.eup %7624 }
 0x9ac   :  { %v9089_v23 = vpop.eup %7626 }
 0x9ad   :  { %v9093_v22 = vpop.eup %7628 }
 0x9f9   :  { %v1638_v48 = vpop.permute.xlu0 %1637 }
 0x9fa   :  { %v1661_v12 = vmul.f32 %v9066_v29, %v1638_v48 }
 0x9fb   :  { %v1642_v20 = vpop.permute.xlu1 %1641 }
 0x9fc   :  { %1677 = vrot.lane.b32.xlu0 %v1661_v12, %s8326_s30  ;;  %v1663_v37 = vmul.f32 %v9069_v2, %v1642_v20 }
 0x9fd   :  { %v1640_v18 = vpop.permute.xlu0 %1639 }
 0x9fe   :  { %1681 = vrot.lane.b32.xlu1 %v1663_v37, %s8326_s30  ;;  %v1662_v13 = vmul.f32 %v9073_v38, %v1640_v18 }
 0x9ff   :  { %v1644_v9 = vpop.permute.xlu1 %1643 }
 0xa00   :  { %1679 = vrot.lane.b32.xlu0 %v1662_v13, %s8326_s30  ;;  %v1664_v43 = vmul.f32 %v9077_v62, %v1644_v9 }
 0xa01   :  { %v1646_v42 = vpop.permute.xlu0 %1645 }
 0xa02   :  { %1683 = vrot.lane.b32.xlu1 %v1664_v43, %s8326_s30  ;;  %v1665_v52 = vmul.f32 %v9081_v56, %v1646_v42 }
 0xa03   :  { %v1648_v58 = vpop.permute.xlu1 %1647 }
 0xa04   :  { %1685 = vrot.lane.b32.xlu0 %v1665_v52, %s8326_s30  ;;  %v1666_v1 = vmul.f32 %v9085_v57, %v1648_v58 }
 0xa05   :  { %v1650_v53 = vpop.permute.xlu0 %1649 }
 0xa06   :  { %v1667_v63 = vmul.f32 %v9089_v23, %v1650_v53  ;;  %1687 = vrot.lane.b32.xlu1 %v1666_v1, %s8326_s30 }
 0xa07   :  { %v1652_v26 = vpop.permute.xlu1 %1651 }
 0xa08   :  { %v1668_v48 = vmul.f32 %v9093_v22, %v1652_v26  ;;  %1689 = vrot.lane.b32.xlu0 %v1667_v63, %s8326_s30 }
 0xa0a   :  { %1691 = vrot.lane.b32.xlu1 %v1668_v48, %s8326_s30 }
 0xa6e   :  { %v1678_v59 = vpop.permute.xlu0 %1677 }
 0xa6f   :  { %v1701_v12 = vadd.f32 %v1678_v59, %v9042_v55 }
 0xa70   :  { %v1682_v20 = vpop.permute.xlu1 %1681 }
 0xa71   :  { %7630 = vtanh.f32 %v1701_v12  ;;  %v1703_v37 = vadd.f32 %v1682_v20, %v9045_v28  ;;  %v1765_v20 = vmul.f32 %v9066_v29, %v8945_v24  ;;  %v1766_v24 = vmul.f32 %v9073_v38, %v8958_v17 }
 0xa72   :  { %v1680_v18 = vpop.permute.xlu0 %1679 }
 0xa73   :  { %7632 = vtanh.f32 %v1703_v37  ;;  %v1702_v13 = vadd.f32 %v1680_v18, %v9048_v11  ;;  %v1719_v18 = vsub.f32 1.0, %v9069_v2 }
 0xa74   :  { %v1684_v9 = vpop.permute.xlu1 %1683 }
 0xa75   :  { %7634 = vtanh.f32 %v1702_v13  ;;  %v1704_v43 = vadd.f32 %v1684_v9, %v9051_v14 }
 0xa76   :  { %v1686_v42 = vpop.permute.xlu0 %1685 }
 0xa77   :  { %7636 = vtanh.f32 %v1704_v43  ;;  %v1705_v52 = vadd.f32 %v1686_v42, %v9054_v3  ;;  %v1767_v43 = vmul.f32 %v9069_v2, %v8947_v44  ;;  %v1721_v44 = vsub.f32 1.0, %v9081_v56 }
 0xa78   :  { %v1688_v58 = vpop.permute.xlu1 %1687 }
 0xa79   :  { %7638 = vtanh.f32 %v1705_v52  ;;  %v1706_v55 = vadd.f32 %v1688_v58, %v9057_v51  ;;  %v1718_v52 = vsub.f32 1.0, %v9073_v38  ;;  %v1722_v38 = vsub.f32 1.0, %v9085_v57 }
 0xa7a   :  { %v1690_v1 = vpop.permute.xlu0 %1689 }
 0xa7b   :  { %v7631_v53 = vpop.eup %7630  ;;  %7640 = vtanh.f32 %v1706_v55  ;;  %v1707_v28 = vadd.f32 %v1690_v1, %v9060_v19 }
 0xa7c   :  { %v1692_v63 = vpop.permute.xlu1 %1691  ;;  %1733 = vrot.lane.b32.xlu0 %v7631_v53, %s8332_s8  ;;  %v1720_v53 = vsub.f32 1.0, %v9077_v62 }
 0xa7d   :  { %v7633_v11 = vpop.eup %7632  ;;  %7642 = vtanh.f32 %v1707_v28  ;;  %v1708_v14 = vadd.f32 %v1692_v63, %v9063_v30  ;;  %v1717_v30 = vsub.f32 1.0, %v9066_v29  ;;  %v1768_v28 = vmul.f32 %v9077_v62, %v8969_v31 }
 0xa7e   :  { %1737 = vrot.lane.b32.xlu1 %v7633_v11, %s8332_s8  ;;  %v1723_v31 = vsub.f32 1.0, %v9089_v23 }
 0xa7f   :  { %v7635_v26 = vpop.eup %7634  ;;  %7644 = vtanh.f32 %v1708_v14 }
 0xa80   :  { %1735 = vrot.lane.b32.xlu0 %v7635_v26, %s8332_s8  ;;  %v1769_v26 = vmul.f32 %v9081_v56, %v8980_v47 }
 0xa81   :  { %v7637_v3 = vpop.eup %7636 }
 0xa82   :  { %1739 = vrot.lane.b32.xlu1 %v7637_v3, %s8332_s8 }
 0xa83   :  { %v7639_v51 = vpop.eup %7638 }
 0xa84   :  { %1741 = vrot.lane.b32.xlu0 %v7639_v51, %s8332_s8  ;;  %v1770_v51 = vmul.f32 %v9085_v57, %v8993_v34 }
 0xa85   :  { %v7641_v19 = vpop.eup %7640 }
 0xa86   :  { %1743 = vrot.lane.b32.xlu1 %v7641_v19, %s8332_s8 }
 0xa87   :  { %v7643_v48 = vpop.eup %7642 }
 0xa88   :  { %1745 = vrot.lane.b32.xlu0 %v7643_v48, %s8332_s8 }
 0xa89   :  { %v7645_v59 = vpop.eup %7644 }
 0xa8a   :  { %1747 = vrot.lane.b32.xlu1 %v7645_v59, %s8332_s8  ;;  %v1771_v59 = vmul.f32 %v9089_v23, %v8998_v10 }
 0xaee   :  { %v1734_v12 = vpop.permute.xlu0 %1733 }
 0xaef   :  { %v1757_v37 = vmul.f32 %v1734_v12, %v1717_v30  ;;  %v1724_v12 = vsub.f32 1.0, %v9093_v22 }
 0xaf0   :  { %v1738_v13 = vpop.permute.xlu1 %1737 }
 0xaf1   :  { %v9118_v9 = vadd.f32 %v1765_v20, %v1757_v37  ;;  %v1759_v42 = vmul.f32 %v1738_v13, %v1719_v18  ;;  %v1772_v20 = vmul.f32 %v9093_v22, %v9013_v50 }
 0xaf2   :  { %v1736_v58 = vpop.permute.xlu0 %1735 }
 0xaf3   :  { %v1781_v55 = vpack.c.bf16 %v9118_v9, %v9118_v9  ;;  %v9125_v1 = vadd.f32 %v1767_v43, %v1759_v42  ;;  %v1758_v29 = vmul.f32 %v1736_v58, %v1718_v52 }
 0xaf4   :  { %v1740_v63 = vpop.permute.xlu1 %1739 }
 0xaf5   :  { %v1814_v2 = vshll.u32 %v1781_v55, 16  ;;  %v1783_v11 = vpack.c.bf16 %v9125_v1, %v9125_v1  ;;  %v9135_v14 = vadd.f32 %v1766_v24, %v1758_v29  ;;  %v1760_v3 = vmul.f32 %v1740_v63, %v1720_v53 }
 0xaf6   :  { %v1742_v17 = vpop.permute.xlu0 %1741  ;;  %v1797_v34 = vunpack.c.l.b16 %v1781_v55 }
 0xaf7   :  { %v1799_v62 = vunpack.c.l.b16 %v1783_v11  ;;  %v1822_v19 = vshll.u32 %v1783_v11, 16  ;;  %v1782_v48 = vpack.c.bf16 %v9135_v14, %v9135_v14  ;;  %v9147_v30 = vadd.f32 %v1768_v28, %v1760_v3 }
 0xaf8   :  { %v1761_v47 = vmul.f32 %v1742_v17, %v1721_v44  ;;  %v1744_v56 = vpop.permute.xlu1 %1743  ;;  %v9152_v57 = vrot.slane %v1814_v2, 7 }
 0xaf9   :  { %v1798_v37 = vunpack.c.l.b16 %v1782_v48  ;;  %v1818_v18 = vshll.u32 %v1782_v48, 16  ;;  %v9154_v13 = vrot.slane %v1822_v19, 7  ;;  %v1784_v43 = vpack.c.bf16 %v9147_v30, %v9147_v30 }
 0xafa   :  { %v9158_v10 = vadd.f32 %v1769_v26, %v1761_v47  ;;  %v1762_v23 = vmul.f32 %v1744_v56, %v1722_v38  ;;  %v1746_v42 = vpop.permute.xlu0 %1745  ;;  %v1897_v52 = vrot.slane %v1799_v62, 6 }
 0xafb   :  { %11874 = vst [vmem:[#allocation14_spill] sm:$0xff] %v9154_v13  ;;  %v9160_v58 = vrot.slane %v1818_v18, 7  ;;  %v1895_v24 = vrot.slane %v1798_v37, 7  ;;  %v1763_v29 = vmul.f32 %v1746_v42, %v1723_v31  ;;  %v1800_v50 = vunpack.c.l.b16 %v1784_v43 }
 0xafc   :  { %v1826_v22 = vshll.u32 %v1784_v43, 16  ;;  %v1785_v55 = vpack.c.bf16 %v9158_v10, %v9158_v10  ;;  %v9164_v53 = vadd.f32 %v1770_v51, %v1762_v23  ;;  %v1748_v28 = vpop.permute.xlu1 %1747 }
 0xafd   :  { %v1896_v63 = vsel %vm699_vm4, %v1895_v24, %v1797_v34  ;;  %v9167_v44 = vadd.f32 %v1771_v59, %v1763_v29  ;;  %v1764_v2 = vmul.f32 %v1748_v28, %v1724_v12  ;;  %v1899_v17 = vrot.slane %v1800_v50, 5 }
 0xafe   :  { %v9171_v26 = vrot.slane %v1826_v22, 7  ;;  %v1898_v3 = vsel %vm702_vm5, %v1897_v52, %v1896_v63  ;;  %v1801_v38 = vunpack.c.l.b16 %v1785_v55  ;;  %v1830_v31 = vshll.u32 %v1785_v55, 16 }
 0xaff   :  { %v1786_v51 = vpack.c.bf16 %v9164_v53, %v9164_v53  ;;  %v1787_v62 = vpack.c.bf16 %v9167_v44, %v9167_v44  ;;  %v9178_v19 = vadd.f32 %v1772_v20, %v1764_v2  ;;  %v1900_v48 = vsel %vm705_vm6, %v1899_v17, %v1898_v3 }
 0xb00   :  { %v1901_v59 = vrot.slane %v1801_v38, 4  ;;  %v9186_v23 = vrot.slane %v1830_v31, 7 }
 0xb01   :  { %v1802_v56 = vunpack.c.l.b16 %v1786_v51  ;;  %v1834_v12 = vshll.u32 %v1786_v51, 16  ;;  %v1803_v34 = vunpack.c.l.b16 %v1787_v62  ;;  %v1838_v18 = vshll.u32 %v1787_v62, 16 }
 0xb02   :  { %v1902_v37 = vsel %vm708_vm7, %v1901_v59, %v1900_v48  ;;  %v1788_v43 = vpack.c.bf16 %v9178_v19, %v9178_v19 }
 0xb03   :  { %v9188_v42 = vrot.slane %v1834_v12, 7  ;;  %v1903_v20 = vrot.slane %v1802_v56, 3  ;;  %v1905_v52 = vrot.slane %v1803_v34, 2  ;;  %v9193_v55 = vrot.slane %v1838_v18, 7 }
 0xb04   :  { %v1804_v24 = vunpack.c.l.b16 %v1788_v43  ;;  %v1842_v29 = vshll.u32 %v1788_v43, 16 }
 0xb05   :  { %v1904_v50 = vsel %vm711_vm8, %v1903_v20, %v1902_v37  ;;  %11875 = vst [vmem:[#allocation15_spill] sm:$0xff] %v9193_v55 }
 0xb06   :  { %v9195_v28 = vrot.slane %v1842_v29, 7  ;;  %v1907_v63 = vrot.slane %v1804_v24, 1  ;;  %v1906_v2 = vsel %vm714_vm9, %v1905_v52, %v1904_v50  ;;  %v9218_v52 = vld [vmem:[#allocation2 + $0x4] sm:$0x1] }
 0xb07   :  { %v9221_v50 = vld [vmem:[#allocation2 + $0x24] sm:$0x1] }
 0xb08   :  { %11876 = vst [vmem:[#allocation16_spill] sm:$0xff] %v9195_v28  ;;  %v1908_v3 = vsel %vm11873_vm10, %v1907_v63, %v1906_v2 }
 0xb09   :  { %v1909_v38 = vpack.c.b16 %v1908_v3, %v1908_v3  ;;  %v9224_v3 = vld [vmem:[#allocation2 + $0x14] sm:$0x1] }
 0xb0b   :  { %1910 = vrot.lane.b32.xlu0 %v1909_v38, %s8332_s8 }
 0xb7d   :  { %v1911_v31 = vpop.permute.xlu0 %1910 }
 0xb7e   :  { %7182 = vmatmul.mubr.msk.bf16.vlgmr.msra.gmra.mrb[16].mxu0 %vm11872_vm0, %v1911_v31 }
 0xb7f   :  { %7194 = vmatpush3.bf16.msra.mxu0 %v8847_v49  ;;  %7197 = vmatprep.mubr.msk.bf16.mxu0 %vm8330_vm1, %v11798_v0 }
 0xb80   :  { %7195 = vmatprep.subr.bf16.mxu0 %v11798_v0 }
 0xb83   :  { %7196 = vmatpush3.bf16.msra.mxu0 %v8853_v35 }
 0xb84   :  { %7209 = vmatprep.subr.bf16.mxu0 %v11798_v0 }
 0xc51   :  { %v1949_v51 = vpop.f32.mrb[16].mxu0 }
 0xc52   :  { %v7183_v62 = vpop.f32.mrb[17].mxu0  ;;  %v2035_v56 = vadd.f32 %v1949_v51, %v8467_v21  ;;  %v1965_v20 = vrot.slane %v1949_v51, 2  ;;  %v1964_v24 = vrot.slane %v1949_v51, 1  ;;  %v1979_v29 = vadd.f32 %v9218_v52, %v1949_v51 }
 0xc53   :  { %v1952_v48 = vpop.f32.mrb[18].mxu0  ;;  %v1966_v63 = vrot.slane %v1949_v51, 3  ;;  %v1967_v38 = vrot.slane %v1949_v51, 4 }
 0xc54   :  { %v7184_v59 = vpop.f32.mrb[19].mxu0  ;;  %2044 = vrot.lane.b32.xlu1 %v2035_v56, %s8326_s30  ;;  %v2038_v12 = vrot.slane %v2035_v56, 2  ;;  %v2037_v49 = vrot.slane %v2035_v56, 1  ;;  %v2039_v34 = vrot.slane %v2035_v56, 3  ;;  %v2040_v35 = vrot.slane %v2035_v56, 4 }
 0xc55   :  { %v2041_v37 = vrot.slane %v2035_v56, 5  ;;  %v2042_v18 = vrot.slane %v2035_v56, 6  ;;  %v2043_v43 = vrot.slane %v2035_v56, 7  ;;  %v1981_v2 = vadd.f32 %v1965_v20, %v9221_v50  ;;  %v9227_v48 = vld [vmem:[#allocation2 + $0x34] sm:$0x1] }
 0xc56   :  { %2048 = vrot.lane.b32.xlu0 %v2038_v12, %s8326_s30  ;;  %v1980_v31 = vadd.f32 %v1964_v24, %v9224_v3  ;;  %v6739_v62 = vmul.f32 -1.442695, %v1979_v29  ;;  %v1968_v59 = vrot.slane %v1949_v51, 5  ;;  %v1982_v56 = vadd.f32 %v1966_v63, %v9227_v48  ;;  %v9236_v29 = vld [vmem:[#allocation2 + $0x64] sm:$0x1] }
 0xc57   :  { %v6741_v12 = vmul.f32 -1.442695, %v1981_v2  ;;  %v9239_v2 = vld [vmem:[#allocation2 + $0x74] sm:$0x1] }
 0xc58   :  { %2046 = vrot.lane.b32.xlu1 %v2037_v49, %s8326_s30  ;;  %v9230_v49 = vld [vmem:[#allocation2 + $0x44] sm:$0x1]  ;;  %7646 = vpow2.f32 %v6739_v62  ;;  %v6742_v24 = vmul.f32 -1.442695, %v1982_v56 }
 0xc59   :  { %7648 = vpow2.f32 %v6741_v12 }
 0xc5a   :  { %2050 = vrot.lane.b32.xlu0 %v2039_v34, %s8326_s30  ;;  %v1969_v34 = vrot.slane %v1949_v51, 6 }
 0xc5c   :  { %2052 = vrot.lane.b32.xlu1 %v2040_v35, %s8326_s30  ;;  %v1983_v35 = vadd.f32 %v1967_v38, %v9230_v49  ;;  %v1985_v17 = vadd.f32 %v1969_v34, %v9236_v29 }
 0xc5e   :  { %2054 = vrot.lane.b32.xlu0 %v2041_v37, %s8326_s30  ;;  %v6740_v37 = vmul.f32 -1.442695, %v1980_v31  ;;  %v6743_v63 = vmul.f32 -1.442695, %v1983_v35  ;;  %v6745_v31 = vmul.f32 -1.442695, %v1985_v17 }
 0xc60   :  { %2056 = vrot.lane.b32.xlu1 %v2042_v18, %s8326_s30  ;;  %v9233_v18 = vld [vmem:[#allocation2 + $0x54] sm:$0x1]  ;;  %7650 = vpow2.f32 %v6740_v37 }
 0xc61   :  { %v1984_v20 = vadd.f32 %v1968_v59, %v9233_v18  ;;  %7652 = vpow2.f32 %v6742_v24 }
 0xc62   :  { %2058 = vrot.lane.b32.xlu0 %v2043_v43, %s8326_s30  ;;  %v1970_v43 = vrot.slane %v1949_v51, 7  ;;  %7654 = vpow2.f32 %v6743_v63  ;;  %v7647_v62 = vpop.eup %7646 }
 0xc63   :  { %v6744_v38 = vmul.f32 -1.442695, %v1984_v20  ;;  %v7649_v59 = vpop.eup %7648  ;;  %v2011_v56 = vadd.f32 1.0, %v7647_v62 }
 0xc64   :  { %v1986_v47 = vadd.f32 %v1970_v43, %v9239_v2  ;;  %v2013_v22 = vadd.f32 1.0, %v7649_v59 }
 0xc65   :  { %7656 = vpow2.f32 %v6744_v38 }
 0xc66   :  { %v6746_v51 = vmul.f32 -1.442695, %v1986_v47  ;;  %7658 = vpow2.f32 %v6745_v31 }
 0xc68   :  { %7660 = vpow2.f32 %v6746_v51 }
 0xc69   :  { %7662 = vrcp.f32 %v2011_v56 }
 0xc6a   :  { %v7651_v12 = vpop.eup %7650  ;;  %7664 = vrcp.f32 %v2013_v22 }
 0xc6b   :  { %v7653_v34 = vpop.eup %7652  ;;  %v2012_v35 = vadd.f32 1.0, %v7651_v12 }
 0xc6c   :  { %v7655_v37 = vpop.eup %7654  ;;  %v2014_v11 = vadd.f32 1.0, %v7653_v34 }
 0xc6d   :  { %7666 = vrcp.f32 %v2012_v35  ;;  %v2015_v20 = vadd.f32 1.0, %v7655_v37 }
 0xc6e   :  { %7668 = vrcp.f32 %v2014_v11 }
 0xc6f   :  { %v7657_v43 = vpop.eup %7656  ;;  %7670 = vrcp.f32 %v2015_v20 }
 0xc70   :  { %v7659_v24 = vpop.eup %7658  ;;  %v2016_v17 = vadd.f32 1.0, %v7657_v43 }
 0xc71   :  { %v2017_v47 = vadd.f32 1.0, %v7659_v24 }
 0xc72   :  { %v7661_v63 = vpop.eup %7660  ;;  %7672 = vrcp.f32 %v2016_v17 }
 0xc73   :  { %v9242_v38 = vpop.eup %7662  ;;  %v2018_v62 = vadd.f32 1.0, %v7661_v63  ;;  %7674 = vrcp.f32 %v2017_v47 }
 0xc74   :  { %v9245_v59 = vpop.eup %7664 }
 0xc75   :  { %7676 = vrcp.f32 %v2018_v62 }
 0xc77   :  { %v9249_v11 = vpop.eup %7666 }
 0xc78   :  { %v9253_v35 = vpop.eup %7668 }
 0xc79   :  { %v9257_v20 = vpop.eup %7670 }
 0xc7c   :  { %v9261_v63 = vpop.eup %7672 }
 0xc7d   :  { %v9265_v62 = vpop.eup %7674 }
 0xcc6   :  { %v2045_v31 = vpop.permute.xlu1 %2044 }
 0xcc7   :  { %v2068_v51 = vmul.f32 %v9242_v38, %v2045_v31 }
 0xcc8   :  { %v2049_v22 = vpop.permute.xlu0 %2048 }
 0xcc9   :  { %v2070_v56 = vmul.f32 %v9245_v59, %v2049_v22  ;;  %2084 = vrot.lane.b32.xlu1 %v2068_v51, %s8326_s30 }
 0xcca   :  { %v2047_v12 = vpop.permute.xlu1 %2046 }
 0xccb   :  { %v2069_v34 = vmul.f32 %v9249_v11, %v2047_v12  ;;  %2088 = vrot.lane.b32.xlu0 %v2070_v56, %s8326_s30  ;;  %v9269_v56 = vpop.eup %7676 }
 0xccc   :  { %v2051_v37 = vpop.permute.xlu0 %2050 }
 0xccd   :  { %v2071_v43 = vmul.f32 %v9253_v35, %v2051_v37  ;;  %2086 = vrot.lane.b32.xlu1 %v2069_v34, %s8326_s30 }
 0xcce   :  { %v2053_v24 = vpop.permute.xlu1 %2052 }
 0xccf   :  { %v2072_v17 = vmul.f32 %v9257_v20, %v2053_v24  ;;  %2090 = vrot.lane.b32.xlu0 %v2071_v43, %s8326_s30 }
 0xcd0   :  { %v2055_v47 = vpop.permute.xlu0 %2054 }
 0xcd1   :  { %v2073_v31 = vmul.f32 %v9261_v63, %v2055_v47  ;;  %2092 = vrot.lane.b32.xlu1 %v2072_v17, %s8326_s30 }
 0xcd2   :  { %v2057_v51 = vpop.permute.xlu1 %2056 }
 0xcd3   :  { %v2074_v22 = vmul.f32 %v9265_v62, %v2057_v51  ;;  %2094 = vrot.lane.b32.xlu0 %v2073_v31, %s8326_s30 }
 0xcd4   :  { %v2059_v12 = vpop.permute.xlu0 %2058 }
 0xcd5   :  { %v2075_v34 = vmul.f32 %v9269_v56, %v2059_v12  ;;  %2096 = vrot.lane.b32.xlu1 %v2074_v22, %s8326_s30 }
 0xcd7   :  { %2098 = vrot.lane.b32.xlu0 %v2075_v34, %s8326_s30 }
 0xd3b   :  { %v2085_v37 = vpop.permute.xlu1 %2084 }
 0xd3c   :  { %v2108_v43 = vadd.f32 %v2085_v37, %v9218_v52 }
 0xd3d   :  { %v2089_v24 = vpop.permute.xlu0 %2088 }
 0xd3e   :  { %7678 = vtanh.f32 %v2108_v43  ;;  %v2110_v17 = vadd.f32 %v2089_v24, %v9221_v50 }
 0xd3f   :  { %v2087_v47 = vpop.permute.xlu1 %2086 }
 0xd40   :  { %7680 = vtanh.f32 %v2110_v17  ;;  %v2109_v31 = vadd.f32 %v2087_v47, %v9224_v3 }
 0xd41   :  { %v2091_v51 = vpop.permute.xlu0 %2090 }
 0xd42   :  { %7682 = vtanh.f32 %v2109_v31  ;;  %v2111_v0 = vadd.f32 %v2091_v51, %v9227_v48 }
 0xd43   :  { %v2093_v12 = vpop.permute.xlu1 %2092 }
 0xd44   :  { %7684 = vtanh.f32 %v2111_v0  ;;  %v2112_v22 = vadd.f32 %v2093_v12, %v9230_v49  ;;  %v2126_v12 = vsub.f32 1.0, %v9245_v59 }
 0xd45   :  { %v2095_v34 = vpop.permute.xlu0 %2094 }
 0xd46   :  { %7686 = vtanh.f32 %v2112_v22  ;;  %v2113_v52 = vadd.f32 %v2095_v34, %v9233_v18  ;;  %v2172_v22 = vmul.f32 %v9242_v38, %v9118_v9  ;;  %v2175_v9 = vmul.f32 %v9253_v35, %v9147_v30 }
 0xd47   :  { %v2097_v37 = vpop.permute.xlu1 %2096 }
 0xd48   :  { %v7679_v43 = vpop.eup %7678  ;;  %7688 = vtanh.f32 %v2113_v52  ;;  %v2114_v50 = vadd.f32 %v2097_v37, %v9236_v29  ;;  %v2174_v52 = vmul.f32 %v9245_v59, %v9125_v1 }
 0xd49   :  { %v2099_v24 = vpop.permute.xlu0 %2098  ;;  %2140 = vrot.lane.b32.xlu1 %v7679_v43, %s8332_s8  ;;  %v2125_v43 = vsub.f32 1.0, %v9249_v11 }
 0xd4a   :  { %v7681_v3 = vpop.eup %7680  ;;  %7690 = vtanh.f32 %v2114_v50  ;;  %v2115_v48 = vadd.f32 %v2099_v24, %v9239_v2  ;;  %v2124_v2 = vsub.f32 1.0, %v9242_v38 }
 0xd4b   :  { %2144 = vrot.lane.b32.xlu0 %v7681_v3, %s8332_s8 }
 0xd4c   :  { %v7683_v0 = vpop.eup %7682  ;;  %7692 = vtanh.f32 %v2115_v48  ;;  %v2173_v48 = vmul.f32 %v9249_v11, %v9135_v14 }
 0xd4d   :  { %2142 = vrot.lane.b32.xlu1 %v7683_v0, %s8332_s8 }
 0xd4e   :  { %v7685_v49 = vpop.eup %7684 }
 0xd4f   :  { %2146 = vrot.lane.b32.xlu0 %v7685_v49, %s8332_s8  ;;  %v2127_v49 = vsub.f32 1.0, %v9253_v35  ;;  %v2176_v35 = vmul.f32 %v9257_v20, %v9158_v10  ;;  %v2177_v10 = vmul.f32 %v9261_v63, %v9164_v53 }
 0xd50   :  { %v7687_v18 = vpop.eup %7686 }
 0xd51   :  { %2148 = vrot.lane.b32.xlu1 %v7687_v18, %s8332_s8 }
 0xd52   :  { %v7689_v29 = vpop.eup %7688 }
 0xd53   :  { %2150 = vrot.lane.b32.xlu0 %v7689_v29, %s8332_s8  ;;  %v2128_v29 = vsub.f32 1.0, %v9257_v20 }
 0xd54   :  { %v7691_v17 = vpop.eup %7690 }
 0xd55   :  { %2152 = vrot.lane.b32.xlu1 %v7691_v17, %s8332_s8 }
 0xd56   :  { %v7693_v47 = vpop.eup %7692 }
 0xd57   :  { %2154 = vrot.lane.b32.xlu0 %v7693_v47, %s8332_s8 }
 0xdbb   :  { %v2141_v31 = vpop.permute.xlu1 %2140 }
 0xdbc   :  { %v2164_v51 = vmul.f32 %v2141_v31, %v2124_v2  ;;  %v2129_v31 = vsub.f32 1.0, %v9261_v63 }
 0xdbd   :  { %v2145_v34 = vpop.permute.xlu0 %2144 }
 0xdbe   :  { %v2166_v37 = vmul.f32 %v2145_v34, %v2126_v12  ;;  %v9297_v50 = vadd.f32 %v2172_v22, %v2164_v51 }
 0xdbf   :  { %v2143_v24 = vpop.permute.xlu1 %2142 }
 0xdc0   :  { %v9299_v3 = vadd.f32 %v2174_v52, %v2166_v37  ;;  %v2165_v0 = vmul.f32 %v2143_v24, %v2125_v43  ;;  %v9315_v17 = vpack.c.bf16 %v9297_v50, %v9297_v50  ;;  %v2130_v52 = vsub.f32 1.0, %v9265_v62 }
 0xdc1   :  { %v2147_v38 = vpop.permute.xlu0 %2146  ;;  %v2178_v43 = vmul.f32 %v9265_v62, %v9167_v44 }
 0xdc2   :  { %v9308_v1 = vpack.c.bf16 %v9299_v3, %v9299_v3  ;;  %v9310_v59 = vadd.f32 %v2173_v48, %v2165_v0  ;;  %v2167_v18 = vmul.f32 %v2147_v38, %v2127_v49  ;;  %11878 = vst [vmem:[#allocation18_spill] sm:$0xff] %v9315_v17  ;;  %v2204_v37 = vunpack.c.l.b16 %v9315_v17 }
 0xdc3   :  { %v2149_v14 = vpop.permute.xlu1 %2148 }
 0xdc4   :  { %11877 = vst [vmem:[#allocation17_spill] sm:$0xff] %v9308_v1  ;;  %v9319_v11 = vpack.c.bf16 %v9310_v59, %v9310_v59  ;;  %v9321_v30 = vadd.f32 %v2175_v9, %v2167_v18  ;;  %v2168_v47 = vmul.f32 %v2149_v14, %v2128_v29  ;;  %v2206_v2 = vunpack.c.l.b16 %v9308_v1 }
 0xdc5   :  { %v2151_v51 = vpop.permute.xlu0 %2150  ;;  %v2131_v29 = vsub.f32 1.0, %v9269_v56 }
 0xdc6   :  { %11879 = vst [vmem:[#allocation19_spill] sm:$0xff] %v9319_v11  ;;  %v2205_v12 = vunpack.c.l.b16 %v9319_v11  ;;  %v9330_v22 = vpack.c.bf16 %v9321_v30, %v9321_v30  ;;  %v9332_v34 = vadd.f32 %v2176_v35, %v2168_v47  ;;  %v2169_v20 = vmul.f32 %v2151_v51, %v2129_v31 }
 0xdc7   :  { %v2153_v24 = vpop.permute.xlu1 %2152  ;;  %v2281_v38 = vrot.slane %v2206_v2, 6  ;;  %v2179_v2 = vmul.f32 %v9269_v56, %v9178_v19 }
 0xdc8   :  { %11880 = vst [vmem:[#allocation20_spill] sm:$0xff] %v9330_v22  ;;  %v2279_v48 = vrot.slane %v2205_v12, 7  ;;  %v2207_v0 = vunpack.c.l.b16 %v9330_v22  ;;  %v9343_v49 = vpack.c.bf16 %v9332_v34, %v9332_v34  ;;  %v2170_v9 = vmul.f32 %v2153_v24, %v2130_v52 }
 0xdc9   :  { %v9345_v18 = vadd.f32 %v2177_v10, %v2169_v20  ;;  %v2155_v14 = vpop.permute.xlu0 %2154 }
 0xdca   :  { %11881 = vst [vmem:[#allocation21_spill] sm:$0xff] %v9343_v49  ;;  %v2280_v53 = vsel %vm699_vm4, %v2279_v48, %v2204_v37  ;;  %v2283_v63 = vrot.slane %v2207_v0, 5  ;;  %v2208_v44 = vunpack.c.l.b16 %v9343_v49  ;;  %v9350_v62 = vadd.f32 %v2178_v43, %v2170_v9 }
 0xdcb   :  { %v2282_v35 = vsel %vm702_vm5, %v2281_v38, %v2280_v53  ;;  %v9355_v47 = vpack.c.bf16 %v9345_v18, %v9345_v18  ;;  %v2171_v31 = vmul.f32 %v2155_v14, %v2131_v29 }
 0xdcc   :  { %v2284_v51 = vsel %vm705_vm6, %v2283_v63, %v2282_v35  ;;  %v2285_v12 = vrot.slane %v2208_v44, 4  ;;  %v9362_v52 = vpack.c.bf16 %v9350_v62, %v9350_v62  ;;  %v9379_v63 = vld [vmem:[#allocation9] sm:$0xff]   ;;  %v11885_v44 = vmov 0.0   ;;  %v9385_v35 = vld [vmem:[#allocation9 + $0x8] sm:$0xff]  }
 0xdcd   :  { %11882 = vst [vmem:[#allocation22_spill] sm:$0xff] %v9355_v47  ;;  %v2209_v37 = vunpack.c.l.b16 %v9355_v47  ;;  %v9365_v10 = vadd.f32 %v2179_v2, %v2171_v31 }
 0xdce   :  { %11883 = vst [vmem:[#allocation23_spill] sm:$0xff] %v9362_v52  ;;  %v2286_v20 = vsel %vm708_vm7, %v2285_v12, %v2284_v51  ;;  %v2210_v43 = vunpack.c.l.b16 %v9362_v52 }
 0xdcf   :  { %v2287_v24 = vrot.slane %v2209_v37, 3  ;;  %v9371_v19 = vpack.c.bf16 %v9365_v10, %v9365_v10 }
 0xdd0   :  { %v2289_v56 = vrot.slane %v2210_v43, 2 }
 0xdd1   :  { %11884 = vst [vmem:[#allocation24_spill] sm:$0xff] %v9371_v19  ;;  %v2211_v48 = vunpack.c.l.b16 %v9371_v19  ;;  %v2288_v0 = vsel %vm711_vm8, %v2287_v24, %v2286_v20  ;;  %v9410_v19 = vld [vmem:[#allocation2 + $0x45] sm:$0x1] }
 0xdd2   :  { %v2290_v9 = vsel %vm714_vm9, %v2289_v56, %v2288_v0 }
 0xdd3   :  { %v2291_v38 = vrot.slane %v2211_v48, 1 }
 0xdd5   :  { %v2292_v29 = vsel %vm11873_vm10, %v2291_v38, %v2290_v9 }
 0xdd6   :  { %v2293_v14 = vpack.c.b16 %v2292_v29, %v2292_v29  ;;  %v9398_v29 = vld [vmem:[#allocation2 + $0x5] sm:$0x1] }
 0xdd8   :  { %2294 = vrot.lane.b32.xlu1 %v2293_v14, %s8332_s8 }
 0xe4a   :  { %v2295_v53 = vpop.permute.xlu1 %2294 }
 0xe4b   :  { %7190 = vmatmul.mubr.msk.bf16.vlgmr.msra.gmra.mrb[16].mxu1 %vm11872_vm0, %v2295_v53 }
 0xe4c   :  { %7202 = vmatpush3.bf16.msra.mxu1 %v9379_v63  ;;  %7205 = vmatprep.mubr.msk.bf16.mxu1 %vm8330_vm1, %v11885_v44 }
 0xe4d   :  { %7203 = vmatprep.subr.bf16.mxu1 %v11885_v44 }
 0xe50   :  { %7204 = vmatpush3.bf16.msra.mxu1 %v9385_v35 }
 0xe51   :  { %7217 = vmatprep.subr.bf16.mxu1 %v11885_v44 }
 0xf1e   :  { %v2333_v2 = vpop.f32.mrb[16].mxu1 }
 0xf1f   :  { %v7191_v31 = vpop.f32.mrb[17].mxu1  ;;  %v2419_v37 = vadd.f32 %v2333_v2, %v8467_v21  ;;  %v2349_v38 = vrot.slane %v2333_v2, 2  ;;  %v2348_v14 = vrot.slane %v2333_v2, 1  ;;  %v2363_v53 = vadd.f32 %v9398_v29, %v2333_v2 }
 0xf20   :  { %v2336_v51 = vpop.f32.mrb[18].mxu1  ;;  %v9401_v31 = vld [vmem:[#allocation2 + $0x25] sm:$0x1]  ;;  %v2353_v47 = vrot.slane %v2333_v2, 6  ;;  %v2354_v49 = vrot.slane %v2333_v2, 7 }
 0xf21   :  { %v7192_v12 = vpop.f32.mrb[19].mxu1  ;;  %2428 = vrot.lane.b32.xlu0 %v2419_v37, %s8326_s30  ;;  %v2422_v20 = vrot.slane %v2419_v37, 2  ;;  %v2421_v43 = vrot.slane %v2419_v37, 1  ;;  %v2423_v24 = vrot.slane %v2419_v37, 3  ;;  %v2424_v56 = vrot.slane %v2419_v37, 4 }
 0xf22   :  { %v2425_v48 = vrot.slane %v2419_v37, 5  ;;  %v2426_v0 = vrot.slane %v2419_v37, 6  ;;  %v2427_v9 = vrot.slane %v2419_v37, 7  ;;  %v2350_v51 = vrot.slane %v2333_v2, 3  ;;  %v9407_v37 = vld [vmem:[#allocation2 + $0x35] sm:$0x1] }
 0xf23   :  { %2432 = vrot.lane.b32.xlu1 %v2422_v20, %s8326_s30  ;;  %v2365_v12 = vadd.f32 %v2349_v38, %v9401_v31  ;;  %v9404_v20 = vld [vmem:[#allocation2 + $0x15] sm:$0x1] }
 0xf24   :  { %v9413_v38 = vld [vmem:[#allocation2 + $0x55] sm:$0x1] }
 0xf25   :  { %2430 = vrot.lane.b32.xlu0 %v2421_v43, %s8326_s30  ;;  %v2351_v43 = vrot.slane %v2333_v2, 4 }
 0xf27   :  { %2434 = vrot.lane.b32.xlu1 %v2423_v24, %s8326_s30  ;;  %v2364_v24 = vadd.f32 %v2348_v14, %v9404_v20  ;;  %v2367_v52 = vadd.f32 %v2351_v43, %v9410_v19 }
 0xf29   :  { %2436 = vrot.lane.b32.xlu0 %v2424_v56, %s8326_s30  ;;  %v6756_v56 = vmul.f32 -1.442695, %v2363_v53  ;;  %v6757_v22 = vmul.f32 -1.442695, %v2364_v24  ;;  %v9416_v53 = vld [vmem:[#allocation2 + $0x65] sm:$0x1] }
 0xf2a   :  { %v2369_v1 = vadd.f32 %v2353_v47, %v9416_v53 }
 0xf2b   :  { %2438 = vrot.lane.b32.xlu1 %v2425_v48, %s8326_s30  ;;  %v2352_v48 = vrot.slane %v2333_v2, 5  ;;  %7694 = vpow2.f32 %v6756_v56 }
 0xf2c   :  { %v6762_v24 = vmul.f32 -1.442695, %v2369_v1 }
 0xf2d   :  { %2440 = vrot.lane.b32.xlu0 %v2426_v0, %s8326_s30  ;;  %v2366_v0 = vadd.f32 %v2350_v51, %v9407_v37  ;;  %v2368_v11 = vadd.f32 %v2352_v48, %v9413_v38  ;;  %v6760_v51 = vmul.f32 -1.442695, %v2367_v52 }
 0xf2f   :  { %2442 = vrot.lane.b32.xlu1 %v2427_v9, %s8326_s30  ;;  %v6758_v9 = vmul.f32 -1.442695, %v2365_v12  ;;  %v6759_v14 = vmul.f32 -1.442695, %v2366_v0  ;;  %v9419_v12 = vld [vmem:[#allocation2 + $0x75] sm:$0x1] }
 0xf30   :  { %v2370_v55 = vadd.f32 %v2354_v49, %v9419_v12  ;;  %v6761_v43 = vmul.f32 -1.442695, %v2368_v11 }
 0xf31   :  { %7696 = vpow2.f32 %v6758_v9 }
 0xf32   :  { %7698 = vpow2.f32 %v6757_v22  ;;  %v6763_v2 = vmul.f32 -1.442695, %v2370_v55 }
 0xf33   :  { %7700 = vpow2.f32 %v6759_v14 }
 0xf34   :  { %7702 = vpow2.f32 %v6760_v51 }
 0xf35   :  { %v7695_v56 = vpop.eup %7694  ;;  %7704 = vpow2.f32 %v6761_v43 }
 0xf36   :  { %7706 = vpow2.f32 %v6762_v24  ;;  %v2395_v0 = vadd.f32 1.0, %v7695_v56 }
 0xf37   :  { %7708 = vpow2.f32 %v6763_v2 }
 0xf38   :  { %7710 = vrcp.f32 %v2395_v0 }
 0xf3b   :  { %v7697_v48 = vpop.eup %7696 }
 0xf3c   :  { %v7699_v9 = vpop.eup %7698  ;;  %v2397_v28 = vadd.f32 1.0, %v7697_v48 }
 0xf3d   :  { %v7701_v47 = vpop.eup %7700  ;;  %v2396_v22 = vadd.f32 1.0, %v7699_v9 }
 0xf3e   :  { %v7703_v52 = vpop.eup %7702  ;;  %7712 = vrcp.f32 %v2397_v28  ;;  %v2398_v17 = vadd.f32 1.0, %v7701_v47 }
 0xf3f   :  { %v7705_v49 = vpop.eup %7704  ;;  %7714 = vrcp.f32 %v2396_v22  ;;  %v2399_v11 = vadd.f32 1.0, %v7703_v52 }
 0xf40   :  { %v7707_v14 = vpop.eup %7706  ;;  %7716 = vrcp.f32 %v2398_v17  ;;  %v2400_v1 = vadd.f32 1.0, %v7705_v49 }
 0xf41   :  { %v7709_v51 = vpop.eup %7708  ;;  %7718 = vrcp.f32 %v2399_v11  ;;  %v2401_v55 = vadd.f32 1.0, %v7707_v14 }
 0xf42   :  { %v9422_v43 = vpop.eup %7710  ;;  %7720 = vrcp.f32 %v2400_v1  ;;  %v2402_v56 = vadd.f32 1.0, %v7709_v51 }
 0xf43   :  { %7722 = vrcp.f32 %v2401_v55 }
 0xf44   :  { %7724 = vrcp.f32 %v2402_v56 }
 0xf48   :  { %v9425_v48 = vpop.eup %7712 }
 0xf49   :  { %v9429_v17 = vpop.eup %7714 }
 0xf4a   :  { %v9433_v22 = vpop.eup %7716 }
 0xf4b   :  { %v9437_v11 = vpop.eup %7718 }
 0xf4c   :  { %v9441_v51 = vpop.eup %7720 }
 0xf4d   :  { %v9445_v56 = vpop.eup %7722 }
 0xf93   :  { %v2429_v24 = vpop.permute.xlu0 %2428 }
 0xf94   :  { %v2452_v2 = vmul.f32 %v9422_v43, %v2429_v24 }
 0xf95   :  { %v2433_v28 = vpop.permute.xlu1 %2432 }
 0xf96   :  { %v2454_v0 = vmul.f32 %v9425_v48, %v2433_v28  ;;  %2468 = vrot.lane.b32.xlu0 %v2452_v2, %s8326_s30 }
 0xf97   :  { %v2431_v9 = vpop.permute.xlu0 %2430 }
 0xf98   :  { %v2453_v47 = vmul.f32 %v9429_v17, %v2431_v9  ;;  %2472 = vrot.lane.b32.xlu1 %v2454_v0, %s8326_s30  ;;  %v9449_v0 = vpop.eup %7724 }
 0xf99   :  { %v2435_v52 = vpop.permute.xlu1 %2434 }
 0xf9a   :  { %v2455_v49 = vmul.f32 %v9433_v22, %v2435_v52  ;;  %2470 = vrot.lane.b32.xlu0 %v2453_v47, %s8326_s30 }
 0xf9b   :  { %v2437_v14 = vpop.permute.xlu0 %2436 }
 0xf9c   :  { %v2456_v1 = vmul.f32 %v9437_v11, %v2437_v14  ;;  %2474 = vrot.lane.b32.xlu1 %v2455_v49, %s8326_s30 }
 0xf9d   :  { %v2439_v55 = vpop.permute.xlu1 %2438 }
 0xf9e   :  { %v2457_v24 = vmul.f32 %v9441_v51, %v2439_v55  ;;  %2476 = vrot.lane.b32.xlu0 %v2456_v1, %s8326_s30 }
 0xf9f   :  { %v2441_v2 = vpop.permute.xlu0 %2440 }
 0xfa0   :  { %v2458_v28 = vmul.f32 %v9445_v56, %v2441_v2  ;;  %2478 = vrot.lane.b32.xlu1 %v2457_v24, %s8326_s30 }
 0xfa1   :  { %v2443_v9 = vpop.permute.xlu1 %2442 }
 0xfa2   :  { %v2459_v47 = vmul.f32 %v9449_v0, %v2443_v9  ;;  %2480 = vrot.lane.b32.xlu0 %v2458_v28, %s8326_s30 }
 0xfa4   :  { %2482 = vrot.lane.b32.xlu1 %v2459_v47, %s8326_s30 }
0x1008   :  { %v2469_v52 = vpop.permute.xlu0 %2468 }
0x1009   :  { %v2492_v49 = vadd.f32 %v2469_v52, %v9398_v29 }
0x100a   :  { %v2473_v14 = vpop.permute.xlu1 %2472 }
0x100b   :  { %7726 = vtanh.f32 %v2492_v49  ;;  %v2494_v1 = vadd.f32 %v2473_v14, %v9401_v31 }
0x100c   :  { %v2471_v55 = vpop.permute.xlu0 %2470 }
0x100d   :  { %7728 = vtanh.f32 %v2494_v1  ;;  %v2493_v24 = vadd.f32 %v2471_v55, %v9404_v20 }
0x100e   :  { %v2475_v2 = vpop.permute.xlu1 %2474 }
0x100f   :  { %7730 = vtanh.f32 %v2493_v24  ;;  %v2495_v13 = vadd.f32 %v2475_v2, %v9407_v37  ;;  %v2556_v2 = vmul.f32 %v9422_v43, %v9297_v50  ;;  %v2557_v50 = vmul.f32 %v9429_v17, %v9310_v59 }
0x1010   :  { %v2477_v9 = vpop.permute.xlu0 %2476 }
0x1011   :  { %7732 = vtanh.f32 %v2495_v13  ;;  %v2496_v28 = vadd.f32 %v2477_v9, %v9410_v19 }
0x1012   :  { %v2479_v47 = vpop.permute.xlu1 %2478 }
0x1013   :  { %7734 = vtanh.f32 %v2496_v28  ;;  %v2497_v29 = vadd.f32 %v2479_v47, %v9413_v38  ;;  %v2510_v28 = vsub.f32 1.0, %v9425_v48 }
0x1014   :  { %v2481_v52 = vpop.permute.xlu0 %2480 }
0x1015   :  { %v7727_v49 = vpop.eup %7726  ;;  %7736 = vtanh.f32 %v2497_v29  ;;  %v2498_v31 = vadd.f32 %v2481_v52, %v9416_v53  ;;  %v2558_v52 = vmul.f32 %v9425_v48, %v9299_v3  ;;  %v2512_v3 = vsub.f32 1.0, %v9437_v11 }
0x1016   :  { %v2483_v14 = vpop.permute.xlu1 %2482  ;;  %2524 = vrot.lane.b32.xlu0 %v7727_v49, %s8332_s8 }
0x1017   :  { %v7729_v20 = vpop.eup %7728  ;;  %7738 = vtanh.f32 %v2498_v31  ;;  %v2499_v37 = vadd.f32 %v2483_v14, %v9419_v12  ;;  %v2508_v12 = vsub.f32 1.0, %v9422_v43  ;;  %v2509_v31 = vsub.f32 1.0, %v9429_v17 }
0x1018   :  { %2528 = vrot.lane.b32.xlu1 %v7729_v20, %s8332_s8  ;;  %v2513_v17 = vsub.f32 1.0, %v9441_v51 }
0x1019   :  { %v7731_v13 = vpop.eup %7730  ;;  %7740 = vtanh.f32 %v2499_v37 }
0x101a   :  { %2526 = vrot.lane.b32.xlu0 %v7731_v13, %s8332_s8  ;;  %v2511_v13 = vsub.f32 1.0, %v9433_v22 }
0x101b   :  { %v7733_v19 = vpop.eup %7732 }
0x101c   :  { %2530 = vrot.lane.b32.xlu1 %v7733_v19, %s8332_s8  ;;  %v2559_v19 = vmul.f32 %v9433_v22, %v9321_v30  ;;  %v2514_v30 = vsub.f32 1.0, %v9445_v56 }
0x101d   :  { %v7735_v38 = vpop.eup %7734 }
0x101e   :  { %2532 = vrot.lane.b32.xlu0 %v7735_v38, %s8332_s8 }
0x101f   :  { %v7737_v53 = vpop.eup %7736 }
0x1020   :  { %2534 = vrot.lane.b32.xlu1 %v7737_v53, %s8332_s8 }
0x1021   :  { %v7739_v1 = vpop.eup %7738 }
0x1022   :  { %2536 = vrot.lane.b32.xlu0 %v7739_v1, %s8332_s8 }
0x1023   :  { %v7741_v55 = vpop.eup %7740 }
0x1024   :  { %2538 = vrot.lane.b32.xlu1 %v7741_v55, %s8332_s8  ;;  %v2560_v55 = vmul.f32 %v9437_v11, %v9332_v34 }
0x1088   :  { %v2525_v24 = vpop.permute.xlu0 %2524 }
0x1089   :  { %v2548_v9 = vmul.f32 %v2525_v24, %v2508_v12  ;;  %v2561_v24 = vmul.f32 %v9441_v51, %v9345_v18 }
0x108a   :  { %v2529_v47 = vpop.permute.xlu1 %2528 }
0x108b   :  { %v9474_v29 = vadd.f32 %v2556_v2, %v2548_v9  ;;  %v2550_v49 = vmul.f32 %v2529_v47, %v2510_v28  ;;  %v2562_v28 = vmul.f32 %v9445_v56, %v9350_v62 }
0x108c   :  { %v2527_v14 = vpop.permute.xlu0 %2526 }
0x108d   :  { %v2572_v20 = vpack.c.bf16 %v9474_v29, %v9474_v29  ;;  %v9481_v37 = vadd.f32 %v2558_v52, %v2550_v49  ;;  %v2549_v43 = vmul.f32 %v2527_v14, %v2509_v31  ;;  %v2515_v52 = vsub.f32 1.0, %v9449_v0 }
0x108e   :  { %v2531_v38 = vpop.permute.xlu1 %2530  ;;  %v2563_v49 = vmul.f32 %v9449_v0, %v9365_v10 }
0x108f   :  { %v2605_v48 = vshll.u32 %v2572_v20, 16  ;;  %v2574_v53 = vpack.c.bf16 %v9481_v37, %v9481_v37  ;;  %v9491_v1 = vadd.f32 %v2557_v50, %v2549_v43  ;;  %v2551_v12 = vmul.f32 %v2531_v38, %v2511_v13 }
0x1090   :  { %v2533_v59 = vpop.permute.xlu0 %2532  ;;  %v2588_v18 = vunpack.c.l.b16 %v2572_v20 }
0x1091   :  { %v2590_v22 = vunpack.c.l.b16 %v2574_v53  ;;  %v2613_v2 = vshll.u32 %v2574_v53, 16  ;;  %v2573_v9 = vpack.c.bf16 %v9491_v1, %v9491_v1  ;;  %v9503_v47 = vadd.f32 %v2559_v19, %v2551_v12 }
0x1092   :  { %v2552_v34 = vmul.f32 %v2533_v59, %v2512_v3  ;;  %v2535_v11 = vpop.permute.xlu1 %2534  ;;  %v9508_v51 = vrot.slane %v2605_v48, 6 }
0x1093   :  { %v2589_v31 = vunpack.c.l.b16 %v2573_v9  ;;  %v2609_v14 = vshll.u32 %v2573_v9, 16  ;;  %v9510_v50 = vrot.slane %v2613_v2, 6  ;;  %v2575_v43 = vpack.c.bf16 %v9503_v47, %v9503_v47 }
0x1094   :  { %11886 = vst [vmem:[#allocation25_spill] sm:$0xff] %v9508_v51  ;;  %v9514_v62 = vadd.f32 %v2560_v55, %v2552_v34  ;;  %v2553_v56 = vmul.f32 %v2535_v11, %v2513_v17  ;;  %v2537_v13 = vpop.permute.xlu0 %2536  ;;  %v2688_v19 = vrot.slane %v2590_v22, 6 }
0x1095   :  { %11887 = vst [vmem:[#allocation26_spill] sm:$0xff] %v9510_v50  ;;  %v9516_v38 = vrot.slane %v2609_v14, 6  ;;  %v2686_v3 = vrot.slane %v2589_v31, 7  ;;  %v2554_v53 = vmul.f32 %v2537_v13, %v2514_v30  ;;  %v2591_v10 = vunpack.c.l.b16 %v2575_v43  ;;  %v9586_v14 = vld [vmem:[#allocation2 + $0x46] sm:$0x1] }
0x1096   :  { %v2617_v0 = vshll.u32 %v2575_v43, 16  ;;  %v2576_v20 = vpack.c.bf16 %v9514_v62, %v9514_v62  ;;  %v9520_v48 = vadd.f32 %v2561_v24, %v2553_v56  ;;  %v2539_v12 = vpop.permute.xlu1 %2538 }
0x1097   :  { %11888 = vst [vmem:[#allocation27_spill] sm:$0xff] %v9516_v38  ;;  %v2687_v59 = vsel %vm699_vm4, %v2686_v3, %v2588_v18  ;;  %v9523_v2 = vadd.f32 %v2562_v28, %v2554_v53  ;;  %v2555_v55 = vmul.f32 %v2539_v12, %v2515_v52  ;;  %v2690_v9 = vrot.slane %v2591_v10, 5 }
0x1098   :  { %v9527_v22 = vrot.slane %v2617_v0, 6  ;;  %v2689_v30 = vsel %vm702_vm5, %v2688_v19, %v2687_v59  ;;  %v2592_v34 = vunpack.c.l.b16 %v2576_v20  ;;  %v2621_v11 = vshll.u32 %v2576_v20, 16 }
0x1099   :  { %v2577_v24 = vpack.c.bf16 %v9520_v48, %v9520_v48  ;;  %v2578_v31 = vpack.c.bf16 %v9523_v2, %v9523_v2  ;;  %v9534_v18 = vadd.f32 %v2563_v49, %v2555_v55  ;;  %v2691_v28 = vsel %vm705_vm6, %v2690_v9, %v2689_v30 }
0x109a   :  { %11889 = vst [vmem:[#allocation28_spill] sm:$0xff] %v9527_v22  ;;  %v2692_v52 = vrot.slane %v2592_v34, 4  ;;  %v9542_v10 = vrot.slane %v2621_v11, 6 }
0x109b   :  { %v2593_v43 = vunpack.c.l.b16 %v2577_v24  ;;  %v2625_v56 = vshll.u32 %v2577_v24, 16  ;;  %v2594_v13 = vunpack.c.l.b16 %v2578_v31  ;;  %v2629_v3 = vshll.u32 %v2578_v31, 16 }
0x109c   :  { %v2693_v19 = vsel %vm708_vm7, %v2692_v52, %v2691_v28  ;;  %v2579_v53 = vpack.c.bf16 %v9534_v18, %v9534_v18  ;;  %11890 = vst [vmem:[#allocation29_spill] sm:$0xff] %v9542_v10 }
0x109d   :  { %v9544_v0 = vrot.slane %v2625_v56, 6  ;;  %v2694_v49 = vrot.slane %v2593_v43, 3  ;;  %v2696_v20 = vrot.slane %v2594_v13, 2  ;;  %v9549_v9 = vrot.slane %v2629_v3, 6 }
0x109e   :  { %v2595_v12 = vunpack.c.l.b16 %v2579_v53  ;;  %v2633_v59 = vshll.u32 %v2579_v53, 16 }
0x109f   :  { %11891 = vst [vmem:[#allocation30_spill] sm:$0xff] %v9544_v0  ;;  %v2695_v55 = vsel %vm711_vm8, %v2694_v49, %v2693_v19  ;;  %11892 = vst [vmem:[#allocation31_spill] sm:$0xff] %v9549_v9 }
0x10a0   :  { %v9551_v34 = vrot.slane %v2633_v59, 6  ;;  %v2698_v24 = vrot.slane %v2595_v12, 1  ;;  %v2697_v31 = vsel %vm714_vm9, %v2696_v20, %v2695_v55 }
0x10a2   :  { %11893 = vst [vmem:[#allocation32_spill] sm:$0xff] %v9551_v34  ;;  %v2699_v11 = vsel %vm11873_vm10, %v2698_v24, %v2697_v31 }
0x10a3   :  { %v2700_v52 = vpack.c.b16 %v2699_v11, %v2699_v11 }
0x10a5   :  { %2701 = vrot.lane.b32.xlu0 %v2700_v52, %s8332_s8  ;;  %v9574_v52 = vld [vmem:[#allocation2 + $0x6] sm:$0x1] }
0x1117   :  { %v2702_v43 = vpop.permute.xlu0 %2701 }
0x1118   :  { %7198 = vmatmul.mubr.msk.bf16.vlgmr.msra.gmra.mrb[20].mxu0 %vm11872_vm0, %v2702_v43 }
0x1119   :  { %7210 = vmatpush3.bf16.msra.mxu0 %v9379_v63  ;;  %7213 = vmatprep.mubr.msk.bf16.mxu0 %vm8330_vm1, %v11885_v44 }
0x111a   :  { %7211 = vmatprep.subr.bf16.mxu0 %v11885_v44 }
0x111d   :  { %7212 = vmatpush3.bf16.msra.mxu0 %v9385_v35 }
0x111e   :  { %7225 = vmatprep.subr.bf16.mxu0 %v11885_v44 }
0x11eb   :  { %v2740_v56 = vpop.f32.mrb[20].mxu0 }
0x11ec   :  { %v7199_v13 = vpop.f32.mrb[21].mxu0  ;;  %v2826_v53 = vadd.f32 %v2740_v56, %v8467_v21  ;;  %v2756_v11 = vrot.slane %v2740_v56, 2  ;;  %v2755_v43 = vrot.slane %v2740_v56, 1  ;;  %v2760_v30 = vrot.slane %v2740_v56, 6 }
0x11ed   :  { %v2743_v19 = vpop.f32.mrb[22].mxu0  ;;  %v2770_v13 = vadd.f32 %v9574_v52, %v2740_v56  ;;  %v2761_v34 = vrot.slane %v2740_v56, 7 }
0x11ee   :  { %v7200_v3 = vpop.f32.mrb[23].mxu0  ;;  %2835 = vrot.lane.b32.xlu1 %v2826_v53, %s8326_s30  ;;  %v2829_v49 = vrot.slane %v2826_v53, 2  ;;  %v2828_v20 = vrot.slane %v2826_v53, 1  ;;  %v2830_v12 = vrot.slane %v2826_v53, 3  ;;  %v2831_v59 = vrot.slane %v2826_v53, 4 }
0x11ef   :  { %v2832_v55 = vrot.slane %v2826_v53, 5  ;;  %v2833_v24 = vrot.slane %v2826_v53, 6  ;;  %v2834_v31 = vrot.slane %v2826_v53, 7  ;;  %v9577_v19 = vld [vmem:[#allocation2 + $0x26] sm:$0x1]  ;;  %v2757_v3 = vrot.slane %v2740_v56, 3 }
0x11f0   :  { %2839 = vrot.lane.b32.xlu0 %v2829_v49, %s8326_s30  ;;  %v2772_v49 = vadd.f32 %v2756_v11, %v9577_v19  ;;  %v9583_v53 = vld [vmem:[#allocation2 + $0x36] sm:$0x1] }
0x11f1   :  { %v9589_v11 = vld [vmem:[#allocation2 + $0x56] sm:$0x1] }
0x11f2   :  { %2837 = vrot.lane.b32.xlu1 %v2828_v20, %s8326_s30  ;;  %v9580_v20 = vld [vmem:[#allocation2 + $0x16] sm:$0x1]  ;;  %v6775_v28 = vmul.f32 -1.442695, %v2772_v49 }
0x11f3   :  { %v9595_v49 = vld [vmem:[#allocation2 + $0x76] sm:$0x1] }
0x11f4   :  { %2841 = vrot.lane.b32.xlu0 %v2830_v12, %s8326_s30  ;;  %v2758_v12 = vrot.slane %v2740_v56, 4  ;;  %v2777_v10 = vadd.f32 %v2761_v34, %v9595_v49 }
0x11f6   :  { %2843 = vrot.lane.b32.xlu1 %v2831_v59, %s8326_s30  ;;  %v2771_v59 = vadd.f32 %v2755_v43, %v9580_v20  ;;  %v2774_v17 = vadd.f32 %v2758_v12, %v9586_v14 }
0x11f8   :  { %2845 = vrot.lane.b32.xlu0 %v2832_v55, %s8326_s30  ;;  %v6773_v55 = vmul.f32 -1.442695, %v2770_v13  ;;  %v6774_v9 = vmul.f32 -1.442695, %v2771_v59  ;;  %v9592_v13 = vld [vmem:[#allocation2 + $0x66] sm:$0x1] }
0x11f9   :  { %v2776_v22 = vadd.f32 %v2760_v30, %v9592_v13 }
0x11fa   :  { %2847 = vrot.lane.b32.xlu1 %v2833_v24, %s8326_s30  ;;  %v2759_v24 = vrot.slane %v2740_v56, 5  ;;  %7742 = vpow2.f32 %v6773_v55  ;;  %v6780_v56 = vmul.f32 -1.442695, %v2777_v10 }
0x11fb   :  { %7744 = vpow2.f32 %v6775_v28  ;;  %v6779_v59 = vmul.f32 -1.442695, %v2776_v22 }
0x11fc   :  { %2849 = vrot.lane.b32.xlu0 %v2834_v31, %s8326_s30  ;;  %v2773_v31 = vadd.f32 %v2757_v3, %v9583_v53  ;;  %v2775_v50 = vadd.f32 %v2759_v24, %v9589_v11  ;;  %7746 = vpow2.f32 %v6774_v9  ;;  %v6777_v3 = vmul.f32 -1.442695, %v2774_v17 }
0x11fe   :  { %v6776_v43 = vmul.f32 -1.442695, %v2773_v31  ;;  %v6778_v12 = vmul.f32 -1.442695, %v2775_v50 }
0x1200   :  { %7748 = vpow2.f32 %v6776_v43 }
0x1201   :  { %7750 = vpow2.f32 %v6777_v3 }
0x1202   :  { %7752 = vpow2.f32 %v6778_v12 }
0x1203   :  { %7754 = vpow2.f32 %v6779_v59 }
0x1204   :  { %v7743_v55 = vpop.eup %7742  ;;  %7756 = vpow2.f32 %v6780_v56 }
0x1205   :  { %v7745_v24 = vpop.eup %7744  ;;  %v2802_v28 = vadd.f32 1.0, %v7743_v55 }
0x1206   :  { %v7747_v31 = vpop.eup %7746  ;;  %v2804_v0 = vadd.f32 1.0, %v7745_v24 }
0x1207   :  { %7758 = vrcp.f32 %v2802_v28  ;;  %v2803_v17 = vadd.f32 1.0, %v7747_v31 }
0x1208   :  { %7760 = vrcp.f32 %v2804_v0 }
0x1209   :  { %7762 = vrcp.f32 %v2803_v17 }
0x120a   :  { %v7749_v30 = vpop.eup %7748 }
0x120b   :  { %v7751_v9 = vpop.eup %7750  ;;  %v2805_v51 = vadd.f32 1.0, %v7749_v30 }
0x120c   :  { %v7753_v34 = vpop.eup %7752  ;;  %v2806_v50 = vadd.f32 1.0, %v7751_v9 }
0x120d   :  { %v7755_v43 = vpop.eup %7754  ;;  %7764 = vrcp.f32 %v2805_v51  ;;  %v2807_v22 = vadd.f32 1.0, %v7753_v34 }
0x120e   :  { %v7757_v3 = vpop.eup %7756  ;;  %7766 = vrcp.f32 %v2806_v50  ;;  %v2808_v10 = vadd.f32 1.0, %v7755_v43 }
0x120f   :  { %7768 = vrcp.f32 %v2807_v22  ;;  %v2809_v55 = vadd.f32 1.0, %v7757_v3 }
0x1210   :  { %7770 = vrcp.f32 %v2808_v10 }
0x1211   :  { %v9598_v12 = vpop.eup %7758  ;;  %7772 = vrcp.f32 %v2809_v55 }
0x1212   :  { %v9601_v24 = vpop.eup %7760 }
0x1213   :  { %v9605_v51 = vpop.eup %7762 }
0x1217   :  { %v9609_v17 = vpop.eup %7764 }
0x1218   :  { %v9613_v50 = vpop.eup %7766 }
0x1219   :  { %v9617_v3 = vpop.eup %7768 }
0x121a   :  { %v9621_v55 = vpop.eup %7770 }
0x1260   :  { %v2836_v59 = vpop.permute.xlu1 %2835 }
0x1261   :  { %v2859_v56 = vmul.f32 %v9598_v12, %v2836_v59 }
0x1262   :  { %v2840_v0 = vpop.permute.xlu0 %2839 }
0x1263   :  { %v2861_v28 = vmul.f32 %v9601_v24, %v2840_v0  ;;  %2875 = vrot.lane.b32.xlu1 %v2859_v56, %s8326_s30 }
0x1264   :  { %v2838_v31 = vpop.permute.xlu1 %2837 }
0x1265   :  { %v2860_v30 = vmul.f32 %v9605_v51, %v2838_v31  ;;  %2879 = vrot.lane.b32.xlu0 %v2861_v28, %s8326_s30  ;;  %v9625_v28 = vpop.eup %7772 }
0x1266   :  { %v2842_v9 = vpop.permute.xlu0 %2841 }
0x1267   :  { %v2862_v34 = vmul.f32 %v9609_v17, %v2842_v9  ;;  %2877 = vrot.lane.b32.xlu1 %v2860_v30, %s8326_s30 }
0x1268   :  { %v2844_v43 = vpop.permute.xlu1 %2843 }
0x1269   :  { %v2863_v22 = vmul.f32 %v9613_v50, %v2844_v43  ;;  %2881 = vrot.lane.b32.xlu0 %v2862_v34, %s8326_s30 }
0x126a   :  { %v2846_v10 = vpop.permute.xlu0 %2845 }
0x126b   :  { %v2864_v59 = vmul.f32 %v9617_v3, %v2846_v10  ;;  %2883 = vrot.lane.b32.xlu1 %v2863_v22, %s8326_s30 }
0x126c   :  { %v2848_v56 = vpop.permute.xlu1 %2847 }
0x126d   :  { %v2865_v0 = vmul.f32 %v9621_v55, %v2848_v56  ;;  %2885 = vrot.lane.b32.xlu0 %v2864_v59, %s8326_s30 }
0x126e   :  { %v2850_v31 = vpop.permute.xlu0 %2849 }
0x126f   :  { %v2866_v30 = vmul.f32 %v9625_v28, %v2850_v31  ;;  %2887 = vrot.lane.b32.xlu1 %v2865_v0, %s8326_s30 }
0x1271   :  { %2889 = vrot.lane.b32.xlu0 %v2866_v30, %s8326_s30 }
0x12d5   :  { %v2876_v9 = vpop.permute.xlu1 %2875 }
0x12d6   :  { %v2899_v34 = vadd.f32 %v2876_v9, %v9574_v52 }
0x12d7   :  { %v2880_v43 = vpop.permute.xlu0 %2879 }
0x12d8   :  { %7774 = vtanh.f32 %v2899_v34  ;;  %v2901_v22 = vadd.f32 %v2880_v43, %v9577_v19 }
0x12d9   :  { %v2878_v10 = vpop.permute.xlu1 %2877 }
0x12da   :  { %7776 = vtanh.f32 %v2901_v22  ;;  %v2900_v59 = vadd.f32 %v2878_v10, %v9580_v20 }
0x12db   :  { %v2882_v56 = vpop.permute.xlu0 %2881 }
0x12dc   :  { %7778 = vtanh.f32 %v2900_v59  ;;  %v2902_v38 = vadd.f32 %v2882_v56, %v9583_v53 }
0x12dd   :  { %v2884_v31 = vpop.permute.xlu1 %2883 }
0x12de   :  { %7780 = vtanh.f32 %v2902_v38  ;;  %v2903_v0 = vadd.f32 %v2884_v31, %v9586_v14  ;;  %v2917_v31 = vsub.f32 1.0, %v9601_v24 }
0x12df   :  { %v2886_v30 = vpop.permute.xlu0 %2885 }
0x12e0   :  { %7782 = vtanh.f32 %v2903_v0  ;;  %v2904_v52 = vadd.f32 %v2886_v30, %v9589_v11  ;;  %v2963_v0 = vmul.f32 %v9598_v12, %v9474_v29  ;;  %v2966_v29 = vmul.f32 %v9609_v17, %v9503_v47 }
0x12e1   :  { %v2888_v9 = vpop.permute.xlu1 %2887 }
0x12e2   :  { %v7775_v34 = vpop.eup %7774  ;;  %7784 = vtanh.f32 %v2904_v52  ;;  %v2905_v19 = vadd.f32 %v2888_v9, %v9592_v13  ;;  %v2965_v52 = vmul.f32 %v9601_v24, %v9481_v37 }
0x12e3   :  { %v2890_v43 = vpop.permute.xlu0 %2889  ;;  %2931 = vrot.lane.b32.xlu1 %v7775_v34, %s8332_s8  ;;  %v2916_v34 = vsub.f32 1.0, %v9605_v51 }
0x12e4   :  { %v7777_v20 = vpop.eup %7776  ;;  %7786 = vtanh.f32 %v2905_v19  ;;  %v2906_v53 = vadd.f32 %v2890_v43, %v9595_v49  ;;  %v2915_v49 = vsub.f32 1.0, %v9598_v12 }
0x12e5   :  { %2935 = vrot.lane.b32.xlu0 %v7777_v20, %s8332_s8 }
0x12e6   :  { %v7779_v38 = vpop.eup %7778  ;;  %7788 = vtanh.f32 %v2906_v53  ;;  %v2964_v53 = vmul.f32 %v9605_v51, %v9491_v1 }
0x12e7   :  { %2933 = vrot.lane.b32.xlu1 %v7779_v38, %s8332_s8 }
0x12e8   :  { %v7781_v14 = vpop.eup %7780 }
0x12e9   :  { %2937 = vrot.lane.b32.xlu0 %v7781_v14, %s8332_s8  ;;  %v2918_v14 = vsub.f32 1.0, %v9609_v17  ;;  %v2967_v17 = vmul.f32 %v9613_v50, %v9514_v62  ;;  %v2968_v62 = vmul.f32 %v9617_v3, %v9520_v48 }
0x12ea   :  { %v7783_v11 = vpop.eup %7782 }
0x12eb   :  { %2939 = vrot.lane.b32.xlu1 %v7783_v11, %s8332_s8 }
0x12ec   :  { %v7785_v13 = vpop.eup %7784 }
0x12ed   :  { %2941 = vrot.lane.b32.xlu0 %v7785_v13, %s8332_s8  ;;  %v2919_v13 = vsub.f32 1.0, %v9613_v50 }
0x12ee   :  { %v7787_v22 = vpop.eup %7786 }
0x12ef   :  { %2943 = vrot.lane.b32.xlu1 %v7787_v22, %s8332_s8 }
0x12f0   :  { %v7789_v10 = vpop.eup %7788 }
0x12f1   :  { %2945 = vrot.lane.b32.xlu0 %v7789_v10, %s8332_s8 }
0x1355   :  { %v2932_v59 = vpop.permute.xlu1 %2931 }
0x1356   :  { %v2955_v56 = vmul.f32 %v2932_v59, %v2915_v49  ;;  %v2920_v59 = vsub.f32 1.0, %v9617_v3 }
0x1357   :  { %v2936_v30 = vpop.permute.xlu0 %2935 }
0x1358   :  { %v2957_v9 = vmul.f32 %v2936_v30, %v2917_v31  ;;  %v9653_v19 = vadd.f32 %v2963_v0, %v2955_v56 }
0x1359   :  { %v2934_v43 = vpop.permute.xlu1 %2933 }
0x135a   :  { %v9655_v20 = vadd.f32 %v2965_v52, %v2957_v9  ;;  %v2956_v38 = vmul.f32 %v2934_v43, %v2916_v34  ;;  %v9671_v22 = vpack.c.bf16 %v9653_v19, %v9653_v19  ;;  %v2921_v52 = vsub.f32 1.0, %v9621_v55 }
0x135b   :  { %v2938_v12 = vpop.permute.xlu0 %2937  ;;  %v2969_v34 = vmul.f32 %v9621_v55, %v9523_v2 }
0x135c   :  { %v9664_v37 = vpack.c.bf16 %v9655_v20, %v9655_v20  ;;  %v9666_v24 = vadd.f32 %v2964_v53, %v2956_v38  ;;  %v2958_v11 = vmul.f32 %v2938_v12, %v2918_v14  ;;  %11895 = vst [vmem:[#allocation34_spill] sm:$0xff] %v9671_v22  ;;  %v2995_v9 = vunpack.c.l.b16 %v9671_v22 }
0x135d   :  { %v2940_v1 = vpop.permute.xlu1 %2939 }
0x135e   :  { %11894 = vst [vmem:[#allocation33_spill] sm:$0xff] %v9664_v37  ;;  %v9675_v51 = vpack.c.bf16 %v9666_v24, %v9666_v24  ;;  %v9677_v47 = vadd.f32 %v2966_v29, %v2958_v11  ;;  %v2959_v10 = vmul.f32 %v2940_v1, %v2919_v13  ;;  %v2997_v49 = vunpack.c.l.b16 %v9664_v37 }
0x135f   :  { %v2942_v56 = vpop.permute.xlu0 %2941  ;;  %v2922_v13 = vsub.f32 1.0, %v9625_v28 }
0x1360   :  { %11896 = vst [vmem:[#allocation35_spill] sm:$0xff] %v9675_v51  ;;  %v2996_v31 = vunpack.c.l.b16 %v9675_v51  ;;  %v9686_v0 = vpack.c.bf16 %v9677_v47, %v9677_v47  ;;  %v9688_v30 = vadd.f32 %v2967_v17, %v2959_v10  ;;  %v2960_v50 = vmul.f32 %v2942_v56, %v2920_v59 }
0x1361   :  { %v2944_v43 = vpop.permute.xlu1 %2943  ;;  %v3072_v12 = vrot.slane %v2997_v49, 6  ;;  %v2970_v49 = vmul.f32 %v9625_v28, %v9534_v18 }
0x1362   :  { %11897 = vst [vmem:[#allocation36_spill] sm:$0xff] %v9686_v0  ;;  %v3070_v53 = vrot.slane %v2996_v31, 7  ;;  %v2998_v38 = vunpack.c.l.b16 %v9686_v0  ;;  %v9699_v14 = vpack.c.bf16 %v9688_v30, %v9688_v30  ;;  %v2961_v29 = vmul.f32 %v2944_v43, %v2921_v52 }
0x1363   :  { %v9701_v11 = vadd.f32 %v2968_v62, %v2960_v50  ;;  %v2946_v1 = vpop.permute.xlu0 %2945 }
0x1364   :  { %11898 = vst [vmem:[#allocation37_spill] sm:$0xff] %v9699_v14  ;;  %v3071_v48 = vsel %vm699_vm4, %v3070_v53, %v2995_v9  ;;  %v3074_v3 = vrot.slane %v2998_v38, 5  ;;  %v2999_v2 = vunpack.c.l.b16 %v9699_v14  ;;  %v9706_v55 = vadd.f32 %v2969_v34, %v2961_v29 }
0x1365   :  { %v3073_v17 = vsel %vm702_vm5, %v3072_v12, %v3071_v48  ;;  %v9711_v10 = vpack.c.bf16 %v9701_v11, %v9701_v11  ;;  %v2962_v59 = vmul.f32 %v2946_v1, %v2922_v13 }
0x1366   :  { %v3075_v56 = vsel %vm705_vm6, %v3074_v3, %v3073_v17  ;;  %v3076_v31 = vrot.slane %v2999_v2, 4  ;;  %v9718_v52 = vpack.c.bf16 %v9706_v55, %v9706_v55 }
0x1367   :  { %11899 = vst [vmem:[#allocation38_spill] sm:$0xff] %v9711_v10  ;;  %v3000_v9 = vunpack.c.l.b16 %v9711_v10  ;;  %v9721_v62 = vadd.f32 %v2970_v49, %v2962_v59 }
0x1368   :  { %11900 = vst [vmem:[#allocation39_spill] sm:$0xff] %v9718_v52  ;;  %v3077_v50 = vsel %vm708_vm7, %v3076_v31, %v3075_v56  ;;  %v3001_v34 = vunpack.c.l.b16 %v9718_v52 }
0x1369   :  { %v3078_v43 = vrot.slane %v3000_v9, 3  ;;  %v9727_v18 = vpack.c.bf16 %v9721_v62, %v9721_v62 }
0x136a   :  { %v3080_v28 = vrot.slane %v3001_v34, 2 }
0x136b   :  { %11901 = vst [vmem:[#allocation40_spill] sm:$0xff] %v9727_v18  ;;  %v3002_v53 = vunpack.c.l.b16 %v9727_v18  ;;  %v3079_v38 = vsel %vm711_vm8, %v3078_v43, %v3077_v50 }
0x136c   :  { %v3081_v29 = vsel %vm714_vm9, %v3080_v28, %v3079_v38  ;;  %v9750_v28 = vld [vmem:[#allocation2 + $0x7] sm:$0x1] }
0x136d   :  { %v3082_v12 = vrot.slane %v3002_v53, 1 }
0x136f   :  { %v3083_v13 = vsel %vm11873_vm10, %v3082_v12, %v3081_v29  ;;  %v9753_v29 = vld [vmem:[#allocation2 + $0x27] sm:$0x1] }
0x1370   :  { %v3084_v1 = vpack.c.b16 %v3083_v13, %v3083_v13 }
0x1372   :  { %3085 = vrot.lane.b32.xlu1 %v3084_v1, %s8332_s8  ;;  %v9756_v1 = vld [vmem:[#allocation2 + $0x17] sm:$0x1] }
0x13e4   :  { %v3086_v48 = vpop.permute.xlu1 %3085 }
0x13e5   :  { %7206 = vmatmul.mubr.msk.bf16.vlgmr.msra.gmra.mrb[20].mxu1 %vm11872_vm0, %v3086_v48 }
0x13e6   :  { %7218 = vmatpush3.bf16.msra.mxu1 %v9379_v63  ;;  %7221 = vmatprep.mubr.msk.bf16.mxu1 %vm8330_vm1, %v11885_v44 }
0x13e7   :  { %7219 = vmatprep.subr.bf16.mxu1 %v11885_v44 }
0x13ea   :  { %7220 = vmatpush3.bf16.msra.mxu1 %v9385_v35 }
0x13eb   :  { %7233 = vmatprep.subr.bf16.mxu1 %v11885_v44 }
0x14b8   :  { %v3124_v3 = vpop.f32.mrb[20].mxu1 }
0x14b9   :  { %v7207_v2 = vpop.f32.mrb[21].mxu1  ;;  %v3210_v59 = vadd.f32 %v3124_v3, %v8467_v21  ;;  %v3140_v43 = vrot.slane %v3124_v3, 2  ;;  %v3139_v53 = vrot.slane %v3124_v3, 1  ;;  %v3154_v38 = vadd.f32 %v9750_v28, %v3124_v3 }
0x14ba   :  { %v3127_v17 = vpop.f32.mrb[22].mxu1  ;;  %v3141_v12 = vrot.slane %v3124_v3, 3  ;;  %v3142_v48 = vrot.slane %v3124_v3, 4 }
0x14bb   :  { %v7208_v49 = vpop.f32.mrb[23].mxu1  ;;  %3219 = vrot.lane.b32.xlu0 %v3210_v59, %s8326_s30  ;;  %v3213_v56 = vrot.slane %v3210_v59, 2  ;;  %v3212_v63 = vrot.slane %v3210_v59, 1  ;;  %v3214_v31 = vrot.slane %v3210_v59, 3  ;;  %v3215_v35 = vrot.slane %v3210_v59, 4 }
0x14bc   :  { %v3216_v9 = vrot.slane %v3210_v59, 5  ;;  %v3217_v50 = vrot.slane %v3210_v59, 6  ;;  %v3218_v34 = vrot.slane %v3210_v59, 7  ;;  %v3156_v13 = vadd.f32 %v3140_v43, %v9753_v29  ;;  %v9759_v49 = vld [vmem:[#allocation2 + $0x37] sm:$0x1] }
0x14bd   :  { %3223 = vrot.lane.b32.xlu1 %v3213_v56, %s8326_s30  ;;  %v3155_v2 = vadd.f32 %v3139_v53, %v9756_v1  ;;  %v6790_v17 = vmul.f32 -1.442695, %v3154_v38  ;;  %v3143_v59 = vrot.slane %v3124_v3, 5  ;;  %v3157_v56 = vadd.f32 %v3141_v12, %v9759_v49  ;;  %v9768_v38 = vld [vmem:[#allocation2 + $0x67] sm:$0x1] }
0x14be   :  { %v3145_v43 = vrot.slane %v3124_v3, 7 }
0x14bf   :  { %3221 = vrot.lane.b32.xlu0 %v3212_v63, %s8326_s30  ;;  %v6792_v63 = vmul.f32 -1.442695, %v3156_v13  ;;  %7790 = vpow2.f32 %v6790_v17  ;;  %v6793_v53 = vmul.f32 -1.442695, %v3157_v56  ;;  %v9771_v13 = vld [vmem:[#allocation2 + $0x77] sm:$0x1] }
0x14c0   :  { %v3161_v52 = vadd.f32 %v3145_v43, %v9771_v13 }
0x14c1   :  { %3225 = vrot.lane.b32.xlu1 %v3214_v31, %s8326_s30  ;;  %v9762_v31 = vld [vmem:[#allocation2 + $0x47] sm:$0x1]  ;;  %7792 = vpow2.f32 %v6792_v63 }
0x14c3   :  { %3227 = vrot.lane.b32.xlu0 %v3215_v35, %s8326_s30  ;;  %v3144_v35 = vrot.slane %v3124_v3, 6  ;;  %v6797_v3 = vmul.f32 -1.442695, %v3161_v52 }
0x14c5   :  { %3229 = vrot.lane.b32.xlu1 %v3216_v9, %s8326_s30  ;;  %v3158_v9 = vadd.f32 %v3142_v48, %v9762_v31  ;;  %v3160_v10 = vadd.f32 %v3144_v35, %v9768_v38 }
0x14c7   :  { %3231 = vrot.lane.b32.xlu0 %v3217_v50, %s8326_s30  ;;  %v6791_v50 = vmul.f32 -1.442695, %v3155_v2  ;;  %v6794_v12 = vmul.f32 -1.442695, %v3158_v9  ;;  %v6796_v2 = vmul.f32 -1.442695, %v3160_v10 }
0x14c9   :  { %3233 = vrot.lane.b32.xlu1 %v3218_v34, %s8326_s30  ;;  %v9765_v34 = vld [vmem:[#allocation2 + $0x57] sm:$0x1]  ;;  %7794 = vpow2.f32 %v6791_v50  ;;  %v7791_v17 = vpop.eup %7790 }
0x14ca   :  { %v3159_v18 = vadd.f32 %v3143_v59, %v9765_v34  ;;  %7796 = vpow2.f32 %v6793_v53  ;;  %v3186_v56 = vadd.f32 1.0, %v7791_v17 }
0x14cb   :  { %7798 = vpow2.f32 %v6794_v12  ;;  %v7793_v59 = vpop.eup %7792 }
0x14cc   :  { %v6795_v48 = vmul.f32 -1.442695, %v3159_v18  ;;  %v3188_v0 = vadd.f32 1.0, %v7793_v59 }
0x14ce   :  { %7800 = vpow2.f32 %v6795_v48 }
0x14cf   :  { %7802 = vpow2.f32 %v6796_v2 }
0x14d0   :  { %7804 = vpow2.f32 %v6797_v3 }
0x14d1   :  { %7806 = vrcp.f32 %v3186_v56 }
0x14d2   :  { %7808 = vrcp.f32 %v3188_v0 }
0x14d3   :  { %v7795_v63 = vpop.eup %7794 }
0x14d4   :  { %v7797_v35 = vpop.eup %7796  ;;  %v3187_v9 = vadd.f32 1.0, %v7795_v63 }
0x14d5   :  { %v7799_v50 = vpop.eup %7798  ;;  %v3189_v14 = vadd.f32 1.0, %v7797_v35 }
0x14d6   :  { %7810 = vrcp.f32 %v3187_v9  ;;  %v3190_v18 = vadd.f32 1.0, %v7799_v50 }
0x14d7   :  { %7812 = vrcp.f32 %v3189_v14 }
0x14d8   :  { %v7801_v43 = vpop.eup %7800  ;;  %7814 = vrcp.f32 %v3190_v18 }
0x14d9   :  { %v7803_v53 = vpop.eup %7802  ;;  %v3191_v10 = vadd.f32 1.0, %v7801_v43 }
0x14da   :  { %v7805_v12 = vpop.eup %7804  ;;  %v3192_v52 = vadd.f32 1.0, %v7803_v53 }
0x14db   :  { %v9774_v48 = vpop.eup %7806  ;;  %7816 = vrcp.f32 %v3191_v10  ;;  %v3193_v17 = vadd.f32 1.0, %v7805_v12 }
0x14dc   :  { %v9777_v59 = vpop.eup %7808  ;;  %7818 = vrcp.f32 %v3192_v52 }
0x14dd   :  { %7820 = vrcp.f32 %v3193_v17 }
0x14e0   :  { %v9781_v14 = vpop.eup %7810 }
0x14e1   :  { %v9785_v9 = vpop.eup %7812 }
0x14e2   :  { %v9789_v18 = vpop.eup %7814 }
0x14e5   :  { %v9793_v12 = vpop.eup %7816 }
0x14e6   :  { %v9797_v17 = vpop.eup %7818 }
0x152d   :  { %v3220_v2 = vpop.permute.xlu0 %3219 }
0x152e   :  { %v3243_v3 = vmul.f32 %v9774_v48, %v3220_v2 }
0x152f   :  { %v3224_v0 = vpop.permute.xlu1 %3223 }
0x1530   :  { %v3245_v56 = vmul.f32 %v9777_v59, %v3224_v0  ;;  %3259 = vrot.lane.b32.xlu0 %v3243_v3, %s8326_s30 }
0x1531   :  { %v3222_v63 = vpop.permute.xlu0 %3221 }
0x1532   :  { %v3244_v35 = vmul.f32 %v9781_v14, %v3222_v63  ;;  %3263 = vrot.lane.b32.xlu1 %v3245_v56, %s8326_s30  ;;  %v9801_v56 = vpop.eup %7820 }
0x1533   :  { %v3226_v50 = vpop.permute.xlu1 %3225 }
0x1534   :  { %v3246_v43 = vmul.f32 %v9785_v9, %v3226_v50  ;;  %3261 = vrot.lane.b32.xlu0 %v3244_v35, %s8326_s30 }
0x1535   :  { %v3228_v53 = vpop.permute.xlu0 %3227 }
0x1536   :  { %v3247_v10 = vmul.f32 %v9789_v18, %v3228_v53  ;;  %3265 = vrot.lane.b32.xlu1 %v3246_v43, %s8326_s30 }
0x1537   :  { %v3230_v52 = vpop.permute.xlu1 %3229 }
0x1538   :  { %v3248_v2 = vmul.f32 %v9793_v12, %v3230_v52  ;;  %3267 = vrot.lane.b32.xlu0 %v3247_v10, %s8326_s30 }
0x1539   :  { %v3232_v3 = vpop.permute.xlu0 %3231 }
0x153a   :  { %v3249_v0 = vmul.f32 %v9797_v17, %v3232_v3  ;;  %3269 = vrot.lane.b32.xlu1 %v3248_v2, %s8326_s30 }
0x153b   :  { %v3234_v63 = vpop.permute.xlu1 %3233 }
0x153c   :  { %v3250_v35 = vmul.f32 %v9801_v56, %v3234_v63  ;;  %3271 = vrot.lane.b32.xlu0 %v3249_v0, %s8326_s30 }
0x153e   :  { %3273 = vrot.lane.b32.xlu1 %v3250_v35, %s8326_s30 }
0x15a2   :  { %v3260_v50 = vpop.permute.xlu0 %3259 }
0x15a3   :  { %v3283_v43 = vadd.f32 %v3260_v50, %v9750_v28 }
0x15a4   :  { %v3264_v53 = vpop.permute.xlu1 %3263 }
0x15a5   :  { %7822 = vtanh.f32 %v3283_v43  ;;  %v3285_v10 = vadd.f32 %v3264_v53, %v9753_v29 }
0x15a6   :  { %v3262_v52 = vpop.permute.xlu0 %3261 }
0x15a7   :  { %7824 = vtanh.f32 %v3285_v10  ;;  %v3284_v2 = vadd.f32 %v3262_v52, %v9756_v1 }
0x15a8   :  { %v3266_v3 = vpop.permute.xlu1 %3265 }
0x15a9   :  { %7826 = vtanh.f32 %v3284_v2  ;;  %v3286_v51 = vadd.f32 %v3266_v3, %v9759_v49  ;;  %v3347_v3 = vmul.f32 %v9774_v48, %v9653_v19  ;;  %v3348_v19 = vmul.f32 %v9781_v14, %v9666_v24 }
0x15aa   :  { %v3268_v63 = vpop.permute.xlu0 %3267 }
0x15ab   :  { %7828 = vtanh.f32 %v3286_v51  ;;  %v3287_v0 = vadd.f32 %v3268_v63, %v9762_v31 }
0x15ac   :  { %v3270_v35 = vpop.permute.xlu1 %3269 }
0x15ad   :  { %7830 = vtanh.f32 %v3287_v0  ;;  %v3288_v28 = vadd.f32 %v3270_v35, %v9765_v34  ;;  %v3301_v0 = vsub.f32 1.0, %v9777_v59 }
0x15ae   :  { %v3272_v50 = vpop.permute.xlu0 %3271 }
0x15af   :  { %v7823_v43 = vpop.eup %7822  ;;  %7832 = vtanh.f32 %v3288_v28  ;;  %v3289_v29 = vadd.f32 %v3272_v50, %v9768_v38  ;;  %v3349_v50 = vmul.f32 %v9777_v59, %v9655_v20  ;;  %v3303_v20 = vsub.f32 1.0, %v9789_v18 }
0x15b0   :  { %v3274_v53 = vpop.permute.xlu1 %3273  ;;  %3315 = vrot.lane.b32.xlu0 %v7823_v43, %s8332_s8 }
0x15b1   :  { %v7825_v1 = vpop.eup %7824  ;;  %7834 = vtanh.f32 %v3289_v29  ;;  %v3290_v49 = vadd.f32 %v3274_v53, %v9771_v13  ;;  %v3299_v13 = vsub.f32 1.0, %v9774_v48  ;;  %v3300_v29 = vsub.f32 1.0, %v9781_v14 }
0x15b2   :  { %3319 = vrot.lane.b32.xlu1 %v7825_v1, %s8332_s8  ;;  %v3304_v14 = vsub.f32 1.0, %v9793_v12 }
0x15b3   :  { %v7827_v51 = vpop.eup %7826  ;;  %7836 = vtanh.f32 %v3290_v49 }
0x15b4   :  { %3317 = vrot.lane.b32.xlu0 %v7827_v51, %s8332_s8  ;;  %v3302_v51 = vsub.f32 1.0, %v9785_v9 }
0x15b5   :  { %v7829_v31 = vpop.eup %7828 }
0x15b6   :  { %3321 = vrot.lane.b32.xlu1 %v7829_v31, %s8332_s8  ;;  %v3350_v31 = vmul.f32 %v9785_v9, %v9677_v47  ;;  %v3305_v47 = vsub.f32 1.0, %v9797_v17 }
0x15b7   :  { %v7831_v34 = vpop.eup %7830 }
0x15b8   :  { %3323 = vrot.lane.b32.xlu0 %v7831_v34, %s8332_s8 }
0x15b9   :  { %v7833_v38 = vpop.eup %7832 }
0x15ba   :  { %3325 = vrot.lane.b32.xlu1 %v7833_v38, %s8332_s8 }
0x15bb   :  { %v7835_v10 = vpop.eup %7834 }
0x15bc   :  { %3327 = vrot.lane.b32.xlu0 %v7835_v10, %s8332_s8 }
0x15bd   :  { %v7837_v52 = vpop.eup %7836 }
0x15be   :  { %3329 = vrot.lane.b32.xlu1 %v7837_v52, %s8332_s8  ;;  %v3351_v52 = vmul.f32 %v9789_v18, %v9688_v30 }
0x1622   :  { %v3316_v2 = vpop.permute.xlu0 %3315 }
0x1623   :  { %v3339_v63 = vmul.f32 %v3316_v2, %v3299_v13  ;;  %v3352_v2 = vmul.f32 %v9793_v12, %v9701_v11 }
0x1624   :  { %v3320_v35 = vpop.permute.xlu1 %3319 }
0x1625   :  { %v9826_v28 = vadd.f32 %v3347_v3, %v3339_v63  ;;  %v3341_v43 = vmul.f32 %v3320_v35, %v3301_v0  ;;  %v3353_v0 = vmul.f32 %v9797_v17, %v9706_v55 }
0x1626   :  { %v3318_v53 = vpop.permute.xlu0 %3317 }
0x1627   :  { %v3363_v1 = vpack.c.bf16 %v9826_v28, %v9826_v28  ;;  %v9833_v49 = vadd.f32 %v3349_v50, %v3341_v43  ;;  %v3340_v48 = vmul.f32 %v3318_v53, %v3300_v29  ;;  %v3306_v50 = vsub.f32 1.0, %v9801_v56 }
0x1628   :  { %v3322_v34 = vpop.permute.xlu1 %3321  ;;  %v3354_v43 = vmul.f32 %v9801_v56, %v9721_v62 }
0x1629   :  { %v3396_v59 = vshll.u32 %v3363_v1, 16  ;;  %v3365_v38 = vpack.c.bf16 %v9833_v49, %v9833_v49  ;;  %v9843_v10 = vadd.f32 %v3348_v19, %v3340_v48  ;;  %v3342_v13 = vmul.f32 %v3322_v34, %v3302_v51 }
0x162a   :  { %v3324_v24 = vpop.permute.xlu0 %3323  ;;  %v3379_v11 = vunpack.c.l.b16 %v3363_v1 }
0x162b   :  { %v3381_v9 = vunpack.c.l.b16 %v3365_v38  ;;  %v3404_v3 = vshll.u32 %v3365_v38, 16  ;;  %v3364_v63 = vpack.c.bf16 %v9843_v10, %v9843_v10  ;;  %v9855_v35 = vadd.f32 %v3350_v31, %v3342_v13 }
0x162c   :  { %v3343_v30 = vmul.f32 %v3324_v24, %v3303_v20  ;;  %v3326_v18 = vpop.permute.xlu1 %3325  ;;  %v9860_v12 = vrot.slane %v3396_v59, 5 }
0x162d   :  { %v3380_v29 = vunpack.c.l.b16 %v3364_v63  ;;  %v3400_v53 = vshll.u32 %v3364_v63, 16  ;;  %v9862_v19 = vrot.slane %v3404_v3, 5  ;;  %v3366_v48 = vpack.c.bf16 %v9855_v35, %v9855_v35 }
0x162e   :  { %11902 = vst [vmem:[#allocation41_spill] sm:$0xff] %v9860_v12  ;;  %v9866_v55 = vadd.f32 %v3351_v52, %v3343_v30  ;;  %v3344_v17 = vmul.f32 %v3326_v18, %v3304_v14  ;;  %v3328_v51 = vpop.permute.xlu0 %3327  ;;  %v3479_v31 = vrot.slane %v3381_v9, 6  ;;  %v9942_v14 = vld [vmem:[#allocation2 + $0x48] sm:$0x1] }
0x162f   :  { %11903 = vst [vmem:[#allocation42_spill] sm:$0xff] %v9862_v19  ;;  %v9868_v34 = vrot.slane %v3400_v53, 5  ;;  %v3477_v20 = vrot.slane %v3380_v29, 7  ;;  %v3345_v38 = vmul.f32 %v3328_v51, %v3305_v47  ;;  %v3382_v62 = vunpack.c.l.b16 %v3366_v48 }
0x1630   :  { %v3408_v56 = vshll.u32 %v3366_v48, 16  ;;  %v3367_v1 = vpack.c.bf16 %v9866_v55, %v9866_v55  ;;  %v9872_v59 = vadd.f32 %v3352_v2, %v3344_v17  ;;  %v3330_v13 = vpop.permute.xlu1 %3329 }
0x1631   :  { %11904 = vst [vmem:[#allocation43_spill] sm:$0xff] %v9868_v34  ;;  %v3478_v24 = vsel %vm699_vm4, %v3477_v20, %v3379_v11  ;;  %v9875_v3 = vadd.f32 %v3353_v0, %v3345_v38  ;;  %v3346_v52 = vmul.f32 %v3330_v13, %v3306_v50  ;;  %v3481_v63 = vrot.slane %v3382_v62, 5 }
0x1632   :  { %v9879_v9 = vrot.slane %v3408_v56, 5  ;;  %v3480_v47 = vsel %vm702_vm5, %v3479_v31, %v3478_v24  ;;  %v3383_v30 = vunpack.c.l.b16 %v3367_v1  ;;  %v3412_v18 = vshll.u32 %v3367_v1, 16 }
0x1633   :  { %v3368_v2 = vpack.c.bf16 %v9872_v59, %v9872_v59  ;;  %v3369_v29 = vpack.c.bf16 %v9875_v3, %v9875_v3  ;;  %v9886_v11 = vadd.f32 %v3354_v43, %v3346_v52  ;;  %v3482_v0 = vsel %vm705_vm6, %v3481_v63, %v3480_v47 }
0x1634   :  { %11905 = vst [vmem:[#allocation44_spill] sm:$0xff] %v9879_v9  ;;  %v3483_v50 = vrot.slane %v3383_v30, 4  ;;  %v9894_v62 = vrot.slane %v3412_v18, 5 }
0x1635   :  { %v3384_v48 = vunpack.c.l.b16 %v3368_v2  ;;  %v3416_v17 = vshll.u32 %v3368_v2, 16  ;;  %v3385_v51 = vunpack.c.l.b16 %v3369_v29  ;;  %v3420_v20 = vshll.u32 %v3369_v29, 16 }
0x1636   :  { %v3484_v31 = vsel %vm708_vm7, %v3483_v50, %v3482_v0  ;;  %v3370_v38 = vpack.c.bf16 %v9886_v11, %v9886_v11  ;;  %11906 = vst [vmem:[#allocation45_spill] sm:$0xff] %v9894_v62 }
0x1637   :  { %v9896_v56 = vrot.slane %v3416_v17, 5  ;;  %v3485_v43 = vrot.slane %v3384_v48, 3  ;;  %v3487_v1 = vrot.slane %v3385_v51, 2  ;;  %v9901_v63 = vrot.slane %v3420_v20, 5  ;;  %v9911_v17 = vld [vmem:[#allocation9] sm:$0xff]   ;;  %v9917_v51 = vld [vmem:[#allocation9 + $0x8] sm:$0xff]  }
0x1638   :  { %v3386_v13 = vunpack.c.l.b16 %v3370_v38  ;;  %v3424_v24 = vshll.u32 %v3370_v38, 16 }
0x1639   :  { %11907 = vst [vmem:[#allocation46_spill] sm:$0xff] %v9896_v56  ;;  %v3486_v52 = vsel %vm711_vm8, %v3485_v43, %v3484_v31  ;;  %11908 = vst [vmem:[#allocation47_spill] sm:$0xff] %v9901_v63 }
0x163a   :  { %v9903_v30 = vrot.slane %v3424_v24, 5  ;;  %v3489_v2 = vrot.slane %v3386_v13, 1  ;;  %v3488_v29 = vsel %vm714_vm9, %v3487_v1, %v3486_v52 }
0x163c   :  { %11909 = vst [vmem:[#allocation48_spill] sm:$0xff] %v9903_v30  ;;  %v3490_v18 = vsel %vm11873_vm10, %v3489_v2, %v3488_v29 }
0x163d   :  { %v3491_v50 = vpack.c.b16 %v3490_v18, %v3490_v18 }
0x163f   :  { %3492 = vrot.lane.b32.xlu0 %v3491_v50, %s8332_s8 }
0x16b1   :  { %v3493_v48 = vpop.permute.xlu0 %3492 }
0x16b2   :  { %7214 = vmatmul.mubr.msk.bf16.vlgmr.msra.gmra.mrb[24].mxu0 %vm11872_vm0, %v3493_v48 }
0x16b3   :  { %7226 = vmatpush3.bf16.msra.mxu0 %v9911_v17  ;;  %7229 = vmatprep.mubr.msk.bf16.mxu0 %vm8330_vm1, %v11885_v44 }
0x16b4   :  { %7227 = vmatprep.subr.bf16.mxu0 %v11885_v44 }
0x16b7   :  { %7228 = vmatpush3.bf16.msra.mxu0 %v9917_v51 }
0x16b8   :  { %7241 = vmatprep.subr.bf16.mxu0 %v11885_v44 }
0x1785   :  { %v3531_v31 = vpop.f32.mrb[24].mxu0 }
0x1786   :  { %v7215_v20 = vpop.f32.mrb[25].mxu0  ;;  %v3617_v1 = vadd.f32 %v3531_v31, %v8467_v21  ;;  %v3547_v48 = vrot.slane %v3531_v31, 2  ;;  %v3551_v63 = vrot.slane %v3531_v31, 6  ;;  %v3552_v9 = vrot.slane %v3531_v31, 7 }
0x1787   :  { %v3534_v38 = vpop.f32.mrb[26].mxu0  ;;  %v9930_v20 = vld [vmem:[#allocation2 + $0x8] sm:$0x1] }
0x1788   :  { %v7216_v43 = vpop.f32.mrb[27].mxu0  ;;  %3626 = vrot.lane.b32.xlu1 %v3617_v1, %s8326_s30  ;;  %v3620_v13 = vrot.slane %v3617_v1, 2  ;;  %v3619_v24 = vrot.slane %v3617_v1, 1  ;;  %v3621_v52 = vrot.slane %v3617_v1, 3  ;;  %v3622_v2 = vrot.slane %v3617_v1, 4 }
0x1789   :  { %v3623_v29 = vrot.slane %v3617_v1, 5  ;;  %v3624_v18 = vrot.slane %v3617_v1, 6  ;;  %v3625_v50 = vrot.slane %v3617_v1, 7  ;;  %v3546_v38 = vrot.slane %v3531_v31, 1  ;;  %v9939_v1 = vld [vmem:[#allocation2 + $0x38] sm:$0x1] }
0x178a   :  { %3630 = vrot.lane.b32.xlu0 %v3620_v13, %s8326_s30  ;;  %v3561_v43 = vadd.f32 %v9930_v20, %v3531_v31  ;;  %v9933_v13 = vld [vmem:[#allocation2 + $0x28] sm:$0x1] }
0x178c   :  { %3628 = vrot.lane.b32.xlu1 %v3619_v24, %s8326_s30  ;;  %v3548_v24 = vrot.slane %v3531_v31, 3 }
0x178e   :  { %3632 = vrot.lane.b32.xlu0 %v3621_v52, %s8326_s30  ;;  %v3563_v52 = vadd.f32 %v3547_v48, %v9933_v13  ;;  %v3564_v53 = vadd.f32 %v3548_v24, %v9939_v1  ;;  %v9945_v48 = vld [vmem:[#allocation2 + $0x58] sm:$0x1] }
0x1790   :  { %3634 = vrot.lane.b32.xlu1 %v3622_v2, %s8326_s30  ;;  %v9936_v2 = vld [vmem:[#allocation2 + $0x18] sm:$0x1]  ;;  %v6809_v47 = vmul.f32 -1.442695, %v3563_v52 }
0x1791   :  { %v3562_v0 = vadd.f32 %v3546_v38, %v9936_v2  ;;  %v6810_v38 = vmul.f32 -1.442695, %v3564_v53  ;;  %v9951_v52 = vld [vmem:[#allocation2 + $0x78] sm:$0x1] }
0x1792   :  { %3636 = vrot.lane.b32.xlu0 %v3623_v29, %s8326_s30  ;;  %v3549_v29 = vrot.slane %v3531_v31, 4  ;;  %v3568_v12 = vadd.f32 %v3552_v9, %v9951_v52 }
0x1793   :  { %v6808_v19 = vmul.f32 -1.442695, %v3562_v0 }
0x1794   :  { %3638 = vrot.lane.b32.xlu1 %v3624_v18, %s8326_s30  ;;  %v6807_v18 = vmul.f32 -1.442695, %v3561_v43  ;;  %v3565_v30 = vadd.f32 %v3549_v29, %v9942_v14  ;;  %v9948_v43 = vld [vmem:[#allocation2 + $0x68] sm:$0x1] }
0x1795   :  { %v3567_v56 = vadd.f32 %v3551_v63, %v9948_v43 }
0x1796   :  { %3640 = vrot.lane.b32.xlu0 %v3625_v50, %s8326_s30  ;;  %v3550_v50 = vrot.slane %v3531_v31, 5  ;;  %7838 = vpow2.f32 %v6807_v18  ;;  %v6811_v24 = vmul.f32 -1.442695, %v3565_v30  ;;  %v6814_v31 = vmul.f32 -1.442695, %v3568_v12 }
0x1797   :  { %7840 = vpow2.f32 %v6809_v47  ;;  %v6813_v0 = vmul.f32 -1.442695, %v3567_v56 }
0x1798   :  { %v3566_v62 = vadd.f32 %v3550_v50, %v9945_v48  ;;  %7842 = vpow2.f32 %v6808_v19 }
0x1799   :  { %7844 = vpow2.f32 %v6810_v38 }
0x179a   :  { %v6812_v29 = vmul.f32 -1.442695, %v3566_v62  ;;  %7846 = vpow2.f32 %v6811_v24 }
0x179c   :  { %7848 = vpow2.f32 %v6812_v29 }
0x179d   :  { %7850 = vpow2.f32 %v6813_v0 }
0x179e   :  { %7852 = vpow2.f32 %v6814_v31 }
0x17a0   :  { %v7839_v18 = vpop.eup %7838 }
0x17a1   :  { %v7841_v50 = vpop.eup %7840  ;;  %v3593_v53 = vadd.f32 1.0, %v7839_v18 }
0x17a2   :  { %v7843_v47 = vpop.eup %7842  ;;  %v3595_v34 = vadd.f32 1.0, %v7841_v50 }
0x17a3   :  { %v7845_v63 = vpop.eup %7844  ;;  %7854 = vrcp.f32 %v3593_v53  ;;  %v3594_v19 = vadd.f32 1.0, %v7843_v47 }
0x17a4   :  { %v7847_v30 = vpop.eup %7846  ;;  %7856 = vrcp.f32 %v3595_v34  ;;  %v3596_v37 = vadd.f32 1.0, %v7845_v63 }
0x17a5   :  { %7858 = vrcp.f32 %v3594_v19  ;;  %v3597_v62 = vadd.f32 1.0, %v7847_v30 }
0x17a6   :  { %v7849_v9 = vpop.eup %7848  ;;  %7860 = vrcp.f32 %v3596_v37 }
0x17a7   :  { %v7851_v38 = vpop.eup %7850  ;;  %v3598_v56 = vadd.f32 1.0, %v7849_v9  ;;  %7862 = vrcp.f32 %v3597_v62 }
0x17a8   :  { %v7853_v24 = vpop.eup %7852  ;;  %v3599_v12 = vadd.f32 1.0, %v7851_v38 }
0x17a9   :  { %7864 = vrcp.f32 %v3598_v56  ;;  %v3600_v18 = vadd.f32 1.0, %v7853_v24 }
0x17aa   :  { %7866 = vrcp.f32 %v3599_v12 }
0x17ab   :  { %7868 = vrcp.f32 %v3600_v18 }
0x17ad   :  { %v9954_v29 = vpop.eup %7854 }
0x17ae   :  { %v9957_v50 = vpop.eup %7856 }
0x17af   :  { %v9961_v37 = vpop.eup %7858 }
0x17b0   :  { %v9965_v19 = vpop.eup %7860 }
0x17b1   :  { %v9969_v62 = vpop.eup %7862 }
0x17b3   :  { %v9973_v24 = vpop.eup %7864 }
0x17b4   :  { %v9977_v18 = vpop.eup %7866 }
0x17fa   :  { %v3627_v0 = vpop.permute.xlu1 %3626 }
0x17fb   :  { %v3650_v31 = vmul.f32 %v9954_v29, %v3627_v0 }
0x17fc   :  { %v3631_v34 = vpop.permute.xlu0 %3630 }
0x17fd   :  { %v3652_v53 = vmul.f32 %v9957_v50, %v3631_v34  ;;  %3666 = vrot.lane.b32.xlu1 %v3650_v31, %s8326_s30 }
0x17fe   :  { %v3629_v47 = vpop.permute.xlu1 %3628 }
0x17ff   :  { %v3651_v63 = vmul.f32 %v9961_v37, %v3629_v47  ;;  %3670 = vrot.lane.b32.xlu0 %v3652_v53, %s8326_s30  ;;  %v9981_v53 = vpop.eup %7868 }
0x1800   :  { %v3633_v30 = vpop.permute.xlu0 %3632 }
0x1801   :  { %v3653_v9 = vmul.f32 %v9965_v19, %v3633_v30  ;;  %3668 = vrot.lane.b32.xlu1 %v3651_v63, %s8326_s30 }
0x1802   :  { %v3635_v38 = vpop.permute.xlu1 %3634 }
0x1803   :  { %v3654_v56 = vmul.f32 %v9969_v62, %v3635_v38  ;;  %3672 = vrot.lane.b32.xlu0 %v3653_v9, %s8326_s30 }
0x1804   :  { %v3637_v12 = vpop.permute.xlu0 %3636 }
0x1805   :  { %v3655_v0 = vmul.f32 %v9973_v24, %v3637_v12  ;;  %3674 = vrot.lane.b32.xlu1 %v3654_v56, %s8326_s30 }
0x1806   :  { %v3639_v31 = vpop.permute.xlu1 %3638 }
0x1807   :  { %v3656_v34 = vmul.f32 %v9977_v18, %v3639_v31  ;;  %3676 = vrot.lane.b32.xlu0 %v3655_v0, %s8326_s30 }
0x1808   :  { %v3641_v47 = vpop.permute.xlu0 %3640 }
0x1809   :  { %v3657_v63 = vmul.f32 %v9981_v53, %v3641_v47  ;;  %3678 = vrot.lane.b32.xlu1 %v3656_v34, %s8326_s30 }
0x180b   :  { %3680 = vrot.lane.b32.xlu0 %v3657_v63, %s8326_s30 }
0x186f   :  { %v3667_v30 = vpop.permute.xlu1 %3666 }
0x1870   :  { %v3690_v9 = vadd.f32 %v3667_v30, %v9930_v20 }
0x1871   :  { %v3671_v38 = vpop.permute.xlu0 %3670 }
0x1872   :  { %7870 = vtanh.f32 %v3690_v9  ;;  %v3692_v56 = vadd.f32 %v3671_v38, %v9933_v13 }
0x1873   :  { %v3669_v12 = vpop.permute.xlu1 %3668 }
0x1874   :  { %7872 = vtanh.f32 %v3692_v56  ;;  %v3691_v0 = vadd.f32 %v3669_v12, %v9936_v2 }
0x1875   :  { %v3673_v31 = vpop.permute.xlu0 %3672 }
0x1876   :  { %7874 = vtanh.f32 %v3691_v0  ;;  %v3693_v22 = vadd.f32 %v3673_v31, %v9939_v1 }
0x1877   :  { %v3675_v47 = vpop.permute.xlu1 %3674 }
0x1878   :  { %7876 = vtanh.f32 %v3693_v22  ;;  %v3694_v34 = vadd.f32 %v3675_v47, %v9942_v14  ;;  %v3708_v47 = vsub.f32 1.0, %v9957_v50 }
0x1879   :  { %v3677_v63 = vpop.permute.xlu0 %3676 }
0x187a   :  { %7878 = vtanh.f32 %v3694_v34  ;;  %v3695_v20 = vadd.f32 %v3677_v63, %v9945_v48  ;;  %v3754_v34 = vmul.f32 %v9954_v29, %v9826_v28  ;;  %v3757_v28 = vmul.f32 %v9965_v19, %v9855_v35 }
0x187b   :  { %v3679_v30 = vpop.permute.xlu1 %3678 }
0x187c   :  { %v7871_v9 = vpop.eup %7870  ;;  %7880 = vtanh.f32 %v3695_v20  ;;  %v3696_v13 = vadd.f32 %v3679_v30, %v9948_v43  ;;  %v3756_v20 = vmul.f32 %v9957_v50, %v9833_v49 }
0x187d   :  { %v3681_v38 = vpop.permute.xlu0 %3680  ;;  %3722 = vrot.lane.b32.xlu1 %v7871_v9, %s8332_s8  ;;  %v3707_v9 = vsub.f32 1.0, %v9961_v37 }
0x187e   :  { %v7873_v2 = vpop.eup %7872  ;;  %7882 = vtanh.f32 %v3696_v13  ;;  %v3697_v1 = vadd.f32 %v3681_v38, %v9951_v52  ;;  %v3706_v52 = vsub.f32 1.0, %v9954_v29 }
0x187f   :  { %3726 = vrot.lane.b32.xlu0 %v7873_v2, %s8332_s8 }
0x1880   :  { %v7875_v22 = vpop.eup %7874  ;;  %7884 = vtanh.f32 %v3697_v1  ;;  %v3755_v1 = vmul.f32 %v9961_v37, %v9843_v10 }
0x1881   :  { %3724 = vrot.lane.b32.xlu1 %v7875_v22, %s8332_s8 }
0x1882   :  { %v7877_v14 = vpop.eup %7876 }
0x1883   :  { %3728 = vrot.lane.b32.xlu0 %v7877_v14, %s8332_s8  ;;  %v3709_v14 = vsub.f32 1.0, %v9965_v19  ;;  %v3758_v19 = vmul.f32 %v9969_v62, %v9866_v55  ;;  %v3759_v55 = vmul.f32 %v9973_v24, %v9872_v59 }
0x1884   :  { %v7879_v48 = vpop.eup %7878 }
0x1885   :  { %3730 = vrot.lane.b32.xlu1 %v7879_v48, %s8332_s8 }
0x1886   :  { %v7881_v43 = vpop.eup %7880 }
0x1887   :  { %3732 = vrot.lane.b32.xlu0 %v7881_v43, %s8332_s8  ;;  %v3710_v43 = vsub.f32 1.0, %v9969_v62 }
0x1888   :  { %v7883_v56 = vpop.eup %7882 }
0x1889   :  { %3734 = vrot.lane.b32.xlu1 %v7883_v56, %s8332_s8 }
0x188a   :  { %v7885_v12 = vpop.eup %7884 }
0x188b   :  { %3736 = vrot.lane.b32.xlu0 %v7885_v12, %s8332_s8 }
0x18ef   :  { %v3723_v0 = vpop.permute.xlu1 %3722 }
0x18f0   :  { %v3746_v31 = vmul.f32 %v3723_v0, %v3706_v52  ;;  %v3711_v0 = vsub.f32 1.0, %v9973_v24 }
0x18f1   :  { %v3727_v63 = vpop.permute.xlu0 %3726 }
0x18f2   :  { %v3748_v30 = vmul.f32 %v3727_v63, %v3708_v47  ;;  %v10009_v13 = vadd.f32 %v3754_v34, %v3746_v31 }
0x18f3   :  { %v3725_v38 = vpop.permute.xlu1 %3724 }
0x18f4   :  { %v10011_v2 = vadd.f32 %v3756_v20, %v3748_v30  ;;  %v3747_v22 = vmul.f32 %v3725_v38, %v3707_v9  ;;  %v10027_v56 = vpack.c.bf16 %v10009_v13, %v10009_v13  ;;  %v3712_v20 = vsub.f32 1.0, %v9977_v18 }
0x18f5   :  { %v3729_v29 = vpop.permute.xlu0 %3728  ;;  %v3760_v9 = vmul.f32 %v9977_v18, %v9875_v3 }
0x18f6   :  { %v10020_v49 = vpack.c.bf16 %v10011_v2, %v10011_v2  ;;  %v10022_v50 = vadd.f32 %v3755_v1, %v3747_v22  ;;  %v3749_v48 = vmul.f32 %v3729_v29, %v3709_v14  ;;  %11911 = vst [vmem:[#allocation50_spill] sm:$0xff] %v10027_v56  ;;  %v3786_v30 = vunpack.c.l.b16 %v10027_v56 }
0x18f7   :  { %v3731_v10 = vpop.permute.xlu1 %3730 }
0x18f8   :  { %11910 = vst [vmem:[#allocation49_spill] sm:$0xff] %v10020_v49  ;;  %v10031_v37 = vpack.c.bf16 %v10022_v50, %v10022_v50  ;;  %v10033_v35 = vadd.f32 %v3757_v28, %v3749_v48  ;;  %v3750_v12 = vmul.f32 %v3731_v10, %v3710_v43  ;;  %v3788_v52 = vunpack.c.l.b16 %v10020_v49 }
0x18f9   :  { %v3733_v31 = vpop.permute.xlu0 %3732  ;;  %v3713_v43 = vsub.f32 1.0, %v9981_v53 }
0x18fa   :  { %11912 = vst [vmem:[#allocation51_spill] sm:$0xff] %v10031_v37  ;;  %v3787_v47 = vunpack.c.l.b16 %v10031_v37  ;;  %v10042_v34 = vpack.c.bf16 %v10033_v35, %v10033_v35  ;;  %v10044_v63 = vadd.f32 %v3758_v19, %v3750_v12  ;;  %v3751_v62 = vmul.f32 %v3733_v31, %v3711_v0 }
0x18fb   :  { %v3735_v38 = vpop.permute.xlu1 %3734  ;;  %v3852_v29 = vrot.slane %v3788_v52, 6  ;;  %v3761_v52 = vmul.f32 %v9981_v53, %v9886_v11 }
0x18fc   :  { %11913 = vst [vmem:[#allocation52_spill] sm:$0xff] %v10042_v34  ;;  %v3850_v1 = vrot.slane %v3787_v47, 7  ;;  %v3789_v22 = vunpack.c.l.b16 %v10042_v34  ;;  %v10055_v14 = vpack.c.bf16 %v10044_v63, %v10044_v63  ;;  %v3752_v28 = vmul.f32 %v3735_v38, %v3712_v20 }
0x18fd   :  { %v10057_v48 = vadd.f32 %v3759_v55, %v3751_v62  ;;  %v3737_v10 = vpop.permute.xlu0 %3736 }
0x18fe   :  { %11914 = vst [vmem:[#allocation53_spill] sm:$0xff] %v10055_v14  ;;  %v3851_v59 = vsel %vm699_vm4, %v3850_v1, %v3786_v30  ;;  %v3854_v24 = vrot.slane %v3789_v22, 5  ;;  %v3790_v3 = vunpack.c.l.b16 %v10055_v14  ;;  %v10062_v18 = vadd.f32 %v3760_v9, %v3752_v28 }
0x18ff   :  { %v3853_v19 = vsel %vm702_vm5, %v3852_v29, %v3851_v59  ;;  %v10067_v12 = vpack.c.bf16 %v10057_v48, %v10057_v48  ;;  %v3753_v0 = vmul.f32 %v3737_v10, %v3713_v43 }
0x1900   :  { %v3855_v31 = vsel %vm705_vm6, %v3854_v24, %v3853_v19  ;;  %v3856_v47 = vrot.slane %v3790_v3, 4  ;;  %v10074_v20 = vpack.c.bf16 %v10062_v18, %v10062_v18 }
0x1901   :  { %11915 = vst [vmem:[#allocation54_spill] sm:$0xff] %v10067_v12  ;;  %v3791_v30 = vunpack.c.l.b16 %v10067_v12  ;;  %v10077_v55 = vadd.f32 %v3761_v52, %v3753_v0 }
0x1902   :  { %11916 = vst [vmem:[#allocation55_spill] sm:$0xff] %v10074_v20  ;;  %v3857_v62 = vsel %vm708_vm7, %v3856_v47, %v3855_v31  ;;  %v3792_v9 = vunpack.c.l.b16 %v10074_v20 }
0x1903   :  { %v3858_v38 = vrot.slane %v3791_v30, 3  ;;  %v10083_v11 = vpack.c.bf16 %v10077_v55, %v10077_v55 }
0x1904   :  { %v3860_v53 = vrot.slane %v3792_v9, 2 }
0x1905   :  { %11917 = vst [vmem:[#allocation56_spill] sm:$0xff] %v10083_v11  ;;  %v3793_v1 = vunpack.c.l.b16 %v10083_v11  ;;  %v3859_v22 = vsel %vm711_vm8, %v3858_v38, %v3857_v62 }
0x1906   :  { %v3861_v28 = vsel %vm714_vm9, %v3860_v53, %v3859_v22  ;;  %v10106_v22 = vld [vmem:[#allocation2 + $0x9] sm:$0x1] }
0x1907   :  { %v3862_v29 = vrot.slane %v3793_v1, 1 }
0x1909   :  { %v3863_v43 = vsel %vm11873_vm10, %v3862_v29, %v3861_v28 }
0x190a   :  { %v3864_v10 = vpack.c.b16 %v3863_v43, %v3863_v43  ;;  %v10109_v43 = vld [vmem:[#allocation2 + $0x29] sm:$0x1] }
0x190c   :  { %3865 = vrot.lane.b32.xlu1 %v3864_v10, %s8332_s8 }
0x197e   :  { %v3866_v59 = vpop.permute.xlu1 %3865 }
0x197f   :  { %7222 = vmatmul.mubr.msk.bf16.vlgmr.msra.gmra.mrb[24].mxu1 %vm11872_vm0, %v3866_v59 }
0x1980   :  { %7234 = vmatpush3.bf16.msra.mxu1 %v9911_v17  ;;  %7237 = vmatprep.mubr.msk.bf16.mxu1 %vm8330_vm1, %v11885_v44 }
0x1981   :  { %7235 = vmatprep.subr.bf16.mxu1 %v11885_v44 }
0x1984   :  { %7236 = vmatpush3.bf16.msra.mxu1 %v9917_v51 }
0x1985   :  { %7249 = vmatprep.subr.bf16.mxu1 %v11885_v44 }
0x1a52   :  { %v3904_v24 = vpop.f32.mrb[24].mxu1 }
0x1a53   :  { %v7223_v3 = vpop.f32.mrb[25].mxu1  ;;  %v3990_v0 = vadd.f32 %v3904_v24, %v8467_v21  ;;  %v3920_v1 = vrot.slane %v3904_v24, 2  ;;  %v3919_v28 = vrot.slane %v3904_v24, 1  ;;  %v3934_v29 = vadd.f32 %v10106_v22, %v3904_v24 }
0x1a54   :  { %v3907_v19 = vpop.f32.mrb[26].mxu1  ;;  %v3921_v10 = vrot.slane %v3904_v24, 3  ;;  %v10112_v3 = vld [vmem:[#allocation2 + $0x19] sm:$0x1]  ;;  %v3925_v12 = vrot.slane %v3904_v24, 7 }
0x1a55   :  { %v7224_v52 = vpop.f32.mrb[27].mxu1  ;;  %3999 = vrot.lane.b32.xlu0 %v3990_v0, %s8326_s30  ;;  %v3993_v31 = vrot.slane %v3990_v0, 2  ;;  %v3992_v47 = vrot.slane %v3990_v0, 1  ;;  %v3994_v30 = vrot.slane %v3990_v0, 3  ;;  %v3995_v62 = vrot.slane %v3990_v0, 4 }
0x1a56   :  { %v3996_v9 = vrot.slane %v3990_v0, 5  ;;  %v3997_v38 = vrot.slane %v3990_v0, 6  ;;  %v3998_v53 = vrot.slane %v3990_v0, 7  ;;  %v3936_v59 = vadd.f32 %v3920_v1, %v10109_v43  ;;  %v10115_v0 = vld [vmem:[#allocation2 + $0x39] sm:$0x1] }
0x1a57   :  { %4003 = vrot.lane.b32.xlu1 %v3993_v31, %s8326_s30  ;;  %v3922_v19 = vrot.slane %v3904_v24, 4  ;;  %v3935_v52 = vadd.f32 %v3919_v28, %v10112_v3  ;;  %v6824_v31 = vmul.f32 -1.442695, %v3934_v29  ;;  %v10121_v1 = vld [vmem:[#allocation2 + $0x59] sm:$0x1] }
0x1a58   :  { %v10124_v29 = vld [vmem:[#allocation2 + $0x69] sm:$0x1] }
0x1a59   :  { %4001 = vrot.lane.b32.xlu0 %v3992_v47, %s8326_s30  ;;  %v3923_v47 = vrot.slane %v3904_v24, 5  ;;  %7886 = vpow2.f32 %v6824_v31  ;;  %v6825_v11 = vmul.f32 -1.442695, %v3935_v52 }
0x1a5b   :  { %4005 = vrot.lane.b32.xlu1 %v3994_v30, %s8326_s30  ;;  %v3937_v30 = vadd.f32 %v3921_v10, %v10115_v0  ;;  %v3939_v20 = vadd.f32 %v3923_v47, %v10121_v1 }
0x1a5d   :  { %4007 = vrot.lane.b32.xlu0 %v3995_v62, %s8326_s30  ;;  %v6826_v62 = vmul.f32 -1.442695, %v3936_v59  ;;  %v6827_v28 = vmul.f32 -1.442695, %v3937_v30  ;;  %v10127_v59 = vld [vmem:[#allocation2 + $0x79] sm:$0x1] }
0x1a5e   :  { %v3941_v14 = vadd.f32 %v3925_v12, %v10127_v59 }
0x1a5f   :  { %4009 = vrot.lane.b32.xlu1 %v3996_v9, %s8326_s30  ;;  %v10118_v9 = vld [vmem:[#allocation2 + $0x49] sm:$0x1]  ;;  %7888 = vpow2.f32 %v6826_v62 }
0x1a60   :  { %7890 = vpow2.f32 %v6825_v11 }
0x1a61   :  { %4011 = vrot.lane.b32.xlu0 %v3997_v38, %s8326_s30  ;;  %v3924_v38 = vrot.slane %v3904_v24, 6  ;;  %7892 = vpow2.f32 %v6827_v28  ;;  %v6831_v24 = vmul.f32 -1.442695, %v3941_v14 }
0x1a63   :  { %4013 = vrot.lane.b32.xlu1 %v3998_v53, %s8326_s30  ;;  %v3938_v53 = vadd.f32 %v3922_v19, %v10118_v9  ;;  %v3940_v34 = vadd.f32 %v3924_v38, %v10124_v29  ;;  %v6829_v19 = vmul.f32 -1.442695, %v3939_v20  ;;  %v7887_v31 = vpop.eup %7886 }
0x1a64   :  { %v3966_v30 = vadd.f32 1.0, %v7887_v31 }
0x1a65   :  { %v6828_v10 = vmul.f32 -1.442695, %v3938_v53  ;;  %v6830_v52 = vmul.f32 -1.442695, %v3940_v34 }
0x1a67   :  { %7894 = vpow2.f32 %v6828_v10 }
0x1a68   :  { %7896 = vpow2.f32 %v6829_v19 }
0x1a69   :  { %v7889_v47 = vpop.eup %7888  ;;  %7898 = vpow2.f32 %v6830_v52 }
0x1a6a   :  { %v7891_v62 = vpop.eup %7890  ;;  %7900 = vpow2.f32 %v6831_v24  ;;  %v3968_v37 = vadd.f32 1.0, %v7889_v47 }
0x1a6b   :  { %v7893_v38 = vpop.eup %7892  ;;  %7902 = vrcp.f32 %v3966_v30  ;;  %v3967_v11 = vadd.f32 1.0, %v7891_v62 }
0x1a6c   :  { %7904 = vrcp.f32 %v3968_v37  ;;  %v3969_v49 = vadd.f32 1.0, %v7893_v38 }
0x1a6d   :  { %7906 = vrcp.f32 %v3967_v11 }
0x1a6e   :  { %7908 = vrcp.f32 %v3969_v49 }
0x1a71   :  { %v7895_v53 = vpop.eup %7894 }
0x1a72   :  { %v7897_v12 = vpop.eup %7896  ;;  %v3970_v20 = vadd.f32 1.0, %v7895_v53 }
0x1a73   :  { %v7899_v28 = vpop.eup %7898  ;;  %v3971_v34 = vadd.f32 1.0, %v7897_v12 }
0x1a74   :  { %v7901_v10 = vpop.eup %7900  ;;  %7910 = vrcp.f32 %v3970_v20  ;;  %v3972_v14 = vadd.f32 1.0, %v7899_v28 }
0x1a75   :  { %v10130_v19 = vpop.eup %7902  ;;  %7912 = vrcp.f32 %v3971_v34  ;;  %v3973_v31 = vadd.f32 1.0, %v7901_v10 }
0x1a76   :  { %v10133_v47 = vpop.eup %7904  ;;  %7914 = vrcp.f32 %v3972_v14 }
0x1a77   :  { %v10137_v49 = vpop.eup %7906  ;;  %7916 = vrcp.f32 %v3973_v31 }
0x1a78   :  { %v10141_v11 = vpop.eup %7908 }
0x1a7e   :  { %v10145_v20 = vpop.eup %7910 }
0x1a7f   :  { %v10149_v10 = vpop.eup %7912 }
0x1a80   :  { %v10153_v31 = vpop.eup %7914 }
0x1ac7   :  { %v4000_v52 = vpop.permute.xlu0 %3999 }
0x1ac8   :  { %v4023_v24 = vmul.f32 %v10130_v19, %v4000_v52 }
0x1ac9   :  { %v4004_v37 = vpop.permute.xlu1 %4003 }
0x1aca   :  { %v4025_v30 = vmul.f32 %v10133_v47, %v4004_v37  ;;  %4039 = vrot.lane.b32.xlu0 %v4023_v24, %s8326_s30 }
0x1acb   :  { %v4002_v62 = vpop.permute.xlu0 %4001 }
0x1acc   :  { %v4024_v38 = vmul.f32 %v10137_v49, %v4002_v62  ;;  %4043 = vrot.lane.b32.xlu1 %v4025_v30, %s8326_s30  ;;  %v10157_v30 = vpop.eup %7916 }
0x1acd   :  { %v4006_v53 = vpop.permute.xlu1 %4005 }
0x1ace   :  { %v4026_v12 = vmul.f32 %v10141_v11, %v4006_v53  ;;  %4041 = vrot.lane.b32.xlu0 %v4024_v38, %s8326_s30 }
0x1acf   :  { %v4008_v28 = vpop.permute.xlu0 %4007 }
0x1ad0   :  { %v4027_v34 = vmul.f32 %v10145_v20, %v4008_v28  ;;  %4045 = vrot.lane.b32.xlu1 %v4026_v12, %s8326_s30 }
0x1ad1   :  { %v4010_v14 = vpop.permute.xlu1 %4009 }
0x1ad2   :  { %v4028_v52 = vmul.f32 %v10149_v10, %v4010_v14  ;;  %4047 = vrot.lane.b32.xlu0 %v4027_v34, %s8326_s30 }
0x1ad3   :  { %v4012_v24 = vpop.permute.xlu0 %4011 }
0x1ad4   :  { %v4029_v37 = vmul.f32 %v10153_v31, %v4012_v24  ;;  %4049 = vrot.lane.b32.xlu1 %v4028_v52, %s8326_s30 }
0x1ad5   :  { %v4014_v62 = vpop.permute.xlu1 %4013 }
0x1ad6   :  { %v4030_v38 = vmul.f32 %v10157_v30, %v4014_v62  ;;  %4051 = vrot.lane.b32.xlu0 %v4029_v37, %s8326_s30 }
0x1ad8   :  { %4053 = vrot.lane.b32.xlu1 %v4030_v38, %s8326_s30 }
0x1b3c   :  { %v4040_v53 = vpop.permute.xlu0 %4039 }
0x1b3d   :  { %v4063_v12 = vadd.f32 %v4040_v53, %v10106_v22 }
0x1b3e   :  { %v4044_v28 = vpop.permute.xlu1 %4043 }
0x1b3f   :  { %7918 = vtanh.f32 %v4063_v12  ;;  %v4065_v34 = vadd.f32 %v4044_v28, %v10109_v43 }
0x1b40   :  { %v4042_v14 = vpop.permute.xlu0 %4041 }
0x1b41   :  { %7920 = vtanh.f32 %v4065_v34  ;;  %v4064_v52 = vadd.f32 %v4042_v14, %v10112_v3 }
0x1b42   :  { %v4046_v24 = vpop.permute.xlu1 %4045 }
0x1b43   :  { %7922 = vtanh.f32 %v4064_v52  ;;  %v4066_v56 = vadd.f32 %v4046_v24, %v10115_v0  ;;  %v4127_v24 = vmul.f32 %v10130_v19, %v10009_v13  ;;  %v4082_v13 = vsub.f32 1.0, %v10141_v11 }
0x1b44   :  { %v4048_v62 = vpop.permute.xlu0 %4047 }
0x1b45   :  { %7924 = vtanh.f32 %v4066_v56  ;;  %v4067_v37 = vadd.f32 %v4048_v62, %v10118_v9 }
0x1b46   :  { %v4050_v38 = vpop.permute.xlu1 %4049 }
0x1b47   :  { %7926 = vtanh.f32 %v4067_v37  ;;  %v4068_v22 = vadd.f32 %v4050_v38, %v10121_v1  ;;  %v4081_v37 = vsub.f32 1.0, %v10133_v47 }
0x1b48   :  { %v4052_v53 = vpop.permute.xlu0 %4051 }
0x1b49   :  { %v7919_v12 = vpop.eup %7918  ;;  %7928 = vtanh.f32 %v4068_v22  ;;  %v4069_v43 = vadd.f32 %v4052_v53, %v10124_v29  ;;  %v4129_v53 = vmul.f32 %v10133_v47, %v10011_v2  ;;  %v4083_v47 = vsub.f32 1.0, %v10145_v20 }
0x1b4a   :  { %v4054_v28 = vpop.permute.xlu1 %4053  ;;  %4095 = vrot.lane.b32.xlu0 %v7919_v12, %s8332_s8 }
0x1b4b   :  { %v7921_v3 = vpop.eup %7920  ;;  %7930 = vtanh.f32 %v4069_v43  ;;  %v4070_v0 = vadd.f32 %v4054_v28, %v10127_v59  ;;  %v4079_v59 = vsub.f32 1.0, %v10130_v19  ;;  %v4080_v43 = vsub.f32 1.0, %v10137_v49 }
0x1b4c   :  { %4099 = vrot.lane.b32.xlu1 %v7921_v3, %s8332_s8 }
0x1b4d   :  { %v7923_v56 = vpop.eup %7922  ;;  %7932 = vtanh.f32 %v4070_v0  ;;  %v4128_v0 = vmul.f32 %v10137_v49, %v10022_v50  ;;  %v4131_v50 = vmul.f32 %v10145_v20, %v10044_v63  ;;  %v4086_v63 = vsub.f32 1.0, %v10157_v30 }
0x1b4e   :  { %4097 = vrot.lane.b32.xlu0 %v7923_v56, %s8332_s8 }
0x1b4f   :  { %v7925_v9 = vpop.eup %7924 }
0x1b50   :  { %4101 = vrot.lane.b32.xlu1 %v7925_v9, %s8332_s8 }
0x1b51   :  { %v7927_v1 = vpop.eup %7926 }
0x1b52   :  { %4103 = vrot.lane.b32.xlu0 %v7927_v1, %s8332_s8 }
0x1b53   :  { %v7929_v29 = vpop.eup %7928 }
0x1b54   :  { %4105 = vrot.lane.b32.xlu1 %v7929_v29, %s8332_s8  ;;  %v4130_v29 = vmul.f32 %v10141_v11, %v10033_v35  ;;  %v4133_v11 = vmul.f32 %v10153_v31, %v10062_v18 }
0x1b55   :  { %v7931_v34 = vpop.eup %7930 }
0x1b56   :  { %4107 = vrot.lane.b32.xlu0 %v7931_v34, %s8332_s8 }
0x1b57   :  { %v7933_v14 = vpop.eup %7932 }
0x1b58   :  { %4109 = vrot.lane.b32.xlu1 %v7933_v14, %s8332_s8  ;;  %v4084_v14 = vsub.f32 1.0, %v10149_v10 }
0x1bbc   :  { %v4096_v52 = vpop.permute.xlu0 %4095 }
0x1bbd   :  { %v4119_v62 = vmul.f32 %v4096_v52, %v4079_v59 }
0x1bbe   :  { %v4100_v38 = vpop.permute.xlu1 %4099 }
0x1bbf   :  { %v10182_v22 = vadd.f32 %v4127_v24, %v4119_v62  ;;  %v4121_v12 = vmul.f32 %v4100_v38, %v4081_v37  ;;  %v4132_v24 = vmul.f32 %v10149_v10, %v10057_v48  ;;  %v4085_v62 = vsub.f32 1.0, %v10153_v31 }
0x1bc0   :  { %v4098_v28 = vpop.permute.xlu0 %4097 }
0x1bc1   :  { %v10187_v3 = vadd.f32 %v4129_v53, %v4121_v12  ;;  %v4120_v56 = vmul.f32 %v4098_v28, %v4080_v43  ;;  %v4143_v9 = vpack.c.bf16 %v10182_v22, %v10182_v22 }
0x1bc2   :  { %v4102_v19 = vpop.permute.xlu1 %4101 }
0x1bc3   :  { %v4145_v1 = vpack.c.bf16 %v10187_v3, %v10187_v3  ;;  %v10196_v2 = vadd.f32 %v4128_v0, %v4120_v56  ;;  %v4122_v34 = vmul.f32 %v4102_v19, %v4082_v13  ;;  %v4176_v20 = vshll.u32 %v4143_v9, 16 }
0x1bc4   :  { %v4104_v49 = vpop.permute.xlu0 %4103  ;;  %v4159_v28 = vunpack.c.l.b16 %v4143_v9  ;;  %v4134_v56 = vmul.f32 %v10157_v30, %v10077_v55 }
0x1bc5   :  { %v4144_v59 = vpack.c.bf16 %v10196_v2, %v10196_v2  ;;  %v4123_v52 = vmul.f32 %v4104_v49, %v4083_v47  ;;  %v4161_v37 = vunpack.c.l.b16 %v4145_v1  ;;  %v10209_v38 = vadd.f32 %v4130_v29, %v4122_v34 }
0x1bc6   :  { %v4106_v35 = vpop.permute.xlu1 %4105  ;;  %v4182_v49 = vshll.u32 %v4145_v1, 16 }
0x1bc7   :  { %v4160_v53 = vunpack.c.l.b16 %v4144_v59  ;;  %v4179_v12 = vshll.u32 %v4144_v59, 16  ;;  %v10214_v43 = vadd.f32 %v4131_v50, %v4123_v52  ;;  %v4146_v48 = vpack.c.bf16 %v10209_v38, %v10209_v38 }
0x1bc8   :  { %v4124_v10 = vmul.f32 %v4106_v35, %v4084_v14  ;;  %v4108_v0 = vpop.permute.xlu0 %4107  ;;  %v4249_v47 = vrot.slane %v4161_v37, 6 }
0x1bc9   :  { %v4247_v13 = vrot.slane %v4160_v53, 7  ;;  %v4147_v18 = vpack.c.bf16 %v10214_v43, %v10214_v43  ;;  %v4125_v31 = vmul.f32 %v4108_v0, %v4085_v62  ;;  %v10222_v19 = vpack.i.bf16 %v4179_v12, %v4176_v20 }
0x1bca   :  { %v4162_v29 = vunpack.c.l.b16 %v4146_v48  ;;  %v4185_v34 = vshll.u32 %v4146_v48, 16  ;;  %v10224_v50 = vadd.f32 %v4132_v24, %v4124_v10  ;;  %v4110_v9 = vpop.permute.xlu1 %4109 }
0x1bcb   :  { %11918 = vst [vmem:[#allocation57_spill] sm:$0xff] %v10222_v19  ;;  %v4248_v14 = vsel %vm699_vm4, %v4247_v13, %v4159_v28  ;;  %v4163_v59 = vunpack.c.l.b16 %v4147_v18  ;;  %v10227_v52 = vadd.f32 %v4133_v11, %v4125_v31  ;;  %v4126_v35 = vmul.f32 %v4110_v9, %v4086_v63 }
0x1bcc   :  { %v4250_v55 = vsel %vm702_vm5, %v4249_v47, %v4248_v14  ;;  %v4251_v30 = vrot.slane %v4162_v29, 5  ;;  %v4148_v62 = vpack.c.bf16 %v10224_v50, %v10224_v50  ;;  %v4188_v20 = vshll.u32 %v4147_v18, 16 }
0x1bcd   :  { %v4253_v37 = vrot.slane %v4163_v59, 4  ;;  %v4149_v24 = vpack.c.bf16 %v10227_v52, %v10227_v52  ;;  %v10234_v53 = vpack.i.bf16 %v4185_v34, %v4182_v49  ;;  %v10237_v11 = vadd.f32 %v4134_v56, %v4126_v35 }
0x1bce   :  { %v4252_v1 = vsel %vm705_vm6, %v4251_v30, %v4250_v55  ;;  %v4164_v12 = vunpack.c.l.b16 %v4148_v62  ;;  %v4191_v28 = vshll.u32 %v4148_v62, 16 }
0x1bcf   :  { %11919 = vst [vmem:[#allocation58_spill] sm:$0xff] %v10234_v53  ;;  %v4254_v48 = vsel %vm708_vm7, %v4253_v37, %v4252_v1  ;;  %v4165_v10 = vunpack.c.l.b16 %v4149_v24  ;;  %v4150_v63 = vpack.c.bf16 %v10237_v11, %v10237_v11  ;;  %v4194_v31 = vshll.u32 %v4149_v24, 16 }
0x1bd0   :  { %v4255_v0 = vrot.slane %v4164_v12, 3  ;;  %v10242_v13 = vpack.i.bf16 %v4191_v28, %v4188_v20 }
0x1bd1   :  { %v4257_v18 = vrot.slane %v4165_v10, 2  ;;  %v4166_v47 = vunpack.c.l.b16 %v4150_v63  ;;  %v4197_v29 = vshll.u32 %v4150_v63, 16 }
0x1bd2   :  { %11920 = vst [vmem:[#allocation59_spill] sm:$0xff] %v10242_v13  ;;  %v4256_v34 = vsel %vm711_vm8, %v4255_v0, %v4254_v48  ;;  %v10266_v0 = vld [vmem:[#allocation2 + $0xa] sm:$0x1] }
0x1bd3   :  { %v4258_v9 = vsel %vm714_vm9, %v4257_v18, %v4256_v34  ;;  %v4259_v49 = vrot.slane %v4166_v47, 1  ;;  %v10246_v56 = vpack.i.bf16 %v4197_v29, %v4194_v31  ;;  %v10269_v31 = vld [vmem:[#allocation2 + $0x2a] sm:$0x1]  ;;  %v10272_v34 = vld [vmem:[#allocation2 + $0x1a] sm:$0x1] }
0x1bd5   :  { %11921 = vst [vmem:[#allocation60_spill] sm:$0xff] %v10246_v56  ;;  %v4260_v14 = vsel %vm11873_vm10, %v4259_v49, %v4258_v9 }
0x1bd6   :  { %v4261_v59 = vpack.c.b16 %v4260_v14, %v4260_v14 }
0x1bd8   :  { %4262 = vrot.lane.b32.xlu0 %v4261_v59, %s8332_s8  ;;  %v10275_v59 = vld [vmem:[#allocation2 + $0x3a] sm:$0x1] }
0x1c4a   :  { %v4263_v55 = vpop.permute.xlu0 %4262 }
0x1c4b   :  { %7230 = vmatmul.mubr.msk.bf16.vlgmr.msra.gmra.mrb[28].mxu0 %vm11872_vm0, %v4263_v55 }
0x1c4c   :  { %7242 = vmatpush3.bf16.msra.mxu0 %v9911_v17  ;;  %7245 = vmatprep.mubr.msk.bf16.mxu0 %vm8330_vm1, %v11885_v44 }
0x1c4d   :  { %7243 = vmatprep.subr.bf16.mxu0 %v11885_v44 }
0x1c50   :  { %7244 = vmatpush3.bf16.msra.mxu0 %v9917_v51 }
0x1c51   :  { %7257 = vmatprep.subr.bf16.mxu0 %v11885_v44 }
0x1d1e   :  { %v4301_v30 = vpop.f32.mrb[28].mxu0 }
0x1d1f   :  { %v7231_v62 = vpop.f32.mrb[29].mxu0  ;;  %v4387_v37 = vadd.f32 %v4301_v30, %v8467_v21  ;;  %v4317_v10 = vrot.slane %v4301_v30, 2  ;;  %v4316_v63 = vrot.slane %v4301_v30, 1  ;;  %v4331_v18 = vadd.f32 %v10266_v0, %v4301_v30 }
0x1d20   :  { %v4304_v35 = vpop.f32.mrb[30].mxu0  ;;  %v4318_v47 = vrot.slane %v4301_v30, 3  ;;  %v4319_v9 = vrot.slane %v4301_v30, 4  ;;  %v4320_v55 = vrot.slane %v4301_v30, 5 }
0x1d21   :  { %v7232_v20 = vpop.f32.mrb[31].mxu0  ;;  %4396 = vrot.lane.b32.xlu1 %v4387_v37, %s8326_s30  ;;  %v4390_v24 = vrot.slane %v4387_v37, 2  ;;  %v4389_v17 = vrot.slane %v4387_v37, 1  ;;  %v4391_v1 = vrot.slane %v4387_v37, 3  ;;  %v4392_v51 = vrot.slane %v4387_v37, 4 }
0x1d22   :  { %v4393_v12 = vrot.slane %v4387_v37, 5  ;;  %v4394_v28 = vrot.slane %v4387_v37, 6  ;;  %v4395_v48 = vrot.slane %v4387_v37, 7  ;;  %v4333_v29 = vadd.f32 %v4317_v10, %v10269_v31  ;;  %v10278_v20 = vld [vmem:[#allocation2 + $0x4a] sm:$0x1] }
0x1d23   :  { %4400 = vrot.lane.b32.xlu0 %v4390_v24, %s8326_s30  ;;  %v4332_v49 = vadd.f32 %v4316_v63, %v10272_v34  ;;  %v6841_v14 = vmul.f32 -1.442695, %v4331_v18  ;;  %v4334_v62 = vadd.f32 %v4318_v47, %v10275_v59  ;;  %v4321_v37 = vrot.slane %v4301_v30, 6  ;;  %v10287_v18 = vld [vmem:[#allocation2 + $0x7a] sm:$0x1] }
0x1d24   :  { %v6843_v35 = vmul.f32 -1.442695, %v4333_v29  ;;  %v4335_v24 = vadd.f32 %v4319_v9, %v10278_v20 }
0x1d25   :  { %4398 = vrot.lane.b32.xlu1 %v4389_v17, %s8326_s30  ;;  %7934 = vpow2.f32 %v6841_v14  ;;  %v6842_v17 = vmul.f32 -1.442695, %v4332_v49 }
0x1d26   :  { %7936 = vpow2.f32 %v6843_v35  ;;  %v6845_v63 = vmul.f32 -1.442695, %v4335_v24 }
0x1d27   :  { %4402 = vrot.lane.b32.xlu0 %v4391_v1, %s8326_s30  ;;  %v10281_v1 = vld [vmem:[#allocation2 + $0x5a] sm:$0x1]  ;;  %7938 = vpow2.f32 %v6842_v17 }
0x1d29   :  { %4404 = vrot.lane.b32.xlu1 %v4392_v51, %s8326_s30  ;;  %v4322_v51 = vrot.slane %v4301_v30, 7 }
0x1d2b   :  { %4406 = vrot.lane.b32.xlu0 %v4393_v12, %s8326_s30  ;;  %v4336_v12 = vadd.f32 %v4320_v55, %v10281_v1  ;;  %v4338_v47 = vadd.f32 %v4322_v51, %v10287_v18 }
0x1d2d   :  { %4408 = vrot.lane.b32.xlu1 %v4394_v28, %s8326_s30  ;;  %v6844_v28 = vmul.f32 -1.442695, %v4334_v62  ;;  %v6846_v29 = vmul.f32 -1.442695, %v4336_v12  ;;  %v6848_v30 = vmul.f32 -1.442695, %v4338_v47 }
0x1d2f   :  { %4410 = vrot.lane.b32.xlu0 %v4395_v48, %s8326_s30  ;;  %v10284_v48 = vld [vmem:[#allocation2 + $0x6a] sm:$0x1]  ;;  %7940 = vpow2.f32 %v6844_v28  ;;  %v7935_v49 = vpop.eup %7934 }
0x1d30   :  { %v4337_v10 = vadd.f32 %v4321_v37, %v10284_v48  ;;  %7942 = vpow2.f32 %v6845_v63  ;;  %v7937_v14 = vpop.eup %7936  ;;  %v4363_v55 = vadd.f32 1.0, %v7935_v49 }
0x1d31   :  { %7944 = vpow2.f32 %v6846_v29  ;;  %v7939_v62 = vpop.eup %7938  ;;  %v4365_v35 = vadd.f32 1.0, %v7937_v14 }
0x1d32   :  { %v6847_v9 = vmul.f32 -1.442695, %v4337_v10  ;;  %v4364_v24 = vadd.f32 1.0, %v7939_v62 }
0x1d34   :  { %7946 = vpow2.f32 %v6847_v9 }
0x1d35   :  { %7948 = vpow2.f32 %v6848_v30 }
0x1d36   :  { %7950 = vrcp.f32 %v4363_v55 }
0x1d37   :  { %7952 = vrcp.f32 %v4365_v35 }
0x1d38   :  { %7954 = vrcp.f32 %v4364_v24 }
0x1d39   :  { %v7941_v37 = vpop.eup %7940 }
0x1d3a   :  { %v7943_v17 = vpop.eup %7942  ;;  %v4366_v56 = vadd.f32 1.0, %v7941_v37 }
0x1d3b   :  { %v7945_v51 = vpop.eup %7944  ;;  %v4367_v12 = vadd.f32 1.0, %v7943_v17 }
0x1d3c   :  { %7956 = vrcp.f32 %v4366_v56  ;;  %v4368_v10 = vadd.f32 1.0, %v7945_v51 }
0x1d3d   :  { %7958 = vrcp.f32 %v4367_v12 }
0x1d3e   :  { %v7947_v28 = vpop.eup %7946  ;;  %7960 = vrcp.f32 %v4368_v10 }
0x1d3f   :  { %v7949_v63 = vpop.eup %7948  ;;  %v4369_v47 = vadd.f32 1.0, %v7947_v28 }
0x1d40   :  { %v10290_v29 = vpop.eup %7950  ;;  %v4370_v49 = vadd.f32 1.0, %v7949_v63 }
0x1d41   :  { %v10293_v14 = vpop.eup %7952  ;;  %7962 = vrcp.f32 %v4369_v47 }
0x1d42   :  { %v10297_v56 = vpop.eup %7954  ;;  %7964 = vrcp.f32 %v4370_v49 }
0x1d46   :  { %v10301_v24 = vpop.eup %7956 }
0x1d47   :  { %v10305_v12 = vpop.eup %7958 }
0x1d48   :  { %v10309_v63 = vpop.eup %7960 }
0x1d4b   :  { %v10313_v49 = vpop.eup %7962 }
0x1d93   :  { %v4397_v9 = vpop.permute.xlu1 %4396 }
0x1d94   :  { %v4420_v30 = vmul.f32 %v10290_v29, %v4397_v9 }
0x1d95   :  { %v4401_v55 = vpop.permute.xlu0 %4400 }
0x1d96   :  { %v4422_v62 = vmul.f32 %v10293_v14, %v4401_v55  ;;  %4436 = vrot.lane.b32.xlu1 %v4420_v30, %s8326_s30 }
0x1d97   :  { %v4399_v35 = vpop.permute.xlu1 %4398 }
0x1d98   :  { %v4421_v37 = vmul.f32 %v10297_v56, %v4399_v35  ;;  %4440 = vrot.lane.b32.xlu0 %v4422_v62, %s8326_s30  ;;  %v10317_v62 = vpop.eup %7964 }
0x1d99   :  { %v4403_v17 = vpop.permute.xlu0 %4402 }
0x1d9a   :  { %v4423_v51 = vmul.f32 %v10301_v24, %v4403_v17  ;;  %4438 = vrot.lane.b32.xlu1 %v4421_v37, %s8326_s30 }
0x1d9b   :  { %v4405_v28 = vpop.permute.xlu1 %4404 }
0x1d9c   :  { %v4424_v10 = vmul.f32 %v10305_v12, %v4405_v28  ;;  %4442 = vrot.lane.b32.xlu0 %v4423_v51, %s8326_s30 }
0x1d9d   :  { %v4407_v47 = vpop.permute.xlu0 %4406 }
0x1d9e   :  { %v4425_v9 = vmul.f32 %v10309_v63, %v4407_v47  ;;  %4444 = vrot.lane.b32.xlu1 %v4424_v10, %s8326_s30 }
0x1d9f   :  { %v4409_v30 = vpop.permute.xlu1 %4408 }
0x1da0   :  { %v4426_v55 = vmul.f32 %v10313_v49, %v4409_v30  ;;  %4446 = vrot.lane.b32.xlu0 %v4425_v9, %s8326_s30 }
0x1da1   :  { %v4411_v35 = vpop.permute.xlu0 %4410 }
0x1da2   :  { %v4427_v37 = vmul.f32 %v10317_v62, %v4411_v35  ;;  %4448 = vrot.lane.b32.xlu1 %v4426_v55, %s8326_s30 }
0x1da4   :  { %4450 = vrot.lane.b32.xlu0 %v4427_v37, %s8326_s30 }
0x1e08   :  { %v4437_v17 = vpop.permute.xlu1 %4436 }
0x1e09   :  { %v4460_v51 = vadd.f32 %v4437_v17, %v10266_v0 }
0x1e0a   :  { %v4441_v28 = vpop.permute.xlu0 %4440 }
0x1e0b   :  { %7966 = vtanh.f32 %v4460_v51  ;;  %v4462_v10 = vadd.f32 %v4441_v28, %v10269_v31 }
0x1e0c   :  { %v4439_v47 = vpop.permute.xlu1 %4438 }
0x1e0d   :  { %7968 = vtanh.f32 %v4462_v10  ;;  %v4461_v9 = vadd.f32 %v4439_v47, %v10272_v34 }
0x1e0e   :  { %v4443_v30 = vpop.permute.xlu0 %4442 }
0x1e0f   :  { %7970 = vtanh.f32 %v4461_v9  ;;  %v4463_v53 = vadd.f32 %v4443_v30, %v10275_v59 }
0x1e10   :  { %v4445_v35 = vpop.permute.xlu1 %4444 }
0x1e11   :  { %7972 = vtanh.f32 %v4463_v53  ;;  %v4464_v55 = vadd.f32 %v4445_v35, %v10278_v20  ;;  %v4478_v35 = vsub.f32 1.0, %v10293_v14 }
0x1e12   :  { %v4447_v37 = vpop.permute.xlu0 %4446 }
0x1e13   :  { %7974 = vtanh.f32 %v4464_v55  ;;  %v4465_v0 = vadd.f32 %v4447_v37, %v10281_v1  ;;  %v4524_v55 = vmul.f32 %v10290_v29, %v10182_v22  ;;  %v4527_v22 = vmul.f32 %v10301_v24, %v10209_v38 }
0x1e14   :  { %v4449_v17 = vpop.permute.xlu1 %4448 }
0x1e15   :  { %v7967_v51 = vpop.eup %7966  ;;  %7976 = vtanh.f32 %v4465_v0  ;;  %v4466_v31 = vadd.f32 %v4449_v17, %v10284_v48  ;;  %v4526_v0 = vmul.f32 %v10293_v14, %v10187_v3 }
0x1e16   :  { %v4451_v28 = vpop.permute.xlu0 %4450  ;;  %4492 = vrot.lane.b32.xlu1 %v7967_v51, %s8332_s8  ;;  %v4477_v51 = vsub.f32 1.0, %v10297_v56 }
0x1e17   :  { %v7969_v34 = vpop.eup %7968  ;;  %7978 = vtanh.f32 %v4466_v31  ;;  %v4467_v59 = vadd.f32 %v4451_v28, %v10287_v18  ;;  %v4476_v18 = vsub.f32 1.0, %v10290_v29 }
0x1e18   :  { %4496 = vrot.lane.b32.xlu0 %v7969_v34, %s8332_s8 }
0x1e19   :  { %v7971_v53 = vpop.eup %7970  ;;  %7980 = vtanh.f32 %v4467_v59  ;;  %v4525_v59 = vmul.f32 %v10297_v56, %v10196_v2 }
0x1e1a   :  { %4494 = vrot.lane.b32.xlu1 %v7971_v53, %s8332_s8 }
0x1e1b   :  { %v7973_v20 = vpop.eup %7972 }
0x1e1c   :  { %4498 = vrot.lane.b32.xlu0 %v7973_v20, %s8332_s8  ;;  %v4479_v20 = vsub.f32 1.0, %v10301_v24  ;;  %v4528_v24 = vmul.f32 %v10305_v12, %v10214_v43  ;;  %v4529_v43 = vmul.f32 %v10309_v63, %v10224_v50 }
0x1e1d   :  { %v7975_v1 = vpop.eup %7974 }
0x1e1e   :  { %4500 = vrot.lane.b32.xlu1 %v7975_v1, %s8332_s8 }
0x1e1f   :  { %v7977_v48 = vpop.eup %7976 }
0x1e20   :  { %4502 = vrot.lane.b32.xlu0 %v7977_v48, %s8332_s8  ;;  %v4480_v48 = vsub.f32 1.0, %v10305_v12 }
0x1e21   :  { %v7979_v10 = vpop.eup %7978 }
0x1e22   :  { %4504 = vrot.lane.b32.xlu1 %v7979_v10, %s8332_s8 }
0x1e23   :  { %v7981_v47 = vpop.eup %7980 }
0x1e24   :  { %4506 = vrot.lane.b32.xlu0 %v7981_v47, %s8332_s8 }
0x1e88   :  { %v4493_v9 = vpop.permute.xlu1 %4492 }
0x1e89   :  { %v4516_v30 = vmul.f32 %v4493_v9, %v4476_v18  ;;  %v4481_v9 = vsub.f32 1.0, %v10309_v63 }
0x1e8a   :  { %v4497_v37 = vpop.permute.xlu0 %4496 }
0x1e8b   :  { %v4518_v17 = vmul.f32 %v4497_v37, %v4478_v35  ;;  %v10345_v31 = vadd.f32 %v4524_v55, %v4516_v30 }
0x1e8c   :  { %v4495_v28 = vpop.permute.xlu1 %4494 }
0x1e8d   :  { %v10347_v34 = vadd.f32 %v4526_v0, %v4518_v17  ;;  %v4517_v53 = vmul.f32 %v4495_v28, %v4477_v51  ;;  %v10363_v10 = vpack.c.bf16 %v10345_v31, %v10345_v31  ;;  %v4482_v0 = vsub.f32 1.0, %v10313_v49 }
0x1e8e   :  { %v4499_v29 = vpop.permute.xlu0 %4498  ;;  %v4530_v51 = vmul.f32 %v10313_v49, %v10227_v52 }
0x1e8f   :  { %v10356_v3 = vpack.c.bf16 %v10347_v34, %v10347_v34  ;;  %v10358_v14 = vadd.f32 %v4525_v59, %v4517_v53  ;;  %v4519_v1 = vmul.f32 %v4499_v29, %v4479_v20  ;;  %11923 = vst [vmem:[#allocation62_spill] sm:$0xff] %v10363_v10  ;;  %v4556_v17 = vunpack.c.l.b16 %v10363_v10 }
0x1e90   :  { %v4501_v2 = vpop.permute.xlu1 %4500 }
0x1e91   :  { %11922 = vst [vmem:[#allocation61_spill] sm:$0xff] %v10356_v3  ;;  %v10367_v56 = vpack.c.bf16 %v10358_v14, %v10358_v14  ;;  %v10369_v38 = vadd.f32 %v4527_v22, %v4519_v1  ;;  %v4520_v47 = vmul.f32 %v4501_v2, %v4480_v48  ;;  %v4558_v18 = vunpack.c.l.b16 %v10356_v3 }
0x1e92   :  { %v4503_v30 = vpop.permute.xlu0 %4502  ;;  %v4483_v48 = vsub.f32 1.0, %v10317_v62 }
0x1e93   :  { %11924 = vst [vmem:[#allocation63_spill] sm:$0xff] %v10367_v56  ;;  %v4557_v35 = vunpack.c.l.b16 %v10367_v56  ;;  %v10378_v55 = vpack.c.bf16 %v10369_v38, %v10369_v38  ;;  %v10380_v37 = vadd.f32 %v4528_v24, %v4520_v47  ;;  %v4521_v12 = vmul.f32 %v4503_v30, %v4481_v9 }
0x1e94   :  { %v4505_v28 = vpop.permute.xlu1 %4504  ;;  %v4630_v29 = vrot.slane %v4558_v18, 6  ;;  %v4531_v18 = vmul.f32 %v10317_v62, %v10237_v11 }
0x1e95   :  { %11925 = vst [vmem:[#allocation64_spill] sm:$0xff] %v10378_v55  ;;  %v4628_v59 = vrot.slane %v4557_v35, 7  ;;  %v4559_v53 = vunpack.c.l.b16 %v10378_v55  ;;  %v10391_v20 = vpack.c.bf16 %v10380_v37, %v10380_v37  ;;  %v4522_v22 = vmul.f32 %v4505_v28, %v4482_v0 }
0x1e96   :  { %v10393_v1 = vadd.f32 %v4529_v43, %v4521_v12  ;;  %v4507_v2 = vpop.permute.xlu0 %4506 }
0x1e97   :  { %11926 = vst [vmem:[#allocation65_spill] sm:$0xff] %v10391_v20  ;;  %v4629_v50 = vsel %vm699_vm4, %v4628_v59, %v4556_v17  ;;  %v4632_v63 = vrot.slane %v4559_v53, 5  ;;  %v4560_v52 = vunpack.c.l.b16 %v10391_v20  ;;  %v10398_v49 = vadd.f32 %v4530_v51, %v4522_v22 }
0x1e98   :  { %v4631_v24 = vsel %vm702_vm5, %v4630_v29, %v4629_v50  ;;  %v10403_v47 = vpack.c.bf16 %v10393_v1, %v10393_v1  ;;  %v4523_v9 = vmul.f32 %v4507_v2, %v4483_v48 }
0x1e99   :  { %v4633_v30 = vsel %vm705_vm6, %v4632_v63, %v4631_v24  ;;  %v4634_v35 = vrot.slane %v4560_v52, 4  ;;  %v10410_v0 = vpack.c.bf16 %v10398_v49, %v10398_v49  ;;  %v10427_v63 = vld [vmem:[#allocation9] sm:$0xff]   ;;  %v10433_v52 = vld [vmem:[#allocation9 + $0x8] sm:$0xff]  }
0x1e9a   :  { %11927 = vst [vmem:[#allocation66_spill] sm:$0xff] %v10403_v47  ;;  %v4561_v17 = vunpack.c.l.b16 %v10403_v47  ;;  %v10413_v43 = vadd.f32 %v4531_v18, %v4523_v9 }
0x1e9b   :  { %11928 = vst [vmem:[#allocation67_spill] sm:$0xff] %v10410_v0  ;;  %v4635_v12 = vsel %vm708_vm7, %v4634_v35, %v4633_v30  ;;  %v4562_v51 = vunpack.c.l.b16 %v10410_v0 }
0x1e9c   :  { %v4636_v28 = vrot.slane %v4561_v17, 3  ;;  %v10419_v11 = vpack.c.bf16 %v10413_v43, %v10413_v43 }
0x1e9d   :  { %v4638_v62 = vrot.slane %v4562_v51, 2 }
0x1e9e   :  { %11929 = vst [vmem:[#allocation68_spill] sm:$0xff] %v10419_v11  ;;  %v4563_v59 = vunpack.c.l.b16 %v10419_v11  ;;  %v4637_v53 = vsel %vm711_vm8, %v4636_v28, %v4635_v12 }
0x1e9f   :  { %v4639_v22 = vsel %vm714_vm9, %v4638_v62, %v4637_v53 }
0x1ea0   :  { %v4640_v29 = vrot.slane %v4563_v59, 1 }
0x1ea2   :  { %v4641_v48 = vsel %vm11873_vm10, %v4640_v29, %v4639_v22  ;;  %v10446_v29 = vld [vmem:[#allocation2 + $0xb] sm:$0x1] }
0x1ea3   :  { %v4642_v2 = vpack.c.b16 %v4641_v48, %v4641_v48 }
0x1ea5   :  { %4643 = vrot.lane.b32.xlu1 %v4642_v2, %s8332_s8 }
0x1f17   :  { %v4644_v50 = vpop.permute.xlu1 %4643 }
0x1f18   :  { %7238 = vmatmul.mubr.msk.bf16.vlgmr.msra.gmra.mrb[28].mxu1 %vm11872_vm0, %v4644_v50  ;;  %v10449_v50 = vld [vmem:[#allocation2 + $0x2b] sm:$0x1] }
0x1f19   :  { %7250 = vmatpush3.bf16.msra.mxu1 %v10427_v63  ;;  %7253 = vmatprep.mubr.msk.bf16.mxu1 %vm8330_vm1, %v11885_v44 }
0x1f1a   :  { %7251 = vmatprep.subr.bf16.mxu1 %v11885_v44 }
0x1f1d   :  { %7252 = vmatpush3.bf16.msra.mxu1 %v10433_v52 }
0x1f1e   :  { %7265 = vmatprep.subr.bf16.mxu1 %v11885_v44 }
0x1feb   :  { %v4682_v24 = vpop.f32.mrb[28].mxu1 }
0x1fec   :  { %v7239_v18 = vpop.f32.mrb[29].mxu1  ;;  %v4768_v35 = vadd.f32 %v4682_v24, %v8467_v21  ;;  %v4698_v22 = vrot.slane %v4682_v24, 2  ;;  %v4697_v48 = vrot.slane %v4682_v24, 1  ;;  %v4712_v2 = vadd.f32 %v10446_v29, %v4682_v24 }
0x1fed   :  { %v4685_v9 = vpop.f32.mrb[30].mxu1  ;;  %v4699_v18 = vrot.slane %v4682_v24, 3  ;;  %v4702_v11 = vrot.slane %v4682_v24, 6  ;;  %v4703_v20 = vrot.slane %v4682_v24, 7 }
0x1fee   :  { %v7240_v30 = vpop.f32.mrb[31].mxu1  ;;  %4777 = vrot.lane.b32.xlu0 %v4768_v35, %s8326_s30  ;;  %v4771_v17 = vrot.slane %v4768_v35, 2  ;;  %v4770_v12 = vrot.slane %v4768_v35, 1  ;;  %v4772_v51 = vrot.slane %v4768_v35, 3  ;;  %v4773_v28 = vrot.slane %v4768_v35, 4 }
0x1fef   :  { %v4774_v62 = vrot.slane %v4768_v35, 5  ;;  %v4775_v59 = vrot.slane %v4768_v35, 6  ;;  %v4776_v53 = vrot.slane %v4768_v35, 7  ;;  %v4714_v9 = vadd.f32 %v4698_v22, %v10449_v50  ;;  %v10452_v30 = vld [vmem:[#allocation2 + $0x1b] sm:$0x1] }
0x1ff0   :  { %4781 = vrot.lane.b32.xlu1 %v4771_v17, %s8326_s30  ;;  %v4700_v17 = vrot.slane %v4682_v24, 4  ;;  %v10455_v35 = vld [vmem:[#allocation2 + $0x3b] sm:$0x1] }
0x1ff1   :  { %v10461_v22 = vld [vmem:[#allocation2 + $0x5b] sm:$0x1] }
0x1ff2   :  { %4779 = vrot.lane.b32.xlu0 %v4770_v12, %s8326_s30  ;;  %v4713_v12 = vadd.f32 %v4697_v48, %v10452_v30 }
0x1ff4   :  { %4783 = vrot.lane.b32.xlu1 %v4772_v51, %s8326_s30  ;;  %v6858_v51 = vmul.f32 -1.442695, %v4712_v2  ;;  %v6859_v47 = vmul.f32 -1.442695, %v4713_v12  ;;  %v10464_v2 = vld [vmem:[#allocation2 + $0x6b] sm:$0x1] }
0x1ff5   :  { %v4718_v3 = vadd.f32 %v4702_v11, %v10464_v2 }
0x1ff6   :  { %4785 = vrot.lane.b32.xlu0 %v4773_v28, %s8326_s30  ;;  %v4701_v28 = vrot.slane %v4682_v24, 5  ;;  %7982 = vpow2.f32 %v6858_v51 }
0x1ff7   :  { %v6864_v12 = vmul.f32 -1.442695, %v4718_v3 }
0x1ff8   :  { %4787 = vrot.lane.b32.xlu1 %v4774_v62, %s8326_s30  ;;  %v4715_v62 = vadd.f32 %v4699_v18, %v10455_v35  ;;  %v4717_v55 = vadd.f32 %v4701_v28, %v10461_v22 }
0x1ffa   :  { %4789 = vrot.lane.b32.xlu0 %v4775_v59, %s8326_s30  ;;  %v6860_v59 = vmul.f32 -1.442695, %v4714_v9  ;;  %v6861_v48 = vmul.f32 -1.442695, %v4715_v62  ;;  %v10467_v9 = vld [vmem:[#allocation2 + $0x7b] sm:$0x1] }
0x1ffb   :  { %v4719_v56 = vadd.f32 %v4703_v20, %v10467_v9 }
0x1ffc   :  { %4791 = vrot.lane.b32.xlu1 %v4776_v53, %s8326_s30  ;;  %v10458_v53 = vld [vmem:[#allocation2 + $0x4b] sm:$0x1]  ;;  %7984 = vpow2.f32 %v6860_v59 }
0x1ffd   :  { %v4716_v0 = vadd.f32 %v4700_v17, %v10458_v53  ;;  %7986 = vpow2.f32 %v6859_v47  ;;  %v6863_v17 = vmul.f32 -1.442695, %v4717_v55  ;;  %v6865_v24 = vmul.f32 -1.442695, %v4719_v56 }
0x1ffe   :  { %7988 = vpow2.f32 %v6861_v48 }
0x1fff   :  { %v6862_v18 = vmul.f32 -1.442695, %v4716_v0 }
0x2000   :  { %v7983_v51 = vpop.eup %7982 }
0x2001   :  { %7990 = vpow2.f32 %v6862_v18  ;;  %v4744_v62 = vadd.f32 1.0, %v7983_v51 }
0x2002   :  { %7992 = vpow2.f32 %v6863_v17 }
0x2003   :  { %7994 = vpow2.f32 %v6864_v12 }
0x2004   :  { %7996 = vpow2.f32 %v6865_v24 }
0x2005   :  { %7998 = vrcp.f32 %v4744_v62 }
0x2006   :  { %v7985_v28 = vpop.eup %7984 }
0x2007   :  { %v7987_v59 = vpop.eup %7986  ;;  %v4746_v10 = vadd.f32 1.0, %v7985_v28 }
0x2008   :  { %v7989_v11 = vpop.eup %7988  ;;  %v4745_v47 = vadd.f32 1.0, %v7987_v59 }
0x2009   :  { %8000 = vrcp.f32 %v4746_v10  ;;  %v4747_v13 = vadd.f32 1.0, %v7989_v11 }
0x200a   :  { %8002 = vrcp.f32 %v4745_v47 }
0x200b   :  { %v7991_v0 = vpop.eup %7990  ;;  %8004 = vrcp.f32 %v4747_v13 }
0x200c   :  { %v7993_v20 = vpop.eup %7992  ;;  %v4748_v55 = vadd.f32 1.0, %v7991_v0 }
0x200d   :  { %v7995_v48 = vpop.eup %7994  ;;  %v4749_v3 = vadd.f32 1.0, %v7993_v20 }
0x200e   :  { %v7997_v18 = vpop.eup %7996  ;;  %8006 = vrcp.f32 %v4748_v55  ;;  %v4750_v56 = vadd.f32 1.0, %v7995_v48 }
0x200f   :  { %v10470_v17 = vpop.eup %7998  ;;  %8008 = vrcp.f32 %v4749_v3  ;;  %v4751_v51 = vadd.f32 1.0, %v7997_v18 }
0x2010   :  { %8010 = vrcp.f32 %v4750_v56 }
0x2011   :  { %8012 = vrcp.f32 %v4751_v51 }
0x2013   :  { %v10473_v28 = vpop.eup %8000 }
0x2014   :  { %v10477_v13 = vpop.eup %8002 }
0x2015   :  { %v10481_v47 = vpop.eup %8004 }
0x2018   :  { %v10485_v55 = vpop.eup %8006 }
0x2019   :  { %v10489_v18 = vpop.eup %8008 }
0x201a   :  { %v10493_v51 = vpop.eup %8010 }
0x2060   :  { %v4778_v12 = vpop.permute.xlu0 %4777 }
0x2061   :  { %v4801_v24 = vmul.f32 %v10470_v17, %v4778_v12 }
0x2062   :  { %v4782_v10 = vpop.permute.xlu1 %4781 }
0x2063   :  { %v4803_v62 = vmul.f32 %v10473_v28, %v4782_v10  ;;  %4817 = vrot.lane.b32.xlu0 %v4801_v24, %s8326_s30 }
0x2064   :  { %v4780_v59 = vpop.permute.xlu0 %4779 }
0x2065   :  { %v4802_v11 = vmul.f32 %v10477_v13, %v4780_v59  ;;  %4821 = vrot.lane.b32.xlu1 %v4803_v62, %s8326_s30  ;;  %v10497_v62 = vpop.eup %8012 }
0x2066   :  { %v4784_v0 = vpop.permute.xlu1 %4783 }
0x2067   :  { %v4804_v20 = vmul.f32 %v10481_v47, %v4784_v0  ;;  %4819 = vrot.lane.b32.xlu0 %v4802_v11, %s8326_s30 }
0x2068   :  { %v4786_v48 = vpop.permute.xlu0 %4785 }
0x2069   :  { %v4805_v3 = vmul.f32 %v10485_v55, %v4786_v48  ;;  %4823 = vrot.lane.b32.xlu1 %v4804_v20, %s8326_s30 }
0x206a   :  { %v4788_v56 = vpop.permute.xlu1 %4787 }
0x206b   :  { %v4806_v12 = vmul.f32 %v10489_v18, %v4788_v56  ;;  %4825 = vrot.lane.b32.xlu0 %v4805_v3, %s8326_s30 }
0x206c   :  { %v4790_v24 = vpop.permute.xlu0 %4789 }
0x206d   :  { %v4807_v10 = vmul.f32 %v10493_v51, %v4790_v24  ;;  %4827 = vrot.lane.b32.xlu1 %v4806_v12, %s8326_s30 }
0x206e   :  { %v4792_v59 = vpop.permute.xlu1 %4791 }
0x206f   :  { %v4808_v11 = vmul.f32 %v10497_v62, %v4792_v59  ;;  %4829 = vrot.lane.b32.xlu0 %v4807_v10, %s8326_s30 }
0x2071   :  { %4831 = vrot.lane.b32.xlu1 %v4808_v11, %s8326_s30 }
0x20d5   :  { %v4818_v0 = vpop.permute.xlu0 %4817 }
0x20d6   :  { %v4841_v20 = vadd.f32 %v4818_v0, %v10446_v29 }
0x20d7   :  { %v4822_v48 = vpop.permute.xlu1 %4821 }
0x20d8   :  { %8014 = vtanh.f32 %v4841_v20  ;;  %v4843_v3 = vadd.f32 %v4822_v48, %v10449_v50 }
0x20d9   :  { %v4820_v56 = vpop.permute.xlu0 %4819 }
0x20da   :  { %8016 = vtanh.f32 %v4843_v3  ;;  %v4842_v12 = vadd.f32 %v4820_v56, %v10452_v30 }
0x20db   :  { %v4824_v24 = vpop.permute.xlu1 %4823 }
0x20dc   :  { %8018 = vtanh.f32 %v4842_v12  ;;  %v4844_v19 = vadd.f32 %v4824_v24, %v10455_v35  ;;  %v4905_v24 = vmul.f32 %v10470_v17, %v10345_v31  ;;  %v4906_v31 = vmul.f32 %v10477_v13, %v10358_v14 }
0x20dd   :  { %v4826_v59 = vpop.permute.xlu0 %4825 }
0x20de   :  { %8020 = vtanh.f32 %v4844_v19  ;;  %v4845_v10 = vadd.f32 %v4826_v59, %v10458_v53 }
0x20df   :  { %v4828_v11 = vpop.permute.xlu1 %4827 }
0x20e0   :  { %8022 = vtanh.f32 %v4845_v10  ;;  %v4846_v29 = vadd.f32 %v4828_v11, %v10461_v22  ;;  %v4859_v10 = vsub.f32 1.0, %v10473_v28 }
0x20e1   :  { %v4830_v0 = vpop.permute.xlu0 %4829 }
0x20e2   :  { %v8015_v20 = vpop.eup %8014  ;;  %8024 = vtanh.f32 %v4846_v29  ;;  %v4847_v50 = vadd.f32 %v4830_v0, %v10464_v2  ;;  %v4907_v0 = vmul.f32 %v10473_v28, %v10347_v34  ;;  %v4861_v34 = vsub.f32 1.0, %v10485_v55 }
0x20e3   :  { %v4832_v48 = vpop.permute.xlu1 %4831  ;;  %4873 = vrot.lane.b32.xlu0 %v8015_v20, %s8332_s8 }
0x20e4   :  { %v8017_v30 = vpop.eup %8016  ;;  %8026 = vtanh.f32 %v4847_v50  ;;  %v4848_v35 = vadd.f32 %v4832_v48, %v10467_v9  ;;  %v4857_v9 = vsub.f32 1.0, %v10470_v17  ;;  %v4858_v50 = vsub.f32 1.0, %v10477_v13 }
0x20e5   :  { %4877 = vrot.lane.b32.xlu1 %v8017_v30, %s8332_s8  ;;  %v4862_v13 = vsub.f32 1.0, %v10489_v18 }
0x20e6   :  { %v8019_v19 = vpop.eup %8018  ;;  %8028 = vtanh.f32 %v4848_v35 }
0x20e7   :  { %4875 = vrot.lane.b32.xlu0 %v8019_v19, %s8332_s8  ;;  %v4860_v19 = vsub.f32 1.0, %v10481_v47 }
0x20e8   :  { %v8021_v53 = vpop.eup %8020 }
0x20e9   :  { %4879 = vrot.lane.b32.xlu1 %v8021_v53, %s8332_s8  ;;  %v4908_v53 = vmul.f32 %v10481_v47, %v10369_v38  ;;  %v4863_v38 = vsub.f32 1.0, %v10493_v51 }
0x20ea   :  { %v8023_v22 = vpop.eup %8022 }
0x20eb   :  { %4881 = vrot.lane.b32.xlu0 %v8023_v22, %s8332_s8 }
0x20ec   :  { %v8025_v2 = vpop.eup %8024 }
0x20ed   :  { %4883 = vrot.lane.b32.xlu1 %v8025_v2, %s8332_s8 }
0x20ee   :  { %v8027_v3 = vpop.eup %8026 }
0x20ef   :  { %4885 = vrot.lane.b32.xlu0 %v8027_v3, %s8332_s8 }
0x20f0   :  { %v8029_v56 = vpop.eup %8028 }
0x20f1   :  { %4887 = vrot.lane.b32.xlu1 %v8029_v56, %s8332_s8  ;;  %v4909_v56 = vmul.f32 %v10485_v55, %v10380_v37 }
0x2155   :  { %v4874_v12 = vpop.permute.xlu0 %4873 }
0x2156   :  { %v4897_v59 = vmul.f32 %v4874_v12, %v4857_v9  ;;  %v4910_v12 = vmul.f32 %v10489_v18, %v10393_v1 }
0x2157   :  { %v4878_v11 = vpop.permute.xlu1 %4877 }
0x2158   :  { %v10522_v29 = vadd.f32 %v4905_v24, %v4897_v59  ;;  %v4899_v20 = vmul.f32 %v4878_v11, %v4859_v10  ;;  %v4911_v10 = vmul.f32 %v10493_v51, %v10398_v49 }
0x2159   :  { %v4876_v48 = vpop.permute.xlu0 %4875 }
0x215a   :  { %v4921_v30 = vpack.c.bf16 %v10522_v29, %v10522_v29  ;;  %v10529_v35 = vadd.f32 %v4907_v0, %v4899_v20  ;;  %v4898_v17 = vmul.f32 %v4876_v48, %v4858_v50  ;;  %v4864_v0 = vsub.f32 1.0, %v10497_v62 }
0x215b   :  { %v4880_v22 = vpop.permute.xlu1 %4879  ;;  %v4912_v20 = vmul.f32 %v10497_v62, %v10413_v43 }
0x215c   :  { %v4954_v28 = vshll.u32 %v4921_v30, 16  ;;  %v4923_v2 = vpack.c.bf16 %v10529_v35, %v10529_v35  ;;  %v10539_v3 = vadd.f32 %v4906_v31, %v4898_v17  ;;  %v4900_v9 = vmul.f32 %v4880_v22, %v4860_v19 }
0x215d   :  { %v4882_v14 = vpop.permute.xlu0 %4881  ;;  %v4937_v1 = vunpack.c.l.b16 %v4921_v30 }
0x215e   :  { %v4939_v47 = vunpack.c.l.b16 %v4923_v2  ;;  %v4962_v24 = vshll.u32 %v4923_v2, 16  ;;  %v4922_v59 = vpack.c.bf16 %v10539_v3, %v10539_v3  ;;  %v10551_v11 = vadd.f32 %v4908_v53, %v4900_v9 }
0x215f   :  { %v4901_v37 = vmul.f32 %v4882_v14, %v4861_v34  ;;  %v4884_v55 = vpop.permute.xlu1 %4883  ;;  %v10556_v18 = vrot.slane %v4954_v28, 7 }
0x2160   :  { %v4938_v50 = vunpack.c.l.b16 %v4922_v59  ;;  %v4958_v48 = vshll.u32 %v4922_v59, 16  ;;  %v10558_v31 = vrot.slane %v4962_v24, 7  ;;  %v4924_v17 = vpack.c.bf16 %v10551_v11, %v10551_v11 }
0x2161   :  { %11930 = vst [vmem:[#allocation69_spill] sm:$0xff] %v10556_v18  ;;  %v10562_v49 = vadd.f32 %v4909_v56, %v4901_v37  ;;  %v4902_v51 = vmul.f32 %v4884_v55, %v4862_v13  ;;  %v4886_v19 = vpop.permute.xlu0 %4885  ;;  %v5035_v53 = vrot.slane %v4939_v47, 6 }
0x2162   :  { %11931 = vst [vmem:[#allocation70_spill] sm:$0xff] %v10558_v31  ;;  %v10564_v22 = vrot.slane %v4958_v48, 7  ;;  %v5033_v34 = vrot.slane %v4938_v50, 7  ;;  %v4903_v2 = vmul.f32 %v4886_v19, %v4863_v38  ;;  %v4940_v43 = vunpack.c.l.b16 %v4924_v17 }
0x2163   :  { %v4966_v62 = vshll.u32 %v4924_v17, 16  ;;  %v4925_v30 = vpack.c.bf16 %v10562_v49, %v10562_v49  ;;  %v10568_v28 = vadd.f32 %v4910_v12, %v4902_v51  ;;  %v4888_v9 = vpop.permute.xlu1 %4887 }
0x2164   :  { %11932 = vst [vmem:[#allocation71_spill] sm:$0xff] %v10564_v22  ;;  %v5034_v14 = vsel %vm699_vm4, %v5033_v34, %v4937_v1  ;;  %v10571_v24 = vadd.f32 %v4911_v10, %v4903_v2  ;;  %v4904_v56 = vmul.f32 %v4888_v9, %v4864_v0  ;;  %v5037_v59 = vrot.slane %v4940_v43, 5 }
0x2165   :  { %v10575_v47 = vrot.slane %v4966_v62, 7  ;;  %v5036_v38 = vsel %vm702_vm5, %v5035_v53, %v5034_v14  ;;  %v4941_v37 = vunpack.c.l.b16 %v4925_v30  ;;  %v4970_v55 = vshll.u32 %v4925_v30, 16 }
0x2166   :  { %v4926_v12 = vpack.c.bf16 %v10568_v28, %v10568_v28  ;;  %v4927_v50 = vpack.c.bf16 %v10571_v24, %v10571_v24  ;;  %v10582_v1 = vadd.f32 %v4912_v20, %v4904_v56  ;;  %v5038_v10 = vsel %vm705_vm6, %v5037_v59, %v5036_v38  ;;  %v10633_v38 = vld [vmem:[#allocation2 + $0x4c] sm:$0x1] }
0x2167   :  { %11933 = vst [vmem:[#allocation72_spill] sm:$0xff] %v10575_v47  ;;  %v5039_v0 = vrot.slane %v4941_v37, 4  ;;  %v10590_v43 = vrot.slane %v4970_v55, 7 }
0x2168   :  { %v4942_v17 = vunpack.c.l.b16 %v4926_v12  ;;  %v4974_v51 = vshll.u32 %v4926_v12, 16  ;;  %v4943_v19 = vunpack.c.l.b16 %v4927_v50  ;;  %v4978_v34 = vshll.u32 %v4927_v50, 16 }
0x2169   :  { %v5040_v53 = vsel %vm708_vm7, %v5039_v0, %v5038_v10  ;;  %v4928_v2 = vpack.c.bf16 %v10582_v1, %v10582_v1  ;;  %11934 = vst [vmem:[#allocation73_spill] sm:$0xff] %v10590_v43 }
0x216a   :  { %v10592_v62 = vrot.slane %v4974_v51, 7  ;;  %v5041_v20 = vrot.slane %v4942_v17, 3  ;;  %v5043_v30 = vrot.slane %v4943_v19, 2  ;;  %v10597_v59 = vrot.slane %v4978_v34, 7 }
0x216b   :  { %v4944_v9 = vunpack.c.l.b16 %v4928_v2  ;;  %v4982_v14 = vshll.u32 %v4928_v2, 16 }
0x216c   :  { %11935 = vst [vmem:[#allocation74_spill] sm:$0xff] %v10592_v62  ;;  %v5042_v56 = vsel %vm711_vm8, %v5041_v20, %v5040_v53  ;;  %11936 = vst [vmem:[#allocation75_spill] sm:$0xff] %v10597_v59 }
0x216d   :  { %v10599_v37 = vrot.slane %v4982_v14, 7  ;;  %v5045_v12 = vrot.slane %v4944_v9, 1  ;;  %v5044_v50 = vsel %vm714_vm9, %v5043_v30, %v5042_v56 }
0x216f   :  { %11937 = vst [vmem:[#allocation76_spill] sm:$0xff] %v10599_v37  ;;  %v5046_v55 = vsel %vm11873_vm10, %v5045_v12, %v5044_v50 }
0x2170   :  { %v5047_v0 = vpack.c.b16 %v5046_v55, %v5046_v55 }
0x2172   :  { %5048 = vrot.lane.b32.xlu0 %v5047_v0, %s8332_s8  ;;  %v10621_v0 = vld [vmem:[#allocation2 + $0xc] sm:$0x1] }
0x21e4   :  { %v5049_v17 = vpop.permute.xlu0 %5048 }
0x21e5   :  { %7246 = vmatmul.mubr.msk.bf16.vlgmr.msra.gmra.mrb[32].mxu0 %vm11872_vm0, %v5049_v17 }
0x21e6   :  { %7258 = vmatpush3.bf16.msra.mxu0 %v10427_v63  ;;  %7261 = vmatprep.mubr.msk.bf16.mxu0 %vm8330_vm1, %v11885_v44 }
0x21e7   :  { %7259 = vmatprep.subr.bf16.mxu0 %v11885_v44 }
0x21ea   :  { %7260 = vmatpush3.bf16.msra.mxu0 %v10433_v52 }
0x22b8   :  { %v5087_v51 = vpop.f32.mrb[32].mxu0 }
0x22b9   :  { %v7247_v19 = vpop.f32.mrb[33].mxu0  ;;  %v5173_v2 = vadd.f32 %v5087_v51, %v8467_v21  ;;  %v5103_v55 = vrot.slane %v5087_v51, 2  ;;  %v5102_v17 = vrot.slane %v5087_v51, 1  ;;  %v5107_v48 = vrot.slane %v5087_v51, 6 }
0x22ba   :  { %v5090_v53 = vpop.f32.mrb[34].mxu0  ;;  %v5117_v19 = vadd.f32 %v10621_v0, %v5087_v51  ;;  %v5108_v37 = vrot.slane %v5087_v51, 7 }
0x22bb   :  { %v7248_v34 = vpop.f32.mrb[35].mxu0  ;;  %5182 = vrot.lane.b32.xlu1 %v5173_v2, %s8326_s30  ;;  %v5176_v20 = vrot.slane %v5173_v2, 2  ;;  %v5175_v30 = vrot.slane %v5173_v2, 1  ;;  %v5177_v9 = vrot.slane %v5173_v2, 3  ;;  %v5178_v14 = vrot.slane %v5173_v2, 4 }
0x22bc   :  { %v5179_v56 = vrot.slane %v5173_v2, 5  ;;  %v5180_v12 = vrot.slane %v5173_v2, 6  ;;  %v5181_v50 = vrot.slane %v5173_v2, 7  ;;  %v10624_v53 = vld [vmem:[#allocation2 + $0x2c] sm:$0x1]  ;;  %v5104_v34 = vrot.slane %v5087_v51, 3 }
0x22bd   :  { %5186 = vrot.lane.b32.xlu0 %v5176_v20, %s8326_s30  ;;  %v5119_v20 = vadd.f32 %v5103_v55, %v10624_v53  ;;  %v10630_v2 = vld [vmem:[#allocation2 + $0x3c] sm:$0x1] }
0x22be   :  { %v10636_v55 = vld [vmem:[#allocation2 + $0x5c] sm:$0x1] }
0x22bf   :  { %5184 = vrot.lane.b32.xlu1 %v5175_v30, %s8326_s30  ;;  %v10627_v30 = vld [vmem:[#allocation2 + $0x1c] sm:$0x1]  ;;  %v6877_v10 = vmul.f32 -1.442695, %v5119_v20 }
0x22c0   :  { %v10642_v20 = vld [vmem:[#allocation2 + $0x7c] sm:$0x1] }
0x22c1   :  { %5188 = vrot.lane.b32.xlu0 %v5177_v9, %s8326_s30  ;;  %v5105_v9 = vrot.slane %v5087_v51, 4  ;;  %v5124_v31 = vadd.f32 %v5108_v37, %v10642_v20 }
0x22c3   :  { %5190 = vrot.lane.b32.xlu1 %v5178_v14, %s8326_s30  ;;  %v5118_v14 = vadd.f32 %v5102_v17, %v10627_v30  ;;  %v5121_v13 = vadd.f32 %v5105_v9, %v10633_v38 }
0x22c5   :  { %5192 = vrot.lane.b32.xlu0 %v5179_v56, %s8326_s30  ;;  %v6875_v56 = vmul.f32 -1.442695, %v5117_v19  ;;  %v6876_v59 = vmul.f32 -1.442695, %v5118_v14  ;;  %v10639_v19 = vld [vmem:[#allocation2 + $0x6c] sm:$0x1] }
0x22c6   :  { %v5123_v62 = vadd.f32 %v5107_v48, %v10639_v19 }
0x22c7   :  { %5194 = vrot.lane.b32.xlu1 %v5180_v12, %s8326_s30  ;;  %v5106_v12 = vrot.slane %v5087_v51, 5  ;;  %8030 = vpow2.f32 %v6875_v56  ;;  %v6882_v51 = vmul.f32 -1.442695, %v5124_v31 }
0x22c8   :  { %8032 = vpow2.f32 %v6877_v10  ;;  %v6881_v14 = vmul.f32 -1.442695, %v5123_v62 }
0x22c9   :  { %5196 = vrot.lane.b32.xlu0 %v5181_v50, %s8326_s30  ;;  %v5120_v50 = vadd.f32 %v5104_v34, %v10630_v2  ;;  %v5122_v43 = vadd.f32 %v5106_v12, %v10636_v55  ;;  %8034 = vpow2.f32 %v6876_v59  ;;  %v6879_v34 = vmul.f32 -1.442695, %v5121_v13 }
0x22cb   :  { %v6878_v17 = vmul.f32 -1.442695, %v5120_v50  ;;  %v6880_v9 = vmul.f32 -1.442695, %v5122_v43 }
0x22cd   :  { %8036 = vpow2.f32 %v6878_v17 }
0x22ce   :  { %8038 = vpow2.f32 %v6879_v34 }
0x22cf   :  { %8040 = vpow2.f32 %v6880_v9 }
0x22d0   :  { %8042 = vpow2.f32 %v6881_v14 }
0x22d1   :  { %v8031_v56 = vpop.eup %8030  ;;  %8044 = vpow2.f32 %v6882_v51 }
0x22d2   :  { %v8033_v12 = vpop.eup %8032  ;;  %v5149_v10 = vadd.f32 1.0, %v8031_v56 }
0x22d3   :  { %v8035_v50 = vpop.eup %8034  ;;  %v5151_v47 = vadd.f32 1.0, %v8033_v12 }
0x22d4   :  { %8046 = vrcp.f32 %v5149_v10  ;;  %v5150_v13 = vadd.f32 1.0, %v8035_v50 }
0x22d5   :  { %8048 = vrcp.f32 %v5151_v47 }
0x22d6   :  { %8050 = vrcp.f32 %v5150_v13 }
0x22d7   :  { %v8037_v48 = vpop.eup %8036 }
0x22d8   :  { %v8039_v59 = vpop.eup %8038  ;;  %v5152_v18 = vadd.f32 1.0, %v8037_v48 }
0x22d9   :  { %v8041_v37 = vpop.eup %8040  ;;  %v5153_v43 = vadd.f32 1.0, %v8039_v59 }
0x22da   :  { %v8043_v17 = vpop.eup %8042  ;;  %8052 = vrcp.f32 %v5152_v18  ;;  %v5154_v62 = vadd.f32 1.0, %v8041_v37 }
0x22db   :  { %v8045_v34 = vpop.eup %8044  ;;  %8054 = vrcp.f32 %v5153_v43  ;;  %v5155_v31 = vadd.f32 1.0, %v8043_v17 }
0x22dc   :  { %8056 = vrcp.f32 %v5154_v62  ;;  %v5156_v56 = vadd.f32 1.0, %v8045_v34 }
0x22dd   :  { %8058 = vrcp.f32 %v5155_v31 }
0x22de   :  { %v10645_v9 = vpop.eup %8046  ;;  %8060 = vrcp.f32 %v5156_v56 }
0x22df   :  { %v10648_v12 = vpop.eup %8048 }
0x22e0   :  { %v10652_v18 = vpop.eup %8050 }
0x22e4   :  { %v10656_v13 = vpop.eup %8052 }
0x22e5   :  { %v10660_v43 = vpop.eup %8054 }
0x22e6   :  { %v10664_v34 = vpop.eup %8056 }
0x22e7   :  { %v10668_v56 = vpop.eup %8058 }
0x232d   :  { %v5183_v14 = vpop.permute.xlu1 %5182 }
0x232e   :  { %v5206_v51 = vmul.f32 %v10645_v9, %v5183_v14 }
0x232f   :  { %v5187_v47 = vpop.permute.xlu0 %5186 }
0x2330   :  { %v5208_v10 = vmul.f32 %v10648_v12, %v5187_v47  ;;  %5222 = vrot.lane.b32.xlu1 %v5206_v51, %s8326_s30 }
0x2331   :  { %v5185_v50 = vpop.permute.xlu1 %5184 }
0x2332   :  { %v5207_v48 = vmul.f32 %v10652_v18, %v5185_v50  ;;  %5226 = vrot.lane.b32.xlu0 %v5208_v10, %s8326_s30  ;;  %v10672_v10 = vpop.eup %8060 }
0x2333   :  { %v5189_v59 = vpop.permute.xlu0 %5188 }
0x2334   :  { %v5209_v37 = vmul.f32 %v10656_v13, %v5189_v59  ;;  %5224 = vrot.lane.b32.xlu1 %v5207_v48, %s8326_s30 }
0x2335   :  { %v5191_v17 = vpop.permute.xlu1 %5190 }
0x2336   :  { %v5210_v62 = vmul.f32 %v10660_v43, %v5191_v17  ;;  %5228 = vrot.lane.b32.xlu0 %v5209_v37, %s8326_s30 }
0x2337   :  { %v5193_v31 = vpop.permute.xlu0 %5192 }
0x2338   :  { %v5211_v14 = vmul.f32 %v10664_v34, %v5193_v31  ;;  %5230 = vrot.lane.b32.xlu1 %v5210_v62, %s8326_s30 }
0x2339   :  { %v5195_v51 = vpop.permute.xlu1 %5194 }
0x233a   :  { %v5212_v47 = vmul.f32 %v10668_v56, %v5195_v51  ;;  %5232 = vrot.lane.b32.xlu0 %v5211_v14, %s8326_s30 }
0x233b   :  { %v5197_v50 = vpop.permute.xlu0 %5196 }
0x233c   :  { %v5213_v48 = vmul.f32 %v10672_v10, %v5197_v50  ;;  %5234 = vrot.lane.b32.xlu1 %v5212_v47, %s8326_s30 }
0x233e   :  { %5236 = vrot.lane.b32.xlu0 %v5213_v48, %s8326_s30 }
0x23a2   :  { %v5223_v59 = vpop.permute.xlu1 %5222 }
0x23a3   :  { %v5246_v37 = vadd.f32 %v5223_v59, %v10621_v0 }
0x23a4   :  { %v5227_v17 = vpop.permute.xlu0 %5226 }
0x23a5   :  { %8062 = vtanh.f32 %v5246_v37  ;;  %v5248_v62 = vadd.f32 %v5227_v17, %v10624_v53 }
0x23a6   :  { %v5225_v31 = vpop.permute.xlu1 %5224 }
0x23a7   :  { %8064 = vtanh.f32 %v5248_v62  ;;  %v5247_v14 = vadd.f32 %v5225_v31, %v10627_v30 }
0x23a8   :  { %v5229_v51 = vpop.permute.xlu0 %5228 }
0x23a9   :  { %8066 = vtanh.f32 %v5247_v14  ;;  %v5249_v22 = vadd.f32 %v5229_v51, %v10630_v2 }
0x23aa   :  { %v5231_v50 = vpop.permute.xlu1 %5230 }
0x23ab   :  { %8068 = vtanh.f32 %v5249_v22  ;;  %v5250_v47 = vadd.f32 %v5231_v50, %v10633_v38  ;;  %v5264_v50 = vsub.f32 1.0, %v10648_v12 }
0x23ac   :  { %v5233_v48 = vpop.permute.xlu0 %5232 }
0x23ad   :  { %8070 = vtanh.f32 %v5250_v47  ;;  %v5251_v0 = vadd.f32 %v5233_v48, %v10636_v55  ;;  %v5310_v47 = vmul.f32 %v10645_v9, %v10522_v29  ;;  %v5313_v29 = vmul.f32 %v10656_v13, %v10551_v11 }
0x23ae   :  { %v5235_v59 = vpop.permute.xlu1 %5234 }
0x23af   :  { %v8063_v37 = vpop.eup %8062  ;;  %8072 = vtanh.f32 %v5251_v0  ;;  %v5252_v53 = vadd.f32 %v5235_v59, %v10639_v19  ;;  %v5312_v0 = vmul.f32 %v10648_v12, %v10529_v35 }
0x23b0   :  { %v5237_v17 = vpop.permute.xlu0 %5236  ;;  %5278 = vrot.lane.b32.xlu1 %v8063_v37, %s8332_s8  ;;  %v5263_v37 = vsub.f32 1.0, %v10652_v18 }
0x23b1   :  { %v8065_v30 = vpop.eup %8064  ;;  %8074 = vtanh.f32 %v5252_v53  ;;  %v5253_v2 = vadd.f32 %v5237_v17, %v10642_v20  ;;  %v5262_v20 = vsub.f32 1.0, %v10645_v9 }
0x23b2   :  { %5282 = vrot.lane.b32.xlu0 %v8065_v30, %s8332_s8 }
0x23b3   :  { %v8067_v22 = vpop.eup %8066  ;;  %8076 = vtanh.f32 %v5253_v2  ;;  %v5311_v2 = vmul.f32 %v10652_v18, %v10539_v3 }
0x23b4   :  { %5280 = vrot.lane.b32.xlu1 %v8067_v22, %s8332_s8 }
0x23b5   :  { %v8069_v38 = vpop.eup %8068 }
0x23b6   :  { %5284 = vrot.lane.b32.xlu0 %v8069_v38, %s8332_s8  ;;  %v5265_v38 = vsub.f32 1.0, %v10656_v13  ;;  %v5314_v13 = vmul.f32 %v10660_v43, %v10562_v49  ;;  %v5315_v49 = vmul.f32 %v10664_v34, %v10568_v28 }
0x23b7   :  { %v8071_v55 = vpop.eup %8070 }
0x23b8   :  { %5286 = vrot.lane.b32.xlu1 %v8071_v55, %s8332_s8 }
0x23b9   :  { %v8073_v19 = vpop.eup %8072 }
0x23ba   :  { %5288 = vrot.lane.b32.xlu0 %v8073_v19, %s8332_s8  ;;  %v5266_v19 = vsub.f32 1.0, %v10660_v43 }
0x23bb   :  { %v8075_v62 = vpop.eup %8074 }
0x23bc   :  { %5290 = vrot.lane.b32.xlu1 %v8075_v62, %s8332_s8 }
0x23bd   :  { %v8077_v31 = vpop.eup %8076 }
0x23be   :  { %5292 = vrot.lane.b32.xlu0 %v8077_v31, %s8332_s8 }
0x2422   :  { %v5279_v14 = vpop.permute.xlu1 %5278 }
0x2423   :  { %v5302_v51 = vmul.f32 %v5279_v14, %v5262_v20  ;;  %v5267_v14 = vsub.f32 1.0, %v10664_v34 }
0x2424   :  { %v5283_v48 = vpop.permute.xlu0 %5282 }
0x2425   :  { %v5304_v59 = vmul.f32 %v5283_v48, %v5264_v50  ;;  %v10700_v53 = vadd.f32 %v5310_v47, %v5302_v51 }
0x2426   :  { %v5281_v17 = vpop.permute.xlu1 %5280 }
0x2427   :  { %v10702_v30 = vadd.f32 %v5312_v0, %v5304_v59  ;;  %v5303_v22 = vmul.f32 %v5281_v17, %v5263_v37  ;;  %v10718_v62 = vpack.c.bf16 %v10700_v53, %v10700_v53  ;;  %v5268_v0 = vsub.f32 1.0, %v10668_v56 }
0x2428   :  { %v5285_v9 = vpop.permute.xlu0 %5284  ;;  %v5316_v37 = vmul.f32 %v10668_v56, %v10571_v24 }
0x2429   :  { %v10711_v35 = vpack.c.bf16 %v10702_v30, %v10702_v30  ;;  %v10713_v12 = vadd.f32 %v5311_v2, %v5303_v22  ;;  %v5305_v55 = vmul.f32 %v5285_v9, %v5265_v38  ;;  %v5342_v59 = vunpack.c.l.b16 %v10718_v62 }
0x242a   :  { %v5287_v3 = vpop.permute.xlu1 %5286 }
0x242b   :  { %v10722_v18 = vpack.c.bf16 %v10713_v12, %v10713_v12  ;;  %v10724_v11 = vadd.f32 %v5313_v29, %v5305_v55  ;;  %v5306_v31 = vmul.f32 %v5287_v3, %v5266_v19  ;;  %v5344_v20 = vunpack.c.l.b16 %v10711_v35 }
0x242c   :  { %v5289_v51 = vpop.permute.xlu0 %5288  ;;  %v5269_v19 = vsub.f32 1.0, %v10672_v10 }
0x242d   :  { %v5343_v50 = vunpack.c.l.b16 %v10722_v18  ;;  %v10733_v47 = vpack.c.bf16 %v10724_v11, %v10724_v11  ;;  %v10735_v48 = vadd.f32 %v5314_v13, %v5306_v31  ;;  %v5307_v43 = vmul.f32 %v5289_v51, %v5267_v14 }
0x242e   :  { %v5291_v17 = vpop.permute.xlu1 %5290  ;;  %v5416_v9 = vrot.slane %v5344_v20, 6  ;;  %v5317_v20 = vmul.f32 %v10672_v10, %v10582_v1 }
0x242f   :  { %11938 = vst [vmem:[#allocation77_spill] sm:$0xff] %v10733_v47  ;;  %v5414_v2 = vrot.slane %v5343_v50, 7  ;;  %v5345_v22 = vunpack.c.l.b16 %v10733_v47  ;;  %v10746_v38 = vpack.c.bf16 %v10735_v48, %v10735_v48  ;;  %v5308_v29 = vmul.f32 %v5291_v17, %v5268_v0 }
0x2430   :  { %v10748_v55 = vadd.f32 %v5315_v49, %v5307_v43  ;;  %v5293_v3 = vpop.permute.xlu0 %5292 }
0x2431   :  { %11939 = vst [vmem:[#allocation78_spill] sm:$0xff] %v10746_v38  ;;  %v5415_v28 = vsel %vm699_vm4, %v5414_v2, %v5342_v59  ;;  %v5418_v34 = vrot.slane %v5345_v22, 5  ;;  %v5346_v24 = vunpack.c.l.b16 %v10746_v38  ;;  %v10753_v56 = vadd.f32 %v5316_v37, %v5308_v29 }
0x2432   :  { %v5417_v13 = vsel %vm702_vm5, %v5416_v9, %v5415_v28  ;;  %v10758_v31 = vpack.c.bf16 %v10748_v55, %v10748_v55  ;;  %v5309_v14 = vmul.f32 %v5293_v3, %v5269_v19 }
0x2433   :  { %v5419_v51 = vsel %vm705_vm6, %v5418_v34, %v5417_v13  ;;  %v5420_v50 = vrot.slane %v5346_v24, 4  ;;  %v10765_v0 = vpack.c.bf16 %v10753_v56, %v10753_v56 }
0x2434   :  { %11940 = vst [vmem:[#allocation79_spill] sm:$0xff] %v10758_v31  ;;  %v5347_v59 = vunpack.c.l.b16 %v10758_v31  ;;  %v10768_v49 = vadd.f32 %v5317_v20, %v5309_v14 }
0x2435   :  { %11941 = vst [vmem:[#allocation80_spill] sm:$0xff] %v10765_v0  ;;  %v5421_v43 = vsel %vm708_vm7, %v5420_v50, %v5419_v51  ;;  %v5348_v37 = vunpack.c.l.b16 %v10765_v0 }
0x2436   :  { %v5422_v17 = vrot.slane %v5347_v59, 3  ;;  %v10774_v1 = vpack.c.bf16 %v10768_v49, %v10768_v49 }
0x2437   :  { %v5424_v10 = vrot.slane %v5348_v37, 2 }
0x2438   :  { %11942 = vst [vmem:[#allocation81_spill] sm:$0xff] %v10774_v1  ;;  %v5349_v2 = vunpack.c.l.b16 %v10774_v1  ;;  %v5423_v22 = vsel %vm711_vm8, %v5422_v17, %v5421_v43  ;;  %v10796_v17 = vld [vmem:[#allocation2 + $0xd] sm:$0x1] }
0x2439   :  { %v5425_v29 = vsel %vm714_vm9, %v5424_v10, %v5423_v22  ;;  %v10799_v22 = vld [vmem:[#allocation2 + $0x2d] sm:$0x1] }
0x243a   :  { %v5426_v9 = vrot.slane %v5349_v2, 1 }
0x243c   :  { %v5427_v19 = vsel %vm11873_vm10, %v5426_v9, %v5425_v29 }
0x243d   :  { %v5428_v3 = vpack.c.b16 %v5427_v19, %v5427_v19  ;;  %v10802_v19 = vld [vmem:[#allocation2 + $0x1d] sm:$0x1] }
0x243f   :  { %5429 = vrot.lane.b32.xlu1 %v5428_v3, %s8332_s8 }
0x24b1   :  { %v5430_v28 = vpop.permute.xlu1 %5429 }
0x24b2   :  { %7254 = vmatmul.mubr.msk.bf16.vlgmr.msra.gmra.mrb[32].mxu1 %vm11872_vm0, %v5430_v28 }
0x24b3   :  { %7266 = vmatpush3.bf16.msra.mxu1 %v10427_v63  ;;  %7269 = vmatprep.mubr.msk.bf16.mxu1 %vm8330_vm1, %v11885_v44  ;;  %vm1461_vm1 = vcmask 254977  }
0x24b4   :  { %7267 = vmatprep.subr.bf16.mxu1 %v11885_v44  ;;  %vm11172_vm3 = vmand %vm1461_vm1, %vm1462_vm2 }
0x24b5   :  { %vm11349_vm12 = vmand %vm1461_vm1, %vm1869_vm11  ;;  %vm2253_vm1 = vsmask.f32 2304  ;;  %vm2660_vm11 = vsmask.f32 7946 }
0x24b6   :  { %vm11368_vm2 = vmand %vm2252_vm14, %vm2253_vm1 }
0x24b7   :  { %7268 = vmatpush3.bf16.msra.mxu1 %v10433_v52  ;;  %vm11420_vm1 = vmand %vm2252_vm14, %vm2660_vm11  ;;  %vm3043_vm14 = vcmask 257027   ;;  %vm3044_vm11 = vsmask.f32 3328 }
0x2585   :  { %v5468_v34 = vpop.f32.mrb[32].mxu1 }
0x2586   :  { %v7255_v24 = vpop.f32.mrb[33].mxu1  ;;  %v5554_v14 = vadd.f32 %v5468_v34, %v8467_v21  ;;  %v5484_v37 = vrot.slane %v5468_v34, 2  ;;  %v5483_v10 = vrot.slane %v5468_v34, 1  ;;  %v5498_v2 = vadd.f32 %v10796_v17, %v5468_v34 }
0x2587   :  { %v5471_v13 = vpop.f32.mrb[34].mxu1  ;;  %v5485_v29 = vrot.slane %v5468_v34, 3  ;;  %v5486_v3 = vrot.slane %v5468_v34, 4 }
0x2588   :  { %v7256_v20 = vpop.f32.mrb[35].mxu1  ;;  %5563 = vrot.lane.b32.xlu0 %v5554_v14, %s8326_s30  ;;  %v5557_v51 = vrot.slane %v5554_v14, 2  ;;  %v5556_v50 = vrot.slane %v5554_v14, 1  ;;  %v5558_v63 = vrot.slane %v5554_v14, 3  ;;  %v5559_v44 = vrot.slane %v5554_v14, 4 }
0x2589   :  { %v5560_v52 = vrot.slane %v5554_v14, 5  ;;  %v5561_v59 = vrot.slane %v5554_v14, 6  ;;  %v5562_v43 = vrot.slane %v5554_v14, 7  ;;  %v5500_v9 = vadd.f32 %v5484_v37, %v10799_v22  ;;  %v10805_v13 = vld [vmem:[#allocation2 + $0x3d] sm:$0x1] }
0x258a   :  { %5567 = vrot.lane.b32.xlu1 %v5557_v51, %s8326_s30  ;;  %v5499_v28 = vadd.f32 %v5483_v10, %v10802_v19  ;;  %v6892_v24 = vmul.f32 -1.442695, %v5498_v2  ;;  %v5487_v20 = vrot.slane %v5468_v34, 5  ;;  %v5501_v14 = vadd.f32 %v5485_v29, %v10805_v13  ;;  %v10814_v2 = vld [vmem:[#allocation2 + $0x6d] sm:$0x1] }
0x258b   :  { %v6894_v51 = vmul.f32 -1.442695, %v5500_v9  ;;  %v10817_v9 = vld [vmem:[#allocation2 + $0x7d] sm:$0x1] }
0x258c   :  { %5565 = vrot.lane.b32.xlu0 %v5556_v50, %s8326_s30  ;;  %v10808_v50 = vld [vmem:[#allocation2 + $0x4d] sm:$0x1]  ;;  %8078 = vpow2.f32 %v6892_v24  ;;  %v6895_v10 = vmul.f32 -1.442695, %v5501_v14 }
0x258d   :  { %8080 = vpow2.f32 %v6894_v51 }
0x258e   :  { %5569 = vrot.lane.b32.xlu1 %v5558_v63, %s8326_s30  ;;  %v5488_v63 = vrot.slane %v5468_v34, 6 }
0x2590   :  { %5571 = vrot.lane.b32.xlu0 %v5559_v44, %s8326_s30  ;;  %v5502_v44 = vadd.f32 %v5486_v3, %v10808_v50  ;;  %v5504_v1 = vadd.f32 %v5488_v63, %v10814_v2 }
0x2592   :  { %5573 = vrot.lane.b32.xlu1 %v5560_v52, %s8326_s30  ;;  %v6893_v52 = vmul.f32 -1.442695, %v5499_v28  ;;  %v6896_v29 = vmul.f32 -1.442695, %v5502_v44  ;;  %v6898_v28 = vmul.f32 -1.442695, %v5504_v1 }
0x2594   :  { %5575 = vrot.lane.b32.xlu0 %v5561_v59, %s8326_s30  ;;  %v10811_v59 = vld [vmem:[#allocation2 + $0x5d] sm:$0x1]  ;;  %8082 = vpow2.f32 %v6893_v52 }
0x2595   :  { %v5503_v37 = vadd.f32 %v5487_v20, %v10811_v59  ;;  %8084 = vpow2.f32 %v6895_v10 }
0x2596   :  { %5577 = vrot.lane.b32.xlu1 %v5562_v43, %s8326_s30  ;;  %v5489_v43 = vrot.slane %v5468_v34, 7  ;;  %8086 = vpow2.f32 %v6896_v29  ;;  %v8079_v24 = vpop.eup %8078 }
0x2597   :  { %v6897_v3 = vmul.f32 -1.442695, %v5503_v37  ;;  %v8081_v20 = vpop.eup %8080  ;;  %v5530_v14 = vadd.f32 1.0, %v8079_v24 }
0x2598   :  { %v5505_v0 = vadd.f32 %v5489_v43, %v10817_v9  ;;  %v5532_v31 = vadd.f32 1.0, %v8081_v20 }
0x2599   :  { %8088 = vpow2.f32 %v6897_v3 }
0x259a   :  { %v6899_v34 = vmul.f32 -1.442695, %v5505_v0  ;;  %8090 = vpow2.f32 %v6898_v28 }
0x259c   :  { %8092 = vpow2.f32 %v6899_v34 }
0x259d   :  { %8094 = vrcp.f32 %v5530_v14 }
0x259e   :  { %v8083_v51 = vpop.eup %8082  ;;  %8096 = vrcp.f32 %v5532_v31 }
0x259f   :  { %v8085_v63 = vpop.eup %8084  ;;  %v5531_v44 = vadd.f32 1.0, %v8083_v51 }
0x25a0   :  { %v8087_v52 = vpop.eup %8086  ;;  %v5533_v38 = vadd.f32 1.0, %v8085_v63 }
0x25a1   :  { %8098 = vrcp.f32 %v5531_v44  ;;  %v5534_v37 = vadd.f32 1.0, %v8087_v52 }
0x25a2   :  { %8100 = vrcp.f32 %v5533_v38 }
0x25a3   :  { %v8089_v43 = vpop.eup %8088  ;;  %8102 = vrcp.f32 %v5534_v37 }
0x25a4   :  { %v8091_v10 = vpop.eup %8090  ;;  %v5535_v1 = vadd.f32 1.0, %v8089_v43 }
0x25a5   :  { %v5536_v0 = vadd.f32 1.0, %v8091_v10 }
0x25a6   :  { %v8093_v29 = vpop.eup %8092  ;;  %8104 = vrcp.f32 %v5535_v1 }
0x25a7   :  { %v10820_v3 = vpop.eup %8094  ;;  %v5537_v24 = vadd.f32 1.0, %v8093_v29  ;;  %8106 = vrcp.f32 %v5536_v0 }
0x25a8   :  { %v10823_v20 = vpop.eup %8096 }
0x25a9   :  { %8108 = vrcp.f32 %v5537_v24 }
0x25ab   :  { %v10827_v38 = vpop.eup %8098 }
0x25ac   :  { %v10831_v44 = vpop.eup %8100 }
0x25ad   :  { %v10835_v37 = vpop.eup %8102 }
0x25b0   :  { %v10839_v29 = vpop.eup %8104 }
0x25b1   :  { %v10843_v24 = vpop.eup %8106 }
0x25fa   :  { %v5564_v28 = vpop.permute.xlu0 %5563 }
0x25fb   :  { %v5587_v34 = vmul.f32 %v10820_v3, %v5564_v28 }
0x25fc   :  { %v5568_v31 = vpop.permute.xlu1 %5567 }
0x25fd   :  { %v5589_v14 = vmul.f32 %v10823_v20, %v5568_v31  ;;  %5603 = vrot.lane.b32.xlu0 %v5587_v34, %s8326_s30 }
0x25fe   :  { %v5566_v51 = vpop.permute.xlu0 %5565 }
0x25ff   :  { %v5588_v63 = vmul.f32 %v10827_v38, %v5566_v51  ;;  %5607 = vrot.lane.b32.xlu1 %v5589_v14, %s8326_s30  ;;  %v10847_v14 = vpop.eup %8108 }
0x2600   :  { %v5570_v52 = vpop.permute.xlu1 %5569 }
0x2601   :  { %v5590_v43 = vmul.f32 %v10831_v44, %v5570_v52  ;;  %5605 = vrot.lane.b32.xlu0 %v5588_v63, %s8326_s30 }
0x2602   :  { %v5572_v10 = vpop.permute.xlu0 %5571 }
0x2603   :  { %v5591_v1 = vmul.f32 %v10835_v37, %v5572_v10  ;;  %5609 = vrot.lane.b32.xlu1 %v5590_v43, %s8326_s30 }
0x2604   :  { %v5574_v0 = vpop.permute.xlu1 %5573 }
0x2605   :  { %v5592_v28 = vmul.f32 %v10839_v29, %v5574_v0  ;;  %5611 = vrot.lane.b32.xlu0 %v5591_v1, %s8326_s30 }
0x2606   :  { %v5576_v34 = vpop.permute.xlu0 %5575 }
0x2607   :  { %v5593_v31 = vmul.f32 %v10843_v24, %v5576_v34  ;;  %5613 = vrot.lane.b32.xlu1 %v5592_v28, %s8326_s30 }
0x2608   :  { %v5578_v51 = vpop.permute.xlu1 %5577 }
0x2609   :  { %v5594_v63 = vmul.f32 %v10847_v14, %v5578_v51  ;;  %5615 = vrot.lane.b32.xlu0 %v5593_v31, %s8326_s30 }
0x260b   :  { %5617 = vrot.lane.b32.xlu1 %v5594_v63, %s8326_s30 }
0x266f   :  { %v5604_v52 = vpop.permute.xlu0 %5603 }
0x2670   :  { %v5627_v43 = vadd.f32 %v5604_v52, %v10796_v17 }
0x2671   :  { %v5608_v10 = vpop.permute.xlu1 %5607 }
0x2672   :  { %8110 = vtanh.f32 %v5627_v43  ;;  %v5629_v1 = vadd.f32 %v5608_v10, %v10799_v22 }
0x2673   :  { %v5606_v0 = vpop.permute.xlu0 %5605 }
0x2674   :  { %8112 = vtanh.f32 %v5629_v1  ;;  %v5628_v28 = vadd.f32 %v5606_v0, %v10802_v19 }
0x2675   :  { %v5610_v34 = vpop.permute.xlu1 %5609 }
0x2676   :  { %8114 = vtanh.f32 %v5628_v28  ;;  %v5630_v47 = vadd.f32 %v5610_v34, %v10805_v13  ;;  %v5691_v34 = vmul.f32 %v10820_v3, %v10700_v53  ;;  %v5692_v53 = vmul.f32 %v10827_v38, %v10713_v12 }
0x2677   :  { %v5612_v51 = vpop.permute.xlu0 %5611 }
0x2678   :  { %8116 = vtanh.f32 %v5630_v47  ;;  %v5631_v31 = vadd.f32 %v5612_v51, %v10808_v50 }
0x2679   :  { %v5614_v63 = vpop.permute.xlu1 %5613 }
0x267a   :  { %8118 = vtanh.f32 %v5631_v31  ;;  %v5632_v17 = vadd.f32 %v5614_v63, %v10811_v59  ;;  %v5645_v31 = vsub.f32 1.0, %v10823_v20 }
0x267b   :  { %v5616_v52 = vpop.permute.xlu0 %5615 }
0x267c   :  { %v8111_v43 = vpop.eup %8110  ;;  %8120 = vtanh.f32 %v5632_v17  ;;  %v5633_v22 = vadd.f32 %v5616_v52, %v10814_v2  ;;  %v5693_v52 = vmul.f32 %v10823_v20, %v10702_v30  ;;  %v5647_v30 = vsub.f32 1.0, %v10835_v37 }
0x267d   :  { %v5618_v10 = vpop.permute.xlu1 %5617  ;;  %5659 = vrot.lane.b32.xlu0 %v8111_v43, %s8332_s8 }
0x267e   :  { %v8113_v19 = vpop.eup %8112  ;;  %8122 = vtanh.f32 %v5633_v22  ;;  %v5634_v13 = vadd.f32 %v5618_v10, %v10817_v9  ;;  %v5643_v9 = vsub.f32 1.0, %v10820_v3  ;;  %v5644_v22 = vsub.f32 1.0, %v10827_v38 }
0x267f   :  { %5663 = vrot.lane.b32.xlu1 %v8113_v19, %s8332_s8  ;;  %v5648_v38 = vsub.f32 1.0, %v10839_v29 }
0x2680   :  { %v8115_v47 = vpop.eup %8114  ;;  %8124 = vtanh.f32 %v5634_v13 }
0x2681   :  { %5661 = vrot.lane.b32.xlu0 %v8115_v47, %s8332_s8  ;;  %v5646_v47 = vsub.f32 1.0, %v10831_v44 }
0x2682   :  { %v8117_v50 = vpop.eup %8116 }
0x2683   :  { %5665 = vrot.lane.b32.xlu1 %v8117_v50, %s8332_s8  ;;  %v5694_v50 = vmul.f32 %v10831_v44, %v10724_v11  ;;  %v5649_v11 = vsub.f32 1.0, %v10843_v24 }
0x2684   :  { %v8119_v59 = vpop.eup %8118 }
0x2685   :  { %5667 = vrot.lane.b32.xlu0 %v8119_v59, %s8332_s8 }
0x2686   :  { %v8121_v2 = vpop.eup %8120 }
0x2687   :  { %5669 = vrot.lane.b32.xlu1 %v8121_v2, %s8332_s8 }
0x2688   :  { %v8123_v1 = vpop.eup %8122 }
0x2689   :  { %5671 = vrot.lane.b32.xlu0 %v8123_v1, %s8332_s8 }
0x268a   :  { %v8125_v0 = vpop.eup %8124 }
0x268b   :  { %5673 = vrot.lane.b32.xlu1 %v8125_v0, %s8332_s8  ;;  %v5695_v0 = vmul.f32 %v10835_v37, %v10735_v48 }
0x26ef   :  { %v5660_v28 = vpop.permute.xlu0 %5659 }
0x26f0   :  { %v5683_v51 = vmul.f32 %v5660_v28, %v5643_v9  ;;  %v5696_v28 = vmul.f32 %v10839_v29, %v10748_v55 }
0x26f1   :  { %v5664_v63 = vpop.permute.xlu1 %5663 }
0x26f2   :  { %v10872_v17 = vadd.f32 %v5691_v34, %v5683_v51  ;;  %v5685_v43 = vmul.f32 %v5664_v63, %v5645_v31  ;;  %v5697_v31 = vmul.f32 %v10843_v24, %v10753_v56 }
0x26f3   :  { %v5662_v10 = vpop.permute.xlu0 %5661 }
0x26f4   :  { %v5707_v19 = vpack.c.bf16 %v10872_v17, %v10872_v17  ;;  %v10879_v13 = vadd.f32 %v5693_v52, %v5685_v43  ;;  %v5684_v3 = vmul.f32 %v5662_v10, %v5644_v22  ;;  %v5650_v52 = vsub.f32 1.0, %v10847_v14 }
0x26f5   :  { %v5666_v59 = vpop.permute.xlu1 %5665  ;;  %v5698_v43 = vmul.f32 %v10847_v14, %v10768_v49 }
0x26f6   :  { %v5740_v20 = vshll.u32 %v5707_v19, 16  ;;  %v5709_v2 = vpack.c.bf16 %v10879_v13, %v10879_v13  ;;  %v10889_v1 = vadd.f32 %v5692_v53, %v5684_v3  ;;  %v5686_v9 = vmul.f32 %v5666_v59, %v5646_v47 }
0x26f7   :  { %v5668_v12 = vpop.permute.xlu0 %5667  ;;  %v5723_v55 = vunpack.c.l.b16 %v5707_v19 }
0x26f8   :  { %v5725_v44 = vunpack.c.l.b16 %v5709_v2  ;;  %v5748_v34 = vshll.u32 %v5709_v2, 16  ;;  %v5708_v51 = vpack.c.bf16 %v10889_v1, %v10889_v1  ;;  %v10901_v63 = vadd.f32 %v5694_v50, %v5686_v9 }
0x26f9   :  { %v5687_v48 = vmul.f32 %v5668_v12, %v5647_v30  ;;  %v5670_v37 = vpop.permute.xlu1 %5669  ;;  %v10906_v29 = vrot.slane %v5740_v20, 6 }
0x26fa   :  { %v5724_v22 = vunpack.c.l.b16 %v5708_v51  ;;  %v5744_v10 = vshll.u32 %v5708_v51, 16  ;;  %v10908_v53 = vrot.slane %v5748_v34, 6  ;;  %v5710_v3 = vpack.c.bf16 %v10901_v63, %v10901_v63 }
0x26fb   :  { %11943 = vst [vmem:[#allocation82_spill] sm:$0xff] %v10906_v29  ;;  %v10912_v56 = vadd.f32 %v5695_v0, %v5687_v48  ;;  %v5688_v24 = vmul.f32 %v5670_v37, %v5648_v38  ;;  %v5672_v47 = vpop.permute.xlu0 %5671  ;;  %v5821_v50 = vrot.slane %v5725_v44, 6 }
0x26fc   :  { %11944 = vst [vmem:[#allocation83_spill] sm:$0xff] %v10908_v53  ;;  %v10914_v59 = vrot.slane %v5744_v10, 6  ;;  %v5819_v30 = vrot.slane %v5724_v22, 7  ;;  %v5689_v2 = vmul.f32 %v5672_v47, %v5649_v11  ;;  %v5726_v49 = vunpack.c.l.b16 %v5710_v3 }
0x26fd   :  { %v5752_v14 = vshll.u32 %v5710_v3, 16  ;;  %v5711_v19 = vpack.c.bf16 %v10912_v56, %v10912_v56  ;;  %v10918_v20 = vadd.f32 %v5696_v28, %v5688_v24  ;;  %v5674_v9 = vpop.permute.xlu1 %5673 }
0x26fe   :  { %11945 = vst [vmem:[#allocation84_spill] sm:$0xff] %v10914_v59  ;;  %v5820_v12 = vsel %vm699_vm4, %v5819_v30, %v5723_v55  ;;  %v10921_v34 = vadd.f32 %v5697_v31, %v5689_v2  ;;  %v5690_v0 = vmul.f32 %v5674_v9, %v5650_v52  ;;  %v5823_v51 = vrot.slane %v5726_v49, 5 }
0x26ff   :  { %v10925_v44 = vrot.slane %v5752_v14, 6  ;;  %v5822_v11 = vsel %vm702_vm5, %v5821_v50, %v5820_v12  ;;  %v5727_v48 = vunpack.c.l.b16 %v5711_v19  ;;  %v5756_v37 = vshll.u32 %v5711_v19, 16 }
0x2700   :  { %v5712_v28 = vpack.c.bf16 %v10918_v20, %v10918_v20  ;;  %v5713_v22 = vpack.c.bf16 %v10921_v34, %v10921_v34  ;;  %v10932_v55 = vadd.f32 %v5698_v43, %v5690_v0  ;;  %v5824_v31 = vsel %vm705_vm6, %v5823_v51, %v5822_v11  ;;  %v10978_v11 = vld [vmem:[#allocation2 + $0x4e] sm:$0x1] }
0x2701   :  { %11946 = vst [vmem:[#allocation85_spill] sm:$0xff] %v10925_v44  ;;  %v5825_v52 = vrot.slane %v5727_v48, 4  ;;  %v10940_v49 = vrot.slane %v5756_v37, 6 }
0x2702   :  { %v5728_v3 = vunpack.c.l.b16 %v5712_v28  ;;  %v5760_v24 = vshll.u32 %v5712_v28, 16  ;;  %v5729_v47 = vunpack.c.l.b16 %v5713_v22  ;;  %v5764_v30 = vshll.u32 %v5713_v22, 16 }
0x2703   :  { %v5826_v50 = vsel %vm708_vm7, %v5825_v52, %v5824_v31  ;;  %v5714_v2 = vpack.c.bf16 %v10932_v55, %v10932_v55  ;;  %11947 = vst [vmem:[#allocation86_spill] sm:$0xff] %v10940_v49 }
0x2704   :  { %v10942_v14 = vrot.slane %v5760_v24, 6  ;;  %v5827_v43 = vrot.slane %v5728_v3, 3  ;;  %v5829_v19 = vrot.slane %v5729_v47, 2  ;;  %v10947_v51 = vrot.slane %v5764_v30, 6 }
0x2705   :  { %v5730_v9 = vunpack.c.l.b16 %v5714_v2  ;;  %v5768_v12 = vshll.u32 %v5714_v2, 16 }
0x2706   :  { %11948 = vst [vmem:[#allocation87_spill] sm:$0xff] %v10942_v14  ;;  %v5828_v0 = vsel %vm711_vm8, %v5827_v43, %v5826_v50  ;;  %11949 = vst [vmem:[#allocation88_spill] sm:$0xff] %v10947_v51 }
0x2707   :  { %v10949_v48 = vrot.slane %v5768_v12, 6  ;;  %v5831_v28 = vrot.slane %v5730_v9, 1  ;;  %v5830_v22 = vsel %vm714_vm9, %v5829_v19, %v5828_v0 }
0x2709   :  { %11950 = vst [vmem:[#allocation89_spill] sm:$0xff] %v10949_v48  ;;  %v5832_v37 = vsel %vm11873_vm10, %v5831_v28, %v5830_v22 }
0x270a   :  { %v5833_v52 = vpack.c.b16 %v5832_v37, %v5832_v37 }
0x270c   :  { %5834 = vrot.lane.b32.xlu0 %v5833_v52, %s8332_s8  ;;  %v10966_v52 = vld [vmem:[#allocation2 + $0xe] sm:$0x1] }
0x277e   :  { %v5835_v3 = vpop.permute.xlu0 %5834 }
0x277f   :  { %7262 = vmatmul.mubr.msk.bf16.vlgmr.msra.gmra.mrb[36].mxu0 %vm11872_vm0, %v5835_v3 }
0x2852   :  { %v5873_v24 = vpop.f32.mrb[36].mxu0 }
0x2853   :  { %v7263_v47 = vpop.f32.mrb[37].mxu0  ;;  %v5959_v2 = vadd.f32 %v5873_v24, %v8467_v21  ;;  %v5889_v37 = vrot.slane %v5873_v24, 2  ;;  %v5888_v3 = vrot.slane %v5873_v24, 1  ;;  %v5893_v10 = vrot.slane %v5873_v24, 6 }
0x2854   :  { %v5876_v50 = vpop.f32.mrb[38].mxu0  ;;  %v5903_v47 = vadd.f32 %v10966_v52, %v5873_v24  ;;  %v5894_v48 = vrot.slane %v5873_v24, 7 }
0x2855   :  { %v7264_v30 = vpop.f32.mrb[39].mxu0  ;;  %5968 = vrot.lane.b32.xlu1 %v5959_v2, %s8326_s30  ;;  %v5962_v43 = vrot.slane %v5959_v2, 2  ;;  %v5961_v19 = vrot.slane %v5959_v2, 1  ;;  %v5963_v9 = vrot.slane %v5959_v2, 3  ;;  %v5964_v12 = vrot.slane %v5959_v2, 4 }
0x2856   :  { %v5965_v0 = vrot.slane %v5959_v2, 5  ;;  %v5966_v28 = vrot.slane %v5959_v2, 6  ;;  %v5967_v22 = vrot.slane %v5959_v2, 7  ;;  %v10969_v50 = vld [vmem:[#allocation2 + $0x2e] sm:$0x1]  ;;  %v5890_v30 = vrot.slane %v5873_v24, 3 }
0x2857   :  { %5972 = vrot.lane.b32.xlu0 %v5962_v43, %s8326_s30  ;;  %v5905_v43 = vadd.f32 %v5889_v37, %v10969_v50  ;;  %v10975_v2 = vld [vmem:[#allocation2 + $0x3e] sm:$0x1] }
0x2858   :  { %v10981_v37 = vld [vmem:[#allocation2 + $0x5e] sm:$0x1] }
0x2859   :  { %5970 = vrot.lane.b32.xlu1 %v5961_v19, %s8326_s30  ;;  %v10972_v19 = vld [vmem:[#allocation2 + $0x1e] sm:$0x1]  ;;  %v6911_v31 = vmul.f32 -1.442695, %v5905_v43 }
0x285a   :  { %v10987_v43 = vld [vmem:[#allocation2 + $0x7e] sm:$0x1] }
0x285b   :  { %5974 = vrot.lane.b32.xlu0 %v5963_v9, %s8326_s30  ;;  %v5891_v9 = vrot.slane %v5873_v24, 4  ;;  %v5910_v53 = vadd.f32 %v5894_v48, %v10987_v43 }
0x285d   :  { %5976 = vrot.lane.b32.xlu1 %v5964_v12, %s8326_s30  ;;  %v5904_v12 = vadd.f32 %v5888_v3, %v10972_v19  ;;  %v5907_v38 = vadd.f32 %v5891_v9, %v10978_v11 }
0x285f   :  { %5978 = vrot.lane.b32.xlu0 %v5965_v0, %s8326_s30  ;;  %v6909_v0 = vmul.f32 -1.442695, %v5903_v47  ;;  %v6910_v51 = vmul.f32 -1.442695, %v5904_v12  ;;  %v10984_v47 = vld [vmem:[#allocation2 + $0x6e] sm:$0x1] }
0x2860   :  { %v5909_v14 = vadd.f32 %v5893_v10, %v10984_v47 }
0x2861   :  { %5980 = vrot.lane.b32.xlu1 %v5966_v28, %s8326_s30  ;;  %v5892_v28 = vrot.slane %v5873_v24, 5  ;;  %8126 = vpow2.f32 %v6909_v0  ;;  %v6916_v24 = vmul.f32 -1.442695, %v5910_v53 }
0x2862   :  { %8128 = vpow2.f32 %v6911_v31  ;;  %v6915_v12 = vmul.f32 -1.442695, %v5909_v14 }
0x2863   :  { %5982 = vrot.lane.b32.xlu0 %v5967_v22, %s8326_s30  ;;  %v5906_v22 = vadd.f32 %v5890_v30, %v10975_v2  ;;  %v5908_v49 = vadd.f32 %v5892_v28, %v10981_v37  ;;  %8130 = vpow2.f32 %v6910_v51  ;;  %v6913_v30 = vmul.f32 -1.442695, %v5907_v38 }
0x2865   :  { %v6912_v3 = vmul.f32 -1.442695, %v5906_v22  ;;  %v6914_v9 = vmul.f32 -1.442695, %v5908_v49 }
0x2867   :  { %8132 = vpow2.f32 %v6912_v3 }
0x2868   :  { %8134 = vpow2.f32 %v6913_v30 }
0x2869   :  { %8136 = vpow2.f32 %v6914_v9 }
0x286a   :  { %8138 = vpow2.f32 %v6915_v12 }
0x286b   :  { %v8127_v0 = vpop.eup %8126  ;;  %8140 = vpow2.f32 %v6916_v24 }
0x286c   :  { %v8129_v28 = vpop.eup %8128  ;;  %v5935_v31 = vadd.f32 1.0, %v8127_v0 }
0x286d   :  { %v8131_v22 = vpop.eup %8130  ;;  %v5937_v44 = vadd.f32 1.0, %v8129_v28 }
0x286e   :  { %8142 = vrcp.f32 %v5935_v31  ;;  %v5936_v38 = vadd.f32 1.0, %v8131_v22 }
0x286f   :  { %8144 = vrcp.f32 %v5937_v44 }
0x2870   :  { %8146 = vrcp.f32 %v5936_v38 }
0x2871   :  { %v8133_v10 = vpop.eup %8132 }
0x2872   :  { %v8135_v51 = vpop.eup %8134  ;;  %v5938_v29 = vadd.f32 1.0, %v8133_v10 }
0x2873   :  { %v8137_v48 = vpop.eup %8136  ;;  %v5939_v49 = vadd.f32 1.0, %v8135_v51 }
0x2874   :  { %v8139_v3 = vpop.eup %8138  ;;  %8148 = vrcp.f32 %v5938_v29  ;;  %v5940_v14 = vadd.f32 1.0, %v8137_v48 }
0x2875   :  { %v8141_v30 = vpop.eup %8140  ;;  %8150 = vrcp.f32 %v5939_v49  ;;  %v5941_v53 = vadd.f32 1.0, %v8139_v3 }
0x2876   :  { %8152 = vrcp.f32 %v5940_v14  ;;  %v5942_v0 = vadd.f32 1.0, %v8141_v30 }
0x2877   :  { %8154 = vrcp.f32 %v5941_v53 }
0x2878   :  { %v10990_v9 = vpop.eup %8142  ;;  %8156 = vrcp.f32 %v5942_v0 }
0x2879   :  { %v10993_v28 = vpop.eup %8144 }
0x287a   :  { %v10997_v29 = vpop.eup %8146 }
0x287e   :  { %v11001_v38 = vpop.eup %8148 }
0x287f   :  { %v11005_v49 = vpop.eup %8150 }
0x2880   :  { %v11009_v30 = vpop.eup %8152 }
0x2881   :  { %v11013_v0 = vpop.eup %8154 }
0x28c7   :  { %v5969_v12 = vpop.permute.xlu1 %5968 }
0x28c8   :  { %v5992_v24 = vmul.f32 %v10990_v9, %v5969_v12 }
0x28c9   :  { %v5973_v44 = vpop.permute.xlu0 %5972 }
0x28ca   :  { %v5994_v31 = vmul.f32 %v10993_v28, %v5973_v44  ;;  %6008 = vrot.lane.b32.xlu1 %v5992_v24, %s8326_s30 }
0x28cb   :  { %v5971_v22 = vpop.permute.xlu1 %5970 }
0x28cc   :  { %v5993_v10 = vmul.f32 %v10997_v29, %v5971_v22  ;;  %6012 = vrot.lane.b32.xlu0 %v5994_v31, %s8326_s30  ;;  %v11017_v31 = vpop.eup %8156 }
0x28cd   :  { %v5975_v51 = vpop.permute.xlu0 %5974 }
0x28ce   :  { %v5995_v48 = vmul.f32 %v11001_v38, %v5975_v51  ;;  %6010 = vrot.lane.b32.xlu1 %v5993_v10, %s8326_s30 }
0x28cf   :  { %v5977_v3 = vpop.permute.xlu1 %5976 }
0x28d0   :  { %v5996_v14 = vmul.f32 %v11005_v49, %v5977_v3  ;;  %6014 = vrot.lane.b32.xlu0 %v5995_v48, %s8326_s30 }
0x28d1   :  { %v5979_v53 = vpop.permute.xlu0 %5978 }
0x28d2   :  { %v5997_v12 = vmul.f32 %v11009_v30, %v5979_v53  ;;  %6016 = vrot.lane.b32.xlu1 %v5996_v14, %s8326_s30 }
0x28d3   :  { %v5981_v24 = vpop.permute.xlu1 %5980 }
0x28d4   :  { %v5998_v44 = vmul.f32 %v11013_v0, %v5981_v24  ;;  %6018 = vrot.lane.b32.xlu0 %v5997_v12, %s8326_s30 }
0x28d5   :  { %v5983_v22 = vpop.permute.xlu0 %5982 }
0x28d6   :  { %v5999_v10 = vmul.f32 %v11017_v31, %v5983_v22  ;;  %6020 = vrot.lane.b32.xlu1 %v5998_v44, %s8326_s30 }
0x28d8   :  { %6022 = vrot.lane.b32.xlu0 %v5999_v10, %s8326_s30 }
0x293c   :  { %v6009_v51 = vpop.permute.xlu1 %6008 }
0x293d   :  { %v6032_v48 = vadd.f32 %v6009_v51, %v10966_v52 }
0x293e   :  { %v6013_v3 = vpop.permute.xlu0 %6012 }
0x293f   :  { %8158 = vtanh.f32 %v6032_v48  ;;  %v6034_v14 = vadd.f32 %v6013_v3, %v10969_v50 }
0x2940   :  { %v6011_v53 = vpop.permute.xlu1 %6010 }
0x2941   :  { %8160 = vtanh.f32 %v6034_v14  ;;  %v6033_v12 = vadd.f32 %v6011_v53, %v10972_v19 }
0x2942   :  { %v6015_v24 = vpop.permute.xlu0 %6014 }
0x2943   :  { %8162 = vtanh.f32 %v6033_v12  ;;  %v6035_v59 = vadd.f32 %v6015_v24, %v10975_v2  ;;  %v6096_v12 = vmul.f32 %v10990_v9, %v10872_v17  ;;  %v6098_v24 = vmul.f32 %v10993_v28, %v10879_v13 }
0x2944   :  { %v6017_v22 = vpop.permute.xlu1 %6016  ;;  %v6099_v17 = vmul.f32 %v11001_v38, %v10901_v63 }
0x2945   :  { %8164 = vtanh.f32 %v6035_v59  ;;  %v6036_v44 = vadd.f32 %v6017_v22, %v10978_v11  ;;  %v6049_v22 = vsub.f32 1.0, %v10997_v29 }
0x2946   :  { %v6019_v10 = vpop.permute.xlu0 %6018 }
0x2947   :  { %8166 = vtanh.f32 %v6036_v44  ;;  %v6037_v52 = vadd.f32 %v6019_v10, %v10981_v37 }
0x2948   :  { %v6021_v51 = vpop.permute.xlu1 %6020 }
0x2949   :  { %v8159_v48 = vpop.eup %8158  ;;  %8168 = vtanh.f32 %v6037_v52  ;;  %v6038_v50 = vadd.f32 %v6021_v51, %v10984_v47  ;;  %v6097_v52 = vmul.f32 %v10997_v29, %v10889_v1 }
0x294a   :  { %v6023_v3 = vpop.permute.xlu0 %6022  ;;  %6064 = vrot.lane.b32.xlu1 %v8159_v48, %s8332_s8  ;;  %v6051_v48 = vsub.f32 1.0, %v11001_v38  ;;  %v6100_v38 = vmul.f32 %v11005_v49, %v10912_v56  ;;  %v6102_v56 = vmul.f32 %v11013_v0, %v10921_v34 }
0x294b   :  { %v8161_v19 = vpop.eup %8160  ;;  %8170 = vtanh.f32 %v6038_v50  ;;  %v6039_v2 = vadd.f32 %v6023_v3, %v10987_v43  ;;  %v1429_v43 = vrot.slane %v8963_v32, 7  ;;  %v6050_v32 = vsub.f32 1.0, %v10993_v28 }
0x294c   :  { %6068 = vrot.lane.b32.xlu0 %v8161_v19, %s8332_s8  ;;  %v6052_v3 = vsub.f32 1.0, %v11005_v49 }
0x294d   :  { %v8163_v59 = vpop.eup %8162  ;;  %8172 = vtanh.f32 %v6039_v2 }
0x294e   :  { %6066 = vrot.lane.b32.xlu1 %v8163_v59, %s8332_s8 }
0x294f   :  { %v8165_v11 = vpop.eup %8164 }
0x2950   :  { %6070 = vrot.lane.b32.xlu0 %v8165_v11, %s8332_s8  ;;  %v6053_v11 = vsub.f32 1.0, %v11009_v30 }
0x2951   :  { %v8167_v37 = vpop.eup %8166 }
0x2952   :  { %6072 = vrot.lane.b32.xlu1 %v8167_v37, %s8332_s8  ;;  %v6101_v37 = vmul.f32 %v11009_v30, %v10918_v20 }
0x2953   :  { %v8169_v47 = vpop.eup %8168 }
0x2954   :  { %6074 = vrot.lane.b32.xlu0 %v8169_v47, %s8332_s8 }
0x2955   :  { %v8171_v14 = vpop.eup %8170 }
0x2956   :  { %6076 = vrot.lane.b32.xlu1 %v8171_v14, %s8332_s8  ;;  %v6054_v14 = vsub.f32 1.0, %v11013_v0 }
0x2957   :  { %v8173_v53 = vpop.eup %8172 }
0x2958   :  { %6078 = vrot.lane.b32.xlu0 %v8173_v53, %s8332_s8 }
0x295c   :  { %647 = vrot.lane.b32.xlu0 %v8646_v39, %s8332_s8  ;;  %v1431_v39 = vrot.slane %v8956_v7, 7 }
0x2960   :  { %651 = vrot.lane.b32.xlu0 %v8631_v33, %s8332_s8  ;;  %v1433_v33 = vrot.slane %v8991_v61, 7 }
0x2964   :  { %655 = vrot.lane.b32.xlu0 %v8651_v8, %s8332_s8  ;;  %v1435_v8 = vrot.slane %v9010_v6, 7 }
0x2968   :  { %659 = vrot.lane.b32.xlu0 %v8668_v46, %s8332_s8  ;;  %v6048_v46 = vsub.f32 1.0, %v10990_v9 }
0x296c   :  { %7284 = vrot.lane.b32.xlu0 %v8818_v40, %s8332_s8 }
0x2970   :  { %7294 = vrot.lane.b32.xlu0 %v8838_v25, %s8332_s8 }
0x2974   :  { %1437 = vrot.lane.b32.xlu0 %v1429_v43, %s8332_s8 }
0x2978   :  { %1441 = vrot.lane.b32.xlu0 %v1431_v39, %s8332_s8 }
0x297c   :  { %1445 = vrot.lane.b32.xlu0 %v1433_v33, %s8332_s8 }
0x2980   :  { %1449 = vrot.lane.b32.xlu0 %v1435_v8, %s8332_s8 }
0x29bc   :  { %v6065_v40 = vpop.permute.xlu1 %6064 }
0x29bd   :  { %v6088_v25 = vmul.f32 %v6065_v40, %v6048_v46 }
0x29be   :  { %v6069_v7 = vpop.permute.xlu0 %6068 }
0x29bf   :  { %v6090_v61 = vmul.f32 %v6069_v7, %v6050_v32  ;;  %v11065_v44 = vadd.f32 %v6096_v12, %v6088_v25  ;;  %v6055_v12 = vsub.f32 1.0, %v11017_v31 }
0x29c0   :  { %v6067_v6 = vpop.permute.xlu1 %6066 }
0x29c1   :  { %v11067_v10 = vadd.f32 %v6098_v24, %v6090_v61  ;;  %v6089_v51 = vmul.f32 %v6067_v6, %v6049_v22  ;;  %v11083_v19 = vpack.c.bf16 %v11065_v44, %v11065_v44 }
0x29c2   :  { %v6071_v9 = vpop.permute.xlu0 %6070 }
0x29c3   :  { %v11076_v13 = vpack.c.bf16 %v11067_v10, %v11067_v10  ;;  %v11078_v28 = vadd.f32 %v6097_v52, %v6089_v51  ;;  %v6091_v50 = vmul.f32 %v6071_v9, %v6051_v48  ;;  %v6128_v49 = vunpack.c.l.b16 %v11083_v19 }
0x29c4   :  { %v6073_v1 = vpop.permute.xlu1 %6072  ;;  %v6103_v52 = vmul.f32 %v11017_v31, %v10932_v55 }
0x29c5   :  { %v11087_v29 = vpack.c.bf16 %v11078_v28, %v11078_v28  ;;  %v11089_v63 = vadd.f32 %v6099_v17, %v6091_v50  ;;  %v6092_v2 = vmul.f32 %v6073_v1, %v6052_v3  ;;  %v6130_v59 = vunpack.c.l.b16 %v11076_v13  ;;  %v674_v17 = vld [vmem:[#allocation10] sm:$0x1] }
0x29c6   :  { %v6075_v47 = vpop.permute.xlu0 %6074 }
0x29c7   :  { %v6129_v53 = vunpack.c.l.b16 %v11087_v29  ;;  %v11101_v43 = vpack.c.bf16 %v11089_v63, %v11089_v63  ;;  %v11103_v39 = vadd.f32 %v6100_v38, %v6092_v2  ;;  %v6093_v33 = vmul.f32 %v6075_v47, %v6053_v11  ;;  %v680_v47 = vld [vmem:[#allocation10 + $0x10] sm:$0x1] }
0x29c8   :  { %v6077_v8 = vpop.permute.xlu1 %6076  ;;  %v6202_v25 = vrot.slane %v6130_v59, 6 }
0x29c9   :  { %v6200_v20 = vrot.slane %v6129_v53, 7  ;;  %v6131_v30 = vunpack.c.l.b16 %v11101_v43  ;;  %v11111_v46 = vpack.c.bf16 %v11103_v39, %v11103_v39  ;;  %v6094_v40 = vmul.f32 %v6077_v8, %v6054_v14 }
0x29ca   :  { %v11113_v32 = vadd.f32 %v6101_v37, %v6093_v33  ;;  %v6079_v34 = vpop.permute.xlu0 %6078 }
0x29cb   :  { %v6201_v0 = vsel %vm699_vm4, %v6200_v20, %v6128_v49  ;;  %v6204_v7 = vrot.slane %v6131_v30, 5  ;;  %v6132_v24 = vunpack.c.l.b16 %v11111_v46  ;;  %v11118_v61 = vadd.f32 %v6102_v56, %v6094_v40  ;;  %v686_v30 = vld [vmem:[#allocation10 + $0x20] sm:$0x1] }
0x29cc   :  { %v6203_v22 = vsel %vm702_vm5, %v6202_v25, %v6201_v0  ;;  %v11123_v6 = vpack.c.bf16 %v11113_v32, %v11113_v32  ;;  %v6095_v51 = vmul.f32 %v6079_v34, %v6055_v12  ;;  %v692_v0 = vld [vmem:[#allocation10 + $0x30] sm:$0x1] }
0x29cd   :  { %v6205_v9 = vsel %vm705_vm6, %v6204_v7, %v6203_v22  ;;  %v6206_v50 = vrot.slane %v6132_v24, 4  ;;  %v11136_v3 = vpack.c.bf16 %v11118_v61, %v11118_v61 }
0x29ce   :  { %v6133_v1 = vunpack.c.l.b16 %v11123_v6  ;;  %v11139_v38 = vadd.f32 %v6103_v52, %v6095_v51  ;;  %v648_v55 = vpop.permute.xlu0 %647  ;;  %v6149_v22 = vrot.slane %v11123_v6, 5  ;;  %v12057_v6 = vld [vmem:[#allocation87_spill] sm:$0xff] }
0x29cf   :  { %v6207_v31 = vsel %vm708_vm7, %v6206_v50, %v6205_v9  ;;  %v6134_v2 = vunpack.c.l.b16 %v11136_v3  ;;  %v675_v59 = vsel %vm11129_vm13, %v648_v55, %v674_v17 }
0x29d0   :  { %v6208_v11 = vrot.slane %v6133_v1, 3  ;;  %v11147_v37 = vpack.c.bf16 %v11139_v38, %v11139_v38  ;;  %676 = vst [vmem:[#allocation10] sm:$0x1] %v675_v59 }
0x29d1   :  { %v6210_v14 = vrot.slane %v6134_v2, 2 }
0x29d2   :  { %v6135_v53 = vunpack.c.l.b16 %v11147_v37  ;;  %v652_v56 = vpop.permute.xlu0 %651  ;;  %v6209_v49 = vsel %vm711_vm8, %v6208_v11, %v6207_v31  ;;  %v1464_v31 = vld [vmem:[#allocation10] sm:$0x2]  ;;  %v1470_v11 = vld [vmem:[#allocation10 + $0x10] sm:$0x2] }
0x29d3   :  { %v681_v33 = vsel %vm11129_vm13, %v652_v56, %v680_v47  ;;  %v6211_v8 = vsel %vm714_vm9, %v6210_v14, %v6209_v49  ;;  %v1482_v49 = vld [vmem:[#allocation10 + $0x30] sm:$0x2] }
0x29d4   :  { %v6212_v20 = vrot.slane %v6135_v53, 1  ;;  %682 = vst [vmem:[#allocation10 + $0x10] sm:$0x1] %v681_v33  ;;  %v1476_v53 = vld [vmem:[#allocation10 + $0x20] sm:$0x2] }
0x29d6   :  { %v656_v40 = vpop.permute.xlu0 %655  ;;  %v6213_v25 = vsel %vm11873_vm10, %v6212_v20, %v6211_v8  ;;  %v1430_v8 = vrot.slane %v8967_v15, 7  ;;  %v1434_v20 = vrot.slane %v9003_v45, 7  ;;  %v683_v15 = vld [vmem:[#allocation10 + $0x18] sm:$0x1] }
0x29d7   :  { %v687_v12 = vsel %vm11129_vm13, %v656_v40, %v686_v30  ;;  %v6214_v34 = vpack.c.b16 %v6213_v25, %v6213_v25  ;;  %v1080_v17 = vld [vmem:[#allocation10] sm:$0x1] }
0x29d8   :  { %688 = vst [vmem:[#allocation10 + $0x20] sm:$0x1] %v687_v12 }
0x29d9   :  { %6215 = vrot.lane.b32.xlu1 %v6214_v34, %s8332_s8  ;;  %v689_v34 = vld [vmem:[#allocation10 + $0x28] sm:$0x1] }
0x29da   :  { %v660_v7 = vpop.permute.xlu0 %659 }
0x29db   :  { %v693_v24 = vsel %vm11129_vm13, %v660_v7, %v692_v0 }
0x29dc   :  { %694 = vst [vmem:[#allocation10 + $0x30] sm:$0x1] %v693_v24 }
0x29dd   :  { %649 = vrot.lane.b32.xlu1 %v8622_v54, %s8332_s8 }
0x29de   :  { %v7285_v52 = vpop.permute.xlu0 %7284 }
0x29df   :  { %v7286_v51 = vunpack.i.l.bf16 %v7285_v52  ;;  %v1092_v54 = vld [vmem:[#allocation10 + $0x20] sm:$0x1]  ;;  %v7287_v0 = vunpack.i.h.bf16 %v7285_v52 }
0x29e1   :  { %v1081_v9 = vsel %vm11163_vm15, %v7286_v51, %v1080_v17  ;;  %653 = vrot.lane.b32.xlu1 %v8639_v36, %s8332_s8  ;;  %v695_v17 = vld [vmem:[#allocation10 + $0x38] sm:$0x1] }
0x29e2   :  { %1082 = vst [vmem:[#allocation10] sm:$0x1] %v1081_v9  ;;  %v7295_v50 = vpop.permute.xlu0 %7294 }
0x29e3   :  { %v7296_v1 = vunpack.i.l.bf16 %v7295_v50 }
0x29e5   :  { %v1093_v2 = vsel %vm11163_vm15, %v7296_v1, %v1092_v54  ;;  %657 = vrot.lane.b32.xlu1 %v8656_v41, %s8332_s8  ;;  %v7297_v54 = vunpack.i.h.bf16 %v7295_v50 }
0x29e6   :  { %1094 = vst [vmem:[#allocation10 + $0x20] sm:$0x1] %v1093_v2  ;;  %v1438_v36 = vpop.permute.xlu0 %1437 }
0x29e7   :  { %v1465_v59 = vsel %vm11172_vm3, %v1438_v36, %v1464_v31 }
0x29e8   :  { %1466 = vst [vmem:[#allocation10] sm:$0x2] %v1465_v59 }
0x29e9   :  { %661 = vrot.lane.b32.xlu1 %v8677_v16, %s8332_s8 }
0x29ea   :  { %v1442_v47 = vpop.permute.xlu0 %1441 }
0x29eb   :  { %v1471_v14 = vsel %vm11172_vm3, %v1442_v47, %v1470_v11  ;;  %v1086_v11 = vld [vmem:[#allocation10 + $0x10] sm:$0x1] }
0x29ec   :  { %1472 = vst [vmem:[#allocation10 + $0x10] sm:$0x2] %v1471_v14 }
0x29ed   :  { %7289 = vrot.lane.b32.xlu1 %v8830_v4, %s8332_s8  ;;  %v1432_v4 = vrot.slane %v8978_v27, 7 }
0x29ee   :  { %v1446_v41 = vpop.permute.xlu0 %1445 }
0x29ef   :  { %v1477_v56 = vsel %vm11172_vm3, %v1446_v41, %v1476_v53 }
0x29f0   :  { %1478 = vst [vmem:[#allocation10 + $0x20] sm:$0x2] %v1477_v56 }
0x29f1   :  { %7299 = vrot.lane.b32.xlu1 %v8842_v5, %s8332_s8  ;;  %v677_v5 = vld [vmem:[#allocation10 + $0x8] sm:$0x1] }
0x29f2   :  { %v1450_v33 = vpop.permute.xlu0 %1449 }
0x29f3   :  { %v1483_v16 = vsel %vm11172_vm3, %v1450_v33, %v1482_v49  ;;  %v1098_v33 = vld [vmem:[#allocation10 + $0x30] sm:$0x1] }
0x29f4   :  { %1484 = vst [vmem:[#allocation10 + $0x30] sm:$0x2] %v1483_v16  ;;  %v1467_v16 = vld [vmem:[#allocation10 + $0x8] sm:$0x2] }
0x29f5   :  { %1439 = vrot.lane.b32.xlu1 %v1430_v8, %s8332_s8 }
0x29f9   :  { %1443 = vrot.lane.b32.xlu1 %v1432_v4, %s8332_s8 }
0x29fd   :  { %1447 = vrot.lane.b32.xlu1 %v1434_v20, %s8332_s8 }
0x2a4b   :  { %v6216_v30 = vpop.permute.xlu1 %6215 }
0x2a4c   :  { %7270 = vmatmul.mubr.msk.bf16.vlgmr.msra.gmra.mrb[36].mxu1 %vm11872_vm0, %v6216_v30  ;;  %vm11483_vm0 = vmand %vm3043_vm14, %vm3044_vm11  ;;  %vm3451_vm11 = vsmask.f32 7950 }
0x2a4d   :  { %vm11517_vm10 = vmand %vm3043_vm14, %vm3451_vm11 }
0x2a4f   :  { %v650_v40 = vpop.permute.xlu1 %649 }
0x2a50   :  { %v678_v25 = vsel %vm11129_vm13, %v650_v40, %v677_v5  ;;  %v1473_v5 = vld [vmem:[#allocation10 + $0x18] sm:$0x2] }
0x2a51   :  { %679 = vst [vmem:[#allocation10 + $0x8] sm:$0x1] %v678_v25 }
0x2a53   :  { %v654_v12 = vpop.permute.xlu1 %653 }
0x2a54   :  { %v684_v27 = vsel %vm11129_vm13, %v654_v12, %v683_v15  ;;  %v1479_v15 = vld [vmem:[#allocation10 + $0x28] sm:$0x2] }
0x2a55   :  { %685 = vst [vmem:[#allocation10 + $0x18] sm:$0x1] %v684_v27 }
0x2a57   :  { %v658_v45 = vpop.permute.xlu1 %657 }
0x2a58   :  { %v1083_v7 = vld [vmem:[#allocation10 + $0x8] sm:$0x1]  ;;  %v690_v24 = vsel %vm11129_vm13, %v658_v45, %v689_v34 }
0x2a59   :  { %v1084_v51 = vsel %vm11163_vm15, %v7287_v0, %v1083_v7  ;;  %691 = vst [vmem:[#allocation10 + $0x28] sm:$0x1] %v690_v24 }
0x2a5a   :  { %1085 = vst [vmem:[#allocation10 + $0x8] sm:$0x1] %v1084_v51 }
0x2a5b   :  { %v662_v9 = vpop.permute.xlu1 %661 }
0x2a5c   :  { %v696_v1 = vsel %vm11129_vm13, %v662_v9, %v695_v17  ;;  %v1089_v47 = vld [vmem:[#allocation10 + $0x18] sm:$0x1] }
0x2a5d   :  { %697 = vst [vmem:[#allocation10 + $0x38] sm:$0x1] %v696_v1 }
0x2a5f   :  { %v7290_v31 = vpop.permute.xlu1 %7289 }
0x2a60   :  { %v1095_v2 = vld [vmem:[#allocation10 + $0x28] sm:$0x1]  ;;  %v7292_v52 = vunpack.i.h.bf16 %v7290_v31  ;;  %v7291_v36 = vunpack.i.l.bf16 %v7290_v31 }
0x2a61   :  { %v1096_v59 = vsel %vm11163_vm15, %v7297_v54, %v1095_v2  ;;  %v11957_v2 = vpack.i.bf16 %v9160_v58, %v9152_v57  ;;  %v11962_v57 = vld [vmem:[#allocation16_spill] sm:$0xff]  ;;  %v11963_v58 = vld [vmem:[#allocation15_spill] sm:$0xff] }
0x2a62   :  { %1097 = vst [vmem:[#allocation10 + $0x28] sm:$0x1] %v1096_v59  ;;  %v1090_v14 = vsel %vm11163_vm15, %v7292_v52, %v1089_v47  ;;  %v1087_v53 = vsel %vm11163_vm15, %v7291_v36, %v1086_v11  ;;  %v1436_v52 = vrot.slane %v9019_v60, 7  ;;  %v11958_v36 = vpack.i.bf16 %v9188_v42, %v9186_v23  ;;  %v11959_v59 = vld [vmem:[#allocation14_spill] sm:$0xff]  ;;  %v11966_v23 = vld [vmem:[#allocation19_spill] sm:$0xff] }
0x2a63   :  { %1091 = vst [vmem:[#allocation10 + $0x18] sm:$0x1] %v1090_v14  ;;  %1088 = vst [vmem:[#allocation10 + $0x10] sm:$0x1] %v1087_v53  ;;  %v7300_v41 = vpop.permute.xlu1 %7299  ;;  %v11960_v11 = vpack.i.bf16 %v9171_v26, %v11959_v59  ;;  %v11961_v47 = vld [vmem:[#allocation18_spill] sm:$0xff]  ;;  %v11964_v60 = vpack.i.bf16 %v11962_v57, %v11963_v58  ;;  %v11965_v53 = vld [vmem:[#allocation17_spill] sm:$0xff] }
0x2a64   :  { %v1101_v50 = vld [vmem:[#allocation10 + $0x38] sm:$0x1]  ;;  %v7302_v56 = vunpack.i.h.bf16 %v7300_v41  ;;  %v7301_v49 = vunpack.i.l.bf16 %v7300_v41  ;;  %v2220_v14 = vrot.slane %v11961_v47, 6  ;;  %v2222_v41 = vrot.slane %v11965_v53, 6  ;;  %v11299_v59 = vld [vmem:[#allocation2 + $0x2f] sm:$0x1] }
0x2a65   :  { %v2221_v42 = vrot.slane %v11966_v23, 6  ;;  %v11303_v57 = vld [vmem:[#allocation2 + $0x5f] sm:$0x1] }
0x2a66   :  { %v1102_v8 = vsel %vm11163_vm15, %v7302_v56, %v1101_v50  ;;  %v1099_v4 = vsel %vm11163_vm15, %v7301_v49, %v1098_v33  ;;  %v11967_v50 = vld [vmem:[#allocation21_spill] sm:$0xff]  ;;  %v11968_v56 = vld [vmem:[#allocation20_spill] sm:$0xff]  ;;  %v11969_v33 = vld [vmem:[#allocation23_spill] sm:$0xff] }
0x2a67   :  { %1103 = vst [vmem:[#allocation10 + $0x38] sm:$0x1] %v1102_v8  ;;  %1100 = vst [vmem:[#allocation10 + $0x30] sm:$0x1] %v1099_v4  ;;  %v1440_v20 = vpop.permute.xlu1 %1439  ;;  %v2224_v26 = vrot.slane %v11967_v50, 6  ;;  %v2223_v49 = vrot.slane %v11968_v56, 6 }
0x2a68   :  { %v1468_v30 = vsel %vm11172_vm3, %v1440_v20, %v1467_v16  ;;  %v2226_v16 = vrot.slane %v11969_v33, 6  ;;  %v11970_v8 = vld [vmem:[#allocation22_spill] sm:$0xff]  ;;  %v11971_v20 = vld [vmem:[#allocation27_spill] sm:$0xff] }
0x2a69   :  { %1469 = vst [vmem:[#allocation10 + $0x8] sm:$0x2] %v1468_v30  ;;  %v2225_v4 = vrot.slane %v11970_v8, 6  ;;  %v11972_v30 = vld [vmem:[#allocation25_spill] sm:$0xff]  ;;  %v11314_v33 = vld [vmem:[#allocation2 + $0x6f] sm:$0x1] }
0x2a6b   :  { %v1444_v40 = vpop.permute.xlu1 %1443 }
0x2a6c   :  { %v1474_v25 = vsel %vm11172_vm3, %v1444_v40, %v1473_v5  ;;  %v11973_v5 = vpack.i.bf16 %v11971_v20, %v11972_v30  ;;  %v11974_v40 = vld [vmem:[#allocation24_spill] sm:$0xff] }
0x2a6d   :  { %1475 = vst [vmem:[#allocation10 + $0x18] sm:$0x2] %v1474_v25  ;;  %v2227_v25 = vrot.slane %v11974_v40, 6 }
0x2a6f   :  { %v1448_v12 = vpop.permute.xlu1 %1447 }
0x2a70   :  { %v1480_v27 = vsel %vm11172_vm3, %v1448_v12, %v1479_v15  ;;  %v11975_v15 = vld [vmem:[#allocation30_spill] sm:$0xff]  ;;  %v11976_v12 = vld [vmem:[#allocation29_spill] sm:$0xff] }
0x2a71   :  { %1481 = vst [vmem:[#allocation10 + $0x28] sm:$0x2] %v1480_v27  ;;  %v11977_v27 = vpack.i.bf16 %v11975_v15, %v11976_v12 }
0x2b1f   :  { %v11227_v34 = vpop.f32.mrb[36].mxu1 }
0x2b20   :  { %v7271_v0 = vpop.f32.mrb[37].mxu1  ;;  %v6340_v24 = vadd.f32 %v11227_v34, %v8467_v21  ;;  %v6275_v58 = vrot.slane %v11227_v34, 7  ;;  %v6274_v23 = vrot.slane %v11227_v34, 6 }
0x2b21   :  { %v6257_v45 = vpop.f32.mrb[38].mxu1  ;;  %v11978_v0 = vld [vmem:[#allocation28_spill] sm:$0xff] }
0x2b22   :  { %v7272_v7 = vpop.f32.mrb[39].mxu1  ;;  %6349 = vrot.lane.b32.xlu0 %v6340_v24, %s8326_s30  ;;  %v6342_v51 = vrot.slane %v6340_v24, 1  ;;  %v6344_v17 = vrot.slane %v6340_v24, 3  ;;  %v6343_v9 = vrot.slane %v6340_v24, 2  ;;  %v6346_v1 = vrot.slane %v6340_v24, 5  ;;  %v11979_v45 = vld [vmem:[#allocation26_spill] sm:$0xff] }
0x2b23   :  { %v6345_v54 = vrot.slane %v6340_v24, 4  ;;  %v6348_v31 = vrot.slane %v6340_v24, 7  ;;  %v6347_v21 = vrot.slane %v6340_v24, 6  ;;  %v11980_v7 = vpack.i.bf16 %v11978_v0, %v11979_v45 }
0x2b24   :  { %6351 = vrot.lane.b32.xlu1 %v6342_v51, %s8326_s30  ;;  %v6269_v24 = vrot.slane %v11227_v34, 1  ;;  %v11286_v51 = vld [vmem:[#allocation2 + $0xf] sm:$0x1] }
0x2b26   :  { %6355 = vrot.lane.b32.xlu0 %v6344_v17, %s8326_s30  ;;  %v6271_v17 = vrot.slane %v11227_v34, 3 }
0x2b28   :  { %6353 = vrot.lane.b32.xlu1 %v6343_v9, %s8326_s30  ;;  %v6284_v9 = vadd.f32 %v11286_v51, %v11227_v34 }
0x2b2a   :  { %6359 = vrot.lane.b32.xlu0 %v6346_v1, %s8326_s30  ;;  %v11291_v1 = vld [vmem:[#allocation2 + $0x1f] sm:$0x1] }
0x2b2c   :  { %6357 = vrot.lane.b32.xlu1 %v6345_v54, %s8326_s30  ;;  %v6270_v54 = vrot.slane %v11227_v34, 2 }
0x2b2e   :  { %6363 = vrot.lane.b32.xlu0 %v6348_v31, %s8326_s30  ;;  %v6285_v31 = vadd.f32 %v6269_v24, %v11291_v1  ;;  %v6286_v47 = vadd.f32 %v6270_v54, %v11299_v59 }
0x2b30   :  { %6361 = vrot.lane.b32.xlu1 %v6347_v21, %s8326_s30  ;;  %v11295_v21 = vld [vmem:[#allocation2 + $0x3f] sm:$0x1]  ;;  %v6928_v50 = vmul.f32 -1.442695, %v6286_v47 }
0x2b32   :  { %7304 = vrot.lane.b32.xlu0 %v11957_v2, %s8332_s8  ;;  %v6273_v2 = vrot.slane %v11227_v34, 5 }
0x2b34   :  { %1451 = vrot.lane.b32.xlu1 %v1436_v52, %s8332_s8  ;;  %v6287_v52 = vadd.f32 %v6271_v17, %v11295_v21 }
0x2b36   :  { %7314 = vrot.lane.b32.xlu0 %v11958_v36, %s8332_s8  ;;  %v6926_v36 = vmul.f32 -1.442695, %v6284_v9  ;;  %v6929_v53 = vmul.f32 -1.442695, %v6287_v52 }
0x2b38   :  { %7309 = vrot.lane.b32.xlu1 %v11960_v11, %s8332_s8  ;;  %v6272_v11 = vrot.slane %v11227_v34, 4  ;;  %8174 = vpow2.f32 %v6926_v36 }
0x2b3a   :  { %2228 = vrot.lane.b32.xlu0 %v2220_v14, %s8332_s8  ;;  %v6927_v14 = vmul.f32 -1.442695, %v6285_v31 }
0x2b3c   :  { %7319 = vrot.lane.b32.xlu1 %v11964_v60, %s8332_s8  ;;  %v6289_v60 = vadd.f32 %v6273_v2, %v11303_v57  ;;  %8176 = vpow2.f32 %v6927_v14 }
0x2b3d   :  { %8178 = vpow2.f32 %v6929_v53 }
0x2b3e   :  { %2232 = vrot.lane.b32.xlu0 %v2222_v41, %s8332_s8  ;;  %v11307_v41 = vld [vmem:[#allocation2 + $0x4f] sm:$0x1]  ;;  %8180 = vpow2.f32 %v6928_v50 }
0x2b40   :  { %2230 = vrot.lane.b32.xlu1 %v2221_v42, %s8332_s8  ;;  %v6288_v42 = vadd.f32 %v6272_v11, %v11307_v41 }
0x2b42   :  { %2236 = vrot.lane.b32.xlu0 %v2224_v26, %s8332_s8  ;;  %v11311_v26 = vld [vmem:[#allocation2 + $0x7f] sm:$0x1]  ;;  %v6930_v8 = vmul.f32 -1.442695, %v6288_v42  ;;  %v8175_v20 = vpop.eup %8174 }
0x2b43   :  { %v6291_v56 = vadd.f32 %v6275_v58, %v11311_v26 }
0x2b44   :  { %2234 = vrot.lane.b32.xlu1 %v2223_v49, %s8332_s8  ;;  %v6931_v49 = vmul.f32 -1.442695, %v6289_v60 }
0x2b46   :  { %2240 = vrot.lane.b32.xlu0 %v2226_v16, %s8332_s8  ;;  %v6290_v16 = vadd.f32 %v6274_v23, %v11314_v33  ;;  %8182 = vpow2.f32 %v6931_v49  ;;  %v8177_v30 = vpop.eup %8176 }
0x2b47   :  { %8184 = vpow2.f32 %v6930_v8  ;;  %v8179_v40 = vpop.eup %8178 }
0x2b48   :  { %2238 = vrot.lane.b32.xlu1 %v2225_v4, %s8332_s8  ;;  %v6933_v4 = vmul.f32 -1.442695, %v6291_v56  ;;  %v6932_v34 = vmul.f32 -1.442695, %v6290_v16  ;;  %v8181_v15 = vpop.eup %8180  ;;  %v6319_v12 = vadd.f32 1.0, %v8179_v40 }
0x2b49   :  { %v6318_v0 = vadd.f32 1.0, %v8181_v15 }
0x2b4a   :  { %7324 = vrot.lane.b32.xlu0 %v11973_v5, %s8332_s8  ;;  %8186 = vpow2.f32 %v6933_v4  ;;  %v6316_v5 = vadd.f32 1.0, %v8175_v20 }
0x2b4b   :  { %8188 = vpow2.f32 %v6932_v34 }
0x2b4c   :  { %2242 = vrot.lane.b32.xlu1 %v2227_v25, %s8332_s8  ;;  %v6317_v25 = vadd.f32 1.0, %v8177_v30  ;;  %8190 = vrcp.f32 %v6316_v5 }
0x2b4e   :  { %7334 = vrot.lane.b32.xlu0 %v11977_v27, %s8332_s8  ;;  %8192 = vrcp.f32 %v6317_v25 }
0x2b4f   :  { %8194 = vrcp.f32 %v6319_v12 }
0x2b50   :  { %7329 = vrot.lane.b32.xlu1 %v11980_v7, %s8332_s8  ;;  %v8183_v27 = vpop.eup %8182  ;;  %8196 = vrcp.f32 %v6318_v0  ;;  %v1485_v0 = vld [vmem:[#allocation10 + $0x38] sm:$0x2] }
0x2b51   :  { %v8185_v45 = vpop.eup %8184  ;;  %v6321_v7 = vadd.f32 1.0, %v8183_v27 }
0x2b52   :  { %v6320_v17 = vadd.f32 1.0, %v8185_v45 }
0x2b53   :  { %8198 = vrcp.f32 %v6321_v7 }
0x2b54   :  { %v8187_v24 = vpop.eup %8186  ;;  %8200 = vrcp.f32 %v6320_v17 }
0x2b55   :  { %v8189_v9 = vpop.eup %8188  ;;  %v6323_v54 = vadd.f32 1.0, %v8187_v24  ;;  %v11983_v24 = vld [vmem:[#allocation34_spill] sm:$0xff] }
0x2b56   :  { %v11317_v31 = vpop.eup %8190  ;;  %v6322_v52 = vadd.f32 1.0, %v8189_v9  ;;  %v3011_v17 = vrot.slane %v11983_v24, 5  ;;  %v1871_v9 = vld [vmem:[#allocation10] sm:$0x2] }
0x2b57   :  { %8202 = vrcp.f32 %v6323_v54  ;;  %v1874_v54 = vld [vmem:[#allocation10 + $0x8] sm:$0x2] }
0x2b58   :  { %v11320_v11 = vpop.eup %8192  ;;  %8204 = vrcp.f32 %v6322_v52 }
0x2b59   :  { %v11324_v58 = vpop.eup %8194 }
0x2b5a   :  { %v11328_v23 = vpop.eup %8196 }
0x2b5d   :  { %v11332_v56 = vpop.eup %8198 }
0x2b5e   :  { %v11336_v8 = vpop.eup %8200 }
0x2b61   :  { %v11340_v34 = vpop.eup %8202 }
0x2b62   :  { %v11344_v40 = vpop.eup %8204 }
0x2b94   :  { %v6350_v2 = vpop.permute.xlu0 %6349 }
0x2b95   :  { %v6373_v36 = vmul.f32 %v11317_v31, %v6350_v2 }
0x2b96   :  { %v6352_v47 = vpop.permute.xlu1 %6351 }
0x2b97   :  { %v6374_v14 = vmul.f32 %v11320_v11, %v6352_v47  ;;  %6389 = vrot.lane.b32.xlu0 %v6373_v36, %s8326_s30 }
0x2b98   :  { %v6356_v60 = vpop.permute.xlu0 %6355 }
0x2b99   :  { %v6376_v53 = vmul.f32 %v11324_v58, %v6356_v60  ;;  %6391 = vrot.lane.b32.xlu1 %v6374_v14, %s8326_s30  ;;  %v1883_v60 = vld [vmem:[#allocation10 + $0x20] sm:$0x2] }
0x2b9a   :  { %v6354_v42 = vpop.permute.xlu1 %6353 }
0x2b9b   :  { %v6375_v50 = vmul.f32 %v11328_v23, %v6354_v42  ;;  %6395 = vrot.lane.b32.xlu0 %v6376_v53, %s8326_s30 }
0x2b9c   :  { %v6360_v49 = vpop.permute.xlu0 %6359 }
0x2b9d   :  { %v6378_v16 = vmul.f32 %v11332_v56, %v6360_v49  ;;  %6393 = vrot.lane.b32.xlu1 %v6375_v50, %s8326_s30  ;;  %v11984_v50 = vld [vmem:[#allocation32_spill] sm:$0xff]  ;;  %v11985_v49 = vld [vmem:[#allocation31_spill] sm:$0xff] }
0x2b9e   :  { %v6358_v4 = vpop.permute.xlu1 %6357 }
0x2b9f   :  { %v6377_v20 = vmul.f32 %v11336_v8, %v6358_v4  ;;  %6399 = vrot.lane.b32.xlu0 %v6378_v16, %s8326_s30  ;;  %v11986_v16 = vpack.i.bf16 %v11984_v50, %v11985_v49  ;;  %v11987_v4 = vld [vmem:[#allocation33_spill] sm:$0xff] }
0x2ba0   :  { %v6364_v30 = vpop.permute.xlu0 %6363 }
0x2ba1   :  { %v6380_v5 = vmul.f32 %v11340_v34, %v6364_v30  ;;  %6397 = vrot.lane.b32.xlu1 %v6377_v20, %s8326_s30  ;;  %v3013_v20 = vrot.slane %v11987_v4, 5  ;;  %v1886_v30 = vld [vmem:[#allocation10 + $0x28] sm:$0x2]  ;;  %v11992_v4 = vld [vmem:[#allocation36_spill] sm:$0xff] }
0x2ba2   :  { %v6362_v25 = vpop.permute.xlu1 %6361 }
0x2ba3   :  { %v6379_v15 = vmul.f32 %v11344_v40, %v6362_v25  ;;  %6403 = vrot.lane.b32.xlu0 %v6380_v5, %s8326_s30 }
0x2ba4   :  { %v7305_v27 = vpop.permute.xlu0 %7304 }
0x2ba5   :  { %v7307_v45 = vunpack.i.h.bf16 %v7305_v27  ;;  %v7306_v7 = vunpack.i.l.bf16 %v7305_v27  ;;  %6401 = vrot.lane.b32.xlu1 %v6379_v15, %s8326_s30  ;;  %v2255_v15 = vld [vmem:[#allocation10] sm:$0x4]  ;;  %v11990_v27 = vld [vmem:[#allocation35_spill] sm:$0xff] }
0x2ba6   :  { %v1452_v2 = vpop.permute.xlu1 %1451 }
0x2ba7   :  { %v1875_v52 = vsel %vm11349_vm12, %v7307_v45, %v1874_v54  ;;  %v1872_v36 = vsel %vm11349_vm12, %v7306_v7, %v1871_v9  ;;  %v1486_v47 = vsel %vm11172_vm3, %v1452_v2, %v1485_v0  ;;  %3019 = vrot.lane.b32.xlu0 %v3011_v17, %s8332_s8  ;;  %v3012_v0 = vrot.slane %v11990_v27, 5  ;;  %v1877_v9 = vld [vmem:[#allocation10 + $0x10] sm:$0x2]  ;;  %v1880_v54 = vld [vmem:[#allocation10 + $0x18] sm:$0x2] }
0x2ba8   :  { %1876 = vst [vmem:[#allocation10 + $0x8] sm:$0x2] %v1875_v52  ;;  %1873 = vst [vmem:[#allocation10] sm:$0x2] %v1872_v36  ;;  %v7315_v14 = vpop.permute.xlu0 %7314  ;;  %v2258_v27 = vld [vmem:[#allocation10 + $0x8] sm:$0x4] }
0x2ba9   :  { %1487 = vst [vmem:[#allocation10 + $0x38] sm:$0x2] %v1486_v47  ;;  %v7317_v53 = vunpack.i.h.bf16 %v7315_v14  ;;  %v7316_v42 = vunpack.i.l.bf16 %v7315_v14  ;;  %7339 = vrot.lane.b32.xlu1 %v11986_v16, %s8332_s8  ;;  %v11991_v14 = vld [vmem:[#allocation37_spill] sm:$0xff] }
0x2baa   :  { %v7310_v5 = vpop.permute.xlu1 %7309 }
0x2bab   :  { %v1887_v45 = vsel %vm11349_vm12, %v7317_v53, %v1886_v30  ;;  %v1884_v7 = vsel %vm11349_vm12, %v7316_v42, %v1883_v60  ;;  %v7312_v24 = vunpack.i.h.bf16 %v7310_v5  ;;  %v7311_v17 = vunpack.i.l.bf16 %v7310_v5  ;;  %3023 = vrot.lane.b32.xlu0 %v3013_v20, %s8332_s8  ;;  %v2261_v42 = vld [vmem:[#allocation10 + $0x10] sm:$0x4]  ;;  %v1889_v30 = vld [vmem:[#allocation10 + $0x30] sm:$0x2] }
0x2bac   :  { %1888 = vst [vmem:[#allocation10 + $0x28] sm:$0x2] %v1887_v45  ;;  %1885 = vst [vmem:[#allocation10 + $0x20] sm:$0x2] %v1884_v7  ;;  %v2229_v2 = vpop.permute.xlu0 %2228  ;;  %v3015_v60 = vrot.slane %v11991_v14, 5  ;;  %v3014_v20 = vrot.slane %v11992_v4, 5 }
0x2bad   :  { %v1881_v52 = vsel %vm11349_vm12, %v7312_v24, %v1880_v54  ;;  %v1878_v36 = vsel %vm11349_vm12, %v7311_v17, %v1877_v9  ;;  %v2256_v47 = vsel %vm11368_vm2, %v2229_v2, %v2255_v15  ;;  %3021 = vrot.lane.b32.xlu1 %v3012_v0, %s8332_s8  ;;  %v11993_v7 = vld [vmem:[#allocation39_spill] sm:$0xff]  ;;  %v2267_v9 = vld [vmem:[#allocation10 + $0x20] sm:$0x4]  ;;  %v11998_v4 = vld [vmem:[#allocation40_spill] sm:$0xff] }
0x2bae   :  { %1882 = vst [vmem:[#allocation10 + $0x18] sm:$0x2] %v1881_v52  ;;  %1879 = vst [vmem:[#allocation10 + $0x10] sm:$0x2] %v1878_v36  ;;  %v7320_v53 = vpop.permute.xlu1 %7319  ;;  %v3017_v24 = vrot.slane %v11993_v7, 5  ;;  %v11994_v2 = vld [vmem:[#allocation38_spill] sm:$0xff] }
0x2baf   :  { %2257 = vst [vmem:[#allocation10] sm:$0x4] %v2256_v47  ;;  %v7322_v49 = vunpack.i.h.bf16 %v7320_v53  ;;  %v7321_v16 = vunpack.i.l.bf16 %v7320_v53  ;;  %3027 = vrot.lane.b32.xlu0 %v3015_v60, %s8332_s8  ;;  %v3016_v52 = vrot.slane %v11994_v2, 5  ;;  %v2264_v47 = vld [vmem:[#allocation10 + $0x18] sm:$0x4] }
0x2bb0   :  { %v1892_v50 = vld [vmem:[#allocation10 + $0x38] sm:$0x2]  ;;  %v2233_v5 = vpop.permute.xlu0 %2232  ;;  %v2273_v53 = vld [vmem:[#allocation10 + $0x30] sm:$0x4] }
0x2bb1   :  { %v1893_v15 = vsel %vm11349_vm12, %v7322_v49, %v1892_v50  ;;  %v1890_v0 = vsel %vm11349_vm12, %v7321_v16, %v1889_v30  ;;  %v2262_v45 = vsel %vm11368_vm2, %v2233_v5, %v2261_v42  ;;  %3025 = vrot.lane.b32.xlu1 %v3014_v20, %s8332_s8  ;;  %v11995_v50 = vld [vmem:[#allocation43_spill] sm:$0xff]  ;;  %v11996_v49 = vld [vmem:[#allocation41_spill] sm:$0xff]  ;;  %v3018_v20 = vrot.slane %v11998_v4, 5  ;;  %v12007_v4 = vld [vmem:[#allocation50_spill] sm:$0xff] }
0x2bb2   :  { %1894 = vst [vmem:[#allocation10 + $0x38] sm:$0x2] %v1893_v15  ;;  %1891 = vst [vmem:[#allocation10 + $0x30] sm:$0x2] %v1890_v0  ;;  %v2231_v17 = vpop.permute.xlu1 %2230  ;;  %v11997_v16 = vpack.i.bf16 %v11995_v50, %v11996_v49  ;;  %v2270_v5 = vld [vmem:[#allocation10 + $0x28] sm:$0x4] }
0x2bb3   :  { %2263 = vst [vmem:[#allocation10 + $0x10] sm:$0x4] %v2262_v45  ;;  %v2259_v54 = vsel %vm11368_vm2, %v2231_v17, %v2258_v27  ;;  %3031 = vrot.lane.b32.xlu0 %v3017_v24, %s8332_s8  ;;  %v11999_v45 = vld [vmem:[#allocation46_spill] sm:$0xff]  ;;  %v12000_v7 = vld [vmem:[#allocation45_spill] sm:$0xff] }
0x2bb4   :  { %2260 = vst [vmem:[#allocation10 + $0x8] sm:$0x4] %v2259_v54  ;;  %v2237_v36 = vpop.permute.xlu0 %2236  ;;  %v12001_v24 = vpack.i.bf16 %v11999_v45, %v12000_v7  ;;  %v2276_v54 = vld [vmem:[#allocation10 + $0x38] sm:$0x4] }
0x2bb5   :  { %v2268_v14 = vsel %vm11368_vm2, %v2237_v36, %v2267_v9  ;;  %3029 = vrot.lane.b32.xlu1 %v3016_v52, %s8332_s8  ;;  %v12004_v36 = vld [vmem:[#allocation44_spill] sm:$0xff] }
0x2bb6   :  { %2269 = vst [vmem:[#allocation10 + $0x20] sm:$0x4] %v2268_v14  ;;  %v2235_v60 = vpop.permute.xlu1 %2234 }
0x2bb7   :  { %v2265_v42 = vsel %vm11368_vm2, %v2235_v60, %v2264_v47  ;;  %7344 = vrot.lane.b32.xlu0 %v11997_v16, %s8332_s8  ;;  %v12005_v47 = vld [vmem:[#allocation42_spill] sm:$0xff] }
0x2bb8   :  { %2266 = vst [vmem:[#allocation10 + $0x18] sm:$0x4] %v2265_v42  ;;  %v2241_v30 = vpop.permute.xlu0 %2240  ;;  %v12006_v14 = vpack.i.bf16 %v12004_v36, %v12005_v47  ;;  %v2662_v60 = vld [vmem:[#allocation10] sm:$0x4] }
0x2bb9   :  { %v2274_v27 = vsel %vm11368_vm2, %v2241_v30, %v2273_v53  ;;  %3033 = vrot.lane.b32.xlu1 %v3018_v20, %s8332_s8 }
0x2bba   :  { %2275 = vst [vmem:[#allocation10 + $0x30] sm:$0x4] %v2274_v27  ;;  %v2239_v15 = vpop.permute.xlu1 %2238  ;;  %v12008_v27 = vld [vmem:[#allocation48_spill] sm:$0xff] }
0x2bbb   :  { %v2271_v0 = vsel %vm11368_vm2, %v2239_v15, %v2270_v5  ;;  %7354 = vrot.lane.b32.xlu0 %v12001_v24, %s8332_s8  ;;  %v2665_v53 = vld [vmem:[#allocation10 + $0x8] sm:$0x4]  ;;  %v2668_v47 = vld [vmem:[#allocation10 + $0x10] sm:$0x4] }
0x2bbc   :  { %2272 = vst [vmem:[#allocation10 + $0x28] sm:$0x4] %v2271_v0  ;;  %v7325_v9 = vpop.permute.xlu0 %7324  ;;  %v12009_v15 = vld [vmem:[#allocation47_spill] sm:$0xff] }
0x2bbd   :  { %v7327_v2 = vunpack.i.h.bf16 %v7325_v9  ;;  %v7326_v52 = vunpack.i.l.bf16 %v7325_v9  ;;  %7349 = vrot.lane.b32.xlu1 %v12006_v14, %s8332_s8  ;;  %v12010_v0 = vpack.i.bf16 %v12008_v27, %v12009_v15  ;;  %v2674_v45 = vld [vmem:[#allocation10 + $0x20] sm:$0x4] }
0x2bbe   :  { %v2243_v42 = vpop.permute.xlu1 %2242  ;;  %v12020_v27 = vld [vmem:[#allocation58_spill] sm:$0xff] }
0x2bbf   :  { %v2663_v50 = vsel %vm11420_vm1, %v7326_v52, %v2662_v60  ;;  %v2666_v49 = vsel %vm11420_vm1, %v7327_v2, %v2665_v53  ;;  %v2277_v16 = vsel %vm11368_vm2, %v2243_v42, %v2276_v54  ;;  %3802 = vrot.lane.b32.xlu0 %v12007_v4, %s8332_s8  ;;  %v12011_v52 = vld [vmem:[#allocation49_spill] sm:$0xff]  ;;  %v12012_v42 = vld [vmem:[#allocation51_spill] sm:$0xff]  ;;  %v12016_v4 = vld [vmem:[#allocation54_spill] sm:$0xff] }
0x2bc0   :  { %2664 = vst [vmem:[#allocation10] sm:$0x4] %v2663_v50  ;;  %2667 = vst [vmem:[#allocation10 + $0x8] sm:$0x4] %v2666_v49  ;;  %v7335_v20 = vpop.permute.xlu0 %7334  ;;  %v2671_v14 = vld [vmem:[#allocation10 + $0x18] sm:$0x4] }
0x2bc1   :  { %2278 = vst [vmem:[#allocation10 + $0x38] sm:$0x4] %v2277_v16  ;;  %v7337_v30 = vunpack.i.h.bf16 %v7335_v20  ;;  %v7336_v5 = vunpack.i.l.bf16 %v7335_v20  ;;  %7359 = vrot.lane.b32.xlu1 %v12010_v0, %s8332_s8  ;;  %v12013_v50 = vld [vmem:[#allocation53_spill] sm:$0xff]  ;;  %v12014_v49 = vld [vmem:[#allocation52_spill] sm:$0xff]  ;;  %v12015_v16 = vld [vmem:[#allocation55_spill] sm:$0xff] }
0x2bc2   :  { %v7330_v7 = vpop.permute.xlu1 %7329  ;;  %v12017_v20 = vld [vmem:[#allocation57_spill] sm:$0xff]  ;;  %v12021_v15 = vld [vmem:[#allocation62_spill] sm:$0xff] }
0x2bc3   :  { %v2675_v24 = vsel %vm11420_vm1, %v7336_v5, %v2674_v45  ;;  %v2677_v9 = vld [vmem:[#allocation10 + $0x28] sm:$0x4]  ;;  %v7332_v54 = vunpack.i.h.bf16 %v7330_v7  ;;  %v7331_v2 = vunpack.i.l.bf16 %v7330_v7  ;;  %3806 = vrot.lane.b32.xlu0 %v12011_v52, %s8332_s8  ;;  %v4572_v0 = vrot.slane %v12021_v15, 7  ;;  %v12022_v45 = vld [vmem:[#allocation60_spill] sm:$0xff] }
0x2bc4   :  { %2676 = vst [vmem:[#allocation10 + $0x20] sm:$0x4] %v2675_v24  ;;  %v2678_v36 = vsel %vm11420_vm1, %v7337_v30, %v2677_v9  ;;  %v12018_v30 = vld [vmem:[#allocation56_spill] sm:$0xff]  ;;  %v12019_v5 = vld [vmem:[#allocation59_spill] sm:$0xff] }
0x2bc5   :  { %2679 = vst [vmem:[#allocation10 + $0x28] sm:$0x4] %v2678_v36  ;;  %v2672_v60 = vsel %vm11420_vm1, %v7332_v54, %v2671_v14  ;;  %v2669_v53 = vsel %vm11420_vm1, %v7331_v2, %v2668_v47  ;;  %3804 = vrot.lane.b32.xlu1 %v12012_v42, %s8332_s8  ;;  %v12023_v7 = vld [vmem:[#allocation63_spill] sm:$0xff] }
0x2bc6   :  { %2673 = vst [vmem:[#allocation10 + $0x18] sm:$0x4] %v2672_v60  ;;  %2670 = vst [vmem:[#allocation10 + $0x10] sm:$0x4] %v2669_v53  ;;  %v4573_v24 = vrot.slane %v12023_v7, 7 }
0x2bc7   :  { %3810 = vrot.lane.b32.xlu0 %v12013_v50, %s8332_s8  ;;  %v2680_v7 = vld [vmem:[#allocation10 + $0x30] sm:$0x4] }
0x2bc9   :  { %3808 = vrot.lane.b32.xlu1 %v12014_v49, %s8332_s8 }
0x2bcb   :  { %3814 = vrot.lane.b32.xlu0 %v12015_v16, %s8332_s8 }
0x2bcd   :  { %3812 = vrot.lane.b32.xlu1 %v12016_v4, %s8332_s8 }
0x2bcf   :  { %7364 = vrot.lane.b32.xlu0 %v12017_v20, %s8332_s8 }
0x2bd1   :  { %3816 = vrot.lane.b32.xlu1 %v12018_v30, %s8332_s8 }
0x2bd3   :  { %7374 = vrot.lane.b32.xlu0 %v12019_v5, %s8332_s8 }
0x2bd5   :  { %7369 = vrot.lane.b32.xlu1 %v12020_v27, %s8332_s8  ;;  %v3052_v27 = vld [vmem:[#allocation10 + $0x10] sm:$0x8] }
0x2bd7   :  { %4580 = vrot.lane.b32.xlu0 %v4572_v0, %s8332_s8 }
0x2bd9   :  { %7379 = vrot.lane.b32.xlu1 %v12022_v45, %s8332_s8 }
0x2bdd   :  { %4582 = vrot.lane.b32.xlu1 %v4573_v24, %s8332_s8  ;;  %v2683_v24 = vld [vmem:[#allocation10 + $0x38] sm:$0x4] }
0x2c09   :  { %v6390_v9 = vpop.permute.xlu0 %6389 }
0x2c0a   :  { %v6413_v54 = vadd.f32 %v6390_v9, %v11286_v51 }
0x2c0b   :  { %v6392_v2 = vpop.permute.xlu1 %6391 }
0x2c0c   :  { %8206 = vtanh.f32 %v6413_v54  ;;  %v6414_v52 = vadd.f32 %v6392_v2, %v11291_v1 }
0x2c0d   :  { %v6396_v36 = vpop.permute.xlu0 %6395 }
0x2c0e   :  { %8208 = vtanh.f32 %v6414_v52  ;;  %v6416_v47 = vadd.f32 %v6396_v36, %v11295_v21 }
0x2c0f   :  { %v6394_v14 = vpop.permute.xlu1 %6393 }
0x2c10   :  { %8210 = vtanh.f32 %v6416_v47  ;;  %v6415_v60 = vadd.f32 %v6394_v14, %v11299_v59  ;;  %v3058_v14 = vld [vmem:[#allocation10 + $0x20] sm:$0x8] }
0x2c11   :  { %v6400_v53 = vpop.permute.xlu0 %6399 }
0x2c12   :  { %8212 = vtanh.f32 %v6415_v60  ;;  %v6418_v42 = vadd.f32 %v6400_v53, %v11303_v57  ;;  %v3046_v57 = vld [vmem:[#allocation10] sm:$0x8] }
0x2c13   :  { %v6398_v50 = vpop.permute.xlu1 %6397 }
0x2c14   :  { %8214 = vtanh.f32 %v6418_v42  ;;  %v6417_v51 = vadd.f32 %v6398_v50, %v11307_v41  ;;  %v3055_v50 = vld [vmem:[#allocation10 + $0x18] sm:$0x8] }
0x2c15   :  { %v6404_v49 = vpop.permute.xlu0 %6403 }
0x2c16   :  { %v8207_v1 = vpop.eup %8206  ;;  %8216 = vtanh.f32 %v6417_v51  ;;  %v6420_v16 = vadd.f32 %v6404_v49, %v11311_v26 }
0x2c17   :  { %6445 = vrot.lane.b32.xlu0 %v8207_v1, %s8332_s8  ;;  %v6402_v21 = vpop.permute.xlu1 %6401 }
0x2c18   :  { %v8209_v4 = vpop.eup %8208  ;;  %8218 = vtanh.f32 %v6420_v16  ;;  %v6419_v41 = vadd.f32 %v6402_v21, %v11314_v33  ;;  %v3049_v33 = vld [vmem:[#allocation10 + $0x8] sm:$0x8]  ;;  %v3064_v16 = vld [vmem:[#allocation10 + $0x30] sm:$0x8] }
0x2c19   :  { %v3020_v20 = vpop.permute.xlu0 %3019  ;;  %6447 = vrot.lane.b32.xlu1 %v8209_v4, %s8332_s8 }
0x2c1a   :  { %v8211_v30 = vpop.eup %8210  ;;  %8220 = vtanh.f32 %v6419_v41  ;;  %v3047_v26 = vsel %vm11483_vm0, %v3020_v20, %v3046_v57  ;;  %v12026_v41 = vld [vmem:[#allocation61_spill] sm:$0xff] }
0x2c1b   :  { %3048 = vst [vmem:[#allocation10] sm:$0x8] %v3047_v26  ;;  %6451 = vrot.lane.b32.xlu0 %v8211_v30, %s8332_s8  ;;  %v7340_v5 = vpop.permute.xlu1 %7339  ;;  %v4574_v20 = vrot.slane %v12026_v41, 7  ;;  %v3061_v30 = vld [vmem:[#allocation10 + $0x28] sm:$0x8] }
0x2c1c   :  { %v8213_v15 = vpop.eup %8212  ;;  %v7342_v0 = vunpack.i.h.bf16 %v7340_v5  ;;  %v7341_v45 = vunpack.i.l.bf16 %v7340_v5  ;;  %v3826_v41 = vld [vmem:[#allocation10 + $0x4] sm:$0x1] }
0x2c1d   :  { %v3024_v9 = vpop.permute.xlu0 %3023  ;;  %6449 = vrot.lane.b32.xlu1 %v8213_v15, %s8332_s8 }
0x2c1e   :  { %v8215_v54 = vpop.eup %8214  ;;  %v2684_v2 = vsel %vm11420_vm1, %v7342_v0, %v2683_v24  ;;  %v2681_v52 = vsel %vm11420_vm1, %v7341_v45, %v2680_v7  ;;  %v3053_v36 = vsel %vm11483_vm0, %v3024_v9, %v3052_v27  ;;  %v12027_v27 = vld [vmem:[#allocation64_spill] sm:$0xff]  ;;  %v12030_v24 = vld [vmem:[#allocation65_spill] sm:$0xff] }
0x2c1f   :  { %2685 = vst [vmem:[#allocation10 + $0x38] sm:$0x4] %v2684_v2  ;;  %2682 = vst [vmem:[#allocation10 + $0x30] sm:$0x4] %v2681_v52  ;;  %6455 = vrot.lane.b32.xlu0 %v8215_v54, %s8332_s8  ;;  %v3022_v47 = vpop.permute.xlu1 %3021  ;;  %v4575_v15 = vrot.slane %v12027_v27, 7  ;;  %v4576_v9 = vrot.slane %v12030_v24, 7 }
0x2c20   :  { %3054 = vst [vmem:[#allocation10 + $0x10] sm:$0x8] %v3053_v36  ;;  %v8217_v60 = vpop.eup %8216  ;;  %v3050_v53 = vsel %vm11483_vm0, %v3022_v47, %v3049_v33  ;;  %v3067_v33 = vld [vmem:[#allocation10 + $0x38] sm:$0x8] }
0x2c21   :  { %3051 = vst [vmem:[#allocation10 + $0x8] sm:$0x8] %v3050_v53  ;;  %v3028_v42 = vpop.permute.xlu0 %3027  ;;  %6453 = vrot.lane.b32.xlu1 %v8217_v60, %s8332_s8 }
0x2c22   :  { %v8219_v51 = vpop.eup %8218  ;;  %v3059_v49 = vsel %vm11483_vm0, %v3028_v42, %v3058_v14  ;;  %v3453_v52 = vld [vmem:[#allocation10] sm:$0x8] }
0x2c23   :  { %3060 = vst [vmem:[#allocation10 + $0x20] sm:$0x8] %v3059_v49  ;;  %6459 = vrot.lane.b32.xlu0 %v8219_v51, %s8332_s8  ;;  %v3026_v1 = vpop.permute.xlu1 %3025  ;;  %v12031_v14 = vld [vmem:[#allocation66_spill] sm:$0xff]  ;;  %v12032_v49 = vld [vmem:[#allocation67_spill] sm:$0xff] }
0x2c24   :  { %v8221_v21 = vpop.eup %8220  ;;  %v3056_v57 = vsel %vm11483_vm0, %v3026_v1, %v3055_v50  ;;  %v4577_v60 = vrot.slane %v12031_v14, 7  ;;  %v4578_v1 = vrot.slane %v12032_v49, 7 }
0x2c25   :  { %3057 = vst [vmem:[#allocation10 + $0x18] sm:$0x8] %v3056_v57  ;;  %v3032_v4 = vpop.permute.xlu0 %3031  ;;  %6457 = vrot.lane.b32.xlu1 %v8221_v21, %s8332_s8 }
0x2c26   :  { %v3065_v26 = vsel %vm11483_vm0, %v3032_v4, %v3064_v16 }
0x2c27   :  { %3066 = vst [vmem:[#allocation10 + $0x30] sm:$0x8] %v3065_v26  ;;  %4584 = vrot.lane.b32.xlu0 %v4574_v20, %s8332_s8  ;;  %v3030_v5 = vpop.permute.xlu1 %3029  ;;  %v12033_v20 = vld [vmem:[#allocation68_spill] sm:$0xff] }
0x2c28   :  { %v3062_v0 = vsel %vm11483_vm0, %v3030_v5, %v3061_v30  ;;  %v3456_v36 = vld [vmem:[#allocation10 + $0x8] sm:$0x8]  ;;  %v4579_v30 = vrot.slane %v12033_v20, 7 }
0x2c29   :  { %3063 = vst [vmem:[#allocation10 + $0x28] sm:$0x8] %v3062_v0  ;;  %v7345_v7 = vpop.permute.xlu0 %7344  ;;  %4586 = vrot.lane.b32.xlu1 %v4575_v15, %s8332_s8 }
0x2c2a   :  { %v7347_v54 = vunpack.i.h.bf16 %v7345_v7  ;;  %v7346_v2 = vunpack.i.l.bf16 %v7345_v7  ;;  %v3465_v57 = vld [vmem:[#allocation10 + $0x20] sm:$0x8]  ;;  %v3459_v7 = vld [vmem:[#allocation10 + $0x10] sm:$0x8] }
0x2c2b   :  { %4588 = vrot.lane.b32.xlu0 %v4576_v9, %s8332_s8  ;;  %v3034_v47 = vpop.permute.xlu1 %3033 }
0x2c2c   :  { %v3454_v53 = vsel %vm11517_vm10, %v7346_v2, %v3453_v52  ;;  %v3457_v42 = vsel %vm11517_vm10, %v7347_v54, %v3456_v36  ;;  %v3068_v50 = vsel %vm11483_vm0, %v3034_v47, %v3067_v33  ;;  %v3462_v24 = vld [vmem:[#allocation10 + $0x18] sm:$0x8]  ;;  %v12034_v52 = vld [vmem:[#allocation71_spill] sm:$0xff] }
0x2c2d   :  { %3455 = vst [vmem:[#allocation10] sm:$0x8] %v3454_v53  ;;  %3458 = vst [vmem:[#allocation10 + $0x8] sm:$0x8] %v3457_v42  ;;  %v7355_v51 = vpop.permute.xlu0 %7354  ;;  %4590 = vrot.lane.b32.xlu1 %v4577_v60, %s8332_s8  ;;  %v12035_v36 = vld [vmem:[#allocation69_spill] sm:$0xff] }
0x2c2e   :  { %3069 = vst [vmem:[#allocation10 + $0x38] sm:$0x8] %v3068_v50  ;;  %v7357_v16 = vunpack.i.h.bf16 %v7355_v51  ;;  %v7356_v21 = vunpack.i.l.bf16 %v7355_v51  ;;  %v12036_v47 = vpack.i.bf16 %v12034_v52, %v12035_v36  ;;  %v3832_v60 = vld [vmem:[#allocation10 + $0x14] sm:$0x1]  ;;  %v3471_v51 = vld [vmem:[#allocation10 + $0x30] sm:$0x8] }
0x2c2f   :  { %4592 = vrot.lane.b32.xlu0 %v4578_v1, %s8332_s8  ;;  %v7350_v4 = vpop.permute.xlu1 %7349  ;;  %v12037_v1 = vld [vmem:[#allocation72_spill] sm:$0xff] }
0x2c30   :  { %v3466_v26 = vsel %vm11517_vm10, %v7356_v21, %v3465_v57  ;;  %v3468_v5 = vld [vmem:[#allocation10 + $0x28] sm:$0x8]  ;;  %v7352_v27 = vunpack.i.h.bf16 %v7350_v4  ;;  %v7351_v15 = vunpack.i.l.bf16 %v7350_v4  ;;  %v3829_v57 = vld [vmem:[#allocation10 + $0xc] sm:$0x1] }
0x2c31   :  { %3467 = vst [vmem:[#allocation10 + $0x20] sm:$0x8] %v3466_v26  ;;  %v3469_v0 = vsel %vm11517_vm10, %v7357_v16, %v3468_v5  ;;  %v3803_v9 = vpop.permute.xlu0 %3802  ;;  %4594 = vrot.lane.b32.xlu1 %v4579_v30, %s8332_s8  ;;  %v12038_v16 = vld [vmem:[#allocation70_spill] sm:$0xff]  ;;  %v12041_v26 = vld [vmem:[#allocation73_spill] sm:$0xff] }
0x2c32   :  { %3470 = vst [vmem:[#allocation10 + $0x28] sm:$0x8] %v3469_v0  ;;  %v3463_v33 = vsel %vm11517_vm10, %v7352_v27, %v3462_v24  ;;  %v3460_v54 = vsel %vm11517_vm10, %v7351_v15, %v3459_v7  ;;  %v3827_v2 = vsel %vm11129_vm13, %v3803_v9, %v3826_v41  ;;  %v12039_v21 = vpack.i.bf16 %v12037_v1, %v12038_v16  ;;  %v12040_v30 = vld [vmem:[#allocation74_spill] sm:$0xff]  ;;  %v12043_v24 = vld [vmem:[#allocation76_spill] sm:$0xff]  ;;  %v12044_v9 = vld [vmem:[#allocation75_spill] sm:$0xff] }
0x2c33   :  { %3464 = vst [vmem:[#allocation10 + $0x18] sm:$0x8] %v3463_v33  ;;  %3461 = vst [vmem:[#allocation10 + $0x10] sm:$0x8] %v3460_v54  ;;  %7384 = vrot.lane.b32.xlu0 %v12036_v47, %s8332_s8  ;;  %v7360_v14 = vpop.permute.xlu1 %7359  ;;  %v12042_v5 = vpack.i.bf16 %v12040_v30, %v12041_v26  ;;  %v3838_v15 = vld [vmem:[#allocation10 + $0x24] sm:$0x1]  ;;  %v12045_v33 = vpack.i.bf16 %v12043_v24, %v12044_v9 }
0x2c34   :  { %3828 = vst [vmem:[#allocation10 + $0x4] sm:$0x1] %v3827_v2  ;;  %v7362_v42 = vunpack.i.h.bf16 %v7360_v14  ;;  %v7361_v50 = vunpack.i.l.bf16 %v7360_v14  ;;  %v5358_v54 = vrot.slane %v10718_v62, 6  ;;  %v3835_v2 = vld [vmem:[#allocation10 + $0x1c] sm:$0x1]  ;;  %v5359_v14 = vrot.slane %v10722_v18, 6 }
0x2c35   :  { %v3474_v53 = vld [vmem:[#allocation10 + $0x38] sm:$0x8]  ;;  %v3807_v49 = vpop.permute.xlu0 %3806  ;;  %7389 = vrot.lane.b32.xlu1 %v12039_v21, %s8332_s8  ;;  %v3844_v47 = vld [vmem:[#allocation10 + $0x34] sm:$0x1]  ;;  %v5360_v62 = vrot.slane %v10711_v35, 6  ;;  %v12047_v21 = vld [vmem:[#allocation78_spill] sm:$0xff] }
0x2c36   :  { %v3475_v4 = vsel %vm11517_vm10, %v7362_v42, %v3474_v53  ;;  %v3472_v41 = vsel %vm11517_vm10, %v7361_v50, %v3471_v51  ;;  %v3833_v20 = vsel %vm11129_vm13, %v3807_v49, %v3832_v60  ;;  %v3841_v42 = vld [vmem:[#allocation10 + $0x2c] sm:$0x1]  ;;  %v12046_v49 = vld [vmem:[#allocation77_spill] sm:$0xff]  ;;  %v12049_v9 = vld [vmem:[#allocation80_spill] sm:$0xff] }
0x2c37   :  { %3476 = vst [vmem:[#allocation10 + $0x38] sm:$0x8] %v3475_v4  ;;  %3473 = vst [vmem:[#allocation10 + $0x30] sm:$0x8] %v3472_v41  ;;  %7394 = vrot.lane.b32.xlu0 %v12042_v5, %s8332_s8  ;;  %v3805_v27 = vpop.permute.xlu1 %3804  ;;  %v5361_v1 = vrot.slane %v12046_v49, 6  ;;  %v12048_v5 = vld [vmem:[#allocation79_spill] sm:$0xff] }
0x2c38   :  { %3834 = vst [vmem:[#allocation10 + $0x14] sm:$0x1] %v3833_v20  ;;  %v3830_v0 = vsel %vm11129_vm13, %v3805_v27, %v3829_v57  ;;  %v5362_v57 = vrot.slane %v12047_v21, 6  ;;  %v3847_v35 = vld [vmem:[#allocation10 + $0x3c] sm:$0x1]  ;;  %v5363_v27 = vrot.slane %v12048_v5, 6 }
0x2c39   :  { %3831 = vst [vmem:[#allocation10 + $0xc] sm:$0x1] %v3830_v0  ;;  %v3811_v7 = vpop.permute.xlu0 %3810  ;;  %7399 = vrot.lane.b32.xlu1 %v12045_v33, %s8332_s8  ;;  %v5364_v33 = vrot.slane %v12049_v9, 6  ;;  %v4607_v5 = vld [vmem:[#allocation10 + $0xc] sm:$0x2]  ;;  %v12051_v9 = vld [vmem:[#allocation84_spill] sm:$0xff] }
0x2c3a   :  { %v3839_v52 = vsel %vm11129_vm13, %v3811_v7, %v3838_v15 }
0x2c3b   :  { %3840 = vst [vmem:[#allocation10 + $0x24] sm:$0x1] %v3839_v52  ;;  %5366 = vrot.lane.b32.xlu0 %v5358_v54, %s8332_s8  ;;  %v3809_v36 = vpop.permute.xlu1 %3808  ;;  %v4223_v20 = vld [vmem:[#allocation10 + $0x4] sm:$0x1] }
0x2c3c   :  { %v3836_v60 = vsel %vm11129_vm13, %v3809_v36, %v3835_v2 }
0x2c3d   :  { %3837 = vst [vmem:[#allocation10 + $0x1c] sm:$0x1] %v3836_v60  ;;  %v3815_v53 = vpop.permute.xlu0 %3814  ;;  %5368 = vrot.lane.b32.xlu1 %v5359_v14, %s8332_s8  ;;  %v12050_v14 = vld [vmem:[#allocation81_spill] sm:$0xff] }
0x2c3e   :  { %v3845_v50 = vsel %vm11129_vm13, %v3815_v53, %v3844_v47  ;;  %v4604_v47 = vld [vmem:[#allocation10 + $0x4] sm:$0x2]  ;;  %v5365_v60 = vrot.slane %v12050_v14, 6 }
0x2c3f   :  { %3846 = vst [vmem:[#allocation10 + $0x34] sm:$0x1] %v3845_v50  ;;  %5370 = vrot.lane.b32.xlu0 %v5360_v62, %s8332_s8  ;;  %v3813_v51 = vpop.permute.xlu1 %3812 }
0x2c40   :  { %v3842_v18 = vsel %vm11129_vm13, %v3813_v51, %v3841_v42  ;;  %v4226_v30 = vld [vmem:[#allocation10 + $0xc] sm:$0x1]  ;;  %v4229_v51 = vld [vmem:[#allocation10 + $0x14] sm:$0x1] }
0x2c41   :  { %3843 = vst [vmem:[#allocation10 + $0x2c] sm:$0x1] %v3842_v18  ;;  %v7365_v16 = vpop.permute.xlu0 %7364  ;;  %5372 = vrot.lane.b32.xlu1 %v5361_v1, %s8332_s8  ;;  %v6144_v18 = vrot.slane %v11083_v19, 5 }
0x2c42   :  { %v7367_v4 = vunpack.i.h.bf16 %v7365_v16  ;;  %v7366_v41 = vunpack.i.l.bf16 %v7365_v16  ;;  %v4235_v52 = vld [vmem:[#allocation10 + $0x24] sm:$0x1] }
0x2c43   :  { %5374 = vrot.lane.b32.xlu0 %v5362_v57, %s8332_s8  ;;  %v3817_v26 = vpop.permute.xlu1 %3816 }
0x2c44   :  { %v4224_v15 = vsel %vm11163_vm15, %v7366_v41, %v4223_v20  ;;  %v4227_v0 = vsel %vm11163_vm15, %v7367_v4, %v4226_v30  ;;  %v3848_v7 = vsel %vm11129_vm13, %v3817_v26, %v3847_v35  ;;  %v4232_v49 = vld [vmem:[#allocation10 + $0x1c] sm:$0x1]  ;;  %v6145_v4 = vrot.slane %v11087_v29, 5 }
0x2c45   :  { %4225 = vst [vmem:[#allocation10 + $0x4] sm:$0x1] %v4224_v15  ;;  %4228 = vst [vmem:[#allocation10 + $0xc] sm:$0x1] %v4227_v0  ;;  %v7375_v24 = vpop.permute.xlu0 %7374  ;;  %5376 = vrot.lane.b32.xlu1 %v5363_v27, %s8332_s8  ;;  %v6146_v26 = vrot.slane %v11076_v13, 5  ;;  %v6147_v0 = vrot.slane %v11101_v43, 5 }
0x2c46   :  { %3849 = vst [vmem:[#allocation10 + $0x3c] sm:$0x1] %v3848_v7  ;;  %v7377_v54 = vunpack.i.h.bf16 %v7375_v24  ;;  %v7376_v2 = vunpack.i.l.bf16 %v7375_v24  ;;  %v4241_v30 = vld [vmem:[#allocation10 + $0x34] sm:$0x1]  ;;  %v6148_v13 = vrot.slane %v11111_v46, 5  ;;  %v6150_v24 = vrot.slane %v11136_v3, 5 }
0x2c47   :  { %5378 = vrot.lane.b32.xlu0 %v5364_v33, %s8332_s8  ;;  %v7370_v36 = vpop.permute.xlu1 %7369  ;;  %v6151_v43 = vrot.slane %v11147_v37, 5  ;;  %v12052_v33 = vld [vmem:[#allocation82_spill] sm:$0xff]  ;;  %v12054_v46 = vld [vmem:[#allocation85_spill] sm:$0xff]  ;;  %v12061_v37 = vld [vmem:[#allocation88_spill] sm:$0xff] }
0x2c48   :  { %v4236_v48 = vsel %vm11163_vm15, %v7376_v2, %v4235_v52  ;;  %v4238_v53 = vld [vmem:[#allocation10 + $0x2c] sm:$0x1]  ;;  %v7372_v62 = vunpack.i.h.bf16 %v7370_v36  ;;  %v7371_v42 = vunpack.i.l.bf16 %v7370_v36  ;;  %v12058_v36 = vld [vmem:[#allocation86_spill] sm:$0xff] }
0x2c49   :  { %4237 = vst [vmem:[#allocation10 + $0x24] sm:$0x1] %v4236_v48  ;;  %v4239_v50 = vsel %vm11163_vm15, %v7377_v54, %v4238_v53  ;;  %v4581_v1 = vpop.permute.xlu0 %4580  ;;  %5380 = vrot.lane.b32.xlu1 %v5365_v60, %s8332_s8  ;;  %v12053_v54 = vpack.i.bf16 %v12051_v9, %v12052_v33  ;;  %v12055_v2 = vld [vmem:[#allocation83_spill] sm:$0xff]  ;;  %v12059_v3 = vpack.i.bf16 %v12057_v6, %v12058_v36  ;;  %v6429_v60 = vsub.f32 1.0, %v11317_v31 }
0x2c4a   :  { %4240 = vst [vmem:[#allocation10 + $0x2c] sm:$0x1] %v4239_v50  ;;  %v4233_v16 = vsel %vm11163_vm15, %v7372_v62, %v4232_v49  ;;  %v4230_v21 = vsel %vm11163_vm15, %v7371_v42, %v4229_v51  ;;  %v4605_v57 = vsel %vm11172_vm3, %v4581_v1, %v4604_v47  ;;  %v12056_v52 = vpack.i.bf16 %v12054_v46, %v12055_v2  ;;  %v12060_v47 = vld [vmem:[#allocation89_spill] sm:$0xff] }
0x2c4b   :  { %4234 = vst [vmem:[#allocation10 + $0x1c] sm:$0x1] %v4233_v16  ;;  %4231 = vst [vmem:[#allocation10 + $0x14] sm:$0x1] %v4230_v21  ;;  %6152 = vrot.lane.b32.xlu0 %v6144_v18, %s8332_s8  ;;  %v7380_v35 = vpop.permute.xlu1 %7379  ;;  %v12062_v14 = vpack.i.bf16 %v12060_v47, %v12061_v37  ;;  %v6477_v53 = vmul.f32 %v11317_v31, %v11065_v44  ;;  %v6430_v42 = vsub.f32 1.0, %v11320_v11  ;;  %v6432_v18 = vsub.f32 1.0, %v11324_v58 }
0x2c4c   :  { %4606 = vst [vmem:[#allocation10 + $0x4] sm:$0x2] %v4605_v57  ;;  %v7382_v19 = vunpack.i.h.bf16 %v7380_v35  ;;  %v7381_v20 = vunpack.i.l.bf16 %v7380_v35  ;;  %v6478_v49 = vmul.f32 %v11320_v11, %v11078_v28  ;;  %v6480_v35 = vmul.f32 %v11324_v58, %v11089_v63 }
0x2c4d   :  { %v4244_v41 = vld [vmem:[#allocation10 + $0x3c] sm:$0x1]  ;;  %6154 = vrot.lane.b32.xlu1 %v6145_v4, %s8332_s8  ;;  %v6431_v44 = vsub.f32 1.0, %v11328_v23  ;;  %v6434_v11 = vsub.f32 1.0, %v11332_v56  ;;  %v6436_v9 = vsub.f32 1.0, %v11340_v34 }
0x2c4e   :  { %v4245_v27 = vsel %vm11163_vm15, %v7382_v19, %v4244_v41  ;;  %v4242_v15 = vsel %vm11163_vm15, %v7381_v20, %v4241_v30  ;;  %v6479_v30 = vmul.f32 %v11328_v23, %v11067_v10  ;;  %v6483_v23 = vmul.f32 %v11344_v40, %v11118_v61 }
0x2c4f   :  { %4246 = vst [vmem:[#allocation10 + $0x3c] sm:$0x1] %v4245_v27  ;;  %4243 = vst [vmem:[#allocation10 + $0x34] sm:$0x1] %v4242_v15  ;;  %6156 = vrot.lane.b32.xlu0 %v6146_v26, %s8332_s8  ;;  %v4583_v29 = vpop.permute.xlu1 %4582  ;;  %v6481_v27 = vmul.f32 %v11336_v8, %v11103_v39  ;;  %v6482_v15 = vmul.f32 %v11332_v56, %v11113_v32  ;;  %v6484_v56 = vmul.f32 %v11340_v34, %v11139_v38 }
0x2c50   :  { %v4608_v7 = vsel %vm11172_vm3, %v4583_v29, %v4607_v5  ;;  %v6433_v5 = vsub.f32 1.0, %v11336_v8  ;;  %v6435_v29 = vsub.f32 1.0, %v11344_v40 }
0x2c51   :  { %4609 = vst [vmem:[#allocation10 + $0xc] sm:$0x2] %v4608_v7  ;;  %6158 = vrot.lane.b32.xlu1 %v6147_v0, %s8332_s8 }
0x2c53   :  { %6160 = vrot.lane.b32.xlu0 %v6148_v13, %s8332_s8 }
0x2c55   :  { %6162 = vrot.lane.b32.xlu1 %v6149_v22, %s8332_s8 }
0x2c57   :  { %6164 = vrot.lane.b32.xlu0 %v6150_v24, %s8332_s8 }
0x2c59   :  { %6166 = vrot.lane.b32.xlu1 %v6151_v43, %s8332_s8 }
0x2c5b   :  { %7404 = vrot.lane.b32.xlu0 %v12053_v54, %s8332_s8 }
0x2c5d   :  { %7409 = vrot.lane.b32.xlu1 %v12056_v52, %s8332_s8 }
0x2c5f   :  { %7414 = vrot.lane.b32.xlu0 %v12059_v3, %s8332_s8 }
0x2c61   :  { %7419 = vrot.lane.b32.xlu1 %v12062_v14, %s8332_s8 }
0x2c89   :  { %v6446_v48 = vpop.permute.xlu0 %6445 }
0x2c8a   :  { %v6469_v62 = vmul.f32 %v6446_v48, %v6429_v60  ;;  %v4610_v48 = vld [vmem:[#allocation10 + $0x14] sm:$0x2] }
0x2c8b   :  { %v6448_v50 = vpop.permute.xlu1 %6447 }
0x2c8c   :  { %v6485_v51 = vadd.f32 %v6477_v53, %v6469_v62  ;;  %v6470_v1 = vmul.f32 %v6448_v50, %v6430_v42  ;;  %v4613_v50 = vld [vmem:[#allocation10 + $0x1c] sm:$0x2] }
0x2c8d   :  { %v6452_v16 = vpop.permute.xlu0 %6451 }
0x2c8e   :  { %v7062_v21 = vpack.c.bf16 %v6485_v51, %v6485_v51  ;;  %v6486_v57 = vadd.f32 %v6478_v49, %v6470_v1  ;;  %v6472_v4 = vmul.f32 %v6452_v16, %v6432_v18 }
0x2c8f   :  { %v6450_v31 = vpop.permute.xlu1 %6449 }
0x2c90   :  { %v6526_v41 = vshll.u32 %v7062_v21, 16  ;;  %v7063_v19 = vpack.c.bf16 %v6486_v57, %v6486_v57  ;;  %v6488_v20 = vadd.f32 %v6480_v35, %v6472_v4  ;;  %v6471_v28 = vmul.f32 %v6450_v31, %v6431_v44  ;;  %v4616_v35 = vld [vmem:[#allocation10 + $0x24] sm:$0x2] }
0x2c91   :  { %v6456_v26 = vpop.permute.xlu0 %6455  ;;  %v6613_v0 = vrot.slane %v6486_v57, 7 }
0x2c92   :  { %v6530_v63 = vshll.u32 %v7063_v19, 16  ;;  %v7065_v58 = vpack.c.bf16 %v6488_v20, %v6488_v20  ;;  %v6487_v7 = vadd.f32 %v6479_v30, %v6471_v28  ;;  %v6474_v13 = vmul.f32 %v6456_v26, %v6434_v11  ;;  %v4619_v26 = vld [vmem:[#allocation10 + $0x2c] sm:$0x2] }
0x2c93   :  { %v6454_v10 = vpop.permute.xlu1 %6453  ;;  %v6528_v22 = vrot.slane %v6526_v41, 5  ;;  %v6614_v6 = vsel %vm699_vm4, %v6613_v0, %v6485_v51  ;;  %v6617_v36 = vrot.slane %v6488_v20, 5  ;;  %vm12063_vm4 = vcmask 1047559  }
0x2c94   :  { %v6532_v24 = vrot.slane %v6530_v63, 5  ;;  %v6473_v43 = vmul.f32 %v6454_v10, %v6433_v5  ;;  %v6538_v39 = vshll.u32 %v7065_v58, 16  ;;  %v7064_v8 = vpack.c.bf16 %v6487_v7, %v6487_v7 }
0x2c95   :  { %v6615_v33 = vrot.slane %v6487_v7, 6  ;;  %v6490_v54 = vadd.f32 %v6482_v15, %v6474_v13  ;;  %v6460_v46 = vpop.permute.xlu0 %6459  ;;  %v4622_v15 = vld [vmem:[#allocation10 + $0x34] sm:$0x2] }
0x2c96   :  { %v6489_v32 = vadd.f32 %v6481_v27, %v6473_v43  ;;  %v6476_v2 = vmul.f32 %v6460_v46, %v6436_v9  ;;  %v7423_v52 = vpack.i.bf16 %v6532_v24, %v6528_v22  ;;  %v6534_v61 = vshll.u32 %v7064_v8, 16  ;;  %v4625_v24 = vld [vmem:[#allocation10 + $0x3c] sm:$0x2] }
0x2c97   :  { %v7067_v40 = vpack.c.bf16 %v6490_v54, %v6490_v54  ;;  %v6458_v3 = vpop.permute.xlu1 %6457  ;;  %v6616_v47 = vsel %vm702_vm5, %v6615_v33, %v6614_v6  ;;  %v6540_v53 = vrot.slane %v6538_v39, 5  ;;  %v6621_v19 = vrot.slane %v6490_v54, 3 }
0x2c98   :  { %v7066_v37 = vpack.c.bf16 %v6489_v32, %v6489_v32  ;;  %v6619_v14 = vrot.slane %v6489_v32, 4  ;;  %v6492_v60 = vadd.f32 %v6484_v56, %v6476_v2  ;;  %7424 = vrot.lane.b32.xlu0 %v7423_v52, %s8332_s8  ;;  %v6536_v62 = vrot.slane %v6534_v61, 5  ;;  %v5009_v56 = vld [vmem:[#allocation10 + $0x4] sm:$0x2]  ;;  %v5012_v2 = vld [vmem:[#allocation10 + $0xc] sm:$0x2] }
0x2c99   :  { %v6546_v42 = vshll.u32 %v7067_v40, 16  ;;  %v6475_v38 = vmul.f32 %v6458_v3, %v6435_v29  ;;  %v4585_v34 = vpop.permute.xlu0 %4584  ;;  %v6618_v1 = vsel %vm705_vm6, %v6617_v36, %v6616_v47 }
0x2c9a   :  { %v6542_v49 = vshll.u32 %v7066_v37, 16  ;;  %v7069_v51 = vpack.c.bf16 %v6492_v60, %v6492_v60  ;;  %v4611_v16 = vsel %vm11172_vm3, %v4585_v34, %v4610_v48  ;;  %v7428_v57 = vpack.i.bf16 %v6540_v53, %v6536_v62 }
0x2c9b   :  { %v6491_v18 = vadd.f32 %v6483_v23, %v6475_v38  ;;  %v4587_v21 = vpop.permute.xlu1 %4586  ;;  %v6548_v4 = vrot.slane %v6546_v42, 5  ;;  %v6620_v31 = vsel %vm708_vm7, %v6619_v14, %v6618_v1  ;;  %4612 = vst [vmem:[#allocation10 + $0x14] sm:$0x2] %v4611_v16  ;;  %v6625_v10 = vrot.slane %v6492_v60, 1  ;;  %v5390_v38 = vld [vmem:[#allocation10 + $0x4] sm:$0x4] }
0x2c9c   :  { %v6544_v44 = vrot.slane %v6542_v49, 5  ;;  %v4614_v41 = vsel %vm11172_vm3, %v4587_v21, %v4613_v50  ;;  %v6554_v20 = vshll.u32 %v7069_v51, 16  ;;  %7429 = vrot.lane.b32.xlu1 %v7428_v57, %s8332_s8  ;;  %v6622_v29 = vsel %vm711_vm8, %v6621_v19, %v6620_v31  ;;  %v5393_v21 = vld [vmem:[#allocation10 + $0xc] sm:$0x4]  ;;  %v5396_v31 = vld [vmem:[#allocation10 + $0x14] sm:$0x4] }
0x2c9d   :  { %v7068_v30 = vpack.c.bf16 %v6491_v18, %v6491_v18  ;;  %v6623_v28 = vrot.slane %v6491_v18, 2  ;;  %4615 = vst [vmem:[#allocation10 + $0x1c] sm:$0x2] %v4614_v41  ;;  %v4589_v11 = vpop.permute.xlu0 %4588 }
0x2c9e   :  { %v4617_v5 = vsel %vm11172_vm3, %v4589_v11, %v4616_v35  ;;  %v7433_v27 = vpack.i.bf16 %v6548_v4, %v6544_v44  ;;  %v6556_v13 = vrot.slane %v6554_v20, 5  ;;  %v5399_v20 = vld [vmem:[#allocation10 + $0x1c] sm:$0x4] }
0x2c9f   :  { %v6550_v63 = vshll.u32 %v7068_v30, 16  ;;  %4618 = vst [vmem:[#allocation10 + $0x24] sm:$0x2] %v4617_v5  ;;  %v4591_v58 = vpop.permute.xlu1 %4590  ;;  %v6624_v7 = vsel %vm714_vm9, %v6623_v28, %v6622_v29  ;;  %v5402_v28 = vld [vmem:[#allocation10 + $0x24] sm:$0x4] }
0x2ca0   :  { %v4620_v0 = vsel %vm11172_vm3, %v4591_v58, %v4619_v26  ;;  %7434 = vrot.lane.b32.xlu0 %v7433_v27, %s8332_s8  ;;  %v6626_v39 = vsel %vm12063_vm4, %v6625_v10, %v6624_v7  ;;  %v5405_v5 = vld [vmem:[#allocation10 + $0x2c] sm:$0x4]  ;;  %v5408_v58 = vld [vmem:[#allocation10 + $0x34] sm:$0x4]  ;;  %v6176_v10 = vld [vmem:[#allocation10 + $0x4] sm:$0x8] }
0x2ca1   :  { %v6552_v23 = vrot.slane %v6550_v63, 5  ;;  %4621 = vst [vmem:[#allocation10 + $0x2c] sm:$0x2] %v4620_v0  ;;  %v4593_v22 = vpop.permute.xlu0 %4592  ;;  %v5411_v0 = vld [vmem:[#allocation10 + $0x3c] sm:$0x4] }
0x2ca2   :  { %v4623_v43 = vsel %vm11172_vm3, %v4593_v22, %v4622_v15  ;;  %v5015_v40 = vld [vmem:[#allocation10 + $0x14] sm:$0x2] }
0x2ca3   :  { %4624 = vst [vmem:[#allocation10 + $0x34] sm:$0x2] %v4623_v43  ;;  %v4595_v9 = vpop.permute.xlu1 %4594  ;;  %v7438_v8 = vpack.i.bf16 %v6556_v13, %v6552_v23 }
0x2ca4   :  { %v4626_v33 = vsel %vm11172_vm3, %v4595_v9, %v4625_v24  ;;  %6627 = vrot.lane.b32.xlu0 %v6626_v39, %s8332_s8  ;;  %v5018_v3 = vld [vmem:[#allocation10 + $0x1c] sm:$0x2]  ;;  %v6179_v24 = vld [vmem:[#allocation10 + $0xc] sm:$0x8]  ;;  %v6182_v39 = vld [vmem:[#allocation10 + $0x14] sm:$0x8] }
0x2ca5   :  { %4627 = vst [vmem:[#allocation10 + $0x3c] sm:$0x2] %v4626_v33  ;;  %7439 = vrot.lane.b32.xlu1 %v7438_v8, %s8332_s8  ;;  %v7385_v54 = vpop.permute.xlu0 %7384 }
0x2ca6   :  { %v7387_v46 = vunpack.i.h.bf16 %v7385_v54  ;;  %v7386_v32 = vunpack.i.l.bf16 %v7385_v54  ;;  %v5021_v53 = vld [vmem:[#allocation10 + $0x24] sm:$0x2]  ;;  %v6185_v54 = vld [vmem:[#allocation10 + $0x1c] sm:$0x8] }
0x2ca7   :  { %v7390_v52 = vpop.permute.xlu1 %7389 }
0x2ca8   :  { %v5010_v6 = vsel %vm11349_vm12, %v7386_v32, %v5009_v56  ;;  %v5013_v36 = vsel %vm11349_vm12, %v7387_v46, %v5012_v2  ;;  %v7392_v61 = vunpack.i.h.bf16 %v7390_v52  ;;  %v7391_v55 = vunpack.i.l.bf16 %v7390_v52  ;;  %v5024_v62 = vld [vmem:[#allocation10 + $0x2c] sm:$0x2]  ;;  %v6188_v32 = vld [vmem:[#allocation10 + $0x24] sm:$0x8]  ;;  %v6191_v52 = vld [vmem:[#allocation10 + $0x2c] sm:$0x8] }
0x2ca9   :  { %5011 = vst [vmem:[#allocation10 + $0x4] sm:$0x2] %v5010_v6  ;;  %5014 = vst [vmem:[#allocation10 + $0xc] sm:$0x2] %v5013_v36  ;;  %v7395_v47 = vpop.permute.xlu0 %7394 }
0x2caa   :  { %v5019_v37 = vsel %vm11349_vm12, %v7392_v61, %v5018_v3  ;;  %v5016_v14 = vsel %vm11349_vm12, %v7391_v55, %v5015_v40  ;;  %v7397_v60 = vunpack.i.h.bf16 %v7395_v47  ;;  %v7396_v48 = vunpack.i.l.bf16 %v7395_v47  ;;  %v5027_v18 = vld [vmem:[#allocation10 + $0x34] sm:$0x2]  ;;  %v6194_v61 = vld [vmem:[#allocation10 + $0x34] sm:$0x8]  ;;  %v6197_v3 = vld [vmem:[#allocation10 + $0x3c] sm:$0x8] }
0x2cab   :  { %5020 = vst [vmem:[#allocation10 + $0x1c] sm:$0x2] %v5019_v37  ;;  %5017 = vst [vmem:[#allocation10 + $0x14] sm:$0x2] %v5016_v14  ;;  %v7400_v42 = vpop.permute.xlu1 %7399 }
0x2cac   :  { %v5022_v34 = vsel %vm11349_vm12, %v7396_v48, %v5021_v53  ;;  %v5025_v50 = vsel %vm11349_vm12, %v7397_v60, %v5024_v62  ;;  %v5030_v49 = vld [vmem:[#allocation10 + $0x3c] sm:$0x2]  ;;  %v7402_v51 = vunpack.i.h.bf16 %v7400_v42  ;;  %v7401_v1 = vunpack.i.l.bf16 %v7400_v42 }
0x2cad   :  { %5023 = vst [vmem:[#allocation10 + $0x24] sm:$0x2] %v5022_v34  ;;  %5026 = vst [vmem:[#allocation10 + $0x2c] sm:$0x2] %v5025_v50  ;;  %v5367_v16 = vpop.permute.xlu0 %5366 }
0x2cae   :  { %v5031_v57 = vsel %vm11349_vm12, %v7402_v51, %v5030_v49  ;;  %v5028_v35 = vsel %vm11349_vm12, %v7401_v1, %v5027_v18  ;;  %v5391_v4 = vsel %vm11368_vm2, %v5367_v16, %v5390_v38 }
0x2caf   :  { %5032 = vst [vmem:[#allocation10 + $0x3c] sm:$0x2] %v5031_v57  ;;  %5029 = vst [vmem:[#allocation10 + $0x34] sm:$0x2] %v5028_v35  ;;  %v5369_v44 = vpop.permute.xlu1 %5368 }
0x2cb0   :  { %5392 = vst [vmem:[#allocation10 + $0x4] sm:$0x4] %v5391_v4  ;;  %v5394_v41 = vsel %vm11368_vm2, %v5369_v44, %v5393_v21 }
0x2cb1   :  { %5395 = vst [vmem:[#allocation10 + $0xc] sm:$0x4] %v5394_v41  ;;  %v5371_v19 = vpop.permute.xlu0 %5370 }
0x2cb2   :  { %v5397_v30 = vsel %vm11368_vm2, %v5371_v19, %v5396_v31 }
0x2cb3   :  { %5398 = vst [vmem:[#allocation10 + $0x14] sm:$0x4] %v5397_v30  ;;  %v5373_v12 = vpop.permute.xlu1 %5372 }
0x2cb4   :  { %v5400_v11 = vsel %vm11368_vm2, %v5373_v12, %v5399_v20 }
0x2cb5   :  { %5401 = vst [vmem:[#allocation10 + $0x1c] sm:$0x4] %v5400_v11  ;;  %v5375_v26 = vpop.permute.xlu0 %5374 }
0x2cb6   :  { %v5403_v27 = vsel %vm11368_vm2, %v5375_v26, %v5402_v28 }
0x2cb7   :  { %5404 = vst [vmem:[#allocation10 + $0x24] sm:$0x4] %v5403_v27  ;;  %v5377_v63 = vpop.permute.xlu1 %5376  ;;  %v5795_v62 = vld [vmem:[#allocation10 + $0x4] sm:$0x4] }
0x2cb8   :  { %v5406_v15 = vsel %vm11368_vm2, %v5377_v63, %v5405_v5  ;;  %v5798_v42 = vld [vmem:[#allocation10 + $0xc] sm:$0x4] }
0x2cb9   :  { %5407 = vst [vmem:[#allocation10 + $0x2c] sm:$0x4] %v5406_v15  ;;  %v5379_v29 = vpop.permute.xlu0 %5378 }
0x2cba   :  { %v5409_v7 = vsel %vm11368_vm2, %v5379_v29, %v5408_v58  ;;  %v5801_v1 = vld [vmem:[#allocation10 + $0x14] sm:$0x4] }
0x2cbb   :  { %5410 = vst [vmem:[#allocation10 + $0x34] sm:$0x4] %v5409_v7  ;;  %v5381_v13 = vpop.permute.xlu1 %5380 }
0x2cbc   :  { %v5412_v23 = vsel %vm11368_vm2, %v5381_v13, %v5411_v0  ;;  %v5804_v59 = vld [vmem:[#allocation10 + $0x1c] sm:$0x4] }
0x2cbd   :  { %5413 = vst [vmem:[#allocation10 + $0x3c] sm:$0x4] %v5412_v23  ;;  %v6153_v22 = vpop.permute.xlu0 %6152 }
0x2cbe   :  { %v6177_v43 = vsel %vm11483_vm0, %v6153_v22, %v6176_v10  ;;  %v5807_v4 = vld [vmem:[#allocation10 + $0x24] sm:$0x4] }
0x2cbf   :  { %6178 = vst [vmem:[#allocation10 + $0x4] sm:$0x8] %v6177_v43  ;;  %v6155_v9 = vpop.permute.xlu1 %6154 }
0x2cc0   :  { %v6180_v8 = vsel %vm11483_vm0, %v6155_v9, %v6179_v24  ;;  %v5810_v44 = vld [vmem:[#allocation10 + $0x2c] sm:$0x4] }
0x2cc1   :  { %6181 = vst [vmem:[#allocation10 + $0xc] sm:$0x8] %v6180_v8  ;;  %v6157_v33 = vpop.permute.xlu0 %6156 }
0x2cc2   :  { %v6183_v46 = vsel %vm11483_vm0, %v6157_v33, %v6182_v39  ;;  %v5813_v12 = vld [vmem:[#allocation10 + $0x34] sm:$0x4] }
0x2cc3   :  { %6184 = vst [vmem:[#allocation10 + $0x14] sm:$0x8] %v6183_v46  ;;  %v6159_v25 = vpop.permute.xlu1 %6158 }
0x2cc4   :  { %v6186_v56 = vsel %vm11483_vm0, %v6159_v25, %v6185_v54  ;;  %v5816_v28 = vld [vmem:[#allocation10 + $0x3c] sm:$0x4] }
0x2cc5   :  { %6187 = vst [vmem:[#allocation10 + $0x1c] sm:$0x8] %v6186_v56  ;;  %v6161_v2 = vpop.permute.xlu0 %6160 }
0x2cc6   :  { %v6189_v6 = vsel %vm11483_vm0, %v6161_v2, %v6188_v32  ;;  %v6581_v58 = vld [vmem:[#allocation10 + $0x4] sm:$0x8] }
0x2cc7   :  { %6190 = vst [vmem:[#allocation10 + $0x24] sm:$0x8] %v6189_v6  ;;  %v6163_v36 = vpop.permute.xlu1 %6162 }
0x2cc8   :  { %v6192_v55 = vsel %vm11483_vm0, %v6163_v36, %v6191_v52  ;;  %v6584_v15 = vld [vmem:[#allocation10 + $0xc] sm:$0x8] }
0x2cc9   :  { %6193 = vst [vmem:[#allocation10 + $0x2c] sm:$0x8] %v6192_v55  ;;  %v6165_v40 = vpop.permute.xlu0 %6164 }
0x2cca   :  { %v6195_v47 = vsel %vm11483_vm0, %v6165_v40, %v6194_v61  ;;  %v6587_v17 = vld [vmem:[#allocation10 + $0x14] sm:$0x8] }
0x2ccb   :  { %6196 = vst [vmem:[#allocation10 + $0x34] sm:$0x8] %v6195_v47  ;;  %v6167_v37 = vpop.permute.xlu1 %6166 }
0x2ccc   :  { %v6198_v14 = vsel %vm11483_vm0, %v6167_v37, %v6197_v3  ;;  %v6590_v23 = vld [vmem:[#allocation10 + $0x1c] sm:$0x8]  ;;  %vm12064_vm0 = vcmask 261120  }
0x2ccd   :  { %6199 = vst [vmem:[#allocation10 + $0x3c] sm:$0x8] %v6198_v14  ;;  %v7405_v60 = vpop.permute.xlu0 %7404 }
0x2cce   :  { %v7407_v48 = vunpack.i.h.bf16 %v7405_v60  ;;  %v7406_v53 = vunpack.i.l.bf16 %v7405_v60  ;;  %v6593_v8 = vld [vmem:[#allocation10 + $0x24] sm:$0x8] }
0x2ccf   :  { %v7410_v38 = vpop.permute.xlu1 %7409 }
0x2cd0   :  { %v5796_v34 = vsel %vm11420_vm1, %v7406_v53, %v5795_v62  ;;  %v5799_v50 = vsel %vm11420_vm1, %v7407_v48, %v5798_v42  ;;  %v7412_v49 = vunpack.i.h.bf16 %v7410_v38  ;;  %v7411_v51 = vunpack.i.l.bf16 %v7410_v38  ;;  %v6596_v33 = vld [vmem:[#allocation10 + $0x2c] sm:$0x8] }
0x2cd1   :  { %5797 = vst [vmem:[#allocation10 + $0x4] sm:$0x4] %v5796_v34  ;;  %5800 = vst [vmem:[#allocation10 + $0xc] sm:$0x4] %v5799_v50  ;;  %v7415_v18 = vpop.permute.xlu0 %7414 }
0x2cd2   :  { %v5805_v16 = vsel %vm11420_vm1, %v7412_v49, %v5804_v59  ;;  %v5802_v21 = vsel %vm11420_vm1, %v7411_v51, %v5801_v1  ;;  %v7417_v57 = vunpack.i.h.bf16 %v7415_v18  ;;  %v7416_v35 = vunpack.i.l.bf16 %v7415_v18  ;;  %v6599_v52 = vld [vmem:[#allocation10 + $0x34] sm:$0x8] }
0x2cd3   :  { %5806 = vst [vmem:[#allocation10 + $0x1c] sm:$0x4] %v5805_v16  ;;  %5803 = vst [vmem:[#allocation10 + $0x14] sm:$0x4] %v5802_v21  ;;  %v7420_v31 = vpop.permute.xlu1 %7419 }
0x2cd4   :  { %v5808_v41 = vsel %vm11420_vm1, %v7416_v35, %v5807_v4  ;;  %v5811_v19 = vsel %vm11420_vm1, %v7417_v57, %v5810_v44  ;;  %v7422_v20 = vunpack.i.h.bf16 %v7420_v31  ;;  %v7421_v30 = vunpack.i.l.bf16 %v7420_v31  ;;  %v6602_v6 = vld [vmem:[#allocation10 + $0x3c] sm:$0x8] }
0x2cd5   :  { %5809 = vst [vmem:[#allocation10 + $0x24] sm:$0x4] %v5808_v41  ;;  %5812 = vst [vmem:[#allocation10 + $0x2c] sm:$0x4] %v5811_v19 }
0x2cd6   :  { %v5817_v11 = vsel %vm11420_vm1, %v7422_v20, %v5816_v28  ;;  %v5814_v26 = vsel %vm11420_vm1, %v7421_v30, %v5813_v12 }
0x2cd7   :  { %5818 = vst [vmem:[#allocation10 + $0x3c] sm:$0x4] %v5817_v11  ;;  %5815 = vst [vmem:[#allocation10 + $0x34] sm:$0x4] %v5814_v26 }
0x2d0a   :  { %v7425_v5 = vpop.permute.xlu0 %7424 }
0x2d0b   :  { %v7427_v27 = vunpack.i.h.bf16 %v7425_v5  ;;  %v7426_v63 = vunpack.i.l.bf16 %v7425_v5 }
0x2d0d   :  { %v6582_v29 = vsel %vm11517_vm10, %v7426_v63, %v6581_v58  ;;  %v6585_v0 = vsel %vm11517_vm10, %v7427_v27, %v6584_v15 }
0x2d0e   :  { %6583 = vst [vmem:[#allocation10 + $0x4] sm:$0x8] %v6582_v29  ;;  %6586 = vst [vmem:[#allocation10 + $0xc] sm:$0x8] %v6585_v0  ;;  %v7430_v7 = vpop.permute.xlu1 %7429 }
0x2d0f   :  { %v7432_v13 = vunpack.i.h.bf16 %v7430_v7  ;;  %v7431_v10 = vunpack.i.l.bf16 %v7430_v7 }
0x2d11   :  { %v6591_v22 = vsel %vm11517_vm10, %v7432_v13, %v6590_v23  ;;  %v6588_v24 = vsel %vm11517_vm10, %v7431_v10, %v6587_v17 }
0x2d12   :  { %v7435_v43 = vpop.permute.xlu0 %7434  ;;  %6592 = vst [vmem:[#allocation10 + $0x1c] sm:$0x8] %v6591_v22  ;;  %6589 = vst [vmem:[#allocation10 + $0x14] sm:$0x8] %v6588_v24 }
0x2d13   :  { %v7437_v9 = vunpack.i.h.bf16 %v7435_v43  ;;  %v7436_v39 = vunpack.i.l.bf16 %v7435_v43 }
0x2d15   :  { %v6594_v54 = vsel %vm11517_vm10, %v7436_v39, %v6593_v8  ;;  %v6597_v46 = vsel %vm11517_vm10, %v7437_v9, %v6596_v33 }
0x2d16   :  { %6595 = vst [vmem:[#allocation10 + $0x24] sm:$0x8] %v6594_v54  ;;  %6598 = vst [vmem:[#allocation10 + $0x2c] sm:$0x8] %v6597_v46  ;;  %v6628_v25 = vpop.permute.xlu0 %6627 }
0x2d17   :  { %6630 = vst.msk [vmem:[#allocation3] sm:$0xff] %vm12064_vm0, %v6628_v25  ;;  %v7440_v32 = vpop.permute.xlu1 %7439 }
0x2d18   :  { %v7442_v56 = vunpack.i.h.bf16 %v7440_v32  ;;  %v7441_v2 = vunpack.i.l.bf16 %v7440_v32 }
0x2d1a   :  { %v6603_v36 = vsel %vm11517_vm10, %v7442_v56, %v6602_v6  ;;  %v6600_v61 = vsel %vm11517_vm10, %v7441_v2, %v6599_v52 }
0x2d1b   :  { %6604 = vst [vmem:[#allocation10 + $0x3c] sm:$0x8] %v6603_v36  ;;  %6601 = vst [vmem:[#allocation10 + $0x34] sm:$0x8] %v6600_v61 }
0x2d1c   :  { %8307 = shalt.err (!%p8304_p0)
}
0x2d1d   :  { %s8308_s14 = scalar_lea.hbm %s11797_s5, 1024 }
0x2d1e   :  { %p8309_p1 = scmp.ne.s32.totalorder %s11797_s5, %s8308_s14  ;;  %p8312_p2 = scmp.lt.u32.totalorder %s8308_s14, %s11797_s5 }
0x2d20   :  { %p8314_p3 = pnand %p8312_p2, %p8309_p1 }
0x2d22   :  { %8317 = shalt.err (!%p8314_p3)
}
0x2d23   :  { %6642 = dma.vmem_to_hbm [thread:$0]  %s6637_s10, 1024, %s11797_s5, [#allocation6], %s8326_s30, %s8326_s30, %s8327_s6  }
0x2d24   :  { %8322 = dma.done.wait [#allocation6], 1024  }
0x2d25   :  { %8323 = vsyncadd [#allocation6], 4294966272 }
0x2d26   :  { %6646 = vsyncpa [#allocation5], 1 }
0x2d27   :  { %6647 = vsyncpa [#allocation8], 1 }
0x2d28   :  { %6648 = vsyncpa [#allocation6], 1 }

</bundles_post_ra>
